<compile_context>
chip_gen: v6e
topology: v6e:2x2x1
jax: 0.10.0
libtpu: 0.0.40
codegen_flags: <defaults>
</compile_context>

<pallas_src>
import numpy as np

import jax
import jax.numpy as jnp
from jax.experimental import pallas as pl
from jax.experimental.pallas import tpu as pltpu


# ---------------------------------------------------------------------------
# Constant 0/1 gather / scatter structures (numpy, built once at import).
# Spatial layout: flattened row-major (h * W + w).
# ---------------------------------------------------------------------------
def _conv_gather(hin, win, k, s, p):
    """Conv2d(k, stride=s, padding=p): G[t, h*Win+w, ho*Wo+wo] = 1 iff
    h = ho*s + i - p, w = wo*s + j - p (OOB == zero padding), t = i*k + j."""
    ho = (hin + 2 * p - k) // s + 1
    wo = (win + 2 * p - k) // s + 1
    g = np.zeros((k * k, hin * win, ho * wo), np.float32)
    for i in range(k):
        for j in range(k):
            t = i * k + j
            for a in range(ho):
                h = a * s + i - p
                if not 0 <= h < hin:
                    continue
                for b in range(wo):
                    w = b * s + j - p
                    if 0 <= w < win:
                        g[t, h * win + w, a * wo + b] = 1.0
    return g, ho, wo


def _convT_scatter(hin, win, k, s, p):
    """ConvTranspose2d(k, stride=s, padding=p): G[t, h*Win+w, ho*Wo+wo] = 1 iff
    ho = h*s + i - p, wo = w*s + j - p, t = i*k + j."""
    ho = (hin - 1) * s + k - 2 * p
    wo = (win - 1) * s + k - 2 * p
    g = np.zeros((k * k, hin * win, ho * wo), np.float32)
    for i in range(k):
        for j in range(k):
            t = i * k + j
            for h in range(hin):
                a = h * s + i - p
                if not 0 <= a < ho:
                    continue
                for w in range(win):
                    b = w * s + j - p
                    if 0 <= b < wo:
                        g[t, h * win + w, a * wo + b] = 1.0
    return g, ho, wo


def _pool_src(hin, win, s):
    """MaxPool2d(2, stride=s), floor mode: per-tap source column indices."""
    ho = (hin - 2) // s + 1
    wo = (win - 2) // s + 1
    src = np.zeros((4, ho * wo), np.int32)
    for i in range(2):
        for j in range(2):
            t = i * 2 + j
            for a in range(ho):
                for b in range(wo):
                    src[t, a * wo + b] = (a * s + i) * win + (b * s + j)
    return src, ho, wo


_G_E1, _h, _w = _conv_gather(28, 28, k=3, s=3, p=1);   assert (_h, _w) == (10, 10)
_SRC_P1, _h, _w = _pool_src(10, 10, s=2);              assert (_h, _w) == (5, 5)
_G_E2, _h, _w = _conv_gather(5, 5, k=3, s=2, p=1);     assert (_h, _w) == (3, 3)
_SRC_P2, _h, _w = _pool_src(3, 3, s=1);                assert (_h, _w) == (2, 2)
_G_D1, _h, _w = _convT_scatter(2, 2, k=3, s=2, p=0);   assert (_h, _w) == (5, 5)
_G_D2, _h, _w = _convT_scatter(5, 5, k=5, s=3, p=1);   assert (_h, _w) == (15, 15)
_G_D3, _h, _w = _convT_scatter(15, 15, k=2, s=2, p=1); assert (_h, _w) == (28, 28)


# ---------------------------------------------------------------------------
# Offline weight folding (plain JAX, batch-independent, O(1) in N).
# Activation layout inside the kernel: (batch, channel*HW), channel-major.
# ---------------------------------------------------------------------------
def _conv_w_taps(w):
    """(Cout, Cin, k, k) -> (k*k, Cout, Cin), tap t = i*k + j."""
    co, ci, k, _ = w.shape
    return jnp.transpose(w, (2, 3, 0, 1)).reshape(k * k, co, ci)


def _convT_w_taps(w):
    """(Cin, Cout, k, k) -> (k*k, Cout, Cin), tap t = i*k + j."""
    ci, co, k, _ = w.shape
    return jnp.transpose(w, (2, 3, 1, 0)).reshape(k * k, co, ci)


def _fold(gather_np, w_taps):
    """Fold weights into the gather: (T,P,Q) x (T,Co,Ci) -> (Ci*P, Co, Q)."""
    t, p_dim, q_dim = gather_np.shape
    _, co, ci = w_taps.shape
    m = jnp.einsum("tpq,toc->cpoq", jnp.asarray(gather_np), w_taps,
                   precision=jax.lax.Precision.HIGHEST)
    return m.reshape(ci * p_dim, co, q_dim)


def _compose_pool(m, src):
    """Pre-compose the following MaxPool's 4 spatial taps into the conv matrix.
    m: (Ci*P, Co, Q) ; src: (4, Qp) int  ->  (4, Ci*P, Co*Qp)."""
    taps = jnp.stack([m[:, :, src[t]] for t in range(src.shape[0])], axis=0)
    four, rows, co, qp = taps.shape
    return taps.reshape(four, rows, co * qp)


def _bias_row(b, hw):
    """(Co,) -> (1, Co*hw) f32, channel-major lane bias."""
    return jnp.repeat(b.astype(jnp.float32), hw)[None, :]


def prepare_constants(params, mxu_dtype=jnp.bfloat16):
    m_e1 = _compose_pool(_fold(_G_E1, _conv_w_taps(params["e1_w"])), _SRC_P1)  # (4, 784, 400)
    m_e2 = _compose_pool(_fold(_G_E2, _conv_w_taps(params["e2_w"])), _SRC_P2)  # (4, 400, 32)
    m_d1 = _fold(_G_D1, _convT_w_taps(params["d1_w"])).reshape(32, 400)
    m_d2 = _fold(_G_D2, _convT_w_taps(params["d2_w"])).reshape(400, 1800)
    m_d3 = _fold(_G_D3, _convT_w_taps(params["d3_w"])).reshape(1800, 784)
    mats = tuple(m.astype(mxu_dtype) for m in (m_e1, m_e2, m_d1, m_d2, m_d3))
    biases = (_bias_row(params["e1_b"], 25), _bias_row(params["e2_b"], 4),
              _bias_row(params["d1_b"], 25), _bias_row(params["d2_b"], 225),
              _bias_row(params["d3_b"], 784))
    return mats, biases


# ---------------------------------------------------------------------------
# The single fused Pallas kernel (one grid step == NB images).
# ---------------------------------------------------------------------------
def _ae_kernel(x_ref, me1_ref, me2_ref, md1_ref, md2_ref, md3_ref,
               be1_ref, be2_ref, bd1_ref, bd2_ref, bd3_ref, o_ref):
    f32 = jnp.float32
    mxu_dt = me1_ref.dtype

    def conv_pool(a, m_ref, b_row):
        # Conv + bias + ReLU + MaxPool, fused: max over the 4 pool-tap-composed
        # conv matrices (ReLU and per-channel bias commute with the gather).
        a = a.astype(mxu_dt)
        out = None
        for t in range(m_ref.shape[0]):            # 4 taps, static unroll
            y = jnp.dot(a, m_ref[t], preferred_element_type=f32) + b_row
            y = jnp.maximum(y, 0.0)
            out = y if out is None else jnp.maximum(out, y)
        return out

    def dense(a, m_ref, b_row):
        return jnp.dot(a.astype(mxu_dt), m_ref[...],
                       preferred_element_type=f32) + b_row

    a = x_ref[...]                                            # (NB, 784)  f32
    a = conv_pool(a, me1_ref, be1_ref[...])                   # (NB, 16*25)
    a = conv_pool(a, me2_ref, be2_ref[...])                   # (NB, 8*4)
    a = jnp.maximum(dense(a, md1_ref, bd1_ref[...]), 0.0)     # (NB, 16*25)
    a = jnp.maximum(dense(a, md2_ref, bd2_ref[...]), 0.0)     # (NB, 8*225)
    a = jnp.tanh(dense(a, md3_ref, bd3_ref[...]))             # (NB, 784)
    o_ref[...] = a.astype(o_ref.dtype)


# ---------------------------------------------------------------------------
# Forward wrapper: grid over batch, constants VMEM-resident across grid steps.
# ---------------------------------------------------------------------------
def _round_up(x, m):
    return (x + m - 1) // m * m


def autoencoder_forward(params, x, *, max_block_batch=128):
    """x: (N, 1, 28, 28) float32 -> (N, 1, 28, 28) float32."""
    n = x.shape[0]
    assert x.shape[1:] == (1, 28, 28), x.shape
    x2d = x.reshape(n, 28 * 28).astype(jnp.float32)       # pure reshape (Cin == 1)

    nb = min(max_block_batch, _round_up(n, 8))             # batch rows per grid step
    n_pad = _round_up(n, nb)
    if n_pad != n:
        x2d = jnp.pad(x2d, ((0, n_pad - n), (0, 0)))

    mats, biases = prepare_constants(params)
    me1, me2, md1, md2, md3 = mats

    def const_spec(arr):
        nd = arr.ndim
        return pl.BlockSpec(arr.shape, lambda i, _nd=nd: (0,) * _nd)

    out2d = pl.pallas_call(
        _ae_kernel,
        out_shape=jax.ShapeDtypeStruct((n_pad, 28 * 28), jnp.float32),
        grid=(n_pad // nb,),
        in_specs=[pl.BlockSpec((nb, 28 * 28), lambda i: (i, 0))]
                 + [const_spec(m) for m in mats]
                 + [const_spec(b) for b in biases],
        out_specs=pl.BlockSpec((nb, 28 * 28), lambda i: (i, 0)),
        compiler_params=pltpu.CompilerParams(
            dimension_semantics=("parallel",),
            vmem_limit_bytes=32 * 1024 * 1024),
    )(x2d, *mats, *biases)
    return out2d[:n].reshape(n, 1, 28, 28)


# ---------------------------------------------------------------------------
# Plain-JAX reference (numerical self-check only).
# ---------------------------------------------------------------------------
def _reference_forward(params, x):
    dn = ("NCHW", "OIHW", "NCHW")
    hi = jax.lax.Precision.HIGHEST

    def conv(x, w, b, s, p):
        y = jax.lax.conv_general_dilated(
            x, w, window_strides=(s, s), padding=[(p, p), (p, p)],
            dimension_numbers=dn, precision=hi)
        return y + b[None, :, None, None]

    def convt(x, w, b, s, p):
        k = w.shape[2]
        w2 = jnp.flip(w, (2, 3)).transpose(1, 0, 2, 3)      # (Cout, Cin, k, k)
        y = jax.lax.conv_general_dilated(
            x, w2, window_strides=(1, 1),
            padding=[(k - 1 - p, k - 1 - p)] * 2, lhs_dilation=(s, s),
            dimension_numbers=dn, precision=hi)
        return y + b[None, :, None, None]

    def pool(x, s):
        return jax.lax.reduce_window(
            x, -jnp.inf, jax.lax.max, (1, 1, 2, 2), (1, 1, s, s), "VALID")

    p = params
    x = pool(jax.nn.relu(conv(x, p["e1_w"], p["e1_b"], 3, 1)), 2)
    x = pool(jax.nn.relu(conv(x, p["e2_w"], p["e2_b"], 2, 1)), 1)
    x = jax.nn.relu(convt(x, p["d1_w"], p["d1_b"], 2, 0))
    x = jax.nn.relu(convt(x, p["d2_w"], p["d2_b"], 3, 1))
    x = jnp.tanh(convt(x, p["d3_w"], p["d3_b"], 2, 1))
    return x


def init_params(key):
    """Deterministic init mirroring PyTorch default uniform(-1/sqrt(fan_in), ...)."""
    ks = jax.random.split(key, 10)

    def u(k, shape, fan_in):
        bound = 1.0 / (fan_in ** 0.5)
        return jax.random.uniform(k, shape, jnp.float32, -bound, bound)

    return {
        # Conv2d(1, 16, 3, stride=3, padding=1): weight (Cout, Cin, k, k)
        "e1_w": u(ks[0], (16, 1, 3, 3), 1 * 3 * 3),
        "e1_b": u(ks[1], (16,), 1 * 3 * 3),
        # Conv2d(16, 8, 3, stride=2, padding=1)
        "e2_w": u(ks[2], (8, 16, 3, 3), 16 * 3 * 3),
        "e2_b": u(ks[3], (8,), 16 * 3 * 3),
        # ConvTranspose2d(8, 16, 3, stride=2): weight (Cin, Cout, k, k)
        "d1_w": u(ks[4], (8, 16, 3, 3), 16 * 3 * 3),
        "d1_b": u(ks[5], (16,), 16 * 3 * 3),
        # ConvTranspose2d(16, 8, 5, stride=3, padding=1)
        "d2_w": u(ks[6], (16, 8, 5, 5), 8 * 5 * 5),
        "d2_b": u(ks[7], (8,), 8 * 5 * 5),
        # ConvTranspose2d(8, 1, 2, stride=2, padding=1)
        "d3_w": u(ks[8], (8, 1, 2, 2), 1 * 2 * 2),
        "d3_b": u(ks[9], (1,), 1 * 2 * 2),
    }


if __name__ == "__main__":
    key = jax.random.PRNGKey(0)
    k_params, k_x, k_x2 = jax.random.split(key, 3)
    params = init_params(k_params)
    # MNIST-shaped input (the architecture's spatial arithmetic requires 28x28).
    x = jax.random.normal(k_x, (2, 1, 28, 28), jnp.float32)

    fwd = jax.jit(autoencoder_forward)
    y = jax.block_until_ready(fwd(params, x))

    assert y.shape == (2, 1, 28, 28), y.shape
    assert y.dtype == jnp.float32
    assert bool(jnp.all(jnp.isfinite(y)))
    assert bool(jnp.all(jnp.abs(y) <= 1.0 + 1e-5))       # tanh output range

    # Numerical check against a plain-JAX reference of the same module
    # (loose tolerance covers the intentional bf16 MXU-operand rounding).
    y_ref = jax.block_until_ready(jax.jit(_reference_forward)(params, x))
    max_err = float(jnp.max(jnp.abs(y - y_ref)))
    assert max_err < 5e-2, f"max abs error vs reference: {max_err}"

    # Exercise the multi-step batch grid (grid > 1, parallel batch axis).
    xg = jax.random.normal(k_x2, (16, 1, 28, 28), jnp.float32)
    yg = jax.block_until_ready(autoencoder_forward(params, xg, max_block_batch=8))
    yg_ref = jax.block_until_ready(jax.jit(_reference_forward)(params, xg))
    max_err_g = float(jnp.max(jnp.abs(yg - yg_ref)))
    assert max_err_g < 5e-2, f"grid>1 max abs error vs reference: {max_err_g}"

    print("KERNEL_OK")
</pallas_src>

<mosaic_0001>
module attributes {stable_mosaic.version = 11 : i64} {
  func.func @_ae_kernel(%arg0: i32, %arg1: memref<8x784xf32, #tpu.memory_space<vmem>>, %arg2: memref<4x784x400xbf16, #tpu.memory_space<vmem>>, %arg3: memref<4x400x32xbf16, #tpu.memory_space<vmem>>, %arg4: memref<32x400xbf16, #tpu.memory_space<vmem>>, %arg5: memref<400x1800xbf16, #tpu.memory_space<vmem>>, %arg6: memref<1800x784xbf16, #tpu.memory_space<vmem>>, %arg7: memref<1x400xf32, #tpu.memory_space<vmem>>, %arg8: memref<1x32xf32, #tpu.memory_space<vmem>>, %arg9: memref<1x400xf32, #tpu.memory_space<vmem>>, %arg10: memref<1x1800xf32, #tpu.memory_space<vmem>>, %arg11: memref<1x784xf32, #tpu.memory_space<vmem>>, %arg12: memref<8x784xf32, #tpu.memory_space<vmem>>) attributes {dimension_semantics = [#tpu.dimension_semantics<parallel>], iteration_bounds = array<i64: 1>, scalar_prefetch = 0 : i64, scratch_operands = 0 : i64, tpu.core_type = #tpu.core_type<tc>, window_params = [{transform_indices = @transform_0, window_bounds = array<i64: 8, 784>}, {pipeline_mode = #tpu.pipeline_mode<synchronous>, transform_indices = @transform_1, window_bounds = array<i64: 4, 784, 400>}, {pipeline_mode = #tpu.pipeline_mode<synchronous>, transform_indices = @transform_2, window_bounds = array<i64: 4, 400, 32>}, {pipeline_mode = #tpu.pipeline_mode<synchronous>, transform_indices = @transform_3, window_bounds = array<i64: 32, 400>}, {pipeline_mode = #tpu.pipeline_mode<synchronous>, transform_indices = @transform_4, window_bounds = array<i64: 400, 1800>}, {pipeline_mode = #tpu.pipeline_mode<synchronous>, transform_indices = @transform_5, window_bounds = array<i64: 1800, 784>}, {pipeline_mode = #tpu.pipeline_mode<synchronous>, transform_indices = @transform_6, window_bounds = array<i64: 1, 400>}, {pipeline_mode = #tpu.pipeline_mode<synchronous>, transform_indices = @transform_7, window_bounds = array<i64: 1, 32>}, {pipeline_mode = #tpu.pipeline_mode<synchronous>, transform_indices = @transform_8, window_bounds = array<i64: 1, 400>}, {pipeline_mode = #tpu.pipeline_mode<synchronous>, transform_indices = @transform_9, window_bounds = array<i64: 1, 1800>}, {pipeline_mode = #tpu.pipeline_mode<synchronous>, transform_indices = @transform_10, window_bounds = array<i64: 1, 784>}, {transform_indices = @transform_11, window_bounds = array<i64: 8, 784>}]} {
    %c0 = arith.constant 0 : index
    %c0_0 = arith.constant 0 : index
    %0 = vector.load %arg1[%c0, %c0_0] : memref<8x784xf32, #tpu.memory_space<vmem>>, vector<8x784xf32>
    %c0_1 = arith.constant 0 : index
    %c0_2 = arith.constant 0 : index
    %1 = vector.load %arg7[%c0_1, %c0_2] : memref<1x400xf32, #tpu.memory_space<vmem>>, vector<1x400xf32>
    %2 = arith.truncf %0 : vector<8x784xf32> to vector<8x784xbf16>
    %c0_3 = arith.constant 0 : index
    %c0_4 = arith.constant 0 : index
    %c0_5 = arith.constant 0 : index
    %3 = vector.load %arg2[%c0_3, %c0_4, %c0_5] : memref<4x784x400xbf16, #tpu.memory_space<vmem>>, vector<1x784x400xbf16>
    %4 = vector.shape_cast %3 : vector<1x784x400xbf16> to vector<784x400xbf16>
    %cst = arith.constant dense<0.000000e+00> : vector<8x400xf32>
    %5 = tpu.matmul %2, %4, %cst {dimension_numbers = #tpu.dot_dimension_numbers<[1], [0], [0], [1], [0, 0, 1, 1], [], []>} : vector<8x784xbf16>, vector<784x400xbf16>, vector<8x400xf32> -> vector<8x400xf32>
    %6 = vector.broadcast %1 : vector<1x400xf32> to vector<8x400xf32>
    %7 = arith.addf %5, %6 : vector<8x400xf32>
    %cst_6 = arith.constant 0.000000e+00 : f32
    %8 = vector.broadcast %cst_6 : f32 to vector<8x400xf32>
    %9 = arith.maximumf %7, %8 : vector<8x400xf32>
    %c1 = arith.constant 1 : index
    %c0_7 = arith.constant 0 : index
    %c0_8 = arith.constant 0 : index
    %10 = vector.load %arg2[%c1, %c0_7, %c0_8] : memref<4x784x400xbf16, #tpu.memory_space<vmem>>, vector<1x784x400xbf16>
    %11 = vector.shape_cast %10 : vector<1x784x400xbf16> to vector<784x400xbf16>
    %cst_9 = arith.constant dense<0.000000e+00> : vector<8x400xf32>
    %12 = tpu.matmul %2, %11, %cst_9 {dimension_numbers = #tpu.dot_dimension_numbers<[1], [0], [0], [1], [0, 0, 1, 1], [], []>} : vector<8x784xbf16>, vector<784x400xbf16>, vector<8x400xf32> -> vector<8x400xf32>
    %13 = vector.broadcast %1 : vector<1x400xf32> to vector<8x400xf32>
    %14 = arith.addf %12, %13 : vector<8x400xf32>
    %cst_10 = arith.constant 0.000000e+00 : f32
    %15 = vector.broadcast %cst_10 : f32 to vector<8x400xf32>
    %16 = arith.maximumf %14, %15 : vector<8x400xf32>
    %17 = arith.maximumf %9, %16 : vector<8x400xf32>
    %c2 = arith.constant 2 : index
    %c0_11 = arith.constant 0 : index
    %c0_12 = arith.constant 0 : index
    %18 = vector.load %arg2[%c2, %c0_11, %c0_12] : memref<4x784x400xbf16, #tpu.memory_space<vmem>>, vector<1x784x400xbf16>
    %19 = vector.shape_cast %18 : vector<1x784x400xbf16> to vector<784x400xbf16>
    %cst_13 = arith.constant dense<0.000000e+00> : vector<8x400xf32>
    %20 = tpu.matmul %2, %19, %cst_13 {dimension_numbers = #tpu.dot_dimension_numbers<[1], [0], [0], [1], [0, 0, 1, 1], [], []>} : vector<8x784xbf16>, vector<784x400xbf16>, vector<8x400xf32> -> vector<8x400xf32>
    %21 = vector.broadcast %1 : vector<1x400xf32> to vector<8x400xf32>
    %22 = arith.addf %20, %21 : vector<8x400xf32>
    %cst_14 = arith.constant 0.000000e+00 : f32
    %23 = vector.broadcast %cst_14 : f32 to vector<8x400xf32>
    %24 = arith.maximumf %22, %23 : vector<8x400xf32>
    %25 = arith.maximumf %17, %24 : vector<8x400xf32>
    %c3 = arith.constant 3 : index
    %c0_15 = arith.constant 0 : index
    %c0_16 = arith.constant 0 : index
    %26 = vector.load %arg2[%c3, %c0_15, %c0_16] : memref<4x784x400xbf16, #tpu.memory_space<vmem>>, vector<1x784x400xbf16>
    %27 = vector.shape_cast %26 : vector<1x784x400xbf16> to vector<784x400xbf16>
    %cst_17 = arith.constant dense<0.000000e+00> : vector<8x400xf32>
    %28 = tpu.matmul %2, %27, %cst_17 {dimension_numbers = #tpu.dot_dimension_numbers<[1], [0], [0], [1], [0, 0, 1, 1], [], []>} : vector<8x784xbf16>, vector<784x400xbf16>, vector<8x400xf32> -> vector<8x400xf32>
    %29 = vector.broadcast %1 : vector<1x400xf32> to vector<8x400xf32>
    %30 = arith.addf %28, %29 : vector<8x400xf32>
    %cst_18 = arith.constant 0.000000e+00 : f32
    %31 = vector.broadcast %cst_18 : f32 to vector<8x400xf32>
    %32 = arith.maximumf %30, %31 : vector<8x400xf32>
    %33 = arith.maximumf %25, %32 : vector<8x400xf32>
    %c0_19 = arith.constant 0 : index
    %c0_20 = arith.constant 0 : index
    %34 = vector.load %arg8[%c0_19, %c0_20] : memref<1x32xf32, #tpu.memory_space<vmem>>, vector<1x32xf32>
    %35 = arith.truncf %33 : vector<8x400xf32> to vector<8x400xbf16>
    %c0_21 = arith.constant 0 : index
    %c0_22 = arith.constant 0 : index
    %c0_23 = arith.constant 0 : index
    %36 = vector.load %arg3[%c0_21, %c0_22, %c0_23] : memref<4x400x32xbf16, #tpu.memory_space<vmem>>, vector<1x400x32xbf16>
    %37 = vector.shape_cast %36 : vector<1x400x32xbf16> to vector<400x32xbf16>
    %cst_24 = arith.constant dense<0.000000e+00> : vector<8x32xf32>
    %38 = tpu.matmul %35, %37, %cst_24 {dimension_numbers = #tpu.dot_dimension_numbers<[1], [0], [0], [1], [0, 0, 1, 1], [], []>} : vector<8x400xbf16>, vector<400x32xbf16>, vector<8x32xf32> -> vector<8x32xf32>
    %39 = vector.broadcast %34 : vector<1x32xf32> to vector<8x32xf32>
    %40 = arith.addf %38, %39 : vector<8x32xf32>
    %cst_25 = arith.constant 0.000000e+00 : f32
    %41 = vector.broadcast %cst_25 : f32 to vector<8x32xf32>
    %42 = arith.maximumf %40, %41 : vector<8x32xf32>
    %c1_26 = arith.constant 1 : index
    %c0_27 = arith.constant 0 : index
    %c0_28 = arith.constant 0 : index
    %43 = vector.load %arg3[%c1_26, %c0_27, %c0_28] : memref<4x400x32xbf16, #tpu.memory_space<vmem>>, vector<1x400x32xbf16>
    %44 = vector.shape_cast %43 : vector<1x400x32xbf16> to vector<400x32xbf16>
    %cst_29 = arith.constant dense<0.000000e+00> : vector<8x32xf32>
    %45 = tpu.matmul %35, %44, %cst_29 {dimension_numbers = #tpu.dot_dimension_numbers<[1], [0], [0], [1], [0, 0, 1, 1], [], []>} : vector<8x400xbf16>, vector<400x32xbf16>, vector<8x32xf32> -> vector<8x32xf32>
    %46 = vector.broadcast %34 : vector<1x32xf32> to vector<8x32xf32>
    %47 = arith.addf %45, %46 : vector<8x32xf32>
    %cst_30 = arith.constant 0.000000e+00 : f32
    %48 = vector.broadcast %cst_30 : f32 to vector<8x32xf32>
    %49 = arith.maximumf %47, %48 : vector<8x32xf32>
    %50 = arith.maximumf %42, %49 : vector<8x32xf32>
    %c2_31 = arith.constant 2 : index
    %c0_32 = arith.constant 0 : index
    %c0_33 = arith.constant 0 : index
    %51 = vector.load %arg3[%c2_31, %c0_32, %c0_33] : memref<4x400x32xbf16, #tpu.memory_space<vmem>>, vector<1x400x32xbf16>
    %52 = vector.shape_cast %51 : vector<1x400x32xbf16> to vector<400x32xbf16>
    %cst_34 = arith.constant dense<0.000000e+00> : vector<8x32xf32>
    %53 = tpu.matmul %35, %52, %cst_34 {dimension_numbers = #tpu.dot_dimension_numbers<[1], [0], [0], [1], [0, 0, 1, 1], [], []>} : vector<8x400xbf16>, vector<400x32xbf16>, vector<8x32xf32> -> vector<8x32xf32>
    %54 = vector.broadcast %34 : vector<1x32xf32> to vector<8x32xf32>
    %55 = arith.addf %53, %54 : vector<8x32xf32>
    %cst_35 = arith.constant 0.000000e+00 : f32
    %56 = vector.broadcast %cst_35 : f32 to vector<8x32xf32>
    %57 = arith.maximumf %55, %56 : vector<8x32xf32>
    %58 = arith.maximumf %50, %57 : vector<8x32xf32>
    %c3_36 = arith.constant 3 : index
    %c0_37 = arith.constant 0 : index
    %c0_38 = arith.constant 0 : index
    %59 = vector.load %arg3[%c3_36, %c0_37, %c0_38] : memref<4x400x32xbf16, #tpu.memory_space<vmem>>, vector<1x400x32xbf16>
    %60 = vector.shape_cast %59 : vector<1x400x32xbf16> to vector<400x32xbf16>
    %cst_39 = arith.constant dense<0.000000e+00> : vector<8x32xf32>
    %61 = tpu.matmul %35, %60, %cst_39 {dimension_numbers = #tpu.dot_dimension_numbers<[1], [0], [0], [1], [0, 0, 1, 1], [], []>} : vector<8x400xbf16>, vector<400x32xbf16>, vector<8x32xf32> -> vector<8x32xf32>
    %62 = vector.broadcast %34 : vector<1x32xf32> to vector<8x32xf32>
    %63 = arith.addf %61, %62 : vector<8x32xf32>
    %cst_40 = arith.constant 0.000000e+00 : f32
    %64 = vector.broadcast %cst_40 : f32 to vector<8x32xf32>
    %65 = arith.maximumf %63, %64 : vector<8x32xf32>
    %66 = arith.maximumf %58, %65 : vector<8x32xf32>
    %c0_41 = arith.constant 0 : index
    %c0_42 = arith.constant 0 : index
    %67 = vector.load %arg9[%c0_41, %c0_42] : memref<1x400xf32, #tpu.memory_space<vmem>>, vector<1x400xf32>
    %68 = arith.truncf %66 : vector<8x32xf32> to vector<8x32xbf16>
    %c0_43 = arith.constant 0 : index
    %c0_44 = arith.constant 0 : index
    %69 = vector.load %arg4[%c0_43, %c0_44] : memref<32x400xbf16, #tpu.memory_space<vmem>>, vector<32x400xbf16>
    %cst_45 = arith.constant dense<0.000000e+00> : vector<8x400xf32>
    %70 = tpu.matmul %68, %69, %cst_45 {dimension_numbers = #tpu.dot_dimension_numbers<[1], [0], [0], [1], [0, 0, 1, 1], [], []>} : vector<8x32xbf16>, vector<32x400xbf16>, vector<8x400xf32> -> vector<8x400xf32>
    %71 = vector.broadcast %67 : vector<1x400xf32> to vector<8x400xf32>
    %72 = arith.addf %70, %71 : vector<8x400xf32>
    %cst_46 = arith.constant 0.000000e+00 : f32
    %73 = vector.broadcast %cst_46 : f32 to vector<8x400xf32>
    %74 = arith.maximumf %72, %73 : vector<8x400xf32>
    %c0_47 = arith.constant 0 : index
    %c0_48 = arith.constant 0 : index
    %75 = vector.load %arg10[%c0_47, %c0_48] : memref<1x1800xf32, #tpu.memory_space<vmem>>, vector<1x1800xf32>
    %76 = arith.truncf %74 : vector<8x400xf32> to vector<8x400xbf16>
    %c0_49 = arith.constant 0 : index
    %c0_50 = arith.constant 0 : index
    %77 = vector.load %arg5[%c0_49, %c0_50] : memref<400x1800xbf16, #tpu.memory_space<vmem>>, vector<400x1800xbf16>
    %cst_51 = arith.constant dense<0.000000e+00> : vector<8x1800xf32>
    %78 = tpu.matmul %76, %77, %cst_51 {dimension_numbers = #tpu.dot_dimension_numbers<[1], [0], [0], [1], [0, 0, 1, 1], [], []>} : vector<8x400xbf16>, vector<400x1800xbf16>, vector<8x1800xf32> -> vector<8x1800xf32>
    %79 = vector.broadcast %75 : vector<1x1800xf32> to vector<8x1800xf32>
    %80 = arith.addf %78, %79 : vector<8x1800xf32>
    %cst_52 = arith.constant 0.000000e+00 : f32
    %81 = vector.broadcast %cst_52 : f32 to vector<8x1800xf32>
    %82 = arith.maximumf %80, %81 : vector<8x1800xf32>
    %c0_53 = arith.constant 0 : index
    %c0_54 = arith.constant 0 : index
    %83 = vector.load %arg11[%c0_53, %c0_54] : memref<1x784xf32, #tpu.memory_space<vmem>>, vector<1x784xf32>
    %84 = arith.truncf %82 : vector<8x1800xf32> to vector<8x1800xbf16>
    %c0_55 = arith.constant 0 : index
    %c0_56 = arith.constant 0 : index
    %85 = vector.load %arg6[%c0_55, %c0_56] : memref<1800x784xbf16, #tpu.memory_space<vmem>>, vector<1800x784xbf16>
    %cst_57 = arith.constant dense<0.000000e+00> : vector<8x784xf32>
    %86 = tpu.matmul %84, %85, %cst_57 {dimension_numbers = #tpu.dot_dimension_numbers<[1], [0], [0], [1], [0, 0, 1, 1], [], []>} : vector<8x1800xbf16>, vector<1800x784xbf16>, vector<8x784xf32> -> vector<8x784xf32>
    %87 = vector.broadcast %83 : vector<1x784xf32> to vector<8x784xf32>
    %88 = arith.addf %86, %87 : vector<8x784xf32>
    %89 = math.tanh %88 : vector<8x784xf32>
    %c0_58 = arith.constant 0 : index
    %c0_59 = arith.constant 0 : index
    %90 = vector.load %arg12[%c0_58, %c0_59] : memref<8x784xf32, #tpu.memory_space<vmem>>, vector<8x784xf32>
    tpu.vector_store %arg12[%c0_58, %c0_59], %89 {strides = array<i32>} : memref<8x784xf32, #tpu.memory_space<vmem>>, vector<8x784xf32>,
    return
  }
  func.func @transform_0(%arg0: i32) -> (i32, i32) {
    %c0_i32 = arith.constant 0 : i32
    %c0_i32_0 = arith.constant 0 : i32
    return %arg0, %c0_i32 : i32, i32
  }
  func.func @transform_1(%arg0: i32) -> (i32, i32, i32) {
    %c0_i32 = arith.constant 0 : i32
    %c0_i32_0 = arith.constant 0 : i32
    %c0_i32_1 = arith.constant 0 : i32
    %c0_i32_2 = arith.constant 0 : i32
    return %c0_i32, %c0_i32_0, %c0_i32_1 : i32, i32, i32
  }
  func.func @transform_2(%arg0: i32) -> (i32, i32, i32) {
    %c0_i32 = arith.constant 0 : i32
    %c0_i32_0 = arith.constant 0 : i32
    %c0_i32_1 = arith.constant 0 : i32
    %c0_i32_2 = arith.constant 0 : i32
    return %c0_i32, %c0_i32_0, %c0_i32_1 : i32, i32, i32
  }
  func.func @transform_3(%arg0: i32) -> (i32, i32) {
    %c0_i32 = arith.constant 0 : i32
    %c0_i32_0 = arith.constant 0 : i32
    %c0_i32_1 = arith.constant 0 : i32
    return %c0_i32, %c0_i32_0 : i32, i32
  }
  func.func @transform_4(%arg0: i32) -> (i32, i32) {
    %c0_i32 = arith.constant 0 : i32
    %c0_i32_0 = arith.constant 0 : i32
    %c0_i32_1 = arith.constant 0 : i32
    return %c0_i32, %c0_i32_0 : i32, i32
  }
  func.func @transform_5(%arg0: i32) -> (i32, i32) {
    %c0_i32 = arith.constant 0 : i32
    %c0_i32_0 = arith.constant 0 : i32
    %c0_i32_1 = arith.constant 0 : i32
    return %c0_i32, %c0_i32_0 : i32, i32
  }
  func.func @transform_6(%arg0: i32) -> (i32, i32) {
    %c0_i32 = arith.constant 0 : i32
    %c0_i32_0 = arith.constant 0 : i32
    %c0_i32_1 = arith.constant 0 : i32
    return %c0_i32, %c0_i32_0 : i32, i32
  }
  func.func @transform_7(%arg0: i32) -> (i32, i32) {
    %c0_i32 = arith.constant 0 : i32
    %c0_i32_0 = arith.constant 0 : i32
    %c0_i32_1 = arith.constant 0 : i32
    return %c0_i32, %c0_i32_0 : i32, i32
  }
  func.func @transform_8(%arg0: i32) -> (i32, i32) {
    %c0_i32 = arith.constant 0 : i32
    %c0_i32_0 = arith.constant 0 : i32
    %c0_i32_1 = arith.constant 0 : i32
    return %c0_i32, %c0_i32_0 : i32, i32
  }
  func.func @transform_9(%arg0: i32) -> (i32, i32) {
    %c0_i32 = arith.constant 0 : i32
    %c0_i32_0 = arith.constant 0 : i32
    %c0_i32_1 = arith.constant 0 : i32
    return %c0_i32, %c0_i32_0 : i32, i32
  }
  func.func @transform_10(%arg0: i32) -> (i32, i32) {
    %c0_i32 = arith.constant 0 : i32
    %c0_i32_0 = arith.constant 0 : i32
    %c0_i32_1 = arith.constant 0 : i32
    return %c0_i32, %c0_i32_0 : i32, i32
  }
  func.func @transform_11(%arg0: i32) -> (i32, i32) {
    %c0_i32 = arith.constant 0 : i32
    %c0_i32_0 = arith.constant 0 : i32
    return %arg0, %c0_i32 : i32, i32
  }
}

</mosaic_0001>

<bundles_post_ra>
// kernel: autoencoder_forward.1
= control target key start
LH: loop header
LB: loop body
LE: loop exit
PB: predicated region body
PF: predicated region fallthrough
CT: control target
= control target key end

     0   :  { %vm1251_vm0 = vcmask 130048   ;;  %vm7341_vm1 = vcmask 261120   ;;  %vm15492_vm2 = vcmask 1043456   ;;  %vm15488_vm3 = vcmask 64512   ;;  %s29853_s1 = inlined_call_operand.vmem [shape: bf16[4,784,400], index: 1, kind: input, shape index: {}]   ;;  %s29854_s0 = inlined_call_operand.vmem [shape: f32[8,784], index: 0, kind: input, shape index: {}]   ;;  %s29855_s6 = inlined_call_operand.vmem [shape: f32[1,400], index: 6, kind: input, shape index: {}]   ;;  %s29856_s2 = inlined_call_operand.vmem [shape: bf16[4,400,32], index: 2, kind: input, shape index: {}]   ;;  %s29857_s3 = inlined_call_operand.vmem [shape: bf16[32,400], index: 3, kind: input, shape index: {}]   ;;  %s29858_s7 = inlined_call_operand.vmem [shape: f32[1,32], index: 7, kind: input, shape index: {}]   ;;  %s29859_s4 = inlined_call_operand.vmem [shape: bf16[400,1800], index: 4, kind: input, shape index: {}]   ;;  %s29860_s8 = inlined_call_operand.vmem [shape: f32[1,400], index: 8, kind: input, shape index: {}]   ;;  %s29861_s9 = inlined_call_operand.vmem [shape: f32[1,1800], index: 9, kind: input, shape index: {}]   ;;  %s29862_s5 = inlined_call_operand.vmem [shape: bf16[1800,784], index: 5, kind: input, shape index: {}]   ;;  %s29863_s10 = inlined_call_operand.vmem [shape: f32[1,784], index: 10, kind: input, shape index: {}]   ;;  %s29864_s11 = inlined_call_operand.vmem [shape: f32[8,784], index: 11, kind: output, shape index: {}]  }
   0x1   :  { %v19937_v0 = vld [vmem:[%s29853_s1 + $0xe4] ss:$16 sps:$4 sm:$0xff]   ;;  %v19941_v2 = vld [vmem:[%s29853_s1 + $0xe0] ss:$16 sps:$4 sm:$0xff]   ;;  %v40_v46 = vld [vmem:[%s29854_s0 + $0x8] sm:$0xff]  ;;  %vm22922_vm4 = vmmov 0  }
   0x2   :  { %v19939_v1 = vld [vmem:[%s29853_s1 + $0x2e4] ss:$16 sps:$4 sm:$0xff]   ;;  %1255 = vmatprep.subr.bf16.mxu0 %v19937_v0  ;;  %v19942_v3 = vld [vmem:[%s29853_s1 + $0x2e0] ss:$16 sps:$4 sm:$0xff]   ;;  %v23130_v49 = vpack.c.bf16 %v40_v46, %v40_v46  ;;  %v42_v50 = vld [vmem:[%s29854_s0 + $0x18] sm:$0xff] }
   0x3   :  { %1296 = vmatprep.subr.bf16.mxu1 %v19939_v1  ;;  %v19943_v4 = vld [vmem:[%s29853_s1 + $0xc4] ss:$16 sps:$4 sm:$0xff]   ;;  %1256 = vmatpush1.bf16.msra.mxu0 %v19941_v2  ;;  %v19947_v6 = vld [vmem:[%s29853_s1 + $0xc0] ss:$16 sps:$4 sm:$0xff]   ;;  %v23138_v52 = vpack.c.bf16 %v42_v50, %v42_v50  ;;  %v20084_v50 = vld [vmem:[%s29853_s1 + $0x8] ss:$16 sps:$4 sm:$0xff]  }
   0x4   :  { %1297 = vmatpush1.bf16.msra.mxu1 %v19942_v3  ;;  %v19945_v5 = vld [vmem:[%s29853_s1 + $0x2c4] ss:$16 sps:$4 sm:$0xff]   ;;  %1257 = vmatprep.subr.bf16.mxu0 %v19943_v4  ;;  %v19948_v7 = vld [vmem:[%s29853_s1 + $0x2c0] ss:$16 sps:$4 sm:$0xff]  }
   0x5   :  { %1298 = vmatprep.subr.bf16.mxu1 %v19945_v5  ;;  %v19949_v8 = vld [vmem:[%s29853_s1 + $0xa4] ss:$16 sps:$4 sm:$0xff]   ;;  %v19953_v10 = vld [vmem:[%s29853_s1 + $0xa0] ss:$16 sps:$4 sm:$0xff]   ;;  %1287 = vmatprep.mubr.bf16.mxu0 %v23130_v49 }
   0x6   :  { %v19951_v9 = vld [vmem:[%s29853_s1 + $0x2a4] ss:$16 sps:$4 sm:$0xff]   ;;  %v19954_v11 = vld [vmem:[%s29853_s1 + $0x2a0] ss:$16 sps:$4 sm:$0xff]   ;;  %1328 = vmatprep.mubr.bf16.mxu1 %v23138_v52 }
   0x7   :  { %1258 = vmatpush1.bf16.msra.mxu0 %v19947_v6  ;;  %v19955_v12 = vld [vmem:[%s29853_s1 + $0x84] ss:$16 sps:$4 sm:$0xff]   ;;  %v19959_v14 = vld [vmem:[%s29853_s1 + $0x80] ss:$16 sps:$4 sm:$0xff]  }
   0x8   :  { %1299 = vmatpush1.bf16.msra.mxu1 %v19948_v7  ;;  %1259 = vmatprep.subr.bf16.mxu0 %v19949_v8  ;;  %v19957_v13 = vld [vmem:[%s29853_s1 + $0x284] ss:$16 sps:$4 sm:$0xff]   ;;  %v19960_v15 = vld [vmem:[%s29853_s1 + $0x280] ss:$16 sps:$4 sm:$0xff]  }
   0x9   :  { %1300 = vmatprep.subr.bf16.mxu1 %v19951_v9  ;;  %v19961_v16 = vld [vmem:[%s29853_s1 + $0x64] ss:$16 sps:$4 sm:$0xff]   ;;  %v19965_v18 = vld [vmem:[%s29853_s1 + $0x60] ss:$16 sps:$4 sm:$0xff]  }
   0xa   :  { %v19963_v17 = vld [vmem:[%s29853_s1 + $0x264] ss:$16 sps:$4 sm:$0xff]   ;;  %v19966_v19 = vld [vmem:[%s29853_s1 + $0x260] ss:$16 sps:$4 sm:$0xff]  }
   0xb   :  { %1260 = vmatpush1.bf16.msra.mxu0 %v19953_v10  ;;  %v19967_v20 = vld [vmem:[%s29853_s1 + $0x44] ss:$16 sps:$4 sm:$0xff]   ;;  %v19971_v22 = vld [vmem:[%s29853_s1 + $0x40] ss:$16 sps:$4 sm:$0xff]  }
   0xc   :  { %1301 = vmatpush1.bf16.msra.mxu1 %v19954_v11  ;;  %1261 = vmatprep.subr.bf16.mxu0 %v19955_v12  ;;  %v19969_v21 = vld [vmem:[%s29853_s1 + $0x244] ss:$16 sps:$4 sm:$0xff]   ;;  %v19972_v23 = vld [vmem:[%s29853_s1 + $0x240] ss:$16 sps:$4 sm:$0xff]  }
   0xd   :  { %1302 = vmatprep.subr.bf16.mxu1 %v19957_v13  ;;  %v19973_v24 = vld [vmem:[%s29853_s1 + $0x24] ss:$16 sps:$4 sm:$0xff]   ;;  %v19977_v26 = vld [vmem:[%s29853_s1 + $0x20] ss:$16 sps:$4 sm:$0xff]   ;;  %v20044_v13 = vld [vmem:[%s29853_s1 + $0xec] ss:$16 sps:$4 sm:$0xff]  }
   0xe   :  { %v19975_v25 = vld [vmem:[%s29853_s1 + $0x224] ss:$16 sps:$4 sm:$0xff]   ;;  %v19978_v27 = vld [vmem:[%s29853_s1 + $0x220] ss:$16 sps:$4 sm:$0xff]  }
   0xf   :  { %1262 = vmatpush1.bf16.msra.mxu0 %v19959_v14  ;;  %v19979_v28 = vld [vmem:[%s29853_s1 + $0x4] ss:$16 sps:$4 sm:$0xff]   ;;  %v19983_v30 = vld [vmem:[%s29853_s1] ss:$16 sps:$4 sm:$0xff]  }
  0x10   :  { %1303 = vmatpush1.bf16.msra.mxu1 %v19960_v15  ;;  %1263 = vmatprep.subr.bf16.mxu0 %v19961_v16  ;;  %v19981_v29 = vld [vmem:[%s29853_s1 + $0x204] ss:$16 sps:$4 sm:$0xff]   ;;  %v19984_v31 = vld [vmem:[%s29853_s1 + $0x200] ss:$16 sps:$4 sm:$0xff]   ;;  %v22920_v16 = vmov 0  }
  0x11   :  { %1304 = vmatprep.subr.bf16.mxu1 %v19963_v17  ;;  %v19985_v32 = vld [vmem:[%s29853_s1 + $0x1e4] ss:$16 sps:$4 sm:$0xff]   ;;  %v19989_v34 = vld [vmem:[%s29853_s1 + $0x1e0] ss:$16 sps:$4 sm:$0xff]  }
  0x12   :  { %v19987_v33 = vld [vmem:[%s29853_s1 + $0x3e4] ss:$16 sps:$4 sm:$0xff]   ;;  %v19990_v35 = vld [vmem:[%s29853_s1 + $0x3e0] ss:$16 sps:$4 sm:$0xff]  }
  0x13   :  { %1264 = vmatpush1.bf16.msra.mxu0 %v19965_v18  ;;  %v19991_v36 = vld [vmem:[%s29853_s1 + $0x1c4] ss:$16 sps:$4 sm:$0xff]   ;;  %v19995_v38 = vld [vmem:[%s29853_s1 + $0x1c0] ss:$16 sps:$4 sm:$0xff]   ;;  %v20042_v18 = vld [vmem:[%s29853_s1 + $0xe8] ss:$16 sps:$4 sm:$0xff]  }
  0x14   :  { %1305 = vmatpush1.bf16.msra.mxu1 %v19966_v19  ;;  %1265 = vmatprep.subr.bf16.mxu0 %v19967_v20  ;;  %v19993_v37 = vld [vmem:[%s29853_s1 + $0x3c4] ss:$16 sps:$4 sm:$0xff]   ;;  %v19996_v39 = vld [vmem:[%s29853_s1 + $0x3c0] ss:$16 sps:$4 sm:$0xff]  }
  0x15   :  { %1306 = vmatprep.subr.bf16.mxu1 %v19969_v21  ;;  %v19997_v40 = vld [vmem:[%s29853_s1 + $0x1a4] ss:$16 sps:$4 sm:$0xff]   ;;  %v20001_v42 = vld [vmem:[%s29853_s1 + $0x1a0] ss:$16 sps:$4 sm:$0xff]   ;;  %v20050_v21 = vld [vmem:[%s29853_s1 + $0xcc] ss:$16 sps:$4 sm:$0xff]  }
  0x16   :  { %v19999_v41 = vld [vmem:[%s29853_s1 + $0x3a4] ss:$16 sps:$4 sm:$0xff]   ;;  %v20002_v43 = vld [vmem:[%s29853_s1 + $0x3a0] ss:$16 sps:$4 sm:$0xff]  }
  0x17   :  { %1266 = vmatpush1.bf16.msra.mxu0 %v19971_v22  ;;  %v20003_v44 = vld [vmem:[%s29853_s1 + $0x184] ss:$16 sps:$4 sm:$0xff]   ;;  %v20007_v47 = vld [vmem:[%s29853_s1 + $0x180] ss:$16 sps:$4 sm:$0xff]  }
  0x18   :  { %1307 = vmatpush1.bf16.msra.mxu1 %v19972_v23  ;;  %1267 = vmatprep.subr.bf16.mxu0 %v19973_v24  ;;  %v20005_v45 = vld [vmem:[%s29853_s1 + $0x384] ss:$16 sps:$4 sm:$0xff]   ;;  %v20008_v48 = vld [vmem:[%s29853_s1 + $0x380] ss:$16 sps:$4 sm:$0xff]   ;;  %v20048_v23 = vld [vmem:[%s29853_s1 + $0xc8] ss:$16 sps:$4 sm:$0xff]  }
  0x19   :  { %1308 = vmatprep.subr.bf16.mxu1 %v19975_v25  ;;  %v20009_v51 = vld [vmem:[%s29853_s1 + $0x164] ss:$16 sps:$4 sm:$0xff]   ;;  %v20013_v54 = vld [vmem:[%s29853_s1 + $0x160] ss:$16 sps:$4 sm:$0xff]   ;;  %v20056_v25 = vld [vmem:[%s29853_s1 + $0xac] ss:$16 sps:$4 sm:$0xff]  }
  0x1a   :  { %v20011_v53 = vld [vmem:[%s29853_s1 + $0x364] ss:$16 sps:$4 sm:$0xff]   ;;  %v20014_v55 = vld [vmem:[%s29853_s1 + $0x360] ss:$16 sps:$4 sm:$0xff]  }
  0x1b   :  { %1268 = vmatpush1.bf16.msra.mxu0 %v19977_v26  ;;  %v20015_v56 = vld [vmem:[%s29853_s1 + $0x144] ss:$16 sps:$4 sm:$0xff]   ;;  %v20019_v58 = vld [vmem:[%s29853_s1 + $0x140] ss:$16 sps:$4 sm:$0xff]  }
  0x1c   :  { %1309 = vmatpush1.bf16.msra.mxu1 %v19978_v27  ;;  %1269 = vmatprep.subr.bf16.mxu0 %v19979_v28  ;;  %v20017_v57 = vld [vmem:[%s29853_s1 + $0x344] ss:$16 sps:$4 sm:$0xff]   ;;  %v20020_v59 = vld [vmem:[%s29853_s1 + $0x340] ss:$16 sps:$4 sm:$0xff]   ;;  %v20054_v27 = vld [vmem:[%s29853_s1 + $0xa8] ss:$16 sps:$4 sm:$0xff]  }
  0x1d   :  { %1310 = vmatprep.subr.bf16.mxu1 %v19981_v29  ;;  %v20021_v60 = vld [vmem:[%s29853_s1 + $0x124] ss:$16 sps:$4 sm:$0xff]   ;;  %v20025_v62 = vld [vmem:[%s29853_s1 + $0x120] ss:$16 sps:$4 sm:$0xff]   ;;  %v20062_v29 = vld [vmem:[%s29853_s1 + $0x8c] ss:$16 sps:$4 sm:$0xff]  }
  0x1e   :  { %v20023_v61 = vld [vmem:[%s29853_s1 + $0x324] ss:$16 sps:$4 sm:$0xff]   ;;  %v20026_v63 = vld [vmem:[%s29853_s1 + $0x320] ss:$16 sps:$4 sm:$0xff]  }
  0x1f   :  { %1270 = vmatpush1.bf16.msra.mxu0 %v19983_v30  ;;  %v20027_v0 = vld [vmem:[%s29853_s1 + $0x104] ss:$16 sps:$4 sm:$0xff]   ;;  %v20031_v2 = vld [vmem:[%s29853_s1 + $0x100] ss:$16 sps:$4 sm:$0xff]  }
  0x20   :  { %1311 = vmatpush1.bf16.msra.mxu1 %v19984_v31  ;;  %1271 = vmatprep.subr.bf16.mxu0 %v19985_v32  ;;  %v20029_v1 = vld [vmem:[%s29853_s1 + $0x304] ss:$16 sps:$4 sm:$0xff]   ;;  %v20032_v3 = vld [vmem:[%s29853_s1 + $0x300] ss:$16 sps:$4 sm:$0xff]   ;;  %v20060_v31 = vld [vmem:[%s29853_s1 + $0x88] ss:$16 sps:$4 sm:$0xff]  }
  0x21   :  { %1312 = vmatprep.subr.bf16.mxu1 %v19987_v33  ;;  %v39_v4 = vld [vmem:[%s29854_s0] sm:$0xff]  ;;  %v41_v5 = vld [vmem:[%s29854_s0 + $0x10] sm:$0xff]  ;;  %v20068_v33 = vld [vmem:[%s29853_s1 + $0x6c] ss:$16 sps:$4 sm:$0xff]  }
  0x22   :  { %v20035_v6 = vld [vmem:[%s29853_s1 + $0x4e4] ss:$16 sps:$4 sm:$0xff]   ;;  %v23199_v8 = vpack.c.bf16 %v39_v4, %v39_v4  ;;  %v23201_v9 = vpack.c.bf16 %v41_v5, %v41_v5  ;;  %v20033_v10 = vld [vmem:[%s29853_s1 + $0x4e0] ss:$16 sps:$4 sm:$0xff]   ;;  %v20116_v5 = vld [vmem:[%s29853_s1 + $0x16c] ss:$16 sps:$4 sm:$0xff]  }
  0x23   :  { %1272 = vmatpush2.bf16.msra.mxu0 %v19989_v34  ;;  %v20038_v7 = vld [vmem:[%s29853_s1 + $0x604] ss:$16 sps:$4 sm:$0xff]   ;;  %v20036_v11 = vld [vmem:[%s29853_s1 + $0x600] ss:$16 sps:$4 sm:$0xff]  }
  0x24   :  { %1313 = vmatpush2.bf16.msra.mxu1 %v19990_v35  ;;  %1273 = vmatprep.subr.bf16.mxu0 %v19991_v36  ;;  %v20041_v12 = vld [vmem:[%s29853_s1 + $0x4c4] ss:$16 sps:$4 sm:$0xff]   ;;  %v20039_v14 = vld [vmem:[%s29853_s1 + $0x4c0] ss:$16 sps:$4 sm:$0xff]   ;;  %v44_v35 = vld [vmem:[%s29854_s0 + $0x28] sm:$0xff] }
  0x25   :  { %1314 = vmatprep.subr.bf16.mxu1 %v19993_v37  ;;  %v45_v15 = vld [vmem:[%s29854_s0 + $0x30] sm:$0xff]  ;;  %v23283_v36 = vpack.c.bf16 %v44_v35, %v44_v35  ;;  %v20066_v37 = vld [vmem:[%s29853_s1 + $0x68] ss:$16 sps:$4 sm:$0xff]   ;;  %v20152_v35 = vld [vmem:[%s29853_s1 + $0x4ac] ss:$16 sps:$4 sm:$0xff]  }
  0x26   :  { %v20047_v17 = vld [vmem:[%s29853_s1 + $0x4a4] ss:$16 sps:$4 sm:$0xff]   ;;  %v23230_v19 = vpack.c.bf16 %v45_v15, %v45_v15  ;;  %v20045_v20 = vld [vmem:[%s29853_s1 + $0x4a0] ss:$16 sps:$4 sm:$0xff]   ;;  %v20128_v15 = vld [vmem:[%s29853_s1 + $0x12c] ss:$16 sps:$4 sm:$0xff]  }
  0x27   :  { %1274 = vmatpush2.bf16.msra.mxu0 %v19995_v38  ;;  %v20053_v22 = vld [vmem:[%s29853_s1 + $0x484] ss:$16 sps:$4 sm:$0xff]   ;;  %v20051_v24 = vld [vmem:[%s29853_s1 + $0x480] ss:$16 sps:$4 sm:$0xff]  }
  0x28   :  { %1315 = vmatpush2.bf16.msra.mxu1 %v19996_v39  ;;  %1275 = vmatprep.subr.bf16.mxu0 %v19997_v40  ;;  %v20059_v26 = vld [vmem:[%s29853_s1 + $0x464] ss:$16 sps:$4 sm:$0xff]   ;;  %v20057_v28 = vld [vmem:[%s29853_s1 + $0x460] ss:$16 sps:$4 sm:$0xff]   ;;  %v20074_v39 = vld [vmem:[%s29853_s1 + $0x4c] ss:$16 sps:$4 sm:$0xff]  }
  0x29   :  { %1316 = vmatprep.subr.bf16.mxu1 %v19999_v41  ;;  %v20065_v30 = vld [vmem:[%s29853_s1 + $0x444] ss:$16 sps:$4 sm:$0xff]   ;;  %v20063_v32 = vld [vmem:[%s29853_s1 + $0x440] ss:$16 sps:$4 sm:$0xff]   ;;  %v20072_v41 = vld [vmem:[%s29853_s1 + $0x48] ss:$16 sps:$4 sm:$0xff]  }
  0x2a   :  { %v20071_v34 = vld [vmem:[%s29853_s1 + $0x424] ss:$16 sps:$4 sm:$0xff]   ;;  %v20069_v38 = vld [vmem:[%s29853_s1 + $0x420] ss:$16 sps:$4 sm:$0xff]  }
  0x2b   :  { %1276 = vmatpush2.bf16.msra.mxu0 %v20001_v42  ;;  %v20077_v40 = vld [vmem:[%s29853_s1 + $0x404] ss:$16 sps:$4 sm:$0xff]   ;;  %v20075_v42 = vld [vmem:[%s29853_s1 + $0x400] ss:$16 sps:$4 sm:$0xff]  }
  0x2c   :  { %1317 = vmatpush2.bf16.msra.mxu1 %v20002_v43  ;;  %1277 = vmatprep.subr.bf16.mxu0 %v20003_v44  ;;  %v20080_v43 = vld [vmem:[%s29853_s1 + $0x2c] ss:$16 sps:$4 sm:$0xff]   ;;  %v20083_v44 = vld [vmem:[%s29853_s1 + $0x5e4] ss:$16 sps:$4 sm:$0xff]   ;;  %v20081_v46 = vld [vmem:[%s29853_s1 + $0x5e0] ss:$16 sps:$4 sm:$0xff]  }
  0x2d   :  { %1318 = vmatprep.subr.bf16.mxu1 %v20005_v45  ;;  %v20078_v45 = vld [vmem:[%s29853_s1 + $0x28] ss:$16 sps:$4 sm:$0xff]   ;;  %v20111_v4 = vld [vmem:[%s29853_s1 + $0x540] ss:$16 sps:$4 sm:$0xff]  }
  0x2f   :  { %1278 = vmatpush2.bf16.msra.mxu0 %v20007_v47  ;;  %v20086_v47 = vld [vmem:[%s29853_s1 + $0xc] ss:$16 sps:$4 sm:$0xff]  }
  0x30   :  { %1319 = vmatpush2.bf16.msra.mxu1 %v20008_v48  ;;  %1279 = vmatprep.subr.bf16.mxu0 %v20009_v51  ;;  %v20089_v48 = vld [vmem:[%s29853_s1 + $0x5c4] ss:$16 sps:$4 sm:$0xff]   ;;  %v20087_v51 = vld [vmem:[%s29853_s1 + $0x5c0] ss:$16 sps:$4 sm:$0xff]  }
  0x31   :  { %1320 = vmatprep.subr.bf16.mxu1 %v20011_v53  ;;  %v20092_v53 = vld [vmem:[%s29853_s1 + $0x1ec] ss:$16 sps:$4 sm:$0xff]  }
  0x33   :  { %1280 = vmatpush2.bf16.msra.mxu0 %v20013_v54  ;;  %v20095_v54 = vld [vmem:[%s29853_s1 + $0x5a4] ss:$16 sps:$4 sm:$0xff]  }
  0x34   :  { %1321 = vmatpush2.bf16.msra.mxu1 %v20014_v55  ;;  %1281 = vmatprep.subr.bf16.mxu0 %v20015_v56  ;;  %v20090_v55 = vld [vmem:[%s29853_s1 + $0x1e8] ss:$16 sps:$4 sm:$0xff]   ;;  %v20093_v56 = vld [vmem:[%s29853_s1 + $0x5a0] ss:$16 sps:$4 sm:$0xff]  }
  0x35   :  { %1322 = vmatprep.subr.bf16.mxu1 %v20017_v57  ;;  %v20098_v57 = vld [vmem:[%s29853_s1 + $0x1cc] ss:$16 sps:$4 sm:$0xff]  }
  0x37   :  { %1282 = vmatpush2.bf16.msra.mxu0 %v20019_v58  ;;  %v20101_v58 = vld [vmem:[%s29853_s1 + $0x584] ss:$16 sps:$4 sm:$0xff]  }
  0x38   :  { %1323 = vmatpush2.bf16.msra.mxu1 %v20020_v59  ;;  %1283 = vmatprep.subr.bf16.mxu0 %v20021_v60  ;;  %v20096_v59 = vld [vmem:[%s29853_s1 + $0x1c8] ss:$16 sps:$4 sm:$0xff]   ;;  %v20099_v60 = vld [vmem:[%s29853_s1 + $0x580] ss:$16 sps:$4 sm:$0xff]  }
  0x39   :  { %1324 = vmatprep.subr.bf16.mxu1 %v20023_v61  ;;  %v20104_v61 = vld [vmem:[%s29853_s1 + $0x1ac] ss:$16 sps:$4 sm:$0xff]  }
  0x3b   :  { %1284 = vmatpush2.bf16.msra.mxu0 %v20025_v62  ;;  %v20107_v62 = vld [vmem:[%s29853_s1 + $0x564] ss:$16 sps:$4 sm:$0xff]  }
  0x3c   :  { %1325 = vmatpush2.bf16.msra.mxu1 %v20026_v63  ;;  %1285 = vmatprep.subr.bf16.mxu0 %v20027_v0  ;;  %v20102_v63 = vld [vmem:[%s29853_s1 + $0x1a8] ss:$16 sps:$4 sm:$0xff]   ;;  %v20105_v0 = vld [vmem:[%s29853_s1 + $0x560] ss:$16 sps:$4 sm:$0xff]  }
  0x3d   :  { %1326 = vmatprep.subr.bf16.mxu1 %v20029_v1  ;;  %v20110_v1 = vld [vmem:[%s29853_s1 + $0x18c] ss:$16 sps:$4 sm:$0xff]  }
  0x3f   :  { %1286 = vmatpush2.bf16.msra.mxu0 %v20031_v2  ;;  %v20113_v2 = vld [vmem:[%s29853_s1 + $0x544] ss:$16 sps:$4 sm:$0xff]  }
  0x40   :  { %1327 = vmatpush2.bf16.msra.mxu1 %v20032_v3  ;;  %1337 = vmatprep.subr.bf16.mxu0 %v20035_v6  ;;  %v20108_v3 = vld [vmem:[%s29853_s1 + $0x188] ss:$16 sps:$4 sm:$0xff]   ;;  %v20119_v6 = vld [vmem:[%s29853_s1 + $0x524] ss:$16 sps:$4 sm:$0xff]  }
  0x41   :  { %1392 = vmatprep.subr.bf16.mxu1 %v20038_v7  ;;  %v20114_v7 = vld [vmem:[%s29853_s1 + $0x168] ss:$16 sps:$4 sm:$0xff]  }
  0x42   :  { %1288 = vmatmul.mubr.bf16.vlgmr.msra.gmra.mxu0 %v23199_v8 }
  0x43   :  { %1329 = vmatmul.mubr.bf16.vlgmr.msra.gmra.mxu1 %v23201_v9  ;;  %1338 = vmatpush1.bf16.msra.mxu0 %v20033_v10  ;;  %v20117_v10 = vld [vmem:[%s29853_s1 + $0x520] ss:$16 sps:$4 sm:$0xff]  }
  0x44   :  { %1393 = vmatpush1.bf16.msra.mxu1 %v20036_v11  ;;  %1339 = vmatprep.subr.bf16.mxu0 %v20041_v12  ;;  %v20122_v11 = vld [vmem:[%s29853_s1 + $0x14c] ss:$16 sps:$4 sm:$0xff]   ;;  %v20125_v12 = vld [vmem:[%s29853_s1 + $0x504] ss:$16 sps:$4 sm:$0xff]  }
  0x45   :  { %1410 = vmatprep.mubr.bf16.mxu1 %v22920_v16  ;;  %1419 = vmatprep.subr.bf16.mxu1 %v20044_v13  ;;  %v20120_v13 = vld [vmem:[%s29853_s1 + $0x148] ss:$16 sps:$4 sm:$0xff]  }
  0x46   :  { %1369 = vmatprep.mubr.bf16.mxu0 %v23283_v36 }
  0x47   :  { %1340 = vmatpush1.bf16.msra.mxu0 %v20039_v14  ;;  %v20123_v14 = vld [vmem:[%s29853_s1 + $0x500] ss:$16 sps:$4 sm:$0xff]  }
  0x48   :  { %1341 = vmatprep.subr.bf16.mxu0 %v20047_v17  ;;  %v43_v17 = vld [vmem:[%s29854_s0 + $0x20] sm:$0xff] }
  0x4b   :  { %17032 = vmatmul.mubr.msk.bf16.vlgmr.msra.gmra.mxu1 %vm1251_vm0, %v23230_v19  ;;  %1342 = vmatpush1.bf16.msra.mxu0 %v20045_v20  ;;  %v20126_v20 = vld [vmem:[%s29853_s1 + $0x128] ss:$16 sps:$4 sm:$0xff]  }
  0x4c   :  { %1420 = vmatpush1.bf16.msra.mxu1 %v20042_v18  ;;  %1343 = vmatprep.subr.bf16.mxu0 %v20053_v22  ;;  %v20131_v18 = vld [vmem:[%s29853_s1 + $0x2ec] ss:$16 sps:$4 sm:$0xff]   ;;  %v20129_v22 = vld [vmem:[%s29853_s1 + $0x2e8] ss:$16 sps:$4 sm:$0xff]  }
  0x4d   :  { %1421 = vmatprep.subr.bf16.mxu1 %v20050_v21  ;;  %1451 = vmatprep.mubr.bf16.mxu1 %v23130_v49  ;;  %v23412_v21 = vpack.c.bf16 %v43_v17, %v43_v17  ;;  %v20212_v17 = vld [vmem:[%s29853_s1 + $0x56c] ss:$16 sps:$4 sm:$0xff]  }
  0x4f   :  { %1344 = vmatpush1.bf16.msra.mxu0 %v20051_v24  ;;  %v20137_v24 = vld [vmem:[%s29853_s1 + $0x2cc] ss:$16 sps:$4 sm:$0xff]  }
  0x50   :  { %1422 = vmatpush1.bf16.msra.mxu1 %v20048_v23  ;;  %1345 = vmatprep.subr.bf16.mxu0 %v20059_v26  ;;  %v20134_v23 = vld [vmem:[%s29853_s1 + $0x10c] ss:$16 sps:$4 sm:$0xff]   ;;  %v20135_v26 = vld [vmem:[%s29853_s1 + $0x2c8] ss:$16 sps:$4 sm:$0xff]  }
  0x51   :  { %1423 = vmatprep.subr.bf16.mxu1 %v20056_v25  ;;  %v20132_v25 = vld [vmem:[%s29853_s1 + $0x108] ss:$16 sps:$4 sm:$0xff]  }
  0x53   :  { %1346 = vmatpush1.bf16.msra.mxu0 %v20057_v28  ;;  %v20143_v28 = vld [vmem:[%s29853_s1 + $0x2ac] ss:$16 sps:$4 sm:$0xff]  }
  0x54   :  { %1424 = vmatpush1.bf16.msra.mxu1 %v20054_v27  ;;  %1347 = vmatprep.subr.bf16.mxu0 %v20065_v30  ;;  %v20140_v27 = vld [vmem:[%s29853_s1 + $0x4ec] ss:$16 sps:$4 sm:$0xff]   ;;  %v20141_v30 = vld [vmem:[%s29853_s1 + $0x2a8] ss:$16 sps:$4 sm:$0xff]  }
  0x55   :  { %1425 = vmatprep.subr.bf16.mxu1 %v20062_v29  ;;  %v20138_v29 = vld [vmem:[%s29853_s1 + $0x4e8] ss:$16 sps:$4 sm:$0xff]  }
  0x57   :  { %1348 = vmatpush1.bf16.msra.mxu0 %v20063_v32  ;;  %v20149_v32 = vld [vmem:[%s29853_s1 + $0x28c] ss:$16 sps:$4 sm:$0xff]  }
  0x58   :  { %1426 = vmatpush1.bf16.msra.mxu1 %v20060_v31  ;;  %1349 = vmatprep.subr.bf16.mxu0 %v20071_v34  ;;  %v20146_v31 = vld [vmem:[%s29853_s1 + $0x4cc] ss:$16 sps:$4 sm:$0xff]   ;;  %v20147_v34 = vld [vmem:[%s29853_s1 + $0x288] ss:$16 sps:$4 sm:$0xff]  }
  0x59   :  { %1427 = vmatprep.subr.bf16.mxu1 %v20068_v33  ;;  %v20144_v33 = vld [vmem:[%s29853_s1 + $0x4c8] ss:$16 sps:$4 sm:$0xff]  }
  0x5b   :  { %1350 = vmatpush1.bf16.msra.mxu0 %v20069_v38  ;;  %v20150_v38 = vld [vmem:[%s29853_s1 + $0x4a8] ss:$16 sps:$4 sm:$0xff]  }
  0x5c   :  { %1428 = vmatpush1.bf16.msra.mxu1 %v20066_v37  ;;  %1351 = vmatprep.subr.bf16.mxu0 %v20077_v40  ;;  %v20155_v37 = vld [vmem:[%s29853_s1 + $0x26c] ss:$16 sps:$4 sm:$0xff]  }
  0x5d   :  { %1429 = vmatprep.subr.bf16.mxu1 %v20074_v39  ;;  %v20153_v39 = vld [vmem:[%s29853_s1 + $0x268] ss:$16 sps:$4 sm:$0xff]   ;;  %v20158_v40 = vld [vmem:[%s29853_s1 + $0x48c] ss:$16 sps:$4 sm:$0xff]  }
  0x5f   :  { %1352 = vmatpush1.bf16.msra.mxu0 %v20075_v42  ;;  %v20156_v42 = vld [vmem:[%s29853_s1 + $0x488] ss:$16 sps:$4 sm:$0xff]  }
  0x60   :  { %1430 = vmatpush1.bf16.msra.mxu1 %v20072_v41  ;;  %1353 = vmatprep.subr.bf16.mxu0 %v20083_v44  ;;  %v20161_v41 = vld [vmem:[%s29853_s1 + $0x24c] ss:$16 sps:$4 sm:$0xff]  }
  0x61   :  { %1431 = vmatprep.subr.bf16.mxu1 %v20080_v43  ;;  %v20159_v43 = vld [vmem:[%s29853_s1 + $0x248] ss:$16 sps:$4 sm:$0xff]   ;;  %v20164_v44 = vld [vmem:[%s29853_s1 + $0x46c] ss:$16 sps:$4 sm:$0xff]  }
  0x63   :  { %1354 = vmatpush2.bf16.msra.mxu0 %v20081_v46  ;;  %v20162_v46 = vld [vmem:[%s29853_s1 + $0x468] ss:$16 sps:$4 sm:$0xff]  }
  0x64   :  { %1432 = vmatpush1.bf16.msra.mxu1 %v20078_v45  ;;  %1355 = vmatprep.subr.bf16.mxu0 %v20089_v48  ;;  %v20167_v45 = vld [vmem:[%s29853_s1 + $0x22c] ss:$16 sps:$4 sm:$0xff]  }
  0x65   :  { %1433 = vmatprep.subr.bf16.mxu1 %v20086_v47  ;;  %v20165_v47 = vld [vmem:[%s29853_s1 + $0x228] ss:$16 sps:$4 sm:$0xff]   ;;  %v20170_v48 = vld [vmem:[%s29853_s1 + $0x44c] ss:$16 sps:$4 sm:$0xff]  }
  0x67   :  { %1356 = vmatpush2.bf16.msra.mxu0 %v20087_v51  ;;  %v20168_v51 = vld [vmem:[%s29853_s1 + $0x448] ss:$16 sps:$4 sm:$0xff]  }
  0x68   :  { %1434 = vmatpush1.bf16.msra.mxu1 %v20084_v50  ;;  %1357 = vmatprep.subr.bf16.mxu0 %v20095_v54  ;;  %v20173_v50 = vld [vmem:[%s29853_s1 + $0x20c] ss:$16 sps:$4 sm:$0xff]  }
  0x69   :  { %1435 = vmatprep.subr.bf16.mxu1 %v20092_v53  ;;  %v20171_v53 = vld [vmem:[%s29853_s1 + $0x208] ss:$16 sps:$4 sm:$0xff]   ;;  %v20176_v54 = vld [vmem:[%s29853_s1 + $0x42c] ss:$16 sps:$4 sm:$0xff]  }
  0x6b   :  { %1358 = vmatpush2.bf16.msra.mxu0 %v20093_v56  ;;  %v20174_v56 = vld [vmem:[%s29853_s1 + $0x428] ss:$16 sps:$4 sm:$0xff]  }
  0x6c   :  { %1436 = vmatpush2.bf16.msra.mxu1 %v20090_v55  ;;  %1359 = vmatprep.subr.bf16.mxu0 %v20101_v58  ;;  %v20179_v55 = vld [vmem:[%s29853_s1 + $0x3ec] ss:$16 sps:$4 sm:$0xff]  }
  0x6d   :  { %1437 = vmatprep.subr.bf16.mxu1 %v20098_v57  ;;  %v20177_v57 = vld [vmem:[%s29853_s1 + $0x3e8] ss:$16 sps:$4 sm:$0xff]   ;;  %v20182_v58 = vld [vmem:[%s29853_s1 + $0x40c] ss:$16 sps:$4 sm:$0xff]  }
  0x6f   :  { %1360 = vmatpush2.bf16.msra.mxu0 %v20099_v60  ;;  %v20180_v60 = vld [vmem:[%s29853_s1 + $0x408] ss:$16 sps:$4 sm:$0xff]  }
  0x70   :  { %1438 = vmatpush2.bf16.msra.mxu1 %v20096_v59  ;;  %1361 = vmatprep.subr.bf16.mxu0 %v20107_v62  ;;  %v20185_v59 = vld [vmem:[%s29853_s1 + $0x3cc] ss:$16 sps:$4 sm:$0xff]  }
  0x71   :  { %1439 = vmatprep.subr.bf16.mxu1 %v20104_v61  ;;  %v20183_v61 = vld [vmem:[%s29853_s1 + $0x3c8] ss:$16 sps:$4 sm:$0xff]   ;;  %v20188_v62 = vld [vmem:[%s29853_s1 + $0x5ec] ss:$16 sps:$4 sm:$0xff]  }
  0x73   :  { %1362 = vmatpush2.bf16.msra.mxu0 %v20105_v0  ;;  %v20186_v0 = vld [vmem:[%s29853_s1 + $0x5e8] ss:$16 sps:$4 sm:$0xff]  }
  0x74   :  { %1440 = vmatpush2.bf16.msra.mxu1 %v20102_v63  ;;  %1363 = vmatprep.subr.bf16.mxu0 %v20113_v2  ;;  %v20191_v63 = vld [vmem:[%s29853_s1 + $0x3ac] ss:$16 sps:$4 sm:$0xff]  }
  0x75   :  { %1441 = vmatprep.subr.bf16.mxu1 %v20110_v1  ;;  %v20189_v1 = vld [vmem:[%s29853_s1 + $0x3a8] ss:$16 sps:$4 sm:$0xff]   ;;  %v20194_v2 = vld [vmem:[%s29853_s1 + $0x5cc] ss:$16 sps:$4 sm:$0xff]  }
  0x77   :  { %1364 = vmatpush2.bf16.msra.mxu0 %v20111_v4  ;;  %v20192_v4 = vld [vmem:[%s29853_s1 + $0x5c8] ss:$16 sps:$4 sm:$0xff]  }
  0x78   :  { %1442 = vmatpush2.bf16.msra.mxu1 %v20108_v3  ;;  %1365 = vmatprep.subr.bf16.mxu0 %v20119_v6  ;;  %v20197_v3 = vld [vmem:[%s29853_s1 + $0x38c] ss:$16 sps:$4 sm:$0xff]  }
  0x79   :  { %1443 = vmatprep.subr.bf16.mxu1 %v20116_v5  ;;  %v20195_v5 = vld [vmem:[%s29853_s1 + $0x388] ss:$16 sps:$4 sm:$0xff]   ;;  %v20200_v6 = vld [vmem:[%s29853_s1 + $0x5ac] ss:$16 sps:$4 sm:$0xff]  }
  0x7b   :  { %1366 = vmatpush2.bf16.msra.mxu0 %v20117_v10  ;;  %v20198_v10 = vld [vmem:[%s29853_s1 + $0x5a8] ss:$16 sps:$4 sm:$0xff]  }
  0x7c   :  { %1444 = vmatpush2.bf16.msra.mxu1 %v20114_v7  ;;  %1367 = vmatprep.subr.bf16.mxu0 %v20125_v12  ;;  %v20203_v7 = vld [vmem:[%s29853_s1 + $0x36c] ss:$16 sps:$4 sm:$0xff]  }
  0x7d   :  { %1445 = vmatprep.subr.bf16.mxu1 %v20122_v11  ;;  %v20201_v11 = vld [vmem:[%s29853_s1 + $0x368] ss:$16 sps:$4 sm:$0xff]   ;;  %v20206_v12 = vld [vmem:[%s29853_s1 + $0x58c] ss:$16 sps:$4 sm:$0xff]  }
  0x7f   :  { %1368 = vmatpush2.bf16.msra.mxu0 %v20123_v14  ;;  %v20204_v14 = vld [vmem:[%s29853_s1 + $0x588] ss:$16 sps:$4 sm:$0xff]  }
  0x80   :  { %1446 = vmatpush2.bf16.msra.mxu1 %v20120_v13  ;;  %1460 = vmatprep.subr.bf16.mxu0 %v20131_v18  ;;  %v20209_v13 = vld [vmem:[%s29853_s1 + $0x34c] ss:$16 sps:$4 sm:$0xff]  }
  0x81   :  { %1447 = vmatprep.subr.bf16.mxu1 %v20128_v15  ;;  %v20207_v15 = vld [vmem:[%s29853_s1 + $0x348] ss:$16 sps:$4 sm:$0xff]   ;;  %v20215_v18 = vld [vmem:[%s29853_s1 + $0x32c] ss:$16 sps:$4 sm:$0xff]  }
  0x82   :  { %1370 = vmatmul.mubr.bf16.vlgmr.msra.gmra.mxu0 %v23412_v21 }
  0x83   :  { %1461 = vmatpush1.bf16.msra.mxu0 %v20129_v22  ;;  %1492 = vmatprep.mubr.bf16.mxu0 %v23138_v52  ;;  %v20213_v22 = vld [vmem:[%s29853_s1 + $0x328] ss:$16 sps:$4 sm:$0xff]  }
  0x84   :  { %1448 = vmatpush2.bf16.msra.mxu1 %v20126_v20  ;;  %1462 = vmatprep.subr.bf16.mxu0 %v20137_v24  ;;  %v20210_v20 = vld [vmem:[%s29853_s1 + $0x568] ss:$16 sps:$4 sm:$0xff]   ;;  %v20221_v24 = vld [vmem:[%s29853_s1 + $0x30c] ss:$16 sps:$4 sm:$0xff]  }
  0x85   :  { %1449 = vmatprep.subr.bf16.mxu1 %v20134_v23  ;;  %v20218_v23 = vld [vmem:[%s29853_s1 + $0x54c] ss:$16 sps:$4 sm:$0xff]  }
  0x87   :  { %1463 = vmatpush1.bf16.msra.mxu0 %v20135_v26  ;;  %v20219_v26 = vld [vmem:[%s29853_s1 + $0x308] ss:$16 sps:$4 sm:$0xff]  }
  0x88   :  { %1450 = vmatpush2.bf16.msra.mxu1 %v20132_v25  ;;  %1464 = vmatprep.subr.bf16.mxu0 %v20143_v28  ;;  %v20216_v25 = vld [vmem:[%s29853_s1 + $0x548] ss:$16 sps:$4 sm:$0xff]   ;;  %v20227_v28 = vld [vmem:[%s29853_s1 + $0x60c] ss:$16 sps:$4 sm:$0xff]  }
  0x89   :  { %1501 = vmatprep.subr.bf16.mxu1 %v20140_v27  ;;  %v20224_v27 = vld [vmem:[%s29853_s1 + $0x52c] ss:$16 sps:$4 sm:$0xff]  }
  0x8b   :  { %1452 = vmatmul.mubr.bf16.vlgmr.msra.gmra.mxu1 %v23199_v8  ;;  %1465 = vmatpush1.bf16.msra.mxu0 %v20141_v30  ;;  %v20225_v30 = vld [vmem:[%s29853_s1 + $0x608] ss:$16 sps:$4 sm:$0xff]  }
  0x8c   :  { %1502 = vmatpush1.bf16.msra.mxu1 %v20138_v29  ;;  %1466 = vmatprep.subr.bf16.mxu0 %v20149_v32  ;;  %v20222_v29 = vld [vmem:[%s29853_s1 + $0x528] ss:$16 sps:$4 sm:$0xff]   ;;  %v20233_v32 = vld [vmem:[%s29853_s1 + $0x704] ss:$16 sps:$4 sm:$0xff]  }
  0x8d   :  { %1503 = vmatprep.subr.bf16.mxu1 %v20146_v31  ;;  %1533 = vmatprep.mubr.bf16.mxu1 %v23283_v36  ;;  %v20230_v31 = vld [vmem:[%s29853_s1 + $0x50c] ss:$16 sps:$4 sm:$0xff]  }
  0x8f   :  { %1467 = vmatpush1.bf16.msra.mxu0 %v20147_v34  ;;  %v20236_v34 = vld [vmem:[%s29853_s1 + $0x904] ss:$16 sps:$4 sm:$0xff]  }
  0x90   :  { %1504 = vmatpush1.bf16.msra.mxu1 %v20144_v33  ;;  %1468 = vmatprep.subr.bf16.mxu0 %v20155_v37  ;;  %v20228_v33 = vld [vmem:[%s29853_s1 + $0x508] ss:$16 sps:$4 sm:$0xff]   ;;  %v20234_v37 = vld [vmem:[%s29853_s1 + $0x900] ss:$16 sps:$4 sm:$0xff]  }
  0x91   :  { %1505 = vmatprep.subr.bf16.mxu1 %v20152_v35  ;;  %v20231_v35 = vld [vmem:[%s29853_s1 + $0x700] ss:$16 sps:$4 sm:$0xff]  }
  0x93   :  { %1469 = vmatpush1.bf16.msra.mxu0 %v20153_v39  ;;  %v20242_v39 = vld [vmem:[%s29853_s1 + $0x8e4] ss:$16 sps:$4 sm:$0xff]  }
  0x94   :  { %1506 = vmatpush1.bf16.msra.mxu1 %v20150_v38  ;;  %1470 = vmatprep.subr.bf16.mxu0 %v20161_v41  ;;  %v20239_v38 = vld [vmem:[%s29853_s1 + $0x6e4] ss:$16 sps:$4 sm:$0xff]   ;;  %v20240_v41 = vld [vmem:[%s29853_s1 + $0x8e0] ss:$16 sps:$4 sm:$0xff]  }
  0x95   :  { %1507 = vmatprep.subr.bf16.mxu1 %v20158_v40  ;;  %v20237_v40 = vld [vmem:[%s29853_s1 + $0x6e0] ss:$16 sps:$4 sm:$0xff]  }
  0x97   :  { %1471 = vmatpush1.bf16.msra.mxu0 %v20159_v43  ;;  %v20248_v43 = vld [vmem:[%s29853_s1 + $0x8c4] ss:$16 sps:$4 sm:$0xff]  }
  0x98   :  { %1508 = vmatpush1.bf16.msra.mxu1 %v20156_v42  ;;  %1472 = vmatprep.subr.bf16.mxu0 %v20167_v45  ;;  %v20245_v42 = vld [vmem:[%s29853_s1 + $0x6c4] ss:$16 sps:$4 sm:$0xff]   ;;  %v20246_v45 = vld [vmem:[%s29853_s1 + $0x8c0] ss:$16 sps:$4 sm:$0xff]  }
  0x99   :  { %1509 = vmatprep.subr.bf16.mxu1 %v20164_v44  ;;  %v20243_v44 = vld [vmem:[%s29853_s1 + $0x6c0] ss:$16 sps:$4 sm:$0xff]  }
  0x9b   :  { %1473 = vmatpush1.bf16.msra.mxu0 %v20165_v47  ;;  %v20254_v47 = vld [vmem:[%s29853_s1 + $0x8a4] ss:$16 sps:$4 sm:$0xff]  }
  0x9c   :  { %1510 = vmatpush1.bf16.msra.mxu1 %v20162_v46  ;;  %1474 = vmatprep.subr.bf16.mxu0 %v20173_v50  ;;  %v20251_v46 = vld [vmem:[%s29853_s1 + $0x6a4] ss:$16 sps:$4 sm:$0xff]   ;;  %v20252_v50 = vld [vmem:[%s29853_s1 + $0x8a0] ss:$16 sps:$4 sm:$0xff]  }
  0x9d   :  { %1511 = vmatprep.subr.bf16.mxu1 %v20170_v48  ;;  %v20249_v48 = vld [vmem:[%s29853_s1 + $0x6a0] ss:$16 sps:$4 sm:$0xff]  }
  0x9f   :  { %1475 = vmatpush1.bf16.msra.mxu0 %v20171_v53  ;;  %v20260_v53 = vld [vmem:[%s29853_s1 + $0x884] ss:$16 sps:$4 sm:$0xff]  }
  0xa0   :  { %1512 = vmatpush1.bf16.msra.mxu1 %v20168_v51  ;;  %1476 = vmatprep.subr.bf16.mxu0 %v20179_v55  ;;  %v20257_v51 = vld [vmem:[%s29853_s1 + $0x684] ss:$16 sps:$4 sm:$0xff]   ;;  %v20258_v55 = vld [vmem:[%s29853_s1 + $0x880] ss:$16 sps:$4 sm:$0xff]  }
  0xa1   :  { %1513 = vmatprep.subr.bf16.mxu1 %v20176_v54  ;;  %v20255_v54 = vld [vmem:[%s29853_s1 + $0x680] ss:$16 sps:$4 sm:$0xff]  }
  0xa3   :  { %1477 = vmatpush2.bf16.msra.mxu0 %v20177_v57  ;;  %v20266_v57 = vld [vmem:[%s29853_s1 + $0x864] ss:$16 sps:$4 sm:$0xff]  }
  0xa4   :  { %1514 = vmatpush1.bf16.msra.mxu1 %v20174_v56  ;;  %1478 = vmatprep.subr.bf16.mxu0 %v20185_v59  ;;  %v20263_v56 = vld [vmem:[%s29853_s1 + $0x664] ss:$16 sps:$4 sm:$0xff]   ;;  %v20264_v59 = vld [vmem:[%s29853_s1 + $0x860] ss:$16 sps:$4 sm:$0xff]  }
  0xa5   :  { %1515 = vmatprep.subr.bf16.mxu1 %v20182_v58  ;;  %v20261_v58 = vld [vmem:[%s29853_s1 + $0x660] ss:$16 sps:$4 sm:$0xff]  }
  0xa7   :  { %1479 = vmatpush2.bf16.msra.mxu0 %v20183_v61  ;;  %v20272_v61 = vld [vmem:[%s29853_s1 + $0x844] ss:$16 sps:$4 sm:$0xff]  }
  0xa8   :  { %1516 = vmatpush1.bf16.msra.mxu1 %v20180_v60  ;;  %1480 = vmatprep.subr.bf16.mxu0 %v20191_v63  ;;  %v20269_v60 = vld [vmem:[%s29853_s1 + $0x644] ss:$16 sps:$4 sm:$0xff]   ;;  %v20270_v63 = vld [vmem:[%s29853_s1 + $0x840] ss:$16 sps:$4 sm:$0xff]  }
  0xa9   :  { %1517 = vmatprep.subr.bf16.mxu1 %v20188_v62  ;;  %v20267_v62 = vld [vmem:[%s29853_s1 + $0x640] ss:$16 sps:$4 sm:$0xff]  }
  0xab   :  { %1481 = vmatpush2.bf16.msra.mxu0 %v20189_v1  ;;  %v20278_v1 = vld [vmem:[%s29853_s1 + $0x824] ss:$16 sps:$4 sm:$0xff]  }
  0xac   :  { %1518 = vmatpush2.bf16.msra.mxu1 %v20186_v0  ;;  %1482 = vmatprep.subr.bf16.mxu0 %v20197_v3  ;;  %v20275_v0 = vld [vmem:[%s29853_s1 + $0x624] ss:$16 sps:$4 sm:$0xff]   ;;  %v20276_v3 = vld [vmem:[%s29853_s1 + $0x820] ss:$16 sps:$4 sm:$0xff]  }
  0xad   :  { %1519 = vmatprep.subr.bf16.mxu1 %v20194_v2  ;;  %v20273_v2 = vld [vmem:[%s29853_s1 + $0x620] ss:$16 sps:$4 sm:$0xff]  }
  0xaf   :  { %1483 = vmatpush2.bf16.msra.mxu0 %v20195_v5  ;;  %v20284_v5 = vld [vmem:[%s29853_s1 + $0xa04] ss:$16 sps:$4 sm:$0xff]  }
  0xb0   :  { %1520 = vmatpush2.bf16.msra.mxu1 %v20192_v4  ;;  %1484 = vmatprep.subr.bf16.mxu0 %v20203_v7  ;;  %v20281_v4 = vld [vmem:[%s29853_s1 + $0x804] ss:$16 sps:$4 sm:$0xff]   ;;  %v20282_v7 = vld [vmem:[%s29853_s1 + $0xa00] ss:$16 sps:$4 sm:$0xff]  }
  0xb1   :  { %1521 = vmatprep.subr.bf16.mxu1 %v20200_v6  ;;  %v20279_v6 = vld [vmem:[%s29853_s1 + $0x800] ss:$16 sps:$4 sm:$0xff]  }
  0xb3   :  { %1485 = vmatpush2.bf16.msra.mxu0 %v20201_v11  ;;  %v20290_v11 = vld [vmem:[%s29853_s1 + $0x9e4] ss:$16 sps:$4 sm:$0xff]  }
  0xb4   :  { %1522 = vmatpush2.bf16.msra.mxu1 %v20198_v10  ;;  %1486 = vmatprep.subr.bf16.mxu0 %v20209_v13  ;;  %v20287_v10 = vld [vmem:[%s29853_s1 + $0x7e4] ss:$16 sps:$4 sm:$0xff]   ;;  %v20288_v13 = vld [vmem:[%s29853_s1 + $0x9e0] ss:$16 sps:$4 sm:$0xff]  }
  0xb5   :  { %1523 = vmatprep.subr.bf16.mxu1 %v20206_v12  ;;  %v20285_v12 = vld [vmem:[%s29853_s1 + $0x7e0] ss:$16 sps:$4 sm:$0xff]  }
  0xb7   :  { %1487 = vmatpush2.bf16.msra.mxu0 %v20207_v15  ;;  %v20296_v15 = vld [vmem:[%s29853_s1 + $0x9c4] ss:$16 sps:$4 sm:$0xff]  }
  0xb8   :  { %1524 = vmatpush2.bf16.msra.mxu1 %v20204_v14  ;;  %1488 = vmatprep.subr.bf16.mxu0 %v20215_v18  ;;  %v20293_v14 = vld [vmem:[%s29853_s1 + $0x7c4] ss:$16 sps:$4 sm:$0xff]   ;;  %v20294_v18 = vld [vmem:[%s29853_s1 + $0x9c0] ss:$16 sps:$4 sm:$0xff]  }
  0xb9   :  { %1525 = vmatprep.subr.bf16.mxu1 %v20212_v17  ;;  %v20291_v17 = vld [vmem:[%s29853_s1 + $0x7c0] ss:$16 sps:$4 sm:$0xff]  }
  0xbb   :  { %1489 = vmatpush2.bf16.msra.mxu0 %v20213_v22  ;;  %v20302_v22 = vld [vmem:[%s29853_s1 + $0x9a4] ss:$16 sps:$4 sm:$0xff]  }
  0xbc   :  { %1526 = vmatpush2.bf16.msra.mxu1 %v20210_v20  ;;  %1490 = vmatprep.subr.bf16.mxu0 %v20221_v24  ;;  %v20299_v20 = vld [vmem:[%s29853_s1 + $0x7a4] ss:$16 sps:$4 sm:$0xff]   ;;  %v20300_v24 = vld [vmem:[%s29853_s1 + $0x9a0] ss:$16 sps:$4 sm:$0xff]  }
  0xbd   :  { %1527 = vmatprep.subr.bf16.mxu1 %v20218_v23  ;;  %v20297_v23 = vld [vmem:[%s29853_s1 + $0x7a0] ss:$16 sps:$4 sm:$0xff]  }
  0xbf   :  { %1491 = vmatpush2.bf16.msra.mxu0 %v20219_v26  ;;  %v251_v26 = vlaneseq }
  0xc0   :  { %1528 = vmatpush2.bf16.msra.mxu1 %v20216_v25  ;;  %1556 = vmatprep.subr.bf16.mxu0 %v20227_v28  ;;  %v20305_v25 = vld [vmem:[%s29853_s1 + $0x784] ss:$16 sps:$4 sm:$0xff]   ;;  %v20303_v28 = vld [vmem:[%s29853_s1 + $0x780] ss:$16 sps:$4 sm:$0xff]  }
  0xc1   :  { %1529 = vmatprep.subr.bf16.mxu1 %v20224_v27  ;;  %v20308_v27 = vld [vmem:[%s29853_s1 + $0x984] ss:$16 sps:$4 sm:$0xff]  }
  0xc2   :  { %1493 = vmatmul.mubr.bf16.vlgmr.msra.gmra.mxu0 %v23201_v9 }
  0xc3   :  { %1557 = vmatpush1.bf16.msra.mxu0 %v20225_v30  ;;  %1574 = vmatprep.mubr.bf16.mxu0 %v22920_v16  ;;  %v20311_v30 = vld [vmem:[%s29853_s1 + $0x764] ss:$16 sps:$4 sm:$0xff]  }
  0xc4   :  { %1530 = vmatpush2.bf16.msra.mxu1 %v20222_v29  ;;  %2764 = vmatprep.subr.bf16.mxu0 %v20233_v32  ;;  %v20306_v29 = vld [vmem:[%s29853_s1 + $0x980] ss:$16 sps:$4 sm:$0xff]   ;;  %v20314_v32 = vld [vmem:[%s29853_s1 + $0x964] ss:$16 sps:$4 sm:$0xff]  }
  0xc5   :  { %1531 = vmatprep.subr.bf16.mxu1 %v20230_v31  ;;  %v23785_v31 = vshrl.u32 %v251_v26, 7  ;;  %v20356_v26 = vld [vmem:[%s29853_s1 + $0x6ac] ss:$16 sps:$4 sm:$0xff]  }
  0xc8   :  { %1532 = vmatpush2.bf16.msra.mxu1 %v20228_v33  ;;  %v20309_v33 = vld [vmem:[%s29853_s1 + $0x760] ss:$16 sps:$4 sm:$0xff]  }
  0xc9   :  { %2805 = vmatprep.subr.bf16.mxu1 %v20236_v34  ;;  %v20312_v34 = vld [vmem:[%s29853_s1 + $0x960] ss:$16 sps:$4 sm:$0xff]  }
  0xca   :  { %17033 = vmatmul.mubr.msk.bf16.vlgmr.msra.gmra.mxu0 %vm1251_vm0, %v23230_v19 }
  0xcb   :  { %1534 = vmatmul.mubr.bf16.vlgmr.msra.gmra.mxu1 %v23412_v21  ;;  %2765 = vmatpush1.bf16.msra.mxu0 %v20231_v35  ;;  %v20317_v35 = vld [vmem:[%s29853_s1 + $0x744] ss:$16 sps:$4 sm:$0xff]  }
  0xcc   :  { %2806 = vmatpush1.bf16.msra.mxu1 %v20234_v37  ;;  %2766 = vmatprep.subr.bf16.mxu0 %v20239_v38  ;;  %v20320_v37 = vld [vmem:[%s29853_s1 + $0x944] ss:$16 sps:$4 sm:$0xff]   ;;  %v23803_v38 = vsub.s32 0, %v23785_v31 }
  0xcd   :  { %2807 = vmatprep.subr.bf16.mxu1 %v20242_v39  ;;  %2796 = vmatprep.mubr.bf16.mxu0 %v23130_v49  ;;  %v23808_v39 = vld [vmem:[%s29855_s6] sm:$0xf] }
  0xce   :  { %2837 = vmatprep.mubr.bf16.mxu1 %v23138_v52 }
  0xcf   :  { %2767 = vmatpush1.bf16.msra.mxu0 %v20237_v40  ;;  %v23811_v40 = vsub.s32 1, %v23785_v31 }
  0xd0   :  { %2808 = vmatpush1.bf16.msra.mxu1 %v20240_v41  ;;  %2768 = vmatprep.subr.bf16.mxu0 %v20245_v42  ;;  %v20315_v41 = vld [vmem:[%s29853_s1 + $0x740] ss:$16 sps:$4 sm:$0xff]  }
  0xd1   :  { %2809 = vmatprep.subr.bf16.mxu1 %v20248_v43  ;;  %v20318_v42 = vld [vmem:[%s29853_s1 + $0x940] ss:$16 sps:$4 sm:$0xff]   ;;  %v23821_v43 = vrot.slane %v23808_v39, %v23803_v38 }
  0xd3   :  { %2769 = vmatpush1.bf16.msra.mxu0 %v20243_v44  ;;  %v20323_v44 = vld [vmem:[%s29853_s1 + $0x724] ss:$16 sps:$4 sm:$0xff]  }
  0xd4   :  { %2810 = vmatpush1.bf16.msra.mxu1 %v20246_v45  ;;  %2770 = vmatprep.subr.bf16.mxu0 %v20251_v46  ;;  %v20326_v45 = vld [vmem:[%s29853_s1 + $0x924] ss:$16 sps:$4 sm:$0xff]   ;;  %v23831_v46 = vrot.slane %v23808_v39, %v23811_v40 }
  0xd5   :  { %2811 = vmatprep.subr.bf16.mxu1 %v20254_v47  ;;  %v20321_v47 = vld [vmem:[%s29853_s1 + $0x720] ss:$16 sps:$4 sm:$0xff]  }
  0xd7   :  { %2771 = vmatpush1.bf16.msra.mxu0 %v20249_v48  ;;  %v20324_v48 = vld [vmem:[%s29853_s1 + $0x920] ss:$16 sps:$4 sm:$0xff]  }
  0xd8   :  { %2812 = vmatpush1.bf16.msra.mxu1 %v20252_v50  ;;  %2772 = vmatprep.subr.bf16.mxu0 %v20257_v51 }
  0xd9   :  { %2813 = vmatprep.subr.bf16.mxu1 %v20260_v53  ;;  %v20329_v53 = vld [vmem:[%s29853_s1 + $0xb04] ss:$16 sps:$4 sm:$0xff]  }
  0xdb   :  { %2773 = vmatpush1.bf16.msra.mxu0 %v20255_v54 }
  0xdc   :  { %2814 = vmatpush1.bf16.msra.mxu1 %v20258_v55  ;;  %2774 = vmatprep.subr.bf16.mxu0 %v20263_v56 }
  0xdd   :  { %2815 = vmatprep.subr.bf16.mxu1 %v20266_v57  ;;  %v20332_v57 = vld [vmem:[%s29853_s1 + $0xc24] ss:$16 sps:$4 sm:$0xff]  }
  0xdf   :  { %2775 = vmatpush1.bf16.msra.mxu0 %v20261_v58 }
  0xe0   :  { %2816 = vmatpush1.bf16.msra.mxu1 %v20264_v59  ;;  %2776 = vmatprep.subr.bf16.mxu0 %v20269_v60  ;;  %v20327_v60 = vld [vmem:[%s29853_s1 + $0xb00] ss:$16 sps:$4 sm:$0xff]  }
  0xe1   :  { %2817 = vmatprep.subr.bf16.mxu1 %v20272_v61  ;;  %v20330_v61 = vld [vmem:[%s29853_s1 + $0xc20] ss:$16 sps:$4 sm:$0xff]  }
  0xe3   :  { %2777 = vmatpush1.bf16.msra.mxu0 %v20267_v62 }
  0xe4   :  { %2818 = vmatpush1.bf16.msra.mxu1 %v20270_v63  ;;  %2778 = vmatprep.subr.bf16.mxu0 %v20275_v0 }
  0xe5   :  { %2819 = vmatprep.subr.bf16.mxu1 %v20278_v1 }
  0xe7   :  { %2779 = vmatpush1.bf16.msra.mxu0 %v20273_v2 }
  0xe8   :  { %2820 = vmatpush1.bf16.msra.mxu1 %v20276_v3  ;;  %2780 = vmatprep.subr.bf16.mxu0 %v20281_v4  ;;  %v20335_v3 = vld [vmem:[%s29853_s1 + $0xae4] ss:$16 sps:$4 sm:$0xff]   ;;  %v20338_v4 = vld [vmem:[%s29853_s1 + $0x70c] ss:$16 sps:$4 sm:$0xff]  }
  0xe9   :  { %2821 = vmatprep.subr.bf16.mxu1 %v20284_v5  ;;  %v20333_v5 = vld [vmem:[%s29853_s1 + $0xae0] ss:$16 sps:$4 sm:$0xff]  }
  0xeb   :  { %2781 = vmatpush2.bf16.msra.mxu0 %v20279_v6 }
  0xec   :  { %2822 = vmatpush2.bf16.msra.mxu1 %v20282_v7  ;;  %2782 = vmatprep.subr.bf16.mxu0 %v20287_v10  ;;  %v20341_v10 = vld [vmem:[%s29853_s1 + $0xac4] ss:$16 sps:$4 sm:$0xff]  }
  0xed   :  { %2823 = vmatprep.subr.bf16.mxu1 %v20290_v11  ;;  %v20336_v11 = vld [vmem:[%s29853_s1 + $0x708] ss:$16 sps:$4 sm:$0xff]  }
  0xef   :  { %2783 = vmatpush2.bf16.msra.mxu0 %v20285_v12  ;;  %v20339_v12 = vld [vmem:[%s29853_s1 + $0xac0] ss:$16 sps:$4 sm:$0xff]  }
  0xf0   :  { %2824 = vmatpush2.bf16.msra.mxu1 %v20288_v13  ;;  %2784 = vmatprep.subr.bf16.mxu0 %v20293_v14 }
  0xf1   :  { %2825 = vmatprep.subr.bf16.mxu1 %v20296_v15  ;;  %v20344_v15 = vld [vmem:[%s29853_s1 + $0x6ec] ss:$16 sps:$4 sm:$0xff]  }
  0xf3   :  { %2785 = vmatpush2.bf16.msra.mxu0 %v20291_v17  ;;  %v20347_v17 = vld [vmem:[%s29853_s1 + $0xaa4] ss:$16 sps:$4 sm:$0xff]  }
  0xf4   :  { %2826 = vmatpush2.bf16.msra.mxu1 %v20294_v18  ;;  %2786 = vmatprep.subr.bf16.mxu0 %v20299_v20  ;;  %v20342_v18 = vld [vmem:[%s29853_s1 + $0x6e8] ss:$16 sps:$4 sm:$0xff]   ;;  %v20345_v20 = vld [vmem:[%s29853_s1 + $0xaa0] ss:$16 sps:$4 sm:$0xff]  }
  0xf5   :  { %2827 = vmatprep.subr.bf16.mxu1 %v20302_v22  ;;  %v20350_v22 = vld [vmem:[%s29853_s1 + $0x6cc] ss:$16 sps:$4 sm:$0xff]  }
  0xf7   :  { %2787 = vmatpush2.bf16.msra.mxu0 %v20297_v23  ;;  %v20353_v23 = vld [vmem:[%s29853_s1 + $0xa84] ss:$16 sps:$4 sm:$0xff]  }
  0xf8   :  { %2828 = vmatpush2.bf16.msra.mxu1 %v20300_v24  ;;  %2788 = vmatprep.subr.bf16.mxu0 %v20305_v25  ;;  %v20348_v24 = vld [vmem:[%s29853_s1 + $0x6c8] ss:$16 sps:$4 sm:$0xff]   ;;  %v20351_v25 = vld [vmem:[%s29853_s1 + $0xa80] ss:$16 sps:$4 sm:$0xff]  }
  0xf9   :  { %2829 = vmatprep.subr.bf16.mxu1 %v20308_v27  ;;  %v20359_v27 = vld [vmem:[%s29853_s1 + $0xa64] ss:$16 sps:$4 sm:$0xff]  }
  0xfb   :  { %2789 = vmatpush2.bf16.msra.mxu0 %v20303_v28  ;;  %v20354_v28 = vld [vmem:[%s29853_s1 + $0x6a8] ss:$16 sps:$4 sm:$0xff]  }
  0xfc   :  { %2830 = vmatpush2.bf16.msra.mxu1 %v20306_v29  ;;  %2790 = vmatprep.subr.bf16.mxu0 %v20311_v30  ;;  %v20357_v29 = vld [vmem:[%s29853_s1 + $0xa60] ss:$16 sps:$4 sm:$0xff]   ;;  %v20362_v30 = vld [vmem:[%s29853_s1 + $0x68c] ss:$16 sps:$4 sm:$0xff]  }
  0xfd   :  { %2831 = vmatprep.subr.bf16.mxu1 %v20314_v32  ;;  %v20365_v32 = vld [vmem:[%s29853_s1 + $0xa44] ss:$16 sps:$4 sm:$0xff]  }
  0xff   :  { %2791 = vmatpush2.bf16.msra.mxu0 %v20309_v33  ;;  %v20360_v33 = vld [vmem:[%s29853_s1 + $0x688] ss:$16 sps:$4 sm:$0xff]  }
 0x100   :  { %2832 = vmatpush2.bf16.msra.mxu1 %v20312_v34  ;;  %2792 = vmatprep.subr.bf16.mxu0 %v20317_v35  ;;  %v20363_v34 = vld [vmem:[%s29853_s1 + $0xa40] ss:$16 sps:$4 sm:$0xff]   ;;  %v20368_v35 = vld [vmem:[%s29853_s1 + $0x66c] ss:$16 sps:$4 sm:$0xff]  }
 0x101   :  { %2833 = vmatprep.subr.bf16.mxu1 %v20320_v37  ;;  %v20371_v37 = vld [vmem:[%s29853_s1 + $0xa24] ss:$16 sps:$4 sm:$0xff]  }
 0x102   :  { %v1289_v50 = vpop.f32.mrf.mxu0 }
 0x103   :  { %v1330_v51 = vpop.f32.mrf.mxu1  ;;  %v1290_v54 = vadd.f32 %v1289_v50, %v23821_v43  ;;  %2793 = vmatpush2.bf16.msra.mxu0 %v20315_v41  ;;  %v20366_v41 = vld [vmem:[%s29853_s1 + $0x668] ss:$16 sps:$4 sm:$0xff]   ;;  %v20380_v50 = vld [vmem:[%s29853_s1 + $0x62c] ss:$16 sps:$4 sm:$0xff]  }
 0x104   :  { %2834 = vmatpush2.bf16.msra.mxu1 %v20318_v42  ;;  %v1291_v55 = vpop.f32.mrf.mxu0  ;;  %2794 = vmatprep.subr.bf16.mxu0 %v20323_v44  ;;  %v20369_v42 = vld [vmem:[%s29853_s1 + $0xa20] ss:$16 sps:$4 sm:$0xff]   ;;  %v20374_v44 = vld [vmem:[%s29853_s1 + $0x64c] ss:$16 sps:$4 sm:$0xff]  }
 0x105   :  { %v1332_v56 = vpop.f32.mrf.mxu1  ;;  %2835 = vmatprep.subr.bf16.mxu1 %v20326_v45  ;;  %v23846_v58 = vadd.f32 %v1330_v51, %v1290_v54  ;;  %v1292_v59 = vadd.f32 %v1291_v55, %v23831_v46  ;;  %v20377_v45 = vld [vmem:[%s29853_s1 + $0xc04] ss:$16 sps:$4 sm:$0xff]   ;;  %v20381_v54 = vld [vmem:[%s29853_s1 + $0xbe0] ss:$16 sps:$4 sm:$0xff]   ;;  %v20386_v55 = vld [vmem:[%s29853_s1 + $0x80c] ss:$16 sps:$4 sm:$0xff]  }
 0x106   :  { %v1293_v62 = vpop.f32.mrf.mxu0  ;;  %v20383_v51 = vld [vmem:[%s29853_s1 + $0xbe4] ss:$16 sps:$4 sm:$0xff]  }
 0x107   :  { %v1334_v63 = vpop.f32.mrf.mxu1  ;;  %v23855_v0 = vadd.f32 %v1332_v56, %v1292_v59  ;;  %2795 = vmatpush2.bf16.msra.mxu0 %v20321_v47  ;;  %v20372_v47 = vld [vmem:[%s29853_s1 + $0x648] ss:$16 sps:$4 sm:$0xff]   ;;  %v20389_v56 = vld [vmem:[%s29853_s1 + $0xbc4] ss:$16 sps:$4 sm:$0xff]   ;;  %v20387_v59 = vld [vmem:[%s29853_s1 + $0xbc0] ss:$16 sps:$4 sm:$0xff]  }
 0x108   :  { %2836 = vmatpush2.bf16.msra.mxu1 %v20324_v48  ;;  %v1294_v1 = vpop.f32.mrf.mxu0  ;;  %2846 = vmatprep.subr.bf16.mxu0 %v20329_v53  ;;  %v20375_v48 = vld [vmem:[%s29853_s1 + $0xc00] ss:$16 sps:$4 sm:$0xff]   ;;  %v20378_v53 = vld [vmem:[%s29853_s1 + $0x628] ss:$16 sps:$4 sm:$0xff]  }
 0x109   :  { %v1335_v2 = vpop.f32.mrf.mxu1  ;;  %2901 = vmatprep.subr.bf16.mxu1 %v20332_v57  ;;  %v20384_v57 = vld [vmem:[%s29853_s1 + $0x808] ss:$16 sps:$4 sm:$0xff]   ;;  %v20393_v63 = vld [vmem:[%s29853_s1 + $0xba0] ss:$16 sps:$4 sm:$0xff]   ;;  %v20398_v1 = vld [vmem:[%s29853_s1 + $0x7cc] ss:$16 sps:$4 sm:$0xff]  }
 0x10a   :  { %2797 = vmatmul.mubr.bf16.vlgmr.msra.gmra.mxu0 %v23199_v8  ;;  %v20390_v62 = vld [vmem:[%s29853_s1 + $0x7e8] ss:$16 sps:$4 sm:$0xff]   ;;  %v20401_v2 = vld [vmem:[%s29853_s1 + $0xb84] ss:$16 sps:$4 sm:$0xff]  }
 0x10b   :  { %2838 = vmatmul.mubr.bf16.vlgmr.msra.gmra.mxu1 %v23201_v9  ;;  %v23868_v6 = vpop.f32.mrf.mxu1  ;;  %2847 = vmatpush1.bf16.msra.mxu0 %v20327_v60  ;;  %v20392_v60 = vld [vmem:[%s29853_s1 + $0x7ec] ss:$16 sps:$4 sm:$0xff]  }
 0x10c   :  { %2902 = vmatpush1.bf16.msra.mxu1 %v20330_v61  ;;  %2848 = vmatprep.subr.bf16.mxu0 %v20335_v3  ;;  %v20395_v61 = vld [vmem:[%s29853_s1 + $0xba4] ss:$16 sps:$4 sm:$0xff]   ;;  %v20396_v3 = vld [vmem:[%s29853_s1 + $0x7c8] ss:$16 sps:$4 sm:$0xff]  }
 0x10d   :  { %v23870_v7 = vpop.f32.mrf.mxu1  ;;  %2919 = vmatprep.mubr.bf16.mxu1 %v22920_v16  ;;  %2928 = vmatprep.subr.bf16.mxu1 %v20338_v4  ;;  %v20399_v4 = vld [vmem:[%s29853_s1 + $0xb80] ss:$16 sps:$4 sm:$0xff]  }
 0x10e   :  { %2878 = vmatprep.mubr.bf16.mxu0 %v23283_v36 }
 0x10f   :  { %v1416_v13 = vpop.f32.mrf.mxu1  ;;  %2849 = vmatpush1.bf16.msra.mxu0 %v20333_v5  ;;  %v20404_v5 = vld [vmem:[%s29853_s1 + $0x7ac] ss:$16 sps:$4 sm:$0xff]  }
 0x110   :  { %2850 = vmatprep.subr.bf16.mxu0 %v20341_v10  ;;  %v20407_v10 = vld [vmem:[%s29853_s1 + $0xb64] ss:$16 sps:$4 sm:$0xff]   ;;  %v20410_v13 = vld [vmem:[%s29853_s1 + $0x78c] ss:$16 sps:$4 sm:$0xff]  }
 0x111   :  { %v1417_v14 = vpop.f32.mrf.mxu1 }
 0x112   :  { %v20413_v14 = vld [vmem:[%s29853_s1 + $0xb44] ss:$16 sps:$4 sm:$0xff]  }
 0x113   :  { %17426 = vmatmul.mubr.msk.bf16.vlgmr.msra.gmra.mxu1 %vm1251_vm0, %v23230_v19  ;;  %2851 = vmatpush1.bf16.msra.mxu0 %v20339_v12  ;;  %v20405_v12 = vld [vmem:[%s29853_s1 + $0xb60] ss:$16 sps:$4 sm:$0xff]  }
 0x114   :  { %2929 = vmatpush1.bf16.msra.mxu1 %v20336_v11  ;;  %2852 = vmatprep.subr.bf16.mxu0 %v20347_v17  ;;  %v20402_v11 = vld [vmem:[%s29853_s1 + $0x7a8] ss:$16 sps:$4 sm:$0xff]   ;;  %v20411_v17 = vld [vmem:[%s29853_s1 + $0xb40] ss:$16 sps:$4 sm:$0xff]  }
 0x115   :  { %2930 = vmatprep.subr.bf16.mxu1 %v20344_v15  ;;  %2960 = vmatprep.mubr.bf16.mxu1 %v23130_v49  ;;  %v20408_v15 = vld [vmem:[%s29853_s1 + $0x788] ss:$16 sps:$4 sm:$0xff]  }
 0x117   :  { %2853 = vmatpush1.bf16.msra.mxu0 %v20345_v20  ;;  %v20419_v20 = vld [vmem:[%s29853_s1 + $0xb24] ss:$16 sps:$4 sm:$0xff]  }
 0x118   :  { %2931 = vmatpush1.bf16.msra.mxu1 %v20342_v18  ;;  %2854 = vmatprep.subr.bf16.mxu0 %v20353_v23  ;;  %v20416_v18 = vld [vmem:[%s29853_s1 + $0x76c] ss:$16 sps:$4 sm:$0xff]  }
 0x119   :  { %2932 = vmatprep.subr.bf16.mxu1 %v20350_v22 }
 0x11b   :  { %2855 = vmatpush1.bf16.msra.mxu0 %v20351_v25  ;;  %v20417_v25 = vld [vmem:[%s29853_s1 + $0xb20] ss:$16 sps:$4 sm:$0xff]  }
 0x11c   :  { %2933 = vmatpush1.bf16.msra.mxu1 %v20348_v24  ;;  %2856 = vmatprep.subr.bf16.mxu0 %v20359_v27  ;;  %v20414_v24 = vld [vmem:[%s29853_s1 + $0x768] ss:$16 sps:$4 sm:$0xff]  }
 0x11d   :  { %2934 = vmatprep.subr.bf16.mxu1 %v20356_v26  ;;  %v24044_v26 = vsub.s32 2, %v23785_v31 }
 0x11f   :  { %2857 = vmatpush1.bf16.msra.mxu0 %v20357_v29 }
 0x120   :  { %2935 = vmatpush1.bf16.msra.mxu1 %v20354_v28  ;;  %2858 = vmatprep.subr.bf16.mxu0 %v20365_v32  ;;  %v20422_v28 = vld [vmem:[%s29853_s1 + $0x74c] ss:$16 sps:$4 sm:$0xff]   ;;  %v24057_v32 = vsub.s32 3, %v23785_v31 }
 0x121   :  { %2936 = vmatprep.subr.bf16.mxu1 %v20362_v30 }
 0x123   :  { %2859 = vmatpush1.bf16.msra.mxu0 %v20363_v34 }
 0x124   :  { %2937 = vmatpush1.bf16.msra.mxu1 %v20360_v33  ;;  %2860 = vmatprep.subr.bf16.mxu0 %v20371_v37  ;;  %v24067_v37 = vrot.slane %v23808_v39, %v24044_v26 }
 0x125   :  { %2938 = vmatprep.subr.bf16.mxu1 %v20368_v35  ;;  %v20420_v35 = vld [vmem:[%s29853_s1 + $0x748] ss:$16 sps:$4 sm:$0xff]  }
 0x127   :  { %2861 = vmatpush1.bf16.msra.mxu0 %v20369_v42  ;;  %v24080_v42 = vrot.slane %v23808_v39, %v24057_v32  ;;  %v20434_v39 = vld [vmem:[%s29853_s1 + $0xb0c] ss:$16 sps:$4 sm:$0xff]  }
 0x128   :  { %2939 = vmatpush1.bf16.msra.mxu1 %v20366_v41  ;;  %2862 = vmatprep.subr.bf16.mxu0 %v20377_v45  ;;  %v20431_v41 = vld [vmem:[%s29853_s1 + $0x8ec] ss:$16 sps:$4 sm:$0xff]   ;;  %v20429_v45 = vld [vmem:[%s29853_s1 + $0x8e8] ss:$16 sps:$4 sm:$0xff]  }
 0x129   :  { %2940 = vmatprep.subr.bf16.mxu1 %v20374_v44  ;;  %v20426_v44 = vld [vmem:[%s29853_s1 + $0x728] ss:$16 sps:$4 sm:$0xff]  }
 0x12b   :  { %2863 = vmatpush2.bf16.msra.mxu0 %v20375_v48 }
 0x12c   :  { %2941 = vmatpush1.bf16.msra.mxu1 %v20372_v47  ;;  %2864 = vmatprep.subr.bf16.mxu0 %v20383_v51  ;;  %v20437_v51 = vld [vmem:[%s29853_s1 + $0x8cc] ss:$16 sps:$4 sm:$0xff]  }
 0x12d   :  { %2942 = vmatprep.subr.bf16.mxu1 %v20380_v50 }
 0x12f   :  { %2865 = vmatpush2.bf16.msra.mxu0 %v20381_v54  ;;  %v20432_v54 = vld [vmem:[%s29853_s1 + $0xb08] ss:$16 sps:$4 sm:$0xff]  }
 0x130   :  { %2943 = vmatpush1.bf16.msra.mxu1 %v20378_v53  ;;  %2866 = vmatprep.subr.bf16.mxu0 %v20389_v56 }
 0x131   :  { %2944 = vmatprep.subr.bf16.mxu1 %v20386_v55  ;;  %v20435_v55 = vld [vmem:[%s29853_s1 + $0x8c8] ss:$16 sps:$4 sm:$0xff]  }
 0x133   :  { %2867 = vmatpush2.bf16.msra.mxu0 %v20387_v59 }
 0x134   :  { %2945 = vmatpush2.bf16.msra.mxu1 %v20384_v57  ;;  %2868 = vmatprep.subr.bf16.mxu0 %v20395_v61  ;;  %v20440_v57 = vld [vmem:[%s29853_s1 + $0xaec] ss:$16 sps:$4 sm:$0xff]   ;;  %v20438_v61 = vld [vmem:[%s29853_s1 + $0xae8] ss:$16 sps:$4 sm:$0xff]  }
 0x135   :  { %2946 = vmatprep.subr.bf16.mxu1 %v20392_v60  ;;  %v20443_v60 = vld [vmem:[%s29853_s1 + $0x8ac] ss:$16 sps:$4 sm:$0xff]  }
 0x137   :  { %2869 = vmatpush2.bf16.msra.mxu0 %v20393_v63  ;;  %v20446_v63 = vld [vmem:[%s29853_s1 + $0xacc] ss:$16 sps:$4 sm:$0xff]  }
 0x138   :  { %2947 = vmatpush2.bf16.msra.mxu1 %v20390_v62  ;;  %2870 = vmatprep.subr.bf16.mxu0 %v20401_v2  ;;  %v20441_v62 = vld [vmem:[%s29853_s1 + $0x8a8] ss:$16 sps:$4 sm:$0xff]  }
 0x139   :  { %2948 = vmatprep.subr.bf16.mxu1 %v20398_v1  ;;  %v20449_v1 = vld [vmem:[%s29853_s1 + $0x88c] ss:$16 sps:$4 sm:$0xff]   ;;  %v20444_v2 = vld [vmem:[%s29853_s1 + $0xac8] ss:$16 sps:$4 sm:$0xff]  }
 0x13b   :  { %2871 = vmatpush2.bf16.msra.mxu0 %v20399_v4  ;;  %v20452_v4 = vld [vmem:[%s29853_s1 + $0xaac] ss:$16 sps:$4 sm:$0xff]  }
 0x13c   :  { %2949 = vmatpush2.bf16.msra.mxu1 %v20396_v3  ;;  %2872 = vmatprep.subr.bf16.mxu0 %v20407_v10  ;;  %v20447_v3 = vld [vmem:[%s29853_s1 + $0x888] ss:$16 sps:$4 sm:$0xff]  }
 0x13d   :  { %2950 = vmatprep.subr.bf16.mxu1 %v20404_v5  ;;  %v20455_v5 = vld [vmem:[%s29853_s1 + $0x86c] ss:$16 sps:$4 sm:$0xff]   ;;  %v20450_v10 = vld [vmem:[%s29853_s1 + $0xaa8] ss:$16 sps:$4 sm:$0xff]  }
 0x13f   :  { %2873 = vmatpush2.bf16.msra.mxu0 %v20405_v12  ;;  %v20458_v12 = vld [vmem:[%s29853_s1 + $0xa8c] ss:$16 sps:$4 sm:$0xff]  }
 0x140   :  { %2951 = vmatpush2.bf16.msra.mxu1 %v20402_v11  ;;  %2874 = vmatprep.subr.bf16.mxu0 %v20413_v14  ;;  %v20453_v11 = vld [vmem:[%s29853_s1 + $0x868] ss:$16 sps:$4 sm:$0xff]  }
 0x141   :  { %2952 = vmatprep.subr.bf16.mxu1 %v20410_v13  ;;  %v20461_v13 = vld [vmem:[%s29853_s1 + $0x84c] ss:$16 sps:$4 sm:$0xff]   ;;  %v20456_v14 = vld [vmem:[%s29853_s1 + $0xa88] ss:$16 sps:$4 sm:$0xff]  }
 0x142   :  { %v1371_v22 = vpop.f32.mrf.mxu0 }
 0x143   :  { %v1372_v23 = vadd.f32 %v1371_v22, %v23846_v58  ;;  %2875 = vmatpush2.bf16.msra.mxu0 %v20411_v17  ;;  %v20425_v58 = vld [vmem:[%s29853_s1 + $0x90c] ss:$16 sps:$4 sm:$0xff]   ;;  %v20465_v22 = vld [vmem:[%s29853_s1 + $0x828] ss:$16 sps:$4 sm:$0xff]  }
 0x144   :  { %2953 = vmatpush2.bf16.msra.mxu1 %v20408_v15  ;;  %v1373_v27 = vpop.f32.mrf.mxu0  ;;  %2876 = vmatprep.subr.bf16.mxu0 %v20419_v20  ;;  %v20459_v15 = vld [vmem:[%s29853_s1 + $0x848] ss:$16 sps:$4 sm:$0xff]   ;;  %v20464_v17 = vld [vmem:[%s29853_s1 + $0xa6c] ss:$16 sps:$4 sm:$0xff]  }
 0x145   :  { %2954 = vmatprep.subr.bf16.mxu1 %v20416_v18  ;;  %v24053_v29 = vadd.f32 %v23868_v6, %v1372_v23  ;;  %v1374_v30 = vadd.f32 %v1373_v27, %v23855_v0  ;;  %v20423_v0 = vld [vmem:[%s29853_s1 + $0x908] ss:$16 sps:$4 sm:$0xff]   ;;  %v20467_v18 = vld [vmem:[%s29853_s1 + $0x82c] ss:$16 sps:$4 sm:$0xff]  }
 0x146   :  { %v1375_v33 = vpop.f32.mrf.mxu0  ;;  %v20462_v20 = vld [vmem:[%s29853_s1 + $0xa68] ss:$16 sps:$4 sm:$0xff]   ;;  %v20470_v23 = vld [vmem:[%s29853_s1 + $0xa4c] ss:$16 sps:$4 sm:$0xff]  }
 0x147   :  { %v24060_v34 = vadd.f32 %v23870_v7, %v1374_v30  ;;  %2877 = vmatpush2.bf16.msra.mxu0 %v20417_v25  ;;  %v20428_v7 = vld [vmem:[%s29853_s1 + $0x72c] ss:$16 sps:$4 sm:$0xff]   ;;  %v20468_v25 = vld [vmem:[%s29853_s1 + $0xa48] ss:$16 sps:$4 sm:$0xff]  }
 0x148   :  { %2955 = vmatpush2.bf16.msra.mxu1 %v20414_v24  ;;  %v1376_v6 = vpop.f32.mrf.mxu0  ;;  %2969 = vmatprep.subr.bf16.mxu0 %v20425_v58  ;;  %v20473_v24 = vld [vmem:[%s29853_s1 + $0xa0c] ss:$16 sps:$4 sm:$0xff]   ;;  %v20471_v27 = vld [vmem:[%s29853_s1 + $0xa08] ss:$16 sps:$4 sm:$0xff]  }
 0x149   :  { %2956 = vmatprep.subr.bf16.mxu1 %v20422_v28  ;;  %v20476_v28 = vld [vmem:[%s29853_s1 + $0xa2c] ss:$16 sps:$4 sm:$0xff]   ;;  %v20474_v30 = vld [vmem:[%s29853_s1 + $0xa28] ss:$16 sps:$4 sm:$0xff]  }
 0x14a   :  { %2879 = vmatmul.mubr.bf16.vlgmr.msra.gmra.mxu0 %v23412_v21  ;;  %v20479_v58 = vld [vmem:[%s29853_s1 + $0x9ec] ss:$16 sps:$4 sm:$0xff]   ;;  %v20477_v33 = vld [vmem:[%s29853_s1 + $0x9e8] ss:$16 sps:$4 sm:$0xff]  }
 0x14b   :  { %v1453_v47 = vpop.f32.mrf.mxu1  ;;  %2970 = vmatpush1.bf16.msra.mxu0 %v20423_v0  ;;  %3001 = vmatprep.mubr.bf16.mxu0 %v23138_v52  ;;  %v20485_v0 = vld [vmem:[%s29853_s1 + $0x9cc] ss:$16 sps:$4 sm:$0xff]   ;;  %v20480_v6 = vld [vmem:[%s29853_s1 + $0xc08] ss:$16 sps:$4 sm:$0xff]  }
 0x14c   :  { %v24090_v48 = vadd.f32 %v1453_v47, %v24067_v37  ;;  %2957 = vmatpush2.bf16.msra.mxu1 %v20420_v35  ;;  %2971 = vmatprep.subr.bf16.mxu0 %v20431_v41  ;;  %v20482_v35 = vld [vmem:[%s29853_s1 + $0xc0c] ss:$16 sps:$4 sm:$0xff]   ;;  %v20489_v47 = vld [vmem:[%s29853_s1 + $0x9a8] ss:$16 sps:$4 sm:$0xff]  }
 0x14d   :  { %v1455_v50 = vpop.f32.mrf.mxu1  ;;  %2958 = vmatprep.subr.bf16.mxu1 %v20428_v7  ;;  %v20483_v7 = vld [vmem:[%s29853_s1 + $0x9c8] ss:$16 sps:$4 sm:$0xff]   ;;  %v20488_v41 = vld [vmem:[%s29853_s1 + $0xbec] ss:$16 sps:$4 sm:$0xff]  }
 0x14e   :  { %v24099_v53 = vadd.f32 %v1455_v50, %v24080_v42  ;;  %v20494_v50 = vld [vmem:[%s29853_s1 + $0xbcc] ss:$16 sps:$4 sm:$0xff]  }
 0x14f   :  { %v1457_v56 = vpop.f32.mrf.mxu1  ;;  %2972 = vmatpush1.bf16.msra.mxu0 %v20429_v45  ;;  %v20486_v45 = vld [vmem:[%s29853_s1 + $0xbe8] ss:$16 sps:$4 sm:$0xff]  }
 0x150   :  { %2959 = vmatpush2.bf16.msra.mxu1 %v20426_v44  ;;  %2973 = vmatprep.subr.bf16.mxu0 %v20437_v51  ;;  %v20491_v44 = vld [vmem:[%s29853_s1 + $0x9ac] ss:$16 sps:$4 sm:$0xff]   ;;  %v20492_v51 = vld [vmem:[%s29853_s1 + $0xbc8] ss:$16 sps:$4 sm:$0xff]  }
 0x151   :  { %v1458_v59 = vpop.f32.mrf.mxu1  ;;  %3010 = vmatprep.subr.bf16.mxu1 %v20434_v39  ;;  %v20497_v39 = vld [vmem:[%s29853_s1 + $0x98c] ss:$16 sps:$4 sm:$0xff]  }
 0x152   :  { %v20503_v56 = vld [vmem:[%s29853_s1 + $0x96c] ss:$16 sps:$4 sm:$0xff]   ;;  %v20501_v59 = vld [vmem:[%s29853_s1 + $0x968] ss:$16 sps:$4 sm:$0xff]  }
 0x153   :  { %2961 = vmatmul.mubr.bf16.vlgmr.msra.gmra.mxu1 %v23199_v8  ;;  %2974 = vmatpush1.bf16.msra.mxu0 %v20435_v55  ;;  %v20500_v55 = vld [vmem:[%s29853_s1 + $0xbac] ss:$16 sps:$4 sm:$0xff]  }
 0x154   :  { %3011 = vmatpush1.bf16.msra.mxu1 %v20432_v54  ;;  %2975 = vmatprep.subr.bf16.mxu0 %v20443_v60  ;;  %v20495_v54 = vld [vmem:[%s29853_s1 + $0x988] ss:$16 sps:$4 sm:$0xff]   ;;  %v20506_v60 = vld [vmem:[%s29853_s1 + $0xb8c] ss:$16 sps:$4 sm:$0xff]  }
 0x155   :  { %3012 = vmatprep.subr.bf16.mxu1 %v20440_v57  ;;  %3042 = vmatprep.mubr.bf16.mxu1 %v23283_v36  ;;  %v20498_v57 = vld [vmem:[%s29853_s1 + $0xba8] ss:$16 sps:$4 sm:$0xff]  }
 0x157   :  { %2976 = vmatpush1.bf16.msra.mxu0 %v20441_v62  ;;  %v20504_v62 = vld [vmem:[%s29853_s1 + $0xb88] ss:$16 sps:$4 sm:$0xff]  }
 0x158   :  { %3013 = vmatpush1.bf16.msra.mxu1 %v20438_v61  ;;  %2977 = vmatprep.subr.bf16.mxu0 %v20449_v1  ;;  %v20509_v61 = vld [vmem:[%s29853_s1 + $0x94c] ss:$16 sps:$4 sm:$0xff]  }
 0x159   :  { %3014 = vmatprep.subr.bf16.mxu1 %v20446_v63  ;;  %v20507_v63 = vld [vmem:[%s29853_s1 + $0x948] ss:$16 sps:$4 sm:$0xff]   ;;  %v20512_v1 = vld [vmem:[%s29853_s1 + $0xb6c] ss:$16 sps:$4 sm:$0xff]  }
 0x15b   :  { %2978 = vmatpush1.bf16.msra.mxu0 %v20447_v3 }
 0x15c   :  { %3015 = vmatpush1.bf16.msra.mxu1 %v20444_v2  ;;  %2979 = vmatprep.subr.bf16.mxu0 %v20455_v5  ;;  %v20515_v2 = vld [vmem:[%s29853_s1 + $0x92c] ss:$16 sps:$4 sm:$0xff]   ;;  %v20510_v5 = vld [vmem:[%s29853_s1 + $0xb68] ss:$16 sps:$4 sm:$0xff]  }
 0x15d   :  { %3016 = vmatprep.subr.bf16.mxu1 %v20452_v4 }
 0x15f   :  { %2980 = vmatpush1.bf16.msra.mxu0 %v20453_v11 }
 0x160   :  { %3017 = vmatpush1.bf16.msra.mxu1 %v20450_v10  ;;  %2981 = vmatprep.subr.bf16.mxu0 %v20461_v13  ;;  %v20513_v10 = vld [vmem:[%s29853_s1 + $0x928] ss:$16 sps:$4 sm:$0xff]  }
 0x161   :  { %3018 = vmatprep.subr.bf16.mxu1 %v20458_v12  ;;  %v20518_v12 = vld [vmem:[%s29853_s1 + $0xb4c] ss:$16 sps:$4 sm:$0xff]  }
 0x163   :  { %2982 = vmatpush1.bf16.msra.mxu0 %v20459_v15  ;;  %v20516_v15 = vld [vmem:[%s29853_s1 + $0xb48] ss:$16 sps:$4 sm:$0xff]  }
 0x164   :  { %3019 = vmatpush1.bf16.msra.mxu1 %v20456_v14  ;;  %2983 = vmatprep.subr.bf16.mxu0 %v20467_v18 }
 0x165   :  { %3020 = vmatprep.subr.bf16.mxu1 %v20464_v17  ;;  %v20519_v17 = vld [vmem:[%s29853_s1 + $0xc28] ss:$16 sps:$4 sm:$0xff]  }
 0x167   :  { %2984 = vmatpush1.bf16.msra.mxu0 %v20465_v22  ;;  %v20522_v22 = vld [vmem:[%s29853_s1 + $0xb28] ss:$16 sps:$4 sm:$0xff]  }
 0x168   :  { %3021 = vmatpush1.bf16.msra.mxu1 %v20462_v20  ;;  %2985 = vmatprep.subr.bf16.mxu0 %v20473_v24  ;;  %v20524_v20 = vld [vmem:[%s29853_s1 + $0xb2c] ss:$16 sps:$4 sm:$0xff]  }
 0x169   :  { %3022 = vmatprep.subr.bf16.mxu1 %v20470_v23 }
 0x16b   :  { %2986 = vmatpush2.bf16.msra.mxu0 %v20471_v27 }
 0x16c   :  { %3023 = vmatpush1.bf16.msra.mxu1 %v20468_v25  ;;  %2987 = vmatprep.subr.bf16.mxu0 %v20479_v58  ;;  %v20530_v58 = vld [vmem:[%s29853_s1 + $0xf24] ss:$16 sps:$4 sm:$0xff]  }
 0x16d   :  { %3024 = vmatprep.subr.bf16.mxu1 %v20476_v28 }
 0x16f   :  { %2988 = vmatpush2.bf16.msra.mxu0 %v20477_v33 }
 0x170   :  { %3025 = vmatpush1.bf16.msra.mxu1 %v20474_v30  ;;  %2989 = vmatprep.subr.bf16.mxu0 %v20485_v0  ;;  %v20528_v0 = vld [vmem:[%s29853_s1 + $0xf20] ss:$16 sps:$4 sm:$0xff]  }
 0x171   :  { %3026 = vmatprep.subr.bf16.mxu1 %v20482_v35  ;;  %v20525_v35 = vld [vmem:[%s29853_s1 + $0xd20] ss:$16 sps:$4 sm:$0xff]  }
 0x173   :  { %2990 = vmatpush2.bf16.msra.mxu0 %v20483_v7 }
 0x174   :  { %3027 = vmatpush2.bf16.msra.mxu1 %v20480_v6  ;;  %2991 = vmatprep.subr.bf16.mxu0 %v20491_v44 }
 0x175   :  { %3028 = vmatprep.subr.bf16.mxu1 %v20488_v41  ;;  %v20533_v41 = vld [vmem:[%s29853_s1 + $0xd04] ss:$16 sps:$4 sm:$0xff]  }
 0x177   :  { %2992 = vmatpush2.bf16.msra.mxu0 %v20489_v47 }
 0x178   :  { %3029 = vmatpush2.bf16.msra.mxu1 %v20486_v45  ;;  %2993 = vmatprep.subr.bf16.mxu0 %v20497_v39  ;;  %v20531_v39 = vld [vmem:[%s29853_s1 + $0xd00] ss:$16 sps:$4 sm:$0xff]  }
 0x179   :  { %3030 = vmatprep.subr.bf16.mxu1 %v20494_v50  ;;  %v20536_v50 = vld [vmem:[%s29853_s1 + $0xf04] ss:$16 sps:$4 sm:$0xff]  }
 0x17b   :  { %2994 = vmatpush2.bf16.msra.mxu0 %v20495_v54  ;;  %v20539_v54 = vld [vmem:[%s29853_s1 + $0xce4] ss:$16 sps:$4 sm:$0xff]  }
 0x17c   :  { %3031 = vmatpush2.bf16.msra.mxu1 %v20492_v51  ;;  %2995 = vmatprep.subr.bf16.mxu0 %v20503_v56  ;;  %v20534_v51 = vld [vmem:[%s29853_s1 + $0xf00] ss:$16 sps:$4 sm:$0xff]  }
 0x17d   :  { %3032 = vmatprep.subr.bf16.mxu1 %v20500_v55  ;;  %v20542_v55 = vld [vmem:[%s29853_s1 + $0xee4] ss:$16 sps:$4 sm:$0xff]   ;;  %v20537_v56 = vld [vmem:[%s29853_s1 + $0xce0] ss:$16 sps:$4 sm:$0xff]  }
 0x17f   :  { %2996 = vmatpush2.bf16.msra.mxu0 %v20501_v59  ;;  %v20545_v59 = vld [vmem:[%s29853_s1 + $0xcc4] ss:$16 sps:$4 sm:$0xff]  }
 0x180   :  { %3033 = vmatpush2.bf16.msra.mxu1 %v20498_v57  ;;  %2997 = vmatprep.subr.bf16.mxu0 %v20509_v61  ;;  %v20540_v57 = vld [vmem:[%s29853_s1 + $0xee0] ss:$16 sps:$4 sm:$0xff]  }
 0x181   :  { %3034 = vmatprep.subr.bf16.mxu1 %v20506_v60  ;;  %v20548_v60 = vld [vmem:[%s29853_s1 + $0xec4] ss:$16 sps:$4 sm:$0xff]   ;;  %v20543_v61 = vld [vmem:[%s29853_s1 + $0xcc0] ss:$16 sps:$4 sm:$0xff]  }
 0x182   :  { %v1494_v3 = vpop.f32.mrf.mxu0 }
 0x183   :  { %v1495_v4 = vadd.f32 %v1494_v3, %v24090_v48  ;;  %2998 = vmatpush2.bf16.msra.mxu0 %v20507_v63  ;;  %v20521_v48 = vld [vmem:[%s29853_s1 + $0xc2c] ss:$16 sps:$4 sm:$0xff]   ;;  %v20551_v63 = vld [vmem:[%s29853_s1 + $0xca4] ss:$16 sps:$4 sm:$0xff]   ;;  %v20552_v3 = vld [vmem:[%s29853_s1 + $0xea0] ss:$16 sps:$4 sm:$0xff]  }
 0x184   :  { %3035 = vmatpush2.bf16.msra.mxu1 %v20504_v62  ;;  %v1496_v11 = vpop.f32.mrf.mxu0  ;;  %2999 = vmatprep.subr.bf16.mxu0 %v20515_v2  ;;  %v20546_v62 = vld [vmem:[%s29853_s1 + $0xec0] ss:$16 sps:$4 sm:$0xff]  }
 0x185   :  { %3036 = vmatprep.subr.bf16.mxu1 %v20512_v1  ;;  %v1497_v13 = vadd.f32 %v1496_v11, %v24099_v53  ;;  %v20527_v53 = vld [vmem:[%s29853_s1 + $0xd24] ss:$16 sps:$4 sm:$0xff]   ;;  %v20549_v2 = vld [vmem:[%s29853_s1 + $0xca0] ss:$16 sps:$4 sm:$0xff]  }
 0x186   :  { %v1498_v14 = vpop.f32.mrf.mxu0  ;;  %v20554_v1 = vld [vmem:[%s29853_s1 + $0xea4] ss:$16 sps:$4 sm:$0xff]   ;;  %v20558_v11 = vld [vmem:[%s29853_s1 + $0xe80] ss:$16 sps:$4 sm:$0xff]  }
 0x187   :  { %3000 = vmatpush2.bf16.msra.mxu0 %v20513_v10  ;;  %v20555_v10 = vld [vmem:[%s29853_s1 + $0xc80] ss:$16 sps:$4 sm:$0xff]  }
 0x188   :  { %3037 = vmatpush2.bf16.msra.mxu1 %v20510_v5  ;;  %v1499_v18 = vpop.f32.mrf.mxu0  ;;  %3065 = vmatprep.subr.bf16.mxu0 %v20521_v48  ;;  %v20560_v5 = vld [vmem:[%s29853_s1 + $0xe84] ss:$16 sps:$4 sm:$0xff]   ;;  %v20564_v14 = vld [vmem:[%s29853_s1 + $0xe60] ss:$16 sps:$4 sm:$0xff]  }
 0x189   :  { %3038 = vmatprep.subr.bf16.mxu1 %v20518_v12  ;;  %v20563_v12 = vld [vmem:[%s29853_s1 + $0xc64] ss:$16 sps:$4 sm:$0xff]   ;;  %v20567_v18 = vld [vmem:[%s29853_s1 + $0xc40] ss:$16 sps:$4 sm:$0xff]  }
 0x18a   :  { %3002 = vmatmul.mubr.bf16.vlgmr.msra.gmra.mxu0 %v23201_v9  ;;  %v1576_v24 = vpop.f32.mrf.mxu0  ;;  %v20566_v48 = vld [vmem:[%s29853_s1 + $0xe64] ss:$16 sps:$4 sm:$0xff]  }
 0x18b   :  { %v1535_v23 = vpop.f32.mrf.mxu1  ;;  %3066 = vmatpush1.bf16.msra.mxu0 %v20519_v17  ;;  %3083 = vmatprep.mubr.bf16.mxu0 %v22920_v16  ;;  %v20572_v17 = vld [vmem:[%s29853_s1 + $0xe44] ss:$16 sps:$4 sm:$0xff]  }
 0x18c   :  { %v1536_v25 = vadd.f32 %v1535_v23, %v1495_v4  ;;  %3039 = vmatpush2.bf16.msra.mxu1 %v20516_v15  ;;  %v1578_v28 = vpop.f32.mrf.mxu0  ;;  %4277 = vmatprep.subr.bf16.mxu0 %v20527_v53  ;;  %v20557_v4 = vld [vmem:[%s29853_s1 + $0xc84] ss:$16 sps:$4 sm:$0xff]   ;;  %v20573_v23 = vld [vmem:[%s29853_s1 + $0xe20] ss:$16 sps:$4 sm:$0xff]  }
 0x18d   :  { %v1537_v27 = vpop.f32.mrf.mxu1  ;;  %3040 = vmatprep.subr.bf16.mxu1 %v20524_v20  ;;  %v20569_v15 = vld [vmem:[%s29853_s1 + $0xc44] ss:$16 sps:$4 sm:$0xff]   ;;  %v20570_v20 = vld [vmem:[%s29853_s1 + $0xe40] ss:$16 sps:$4 sm:$0xff]  }
 0x18e   :  { %v24294_v30 = vadd.f32 %v1576_v24, %v1536_v25  ;;  %v1538_v33 = vadd.f32 %v1537_v27, %v1497_v13  ;;  %v1580_v7 = vpop.f32.mrf.mxu0  ;;  %v20561_v13 = vld [vmem:[%s29853_s1 + $0xc60] ss:$16 sps:$4 sm:$0xff]   ;;  %v20575_v53 = vld [vmem:[%s29853_s1 + $0xe24] ss:$16 sps:$4 sm:$0xff]  }
 0x18f   :  { %v1539_v6 = vpop.f32.mrf.mxu1  ;;  %v20576_v24 = vld [vmem:[%s29853_s1 + $0x1020] ss:$16 sps:$4 sm:$0xff]   ;;  %v20581_v25 = vld [vmem:[%s29853_s1 + $0xe04] ss:$16 sps:$4 sm:$0xff]  }
 0x190   :  { %v24305_v44 = vadd.f32 %v1578_v28, %v1538_v33  ;;  %3041 = vmatpush2.bf16.msra.mxu1 %v20522_v22  ;;  %v1581_v47 = vpop.f32.mrf.mxu0  ;;  %v20578_v22 = vld [vmem:[%s29853_s1 + $0x1024] ss:$16 sps:$4 sm:$0xff]   ;;  %v20579_v28 = vld [vmem:[%s29853_s1 + $0xe00] ss:$16 sps:$4 sm:$0xff]  }
 0x191   :  { %v1540_v45 = vpop.f32.mrf.mxu1  ;;  %4318 = vmatprep.subr.bf16.mxu1 %v20530_v58  ;;  %v20584_v27 = vld [vmem:[%s29853_s1 + $0x1004] ss:$16 sps:$4 sm:$0xff]   ;;  %v20582_v58 = vld [vmem:[%s29853_s1 + $0x1000] ss:$16 sps:$4 sm:$0xff]  }
 0x192   :  { %17427 = vmatmul.mubr.msk.bf16.vlgmr.msra.gmra.mxu0 %vm1251_vm0, %v23230_v19  ;;  %v20587_v33 = vld [vmem:[%s29853_s1 + $0xde4] ss:$16 sps:$4 sm:$0xff]   ;;  %v20588_v6 = vld [vmem:[%s29853_s1 + $0xfe0] ss:$16 sps:$4 sm:$0xff]  }
 0x193   :  { %3043 = vmatmul.mubr.bf16.vlgmr.msra.gmra.mxu1 %v23412_v21  ;;  %4278 = vmatpush1.bf16.msra.mxu0 %v20525_v35  ;;  %v20590_v35 = vld [vmem:[%s29853_s1 + $0xfe4] ss:$16 sps:$4 sm:$0xff]   ;;  %v20591_v45 = vld [vmem:[%s29853_s1 + $0xdc0] ss:$16 sps:$4 sm:$0xff]  }
 0x194   :  { %4319 = vmatpush1.bf16.msra.mxu1 %v20528_v0  ;;  %4279 = vmatprep.subr.bf16.mxu0 %v20533_v41  ;;  %v20585_v0 = vld [vmem:[%s29853_s1 + $0xde0] ss:$16 sps:$4 sm:$0xff]   ;;  %v20593_v7 = vld [vmem:[%s29853_s1 + $0xdc4] ss:$16 sps:$4 sm:$0xff]  }
 0x195   :  { %4320 = vmatprep.subr.bf16.mxu1 %v20536_v50  ;;  %4309 = vmatprep.mubr.bf16.mxu0 %v23130_v49  ;;  %v20596_v41 = vld [vmem:[%s29853_s1 + $0xfc4] ss:$16 sps:$4 sm:$0xff]   ;;  %v20594_v47 = vld [vmem:[%s29853_s1 + $0xfc0] ss:$16 sps:$4 sm:$0xff]  }
 0x196   :  { %4350 = vmatprep.mubr.bf16.mxu1 %v23138_v52  ;;  %v20599_v50 = vld [vmem:[%s29853_s1 + $0xda4] ss:$16 sps:$4 sm:$0xff]  }
 0x197   :  { %4280 = vmatpush1.bf16.msra.mxu0 %v20531_v39  ;;  %v20602_v39 = vld [vmem:[%s29853_s1 + $0xfa4] ss:$16 sps:$4 sm:$0xff]  }
 0x198   :  { %4321 = vmatpush1.bf16.msra.mxu1 %v20534_v51  ;;  %4281 = vmatprep.subr.bf16.mxu0 %v20539_v54  ;;  %v20597_v51 = vld [vmem:[%s29853_s1 + $0xda0] ss:$16 sps:$4 sm:$0xff]  }
 0x199   :  { %4322 = vmatprep.subr.bf16.mxu1 %v20542_v55  ;;  %v20600_v54 = vld [vmem:[%s29853_s1 + $0xfa0] ss:$16 sps:$4 sm:$0xff]   ;;  %v20605_v55 = vld [vmem:[%s29853_s1 + $0xd84] ss:$16 sps:$4 sm:$0xff]  }
 0x19b   :  { %4282 = vmatpush1.bf16.msra.mxu0 %v20537_v56  ;;  %v20608_v56 = vld [vmem:[%s29853_s1 + $0xf84] ss:$16 sps:$4 sm:$0xff]  }
 0x19c   :  { %4323 = vmatpush1.bf16.msra.mxu1 %v20540_v57  ;;  %4283 = vmatprep.subr.bf16.mxu0 %v20545_v59  ;;  %v20603_v57 = vld [vmem:[%s29853_s1 + $0xd80] ss:$16 sps:$4 sm:$0xff]  }
 0x19d   :  { %4324 = vmatprep.subr.bf16.mxu1 %v20548_v60  ;;  %v20606_v59 = vld [vmem:[%s29853_s1 + $0xf80] ss:$16 sps:$4 sm:$0xff]   ;;  %v20611_v60 = vld [vmem:[%s29853_s1 + $0xd64] ss:$16 sps:$4 sm:$0xff]  }
 0x19f   :  { %4284 = vmatpush1.bf16.msra.mxu0 %v20543_v61  ;;  %v20614_v61 = vld [vmem:[%s29853_s1 + $0xf64] ss:$16 sps:$4 sm:$0xff]  }
 0x1a0   :  { %4325 = vmatpush1.bf16.msra.mxu1 %v20546_v62  ;;  %4285 = vmatprep.subr.bf16.mxu0 %v20551_v63  ;;  %v20609_v62 = vld [vmem:[%s29853_s1 + $0xd60] ss:$16 sps:$4 sm:$0xff]  }
 0x1a1   :  { %4326 = vmatprep.subr.bf16.mxu1 %v20554_v1  ;;  %v20612_v63 = vld [vmem:[%s29853_s1 + $0xf60] ss:$16 sps:$4 sm:$0xff]   ;;  %v20617_v1 = vld [vmem:[%s29853_s1 + $0xd44] ss:$16 sps:$4 sm:$0xff]  }
 0x1a3   :  { %4286 = vmatpush1.bf16.msra.mxu0 %v20549_v2  ;;  %v20620_v2 = vld [vmem:[%s29853_s1 + $0xf44] ss:$16 sps:$4 sm:$0xff]  }
 0x1a4   :  { %4327 = vmatpush1.bf16.msra.mxu1 %v20552_v3  ;;  %4287 = vmatprep.subr.bf16.mxu0 %v20557_v4 }
 0x1a5   :  { %4328 = vmatprep.subr.bf16.mxu1 %v20560_v5 }
 0x1a7   :  { %4288 = vmatpush1.bf16.msra.mxu0 %v20555_v10  ;;  %v20615_v10 = vld [vmem:[%s29853_s1 + $0xd40] ss:$16 sps:$4 sm:$0xff]  }
 0x1a8   :  { %4329 = vmatpush1.bf16.msra.mxu1 %v20558_v11  ;;  %4289 = vmatprep.subr.bf16.mxu0 %v20563_v12  ;;  %v20618_v11 = vld [vmem:[%s29853_s1 + $0xf40] ss:$16 sps:$4 sm:$0xff]  }
 0x1a9   :  { %4330 = vmatprep.subr.bf16.mxu1 %v20566_v48 }
 0x1ab   :  { %4290 = vmatpush1.bf16.msra.mxu0 %v20561_v13  ;;  %v20623_v13 = vld [vmem:[%s29853_s1 + $0x1124] ss:$16 sps:$4 sm:$0xff]  }
 0x1ac   :  { %4331 = vmatpush1.bf16.msra.mxu1 %v20564_v14  ;;  %4291 = vmatprep.subr.bf16.mxu0 %v20569_v15  ;;  %v20626_v14 = vld [vmem:[%s29853_s1 + $0x1244] ss:$16 sps:$4 sm:$0xff]  }
 0x1ad   :  { %4332 = vmatprep.subr.bf16.mxu1 %v20572_v17 }
 0x1af   :  { %4292 = vmatpush1.bf16.msra.mxu0 %v20567_v18 }
 0x1b0   :  { %4333 = vmatpush1.bf16.msra.mxu1 %v20570_v20  ;;  %4293 = vmatprep.subr.bf16.mxu0 %v20575_v53 }
 0x1b1   :  { %4334 = vmatprep.subr.bf16.mxu1 %v20578_v22  ;;  %v20621_v22 = vld [vmem:[%s29853_s1 + $0x1120] ss:$16 sps:$4 sm:$0xff]  }
 0x1b3   :  { %4294 = vmatpush2.bf16.msra.mxu0 %v20573_v23  ;;  %v20624_v23 = vld [vmem:[%s29853_s1 + $0x1240] ss:$16 sps:$4 sm:$0xff]  }
 0x1b4   :  { %4335 = vmatpush2.bf16.msra.mxu1 %v20576_v24  ;;  %4295 = vmatprep.subr.bf16.mxu0 %v20581_v25 }
 0x1b5   :  { %4336 = vmatprep.subr.bf16.mxu1 %v20584_v27  ;;  %v20629_v27 = vld [vmem:[%s29853_s1 + $0x1104] ss:$16 sps:$4 sm:$0xff]  }
 0x1b7   :  { %4296 = vmatpush2.bf16.msra.mxu0 %v20579_v28  ;;  %v20632_v28 = vld [vmem:[%s29853_s1 + $0xd2c] ss:$16 sps:$4 sm:$0xff]  }
 0x1b8   :  { %4337 = vmatpush2.bf16.msra.mxu1 %v20582_v58  ;;  %4297 = vmatprep.subr.bf16.mxu0 %v20587_v33  ;;  %v20627_v33 = vld [vmem:[%s29853_s1 + $0x1100] ss:$16 sps:$4 sm:$0xff]  }
 0x1b9   :  { %4338 = vmatprep.subr.bf16.mxu1 %v20590_v35 }
 0x1bb   :  { %4298 = vmatpush2.bf16.msra.mxu0 %v20585_v0  ;;  %v20635_v0 = vld [vmem:[%s29853_s1 + $0x10e4] ss:$16 sps:$4 sm:$0xff]  }
 0x1bc   :  { %4339 = vmatpush2.bf16.msra.mxu1 %v20588_v6  ;;  %4299 = vmatprep.subr.bf16.mxu0 %v20593_v7  ;;  %v20630_v7 = vld [vmem:[%s29853_s1 + $0xd28] ss:$16 sps:$4 sm:$0xff]  }
 0x1bd   :  { %4340 = vmatprep.subr.bf16.mxu1 %v20596_v41  ;;  %v20633_v41 = vld [vmem:[%s29853_s1 + $0x10e0] ss:$16 sps:$4 sm:$0xff]  }
 0x1bf   :  { %4300 = vmatpush2.bf16.msra.mxu0 %v20591_v45 }
 0x1c0   :  { %4341 = vmatpush2.bf16.msra.mxu1 %v20594_v47  ;;  %4301 = vmatprep.subr.bf16.mxu0 %v20599_v50  ;;  %v20638_v47 = vld [vmem:[%s29853_s1 + $0xd0c] ss:$16 sps:$4 sm:$0xff]   ;;  %v20641_v50 = vld [vmem:[%s29853_s1 + $0x10c4] ss:$16 sps:$4 sm:$0xff]  }
 0x1c1   :  { %4342 = vmatprep.subr.bf16.mxu1 %v20602_v39  ;;  %v20636_v39 = vld [vmem:[%s29853_s1 + $0xd08] ss:$16 sps:$4 sm:$0xff]  }
 0x1c3   :  { %4302 = vmatpush2.bf16.msra.mxu0 %v20597_v51  ;;  %v20639_v51 = vld [vmem:[%s29853_s1 + $0x10c0] ss:$16 sps:$4 sm:$0xff]  }
 0x1c4   :  { %4343 = vmatpush2.bf16.msra.mxu1 %v20600_v54  ;;  %4303 = vmatprep.subr.bf16.mxu0 %v20605_v55  ;;  %v20644_v54 = vld [vmem:[%s29853_s1 + $0xcec] ss:$16 sps:$4 sm:$0xff]   ;;  %v20647_v55 = vld [vmem:[%s29853_s1 + $0x10a4] ss:$16 sps:$4 sm:$0xff]  }
 0x1c5   :  { %4344 = vmatprep.subr.bf16.mxu1 %v20608_v56  ;;  %v20642_v56 = vld [vmem:[%s29853_s1 + $0xce8] ss:$16 sps:$4 sm:$0xff]  }
 0x1c7   :  { %4304 = vmatpush2.bf16.msra.mxu0 %v20603_v57  ;;  %v20645_v57 = vld [vmem:[%s29853_s1 + $0x10a0] ss:$16 sps:$4 sm:$0xff]  }
 0x1c8   :  { %4345 = vmatpush2.bf16.msra.mxu1 %v20606_v59  ;;  %4305 = vmatprep.subr.bf16.mxu0 %v20611_v60  ;;  %v20650_v59 = vld [vmem:[%s29853_s1 + $0xccc] ss:$16 sps:$4 sm:$0xff]   ;;  %v20653_v60 = vld [vmem:[%s29853_s1 + $0x1084] ss:$16 sps:$4 sm:$0xff]  }
 0x1c9   :  { %4346 = vmatprep.subr.bf16.mxu1 %v20614_v61  ;;  %v20648_v61 = vld [vmem:[%s29853_s1 + $0xcc8] ss:$16 sps:$4 sm:$0xff]  }
 0x1ca   :  { %v2798_v3 = vpop.f32.mrf.mxu0 }
 0x1cb   :  { %v2839_v4 = vpop.f32.mrf.mxu1  ;;  %v2799_v5 = vadd.f32 %v2798_v3, %v23821_v43  ;;  %4306 = vmatpush2.bf16.msra.mxu0 %v20609_v62  ;;  %v20651_v62 = vld [vmem:[%s29853_s1 + $0x1080] ss:$16 sps:$4 sm:$0xff]  }
 0x1cc   :  { %4347 = vmatpush2.bf16.msra.mxu1 %v20612_v63  ;;  %v2800_v12 = vpop.f32.mrf.mxu0  ;;  %4307 = vmatprep.subr.bf16.mxu0 %v20617_v1  ;;  %v20656_v63 = vld [vmem:[%s29853_s1 + $0xcac] ss:$16 sps:$4 sm:$0xff]   ;;  %v20659_v1 = vld [vmem:[%s29853_s1 + $0x1064] ss:$16 sps:$4 sm:$0xff]   ;;  %v20657_v3 = vld [vmem:[%s29853_s1 + $0x1060] ss:$16 sps:$4 sm:$0xff]  }
 0x1cd   :  { %v2841_v48 = vpop.f32.mrf.mxu1  ;;  %4348 = vmatprep.subr.bf16.mxu1 %v20620_v2  ;;  %v24496_v15 = vadd.f32 %v2839_v4, %v2799_v5  ;;  %v2801_v17 = vadd.f32 %v2800_v12, %v23831_v46  ;;  %v20654_v2 = vld [vmem:[%s29853_s1 + $0xca8] ss:$16 sps:$4 sm:$0xff]   ;;  %v20662_v4 = vld [vmem:[%s29853_s1 + $0xc8c] ss:$16 sps:$4 sm:$0xff]   ;;  %v20665_v5 = vld [vmem:[%s29853_s1 + $0x1044] ss:$16 sps:$4 sm:$0xff]  }
 0x1ce   :  { %v2802_v18 = vpop.f32.mrf.mxu0  ;;  %v20668_v12 = vld [vmem:[%s29853_s1 + $0xc6c] ss:$16 sps:$4 sm:$0xff]  }
 0x1cf   :  { %v2843_v20 = vpop.f32.mrf.mxu1  ;;  %v24499_v53 = vadd.f32 %v2841_v48, %v2801_v17  ;;  %4308 = vmatpush2.bf16.msra.mxu0 %v20615_v10  ;;  %v20660_v10 = vld [vmem:[%s29853_s1 + $0xc88] ss:$16 sps:$4 sm:$0xff]   ;;  %v20671_v48 = vld [vmem:[%s29853_s1 + $0x1224] ss:$16 sps:$4 sm:$0xff]   ;;  %v20674_v17 = vld [vmem:[%s29853_s1 + $0xc4c] ss:$16 sps:$4 sm:$0xff]  }
 0x1d0   :  { %4349 = vmatpush2.bf16.msra.mxu1 %v20618_v11  ;;  %v2803_v24 = vpop.f32.mrf.mxu0  ;;  %4359 = vmatprep.subr.bf16.mxu0 %v20623_v13  ;;  %v20663_v11 = vld [vmem:[%s29853_s1 + $0x1040] ss:$16 sps:$4 sm:$0xff]   ;;  %v20666_v13 = vld [vmem:[%s29853_s1 + $0xc68] ss:$16 sps:$4 sm:$0xff]   ;;  %v20677_v18 = vld [vmem:[%s29853_s1 + $0x1204] ss:$16 sps:$4 sm:$0xff]  }
 0x1d1   :  { %v2844_v25 = vpop.f32.mrf.mxu1  ;;  %4414 = vmatprep.subr.bf16.mxu1 %v20626_v14  ;;  %v20669_v14 = vld [vmem:[%s29853_s1 + $0x1220] ss:$16 sps:$4 sm:$0xff]   ;;  %v20672_v20 = vld [vmem:[%s29853_s1 + $0xc48] ss:$16 sps:$4 sm:$0xff]   ;;  %v20683_v24 = vld [vmem:[%s29853_s1 + $0x11e4] ss:$16 sps:$4 sm:$0xff]  }
 0x1d2   :  { %4310 = vmatmul.mubr.bf16.vlgmr.msra.gmra.mxu0 %v23199_v8  ;;  %v20678_v25 = vld [vmem:[%s29853_s1 + $0xe28] ss:$16 sps:$4 sm:$0xff]  }
 0x1d3   :  { %4351 = vmatmul.mubr.bf16.vlgmr.msra.gmra.mxu1 %v23201_v9  ;;  %v24515_v58 = vpop.f32.mrf.mxu1  ;;  %4360 = vmatpush1.bf16.msra.mxu0 %v20621_v22  ;;  %v20675_v22 = vld [vmem:[%s29853_s1 + $0x1200] ss:$16 sps:$4 sm:$0xff]  }
 0x1d4   :  { %4415 = vmatpush1.bf16.msra.mxu1 %v20624_v23  ;;  %4361 = vmatprep.subr.bf16.mxu0 %v20629_v27  ;;  %v20680_v23 = vld [vmem:[%s29853_s1 + $0xe2c] ss:$16 sps:$4 sm:$0xff]   ;;  %v20681_v27 = vld [vmem:[%s29853_s1 + $0x11e0] ss:$16 sps:$4 sm:$0xff]  }
 0x1d5   :  { %v24520_v35 = vpop.f32.mrf.mxu1  ;;  %4432 = vmatprep.mubr.bf16.mxu1 %v22920_v16  ;;  %4441 = vmatprep.subr.bf16.mxu1 %v20632_v28  ;;  %v20686_v28 = vld [vmem:[%s29853_s1 + $0xe0c] ss:$16 sps:$4 sm:$0xff]  }
 0x1d6   :  { %4391 = vmatprep.mubr.bf16.mxu0 %v23283_v36 }
 0x1d7   :  { %v2925_v6 = vpop.f32.mrf.mxu1  ;;  %4362 = vmatpush1.bf16.msra.mxu0 %v20627_v33  ;;  %v20689_v33 = vld [vmem:[%s29853_s1 + $0x11c4] ss:$16 sps:$4 sm:$0xff]  }
 0x1d8   :  { %4363 = vmatprep.subr.bf16.mxu0 %v20635_v0  ;;  %v20684_v0 = vld [vmem:[%s29853_s1 + $0xe08] ss:$16 sps:$4 sm:$0xff]   ;;  %v20687_v6 = vld [vmem:[%s29853_s1 + $0x11c0] ss:$16 sps:$4 sm:$0xff]  }
 0x1d9   :  { %v2926_v45 = vpop.f32.mrf.mxu1 }
 0x1da   :  { %v20690_v45 = vld [vmem:[%s29853_s1 + $0xde8] ss:$16 sps:$4 sm:$0xff]  }
 0x1db   :  { %17820 = vmatmul.mubr.msk.bf16.vlgmr.msra.gmra.mxu1 %vm1251_vm0, %v23230_v19  ;;  %4364 = vmatpush1.bf16.msra.mxu0 %v20633_v41  ;;  %v20695_v41 = vld [vmem:[%s29853_s1 + $0x11a4] ss:$16 sps:$4 sm:$0xff]  }
 0x1dc   :  { %4442 = vmatpush1.bf16.msra.mxu1 %v20630_v7  ;;  %4365 = vmatprep.subr.bf16.mxu0 %v20641_v50  ;;  %v20692_v7 = vld [vmem:[%s29853_s1 + $0xdec] ss:$16 sps:$4 sm:$0xff]  }
 0x1dd   :  { %4443 = vmatprep.subr.bf16.mxu1 %v20638_v47  ;;  %4473 = vmatprep.mubr.bf16.mxu1 %v23130_v49  ;;  %v20693_v47 = vld [vmem:[%s29853_s1 + $0x11a0] ss:$16 sps:$4 sm:$0xff]   ;;  %v20698_v50 = vld [vmem:[%s29853_s1 + $0xdcc] ss:$16 sps:$4 sm:$0xff]  }
 0x1df   :  { %4366 = vmatpush1.bf16.msra.mxu0 %v20639_v51  ;;  %v20696_v51 = vld [vmem:[%s29853_s1 + $0xdc8] ss:$16 sps:$4 sm:$0xff]  }
 0x1e0   :  { %4444 = vmatpush1.bf16.msra.mxu1 %v20636_v39  ;;  %4367 = vmatprep.subr.bf16.mxu0 %v20647_v55  ;;  %v20701_v39 = vld [vmem:[%s29853_s1 + $0x1184] ss:$16 sps:$4 sm:$0xff]   ;;  %v20704_v55 = vld [vmem:[%s29853_s1 + $0xdac] ss:$16 sps:$4 sm:$0xff]  }
 0x1e1   :  { %4445 = vmatprep.subr.bf16.mxu1 %v20644_v54  ;;  %v20699_v54 = vld [vmem:[%s29853_s1 + $0x1180] ss:$16 sps:$4 sm:$0xff]  }
 0x1e3   :  { %4368 = vmatpush1.bf16.msra.mxu0 %v20645_v57  ;;  %v20702_v57 = vld [vmem:[%s29853_s1 + $0xda8] ss:$16 sps:$4 sm:$0xff]  }
 0x1e4   :  { %4446 = vmatpush1.bf16.msra.mxu1 %v20642_v56  ;;  %4369 = vmatprep.subr.bf16.mxu0 %v20653_v60  ;;  %v20707_v56 = vld [vmem:[%s29853_s1 + $0x1164] ss:$16 sps:$4 sm:$0xff]   ;;  %v20710_v60 = vld [vmem:[%s29853_s1 + $0xd8c] ss:$16 sps:$4 sm:$0xff]  }
 0x1e5   :  { %4447 = vmatprep.subr.bf16.mxu1 %v20650_v59  ;;  %v20705_v59 = vld [vmem:[%s29853_s1 + $0x1160] ss:$16 sps:$4 sm:$0xff]  }
 0x1e7   :  { %4370 = vmatpush1.bf16.msra.mxu0 %v20651_v62 }
 0x1e8   :  { %4448 = vmatpush1.bf16.msra.mxu1 %v20648_v61  ;;  %4371 = vmatprep.subr.bf16.mxu0 %v20659_v1  ;;  %v20713_v61 = vld [vmem:[%s29853_s1 + $0x1144] ss:$16 sps:$4 sm:$0xff]   ;;  %v20708_v1 = vld [vmem:[%s29853_s1 + $0xd88] ss:$16 sps:$4 sm:$0xff]  }
 0x1e9   :  { %4449 = vmatprep.subr.bf16.mxu1 %v20656_v63 }
 0x1eb   :  { %4372 = vmatpush1.bf16.msra.mxu0 %v20657_v3 }
 0x1ec   :  { %4450 = vmatpush1.bf16.msra.mxu1 %v20654_v2  ;;  %4373 = vmatprep.subr.bf16.mxu0 %v20665_v5  ;;  %v20711_v2 = vld [vmem:[%s29853_s1 + $0x1140] ss:$16 sps:$4 sm:$0xff]  }
 0x1ed   :  { %4451 = vmatprep.subr.bf16.mxu1 %v20662_v4  ;;  %v20716_v4 = vld [vmem:[%s29853_s1 + $0xd6c] ss:$16 sps:$4 sm:$0xff]  }
 0x1ef   :  { %4374 = vmatpush1.bf16.msra.mxu0 %v20663_v11 }
 0x1f0   :  { %4452 = vmatpush1.bf16.msra.mxu1 %v20660_v10  ;;  %4375 = vmatprep.subr.bf16.mxu0 %v20671_v48 }
 0x1f1   :  { %4453 = vmatprep.subr.bf16.mxu1 %v20668_v12  ;;  %v1583_v12 = vmax.f32 %v24053_v29, 0.0  ;;  %v20722_v29 = vld [vmem:[%s29853_s1 + $0xd4c] ss:$16 sps:$4 sm:$0xff]  }
 0x1f3   :  { %4376 = vmatpush2.bf16.msra.mxu0 %v20669_v14  ;;  %v20714_v14 = vld [vmem:[%s29853_s1 + $0xd68] ss:$16 sps:$4 sm:$0xff]  }
 0x1f4   :  { %4454 = vmatpush1.bf16.msra.mxu1 %v20666_v13  ;;  %4377 = vmatprep.subr.bf16.mxu0 %v20677_v18 }
 0x1f5   :  { %4455 = vmatprep.subr.bf16.mxu1 %v20674_v17  ;;  %v20717_v17 = vld [vmem:[%s29853_s1 + $0xf28] ss:$16 sps:$4 sm:$0xff]  }
 0x1f7   :  { %4378 = vmatpush2.bf16.msra.mxu0 %v20675_v22 }
 0x1f8   :  { %4456 = vmatpush1.bf16.msra.mxu1 %v20672_v20  ;;  %4379 = vmatprep.subr.bf16.mxu0 %v20683_v24 }
 0x1f9   :  { %4457 = vmatprep.subr.bf16.mxu1 %v20680_v23 }
 0x1fb   :  { %4380 = vmatpush2.bf16.msra.mxu0 %v20681_v27 }
 0x1fc   :  { %4458 = vmatpush2.bf16.msra.mxu1 %v20678_v25  ;;  %4381 = vmatprep.subr.bf16.mxu0 %v20689_v33  ;;  %v20720_v25 = vld [vmem:[%s29853_s1 + $0xd48] ss:$16 sps:$4 sm:$0xff]   ;;  %v20731_v33 = vld [vmem:[%s29853_s1 + $0xeec] ss:$16 sps:$4 sm:$0xff]  }
 0x1fd   :  { %4459 = vmatprep.subr.bf16.mxu1 %v20686_v28  ;;  %v20728_v28 = vld [vmem:[%s29853_s1 + $0x112c] ss:$16 sps:$4 sm:$0xff]  }
 0x1ff   :  { %4382 = vmatpush2.bf16.msra.mxu0 %v20687_v6 }
 0x200   :  { %4460 = vmatpush2.bf16.msra.mxu1 %v20684_v0  ;;  %4383 = vmatprep.subr.bf16.mxu0 %v20695_v41  ;;  %v20729_v41 = vld [vmem:[%s29853_s1 + $0xee8] ss:$16 sps:$4 sm:$0xff]  }
 0x201   :  { %4461 = vmatprep.subr.bf16.mxu1 %v20692_v7  ;;  %v20726_v7 = vld [vmem:[%s29853_s1 + $0x1128] ss:$16 sps:$4 sm:$0xff]  }
 0x203   :  { %4384 = vmatpush2.bf16.msra.mxu0 %v20693_v47  ;;  %v20734_v47 = vld [vmem:[%s29853_s1 + $0x110c] ss:$16 sps:$4 sm:$0xff]  }
 0x204   :  { %4462 = vmatpush2.bf16.msra.mxu1 %v20690_v45  ;;  %4385 = vmatprep.subr.bf16.mxu0 %v20701_v39  ;;  %v20732_v39 = vld [vmem:[%s29853_s1 + $0x1108] ss:$16 sps:$4 sm:$0xff]  }
 0x205   :  { %4463 = vmatprep.subr.bf16.mxu1 %v20698_v50  ;;  %v20737_v50 = vld [vmem:[%s29853_s1 + $0xecc] ss:$16 sps:$4 sm:$0xff]  }
 0x207   :  { %4386 = vmatpush2.bf16.msra.mxu0 %v20699_v54  ;;  %v20740_v54 = vld [vmem:[%s29853_s1 + $0x10ec] ss:$16 sps:$4 sm:$0xff]  }
 0x208   :  { %4464 = vmatpush2.bf16.msra.mxu1 %v20696_v51  ;;  %4387 = vmatprep.subr.bf16.mxu0 %v20707_v56  ;;  %v20735_v51 = vld [vmem:[%s29853_s1 + $0xec8] ss:$16 sps:$4 sm:$0xff]  }
 0x209   :  { %4465 = vmatprep.subr.bf16.mxu1 %v20704_v55  ;;  %v20743_v55 = vld [vmem:[%s29853_s1 + $0xeac] ss:$16 sps:$4 sm:$0xff]   ;;  %v20738_v56 = vld [vmem:[%s29853_s1 + $0x10e8] ss:$16 sps:$4 sm:$0xff]  }
 0x20a   :  { %v2880_v62 = vpop.f32.mrf.mxu0 }
 0x20b   :  { %v2881_v63 = vadd.f32 %v2880_v62, %v24496_v15  ;;  %4388 = vmatpush2.bf16.msra.mxu0 %v20705_v59  ;;  %v20719_v15 = vld [vmem:[%s29853_s1 + $0xf2c] ss:$16 sps:$4 sm:$0xff]   ;;  %v20747_v62 = vld [vmem:[%s29853_s1 + $0xe88] ss:$16 sps:$4 sm:$0xff]  }
 0x20c   :  { %4466 = vmatpush2.bf16.msra.mxu1 %v20702_v57  ;;  %v2882_v3 = vpop.f32.mrf.mxu0  ;;  %4389 = vmatprep.subr.bf16.mxu0 %v20713_v61  ;;  %v20741_v57 = vld [vmem:[%s29853_s1 + $0xea8] ss:$16 sps:$4 sm:$0xff]   ;;  %v20746_v59 = vld [vmem:[%s29853_s1 + $0x10cc] ss:$16 sps:$4 sm:$0xff]  }
 0x20d   :  { %4467 = vmatprep.subr.bf16.mxu1 %v20710_v60  ;;  %v2922_v5 = vadd.f32 %v24515_v58, %v2881_v63  ;;  %v2883_v10 = vadd.f32 %v2882_v3, %v24499_v53  ;;  %v20725_v53 = vld [vmem:[%s29853_s1 + $0xf0c] ss:$16 sps:$4 sm:$0xff]   ;;  %v1584_v58 = vmax.f32 %v24060_v34, 0.0  ;;  %v20723_v34 = vld [vmem:[%s29853_s1 + $0xf08] ss:$16 sps:$4 sm:$0xff]  }
 0x20e   :  { %v2884_v11 = vpop.f32.mrf.mxu0  ;;  %v20749_v60 = vld [vmem:[%s29853_s1 + $0xe8c] ss:$16 sps:$4 sm:$0xff]   ;;  %v20744_v61 = vld [vmem:[%s29853_s1 + $0x10c8] ss:$16 sps:$4 sm:$0xff]  }
 0x20f   :  { %v3092_v48 = vmax.f32 %v2922_v5, 0.0  ;;  %v2924_v13 = vadd.f32 %v24520_v35, %v2883_v10  ;;  %4390 = vmatpush2.bf16.msra.mxu0 %v20711_v2  ;;  %v20752_v63 = vld [vmem:[%s29853_s1 + $0x10ac] ss:$16 sps:$4 sm:$0xff]   ;;  %v20750_v2 = vld [vmem:[%s29853_s1 + $0x10a8] ss:$16 sps:$4 sm:$0xff]  }
 0x210   :  { %4468 = vmatpush2.bf16.msra.mxu1 %v20708_v1  ;;  %v2885_v18 = vpop.f32.mrf.mxu0  ;;  %4482 = vmatprep.subr.bf16.mxu0 %v20719_v15  ;;  %v20755_v1 = vld [vmem:[%s29853_s1 + $0xe6c] ss:$16 sps:$4 sm:$0xff]   ;;  %v20753_v3 = vld [vmem:[%s29853_s1 + $0xe68] ss:$16 sps:$4 sm:$0xff]  }
 0x211   :  { %4469 = vmatprep.subr.bf16.mxu1 %v20716_v4  ;;  %v24716_v35 = vmax.f32 %v1583_v12, %v3092_v48  ;;  %v3093_v20 = vmax.f32 %v2924_v13, 0.0  ;;  %v20758_v4 = vld [vmem:[%s29853_s1 + $0x108c] ss:$16 sps:$4 sm:$0xff]   ;;  %v20756_v5 = vld [vmem:[%s29853_s1 + $0x1088] ss:$16 sps:$4 sm:$0xff]  }
 0x212   :  { %4392 = vmatmul.mubr.bf16.vlgmr.msra.gmra.mxu0 %v23412_v21  ;;  %v20761_v15 = vld [vmem:[%s29853_s1 + $0xe4c] ss:$16 sps:$4 sm:$0xff]   ;;  %v20759_v10 = vld [vmem:[%s29853_s1 + $0xe48] ss:$16 sps:$4 sm:$0xff]  }
 0x213   :  { %v2962_v22 = vpop.f32.mrf.mxu1  ;;  %v24719_v23 = vmax.f32 %v1584_v58, %v3093_v20  ;;  %4483 = vmatpush1.bf16.msra.mxu0 %v20717_v17  ;;  %4514 = vmatprep.mubr.bf16.mxu0 %v23138_v52  ;;  %v20764_v11 = vld [vmem:[%s29853_s1 + $0x106c] ss:$16 sps:$4 sm:$0xff]   ;;  %v20762_v48 = vld [vmem:[%s29853_s1 + $0x1068] ss:$16 sps:$4 sm:$0xff]  }
 0x214   :  { %v24722_v24 = vadd.f32 %v2962_v22, %v24067_v37  ;;  %4470 = vmatpush2.bf16.msra.mxu1 %v20714_v14  ;;  %4484 = vmatprep.subr.bf16.mxu0 %v20725_v53  ;;  %v20767_v12 = vld [vmem:[%s29853_s1 + $0x102c] ss:$16 sps:$4 sm:$0xff]   ;;  %v20765_v13 = vld [vmem:[%s29853_s1 + $0x1028] ss:$16 sps:$4 sm:$0xff]  }
 0x215   :  { %v2964_v27 = vpop.f32.mrf.mxu1  ;;  %4471 = vmatprep.subr.bf16.mxu1 %v20722_v29  ;;  %v20770_v14 = vld [vmem:[%s29853_s1 + $0x104c] ss:$16 sps:$4 sm:$0xff]   ;;  %v20768_v18 = vld [vmem:[%s29853_s1 + $0x1048] ss:$16 sps:$4 sm:$0xff]  }
 0x216   :  { %v24737_v0 = vadd.f32 %v2964_v27, %v24080_v42  ;;  %v20773_v17 = vld [vmem:[%s29853_s1 + $0x100c] ss:$16 sps:$4 sm:$0xff]   ;;  %v20771_v29 = vld [vmem:[%s29853_s1 + $0x1008] ss:$16 sps:$4 sm:$0xff]  }
 0x217   :  { %v2966_v6 = vpop.f32.mrf.mxu1  ;;  %4485 = vmatpush1.bf16.msra.mxu0 %v20723_v34  ;;  %v20776_v53 = vld [vmem:[%s29853_s1 + $0x122c] ss:$16 sps:$4 sm:$0xff]   ;;  %v20774_v20 = vld [vmem:[%s29853_s1 + $0x1228] ss:$16 sps:$4 sm:$0xff]  }
 0x218   :  { %4472 = vmatpush2.bf16.msra.mxu1 %v20720_v25  ;;  %4486 = vmatprep.subr.bf16.mxu0 %v20731_v33  ;;  %v20779_v58 = vld [vmem:[%s29853_s1 + $0xfec] ss:$16 sps:$4 sm:$0xff]   ;;  %v20777_v22 = vld [vmem:[%s29853_s1 + $0xfe8] ss:$16 sps:$4 sm:$0xff]  }
 0x219   :  { %v2967_v45 = vpop.f32.mrf.mxu1  ;;  %4523 = vmatprep.subr.bf16.mxu1 %v20728_v28  ;;  %v20782_v25 = vld [vmem:[%s29853_s1 + $0x120c] ss:$16 sps:$4 sm:$0xff]   ;;  %v20780_v27 = vld [vmem:[%s29853_s1 + $0x1208] ss:$16 sps:$4 sm:$0xff]  }
 0x21a   :  { %v20785_v34 = vld [vmem:[%s29853_s1 + $0xfcc] ss:$16 sps:$4 sm:$0xff]   ;;  %v20783_v28 = vld [vmem:[%s29853_s1 + $0xfc8] ss:$16 sps:$4 sm:$0xff]  }
 0x21b   :  { %4474 = vmatmul.mubr.bf16.vlgmr.msra.gmra.mxu1 %v23199_v8  ;;  %4487 = vmatpush1.bf16.msra.mxu0 %v20729_v41  ;;  %v20788_v33 = vld [vmem:[%s29853_s1 + $0x11ec] ss:$16 sps:$4 sm:$0xff]   ;;  %v20789_v41 = vld [vmem:[%s29853_s1 + $0xfa8] ss:$16 sps:$4 sm:$0xff]  }
 0x21c   :  { %4524 = vmatpush1.bf16.msra.mxu1 %v20726_v7  ;;  %4488 = vmatprep.subr.bf16.mxu0 %v20737_v50  ;;  %v20791_v6 = vld [vmem:[%s29853_s1 + $0xfac] ss:$16 sps:$4 sm:$0xff]   ;;  %v20786_v7 = vld [vmem:[%s29853_s1 + $0x11e8] ss:$16 sps:$4 sm:$0xff]  }
 0x21d   :  { %4525 = vmatprep.subr.bf16.mxu1 %v20734_v47  ;;  %4555 = vmatprep.mubr.bf16.mxu1 %v23283_v36  ;;  %v20794_v45 = vld [vmem:[%s29853_s1 + $0x11cc] ss:$16 sps:$4 sm:$0xff]   ;;  %v20792_v50 = vld [vmem:[%s29853_s1 + $0x11c8] ss:$16 sps:$4 sm:$0xff]  }
 0x21e   :  { %v20797_v47 = vld [vmem:[%s29853_s1 + $0xf8c] ss:$16 sps:$4 sm:$0xff]  }
 0x21f   :  { %4489 = vmatpush1.bf16.msra.mxu0 %v20735_v51  ;;  %v20800_v51 = vld [vmem:[%s29853_s1 + $0x11ac] ss:$16 sps:$4 sm:$0xff]  }
 0x220   :  { %4526 = vmatpush1.bf16.msra.mxu1 %v20732_v39  ;;  %4490 = vmatprep.subr.bf16.mxu0 %v20743_v55  ;;  %v20795_v39 = vld [vmem:[%s29853_s1 + $0xf88] ss:$16 sps:$4 sm:$0xff]  }
 0x221   :  { %4527 = vmatprep.subr.bf16.mxu1 %v20740_v54  ;;  %v20803_v54 = vld [vmem:[%s29853_s1 + $0xf6c] ss:$16 sps:$4 sm:$0xff]   ;;  %v20798_v55 = vld [vmem:[%s29853_s1 + $0x11a8] ss:$16 sps:$4 sm:$0xff]  }
 0x223   :  { %4491 = vmatpush1.bf16.msra.mxu0 %v20741_v57  ;;  %v20806_v57 = vld [vmem:[%s29853_s1 + $0x118c] ss:$16 sps:$4 sm:$0xff]  }
 0x224   :  { %4528 = vmatpush1.bf16.msra.mxu1 %v20738_v56  ;;  %4492 = vmatprep.subr.bf16.mxu0 %v20749_v60  ;;  %v20801_v56 = vld [vmem:[%s29853_s1 + $0xf68] ss:$16 sps:$4 sm:$0xff]  }
 0x225   :  { %4529 = vmatprep.subr.bf16.mxu1 %v20746_v59  ;;  %v20809_v59 = vld [vmem:[%s29853_s1 + $0xf4c] ss:$16 sps:$4 sm:$0xff]  }
 0x227   :  { %4493 = vmatpush1.bf16.msra.mxu0 %v20747_v62  ;;  %v20804_v62 = vld [vmem:[%s29853_s1 + $0x1188] ss:$16 sps:$4 sm:$0xff]  }
 0x228   :  { %4530 = vmatpush1.bf16.msra.mxu1 %v20744_v61  ;;  %4494 = vmatprep.subr.bf16.mxu0 %v20755_v1 }
 0x229   :  { %4531 = vmatprep.subr.bf16.mxu1 %v20752_v63  ;;  %v20807_v63 = vld [vmem:[%s29853_s1 + $0xf48] ss:$16 sps:$4 sm:$0xff]  }
 0x22b   :  { %4495 = vmatpush1.bf16.msra.mxu0 %v20753_v3 }
 0x22c   :  { %4532 = vmatpush1.bf16.msra.mxu1 %v20750_v2  ;;  %4496 = vmatprep.subr.bf16.mxu0 %v20761_v15  ;;  %v20812_v2 = vld [vmem:[%s29853_s1 + $0x116c] ss:$16 sps:$4 sm:$0xff]   ;;  %v20810_v15 = vld [vmem:[%s29853_s1 + $0x1168] ss:$16 sps:$4 sm:$0xff]  }
 0x22d   :  { %4533 = vmatprep.subr.bf16.mxu1 %v20758_v4 }
 0x22f   :  { %4497 = vmatpush1.bf16.msra.mxu0 %v20759_v10 }
 0x230   :  { %4534 = vmatpush1.bf16.msra.mxu1 %v20756_v5  ;;  %4498 = vmatprep.subr.bf16.mxu0 %v20767_v12  ;;  %v20813_v5 = vld [vmem:[%s29853_s1 + $0x1248] ss:$16 sps:$4 sm:$0xff]  }
 0x231   :  { %4535 = vmatprep.subr.bf16.mxu1 %v20764_v11  ;;  %v20818_v11 = vld [vmem:[%s29853_s1 + $0x114c] ss:$16 sps:$4 sm:$0xff]  }
 0x233   :  { %4499 = vmatpush2.bf16.msra.mxu0 %v20765_v13 }
 0x234   :  { %4536 = vmatpush1.bf16.msra.mxu1 %v20762_v48  ;;  %4500 = vmatprep.subr.bf16.mxu0 %v20773_v17 }
 0x235   :  { %4537 = vmatprep.subr.bf16.mxu1 %v20770_v14  ;;  %v20816_v14 = vld [vmem:[%s29853_s1 + $0x1148] ss:$16 sps:$4 sm:$0xff]  }
 0x237   :  { %4501 = vmatpush2.bf16.msra.mxu0 %v20771_v29  ;;  %v20824_v29 = vld [vmem:[%s29853_s1 + $0x1544] ss:$16 sps:$4 sm:$0xff]  }
 0x238   :  { %4538 = vmatpush1.bf16.msra.mxu1 %v20768_v18  ;;  %4502 = vmatprep.subr.bf16.mxu0 %v20779_v58 }
 0x239   :  { %4539 = vmatprep.subr.bf16.mxu1 %v20776_v53 }
 0x23b   :  { %4503 = vmatpush2.bf16.msra.mxu0 %v20777_v22 }
 0x23c   :  { %4540 = vmatpush2.bf16.msra.mxu1 %v20774_v20  ;;  %4504 = vmatprep.subr.bf16.mxu0 %v20785_v34 }
 0x23d   :  { %4541 = vmatprep.subr.bf16.mxu1 %v20782_v25  ;;  %v1585_v25 = vmax.f32 %v24294_v30, 0.0  ;;  %v20830_v30 = vld [vmem:[%s29853_s1 + $0x1524] ss:$16 sps:$4 sm:$0xff]  }
 0x23f   :  { %4505 = vmatpush2.bf16.msra.mxu0 %v20783_v28  ;;  %v20819_v28 = vld [vmem:[%s29853_s1 + $0x1340] ss:$16 sps:$4 sm:$0xff]  }
 0x240   :  { %4542 = vmatpush2.bf16.msra.mxu1 %v20780_v27  ;;  %4506 = vmatprep.subr.bf16.mxu0 %v20791_v6 }
 0x241   :  { %4543 = vmatprep.subr.bf16.mxu1 %v20788_v33  ;;  %v20822_v33 = vld [vmem:[%s29853_s1 + $0x1540] ss:$16 sps:$4 sm:$0xff]  }
 0x243   :  { %4507 = vmatpush2.bf16.msra.mxu0 %v20789_v41  ;;  %v20827_v41 = vld [vmem:[%s29853_s1 + $0x1324] ss:$16 sps:$4 sm:$0xff]  }
 0x244   :  { %4544 = vmatpush2.bf16.msra.mxu1 %v20786_v7  ;;  %4508 = vmatprep.subr.bf16.mxu0 %v20797_v47 }
 0x245   :  { %4545 = vmatprep.subr.bf16.mxu1 %v20794_v45  ;;  %v1586_v45 = vmax.f32 %v24305_v44, 0.0  ;;  %v20828_v44 = vld [vmem:[%s29853_s1 + $0x1520] ss:$16 sps:$4 sm:$0xff]  }
 0x247   :  { %4509 = vmatpush2.bf16.msra.mxu0 %v20795_v39 }
 0x248   :  { %4546 = vmatpush2.bf16.msra.mxu1 %v20792_v50  ;;  %4510 = vmatprep.subr.bf16.mxu0 %v20803_v54  ;;  %v20833_v54 = vld [vmem:[%s29853_s1 + $0x1304] ss:$16 sps:$4 sm:$0xff]  }
 0x249   :  { %4547 = vmatprep.subr.bf16.mxu1 %v20800_v51  ;;  %v20825_v51 = vld [vmem:[%s29853_s1 + $0x1320] ss:$16 sps:$4 sm:$0xff]  }
 0x24a   :  { %v3003_v60 = vpop.f32.mrf.mxu0 }
 0x24b   :  { %v3004_v61 = vadd.f32 %v3003_v60, %v24722_v24  ;;  %4511 = vmatpush2.bf16.msra.mxu0 %v20801_v56  ;;  %v20815_v24 = vld [vmem:[%s29853_s1 + $0x124c] ss:$16 sps:$4 sm:$0xff]   ;;  %v20831_v56 = vld [vmem:[%s29853_s1 + $0x1300] ss:$16 sps:$4 sm:$0xff]   ;;  %v20842_v60 = vld [vmem:[%s29853_s1 + $0x14e4] ss:$16 sps:$4 sm:$0xff]  }
 0x24c   :  { %4548 = vmatpush2.bf16.msra.mxu1 %v20798_v55  ;;  %v3005_v1 = vpop.f32.mrf.mxu0  ;;  %4512 = vmatprep.subr.bf16.mxu0 %v20809_v59  ;;  %v20836_v55 = vld [vmem:[%s29853_s1 + $0x1504] ss:$16 sps:$4 sm:$0xff]  }
 0x24d   :  { %4549 = vmatprep.subr.bf16.mxu1 %v20806_v57  ;;  %v3006_v3 = vadd.f32 %v3005_v1, %v24737_v0  ;;  %v20821_v0 = vld [vmem:[%s29853_s1 + $0x1344] ss:$16 sps:$4 sm:$0xff]   ;;  %v20834_v57 = vld [vmem:[%s29853_s1 + $0x1500] ss:$16 sps:$4 sm:$0xff]  }
 0x24e   :  { %v3007_v4 = vpop.f32.mrf.mxu0  ;;  %v20839_v59 = vld [vmem:[%s29853_s1 + $0x12e4] ss:$16 sps:$4 sm:$0xff]  }
 0x24f   :  { %4513 = vmatpush2.bf16.msra.mxu0 %v20807_v63  ;;  %v20845_v63 = vld [vmem:[%s29853_s1 + $0x12c4] ss:$16 sps:$4 sm:$0xff]  }
 0x250   :  { %4550 = vmatpush2.bf16.msra.mxu1 %v20804_v62  ;;  %v3008_v10 = vpop.f32.mrf.mxu0  ;;  %4578 = vmatprep.subr.bf16.mxu0 %v20815_v24  ;;  %v20840_v62 = vld [vmem:[%s29853_s1 + $0x14e0] ss:$16 sps:$4 sm:$0xff]   ;;  %v20848_v1 = vld [vmem:[%s29853_s1 + $0x14c4] ss:$16 sps:$4 sm:$0xff]  }
 0x251   :  { %4551 = vmatprep.subr.bf16.mxu1 %v20812_v2  ;;  %v20843_v2 = vld [vmem:[%s29853_s1 + $0x12c0] ss:$16 sps:$4 sm:$0xff]   ;;  %v20854_v4 = vld [vmem:[%s29853_s1 + $0x14a4] ss:$16 sps:$4 sm:$0xff]  }
 0x252   :  { %4515 = vmatmul.mubr.bf16.vlgmr.msra.gmra.mxu0 %v23201_v9  ;;  %v3085_v48 = vpop.f32.mrf.mxu0  ;;  %v20846_v24 = vld [vmem:[%s29853_s1 + $0x14c0] ss:$16 sps:$4 sm:$0xff]   ;;  %v20857_v10 = vld [vmem:[%s29853_s1 + $0x1284] ss:$16 sps:$4 sm:$0xff]  }
 0x253   :  { %v3044_v12 = vpop.f32.mrf.mxu1  ;;  %4579 = vmatpush1.bf16.msra.mxu0 %v20813_v5  ;;  %4596 = vmatprep.mubr.bf16.mxu0 %v22920_v16  ;;  %v20852_v5 = vld [vmem:[%s29853_s1 + $0x14a0] ss:$16 sps:$4 sm:$0xff]  }
 0x254   :  { %v3045_v13 = vadd.f32 %v3044_v12, %v3004_v61  ;;  %4552 = vmatpush2.bf16.msra.mxu1 %v20810_v15  ;;  %v3087_v18 = vpop.f32.mrf.mxu0  ;;  %5790 = vmatprep.subr.bf16.mxu0 %v20821_v0  ;;  %v20837_v61 = vld [vmem:[%s29853_s1 + $0x12e0] ss:$16 sps:$4 sm:$0xff]  }
 0x255   :  { %v3046_v17 = vpop.f32.mrf.mxu1  ;;  %4553 = vmatprep.subr.bf16.mxu1 %v20818_v11  ;;  %v20849_v15 = vld [vmem:[%s29853_s1 + $0x12a0] ss:$16 sps:$4 sm:$0xff]   ;;  %v20860_v11 = vld [vmem:[%s29853_s1 + $0x1484] ss:$16 sps:$4 sm:$0xff]  }
 0x256   :  { %v3086_v53 = vadd.f32 %v3085_v48, %v3045_v13  ;;  %v3047_v58 = vadd.f32 %v3046_v17, %v3006_v3  ;;  %v3089_v22 = vpop.f32.mrf.mxu0  ;;  %v20851_v3 = vld [vmem:[%s29853_s1 + $0x12a4] ss:$16 sps:$4 sm:$0xff]   ;;  %v20855_v0 = vld [vmem:[%s29853_s1 + $0x1280] ss:$16 sps:$4 sm:$0xff]  }
 0x257   :  { %v3048_v20 = vpop.f32.mrf.mxu1  ;;  %v20858_v12 = vld [vmem:[%s29853_s1 + $0x1480] ss:$16 sps:$4 sm:$0xff]   ;;  %v20863_v48 = vld [vmem:[%s29853_s1 + $0x1264] ss:$16 sps:$4 sm:$0xff]  }
 0x258   :  { %v3094_v34 = vmax.f32 %v3086_v53, 0.0  ;;  %v3088_v27 = vadd.f32 %v3087_v18, %v3047_v58  ;;  %4554 = vmatpush2.bf16.msra.mxu1 %v20816_v14  ;;  %v3090_v7 = vpop.f32.mrf.mxu0  ;;  %v20866_v13 = vld [vmem:[%s29853_s1 + $0x1464] ss:$16 sps:$4 sm:$0xff]   ;;  %v20861_v14 = vld [vmem:[%s29853_s1 + $0x1260] ss:$16 sps:$4 sm:$0xff]  }
 0x259   :  { %v3049_v6 = vpop.f32.mrf.mxu1  ;;  %5831 = vmatprep.subr.bf16.mxu1 %v20824_v29  ;;  %v20864_v17 = vld [vmem:[%s29853_s1 + $0x1460] ss:$16 sps:$4 sm:$0xff]   ;;  %v20869_v18 = vld [vmem:[%s29853_s1 + $0x1444] ss:$16 sps:$4 sm:$0xff]  }
 0x25a   :  { %v24946_v47 = vmax.f32 %v1585_v25, %v3094_v34  ;;  %v3095_v50 = vmax.f32 %v3088_v27, 0.0  ;;  %17821 = vmatmul.mubr.msk.bf16.vlgmr.msra.gmra.mxu0 %vm1251_vm0, %v23230_v19  ;;  %v20872_v29 = vld [vmem:[%s29853_s1 + $0x1644] ss:$16 sps:$4 sm:$0xff]   ;;  %v20867_v53 = vld [vmem:[%s29853_s1 + $0x1440] ss:$16 sps:$4 sm:$0xff]  }
 0x25b   :  { %4556 = vmatmul.mubr.bf16.vlgmr.msra.gmra.mxu1 %v23412_v21  ;;  %5791 = vmatpush1.bf16.msra.mxu0 %v20819_v28  ;;  %v20870_v58 = vld [vmem:[%s29853_s1 + $0x1640] ss:$16 sps:$4 sm:$0xff]   ;;  %v20875_v20 = vld [vmem:[%s29853_s1 + $0x1424] ss:$16 sps:$4 sm:$0xff]  }
 0x25c   :  { %v24951_v39 = vmax.f32 %v1586_v45, %v3095_v50  ;;  %5832 = vmatpush1.bf16.msra.mxu1 %v20822_v33  ;;  %5792 = vmatprep.subr.bf16.mxu0 %v20827_v41  ;;  %v20878_v22 = vld [vmem:[%s29853_s1 + $0x1624] ss:$16 sps:$4 sm:$0xff]   ;;  %v20873_v25 = vld [vmem:[%s29853_s1 + $0x1420] ss:$16 sps:$4 sm:$0xff]  }
 0x25d   :  { %5833 = vmatprep.subr.bf16.mxu1 %v20830_v30  ;;  %5822 = vmatprep.mubr.bf16.mxu0 %v23130_v49  ;;  %v20876_v34 = vld [vmem:[%s29853_s1 + $0x1620] ss:$16 sps:$4 sm:$0xff]   ;;  %v20881_v27 = vld [vmem:[%s29853_s1 + $0x1404] ss:$16 sps:$4 sm:$0xff]  }
 0x25e   :  { %5863 = vmatprep.mubr.bf16.mxu1 %v23138_v52  ;;  %v20884_v28 = vld [vmem:[%s29853_s1 + $0x1604] ss:$16 sps:$4 sm:$0xff]   ;;  %v20879_v33 = vld [vmem:[%s29853_s1 + $0x1400] ss:$16 sps:$4 sm:$0xff]  }
 0x25f   :  { %5793 = vmatpush1.bf16.msra.mxu0 %v20825_v51  ;;  %v20882_v6 = vld [vmem:[%s29853_s1 + $0x1600] ss:$16 sps:$4 sm:$0xff]   ;;  %v20887_v7 = vld [vmem:[%s29853_s1 + $0x13e4] ss:$16 sps:$4 sm:$0xff]  }
 0x260   :  { %5834 = vmatpush1.bf16.msra.mxu1 %v20828_v44  ;;  %5794 = vmatprep.subr.bf16.mxu0 %v20833_v54  ;;  %v20890_v41 = vld [vmem:[%s29853_s1 + $0x15e4] ss:$16 sps:$4 sm:$0xff]   ;;  %v20885_v30 = vld [vmem:[%s29853_s1 + $0x13e0] ss:$16 sps:$4 sm:$0xff]  }
 0x261   :  { %5835 = vmatprep.subr.bf16.mxu1 %v20836_v55  ;;  %v20888_v45 = vld [vmem:[%s29853_s1 + $0x15e0] ss:$16 sps:$4 sm:$0xff]   ;;  %v20893_v50 = vld [vmem:[%s29853_s1 + $0x13c4] ss:$16 sps:$4 sm:$0xff]  }
 0x262   :  { %v20896_v51 = vld [vmem:[%s29853_s1 + $0x15c4] ss:$16 sps:$4 sm:$0xff]   ;;  %v20891_v44 = vld [vmem:[%s29853_s1 + $0x13c0] ss:$16 sps:$4 sm:$0xff]  }
 0x263   :  { %5795 = vmatpush1.bf16.msra.mxu0 %v20831_v56  ;;  %v20894_v54 = vld [vmem:[%s29853_s1 + $0x15c0] ss:$16 sps:$4 sm:$0xff]   ;;  %v20899_v55 = vld [vmem:[%s29853_s1 + $0x13a4] ss:$16 sps:$4 sm:$0xff]  }
 0x264   :  { %5836 = vmatpush1.bf16.msra.mxu1 %v20834_v57  ;;  %5796 = vmatprep.subr.bf16.mxu0 %v20839_v59  ;;  %v20902_v56 = vld [vmem:[%s29853_s1 + $0x15a4] ss:$16 sps:$4 sm:$0xff]   ;;  %v20897_v57 = vld [vmem:[%s29853_s1 + $0x13a0] ss:$16 sps:$4 sm:$0xff]  }
 0x265   :  { %5837 = vmatprep.subr.bf16.mxu1 %v20842_v60  ;;  %v20900_v59 = vld [vmem:[%s29853_s1 + $0x15a0] ss:$16 sps:$4 sm:$0xff]   ;;  %v20905_v60 = vld [vmem:[%s29853_s1 + $0x1384] ss:$16 sps:$4 sm:$0xff]  }
 0x267   :  { %5797 = vmatpush1.bf16.msra.mxu0 %v20837_v61  ;;  %v20908_v61 = vld [vmem:[%s29853_s1 + $0x1584] ss:$16 sps:$4 sm:$0xff]  }
 0x268   :  { %5838 = vmatpush1.bf16.msra.mxu1 %v20840_v62  ;;  %5798 = vmatprep.subr.bf16.mxu0 %v20845_v63  ;;  %v20903_v62 = vld [vmem:[%s29853_s1 + $0x1380] ss:$16 sps:$4 sm:$0xff]  }
 0x269   :  { %5839 = vmatprep.subr.bf16.mxu1 %v20848_v1  ;;  %v20906_v63 = vld [vmem:[%s29853_s1 + $0x1580] ss:$16 sps:$4 sm:$0xff]   ;;  %v20911_v1 = vld [vmem:[%s29853_s1 + $0x1364] ss:$16 sps:$4 sm:$0xff]  }
 0x26b   :  { %5799 = vmatpush1.bf16.msra.mxu0 %v20843_v2  ;;  %v20914_v2 = vld [vmem:[%s29853_s1 + $0x1564] ss:$16 sps:$4 sm:$0xff]  }
 0x26c   :  { %5840 = vmatpush1.bf16.msra.mxu1 %v20846_v24  ;;  %5800 = vmatprep.subr.bf16.mxu0 %v20851_v3 }
 0x26d   :  { %5841 = vmatprep.subr.bf16.mxu1 %v20854_v4 }
 0x26f   :  { %5801 = vmatpush1.bf16.msra.mxu0 %v20849_v15  ;;  %v20909_v15 = vld [vmem:[%s29853_s1 + $0x1360] ss:$16 sps:$4 sm:$0xff]  }
 0x270   :  { %5842 = vmatpush1.bf16.msra.mxu1 %v20852_v5  ;;  %5802 = vmatprep.subr.bf16.mxu0 %v20857_v10  ;;  %v20912_v5 = vld [vmem:[%s29853_s1 + $0x1560] ss:$16 sps:$4 sm:$0xff]  }
 0x271   :  { %5843 = vmatprep.subr.bf16.mxu1 %v20860_v11 }
 0x273   :  { %5803 = vmatpush1.bf16.msra.mxu0 %v20855_v0  ;;  %v20917_v0 = vld [vmem:[%s29853_s1 + $0x1744] ss:$16 sps:$4 sm:$0xff]  }
 0x274   :  { %5844 = vmatpush1.bf16.msra.mxu1 %v20858_v12  ;;  %5804 = vmatprep.subr.bf16.mxu0 %v20863_v48  ;;  %v20920_v12 = vld [vmem:[%s29853_s1 + $0x1864] ss:$16 sps:$4 sm:$0xff]  }
 0x275   :  { %5845 = vmatprep.subr.bf16.mxu1 %v20866_v13 }
 0x277   :  { %5805 = vmatpush1.bf16.msra.mxu0 %v20861_v14 }
 0x278   :  { %5846 = vmatpush1.bf16.msra.mxu1 %v20864_v17  ;;  %5806 = vmatprep.subr.bf16.mxu0 %v20869_v18 }
 0x279   :  { %5847 = vmatprep.subr.bf16.mxu1 %v20872_v29  ;;  %v20915_v29 = vld [vmem:[%s29853_s1 + $0x1740] ss:$16 sps:$4 sm:$0xff]  }
 0x27b   :  { %5807 = vmatpush2.bf16.msra.mxu0 %v20867_v53  ;;  %v20918_v53 = vld [vmem:[%s29853_s1 + $0x1860] ss:$16 sps:$4 sm:$0xff]  }
 0x27c   :  { %5848 = vmatpush2.bf16.msra.mxu1 %v20870_v58  ;;  %5808 = vmatprep.subr.bf16.mxu0 %v20875_v20 }
 0x27d   :  { %5849 = vmatprep.subr.bf16.mxu1 %v20878_v22  ;;  %v20923_v22 = vld [vmem:[%s29853_s1 + $0x1724] ss:$16 sps:$4 sm:$0xff]  }
 0x27f   :  { %5809 = vmatpush2.bf16.msra.mxu0 %v20873_v25  ;;  %v20926_v25 = vld [vmem:[%s29853_s1 + $0x134c] ss:$16 sps:$4 sm:$0xff]  }
 0x280   :  { %5850 = vmatpush2.bf16.msra.mxu1 %v20876_v34  ;;  %5810 = vmatprep.subr.bf16.mxu0 %v20881_v27  ;;  %v20921_v27 = vld [vmem:[%s29853_s1 + $0x1720] ss:$16 sps:$4 sm:$0xff]  }
 0x281   :  { %5851 = vmatprep.subr.bf16.mxu1 %v20884_v28 }
 0x283   :  { %5811 = vmatpush2.bf16.msra.mxu0 %v20879_v33  ;;  %v20929_v33 = vld [vmem:[%s29853_s1 + $0x1704] ss:$16 sps:$4 sm:$0xff]  }
 0x284   :  { %5852 = vmatpush2.bf16.msra.mxu1 %v20882_v6  ;;  %5812 = vmatprep.subr.bf16.mxu0 %v20887_v7  ;;  %v20924_v7 = vld [vmem:[%s29853_s1 + $0x1348] ss:$16 sps:$4 sm:$0xff]  }
 0x285   :  { %5853 = vmatprep.subr.bf16.mxu1 %v20890_v41  ;;  %v20927_v41 = vld [vmem:[%s29853_s1 + $0x1700] ss:$16 sps:$4 sm:$0xff]  }
 0x287   :  { %5813 = vmatpush2.bf16.msra.mxu0 %v20885_v30 }
 0x288   :  { %5854 = vmatpush2.bf16.msra.mxu1 %v20888_v45  ;;  %5814 = vmatprep.subr.bf16.mxu0 %v20893_v50  ;;  %v20932_v45 = vld [vmem:[%s29853_s1 + $0x132c] ss:$16 sps:$4 sm:$0xff]   ;;  %v20935_v50 = vld [vmem:[%s29853_s1 + $0x16e4] ss:$16 sps:$4 sm:$0xff]  }
 0x289   :  { %5855 = vmatprep.subr.bf16.mxu1 %v20896_v51  ;;  %v20930_v51 = vld [vmem:[%s29853_s1 + $0x1328] ss:$16 sps:$4 sm:$0xff]  }
 0x28b   :  { %5815 = vmatpush2.bf16.msra.mxu0 %v20891_v44  ;;  %v20933_v44 = vld [vmem:[%s29853_s1 + $0x16e0] ss:$16 sps:$4 sm:$0xff]  }
 0x28c   :  { %5856 = vmatpush2.bf16.msra.mxu1 %v20894_v54  ;;  %5816 = vmatprep.subr.bf16.mxu0 %v20899_v55  ;;  %v20938_v54 = vld [vmem:[%s29853_s1 + $0x130c] ss:$16 sps:$4 sm:$0xff]   ;;  %v20941_v55 = vld [vmem:[%s29853_s1 + $0x16c4] ss:$16 sps:$4 sm:$0xff]  }
 0x28d   :  { %5857 = vmatprep.subr.bf16.mxu1 %v20902_v56  ;;  %v20936_v56 = vld [vmem:[%s29853_s1 + $0x1308] ss:$16 sps:$4 sm:$0xff]  }
 0x28f   :  { %5817 = vmatpush2.bf16.msra.mxu0 %v20897_v57  ;;  %v20939_v57 = vld [vmem:[%s29853_s1 + $0x16c0] ss:$16 sps:$4 sm:$0xff]  }
 0x290   :  { %5858 = vmatpush2.bf16.msra.mxu1 %v20900_v59  ;;  %5818 = vmatprep.subr.bf16.mxu0 %v20905_v60  ;;  %v20944_v59 = vld [vmem:[%s29853_s1 + $0x12ec] ss:$16 sps:$4 sm:$0xff]   ;;  %v20942_v60 = vld [vmem:[%s29853_s1 + $0x12e8] ss:$16 sps:$4 sm:$0xff]  }
 0x291   :  { %5859 = vmatprep.subr.bf16.mxu1 %v20908_v61  ;;  %v20945_v61 = vld [vmem:[%s29853_s1 + $0x16a0] ss:$16 sps:$4 sm:$0xff]  }
 0x292   :  { %v4311_v24 = vpop.f32.mrf.mxu0 }
 0x293   :  { %v4352_v3 = vpop.f32.mrf.mxu1  ;;  %v4312_v4 = vadd.f32 %v4311_v24, %v23821_v43  ;;  %5819 = vmatpush2.bf16.msra.mxu0 %v20903_v62  ;;  %v20950_v62 = vld [vmem:[%s29853_s1 + $0x12cc] ss:$16 sps:$4 sm:$0xff]  }
 0x294   :  { %5860 = vmatpush2.bf16.msra.mxu1 %v20906_v63  ;;  %v4313_v10 = vpop.f32.mrf.mxu0  ;;  %5820 = vmatprep.subr.bf16.mxu0 %v20911_v1  ;;  %v20953_v63 = vld [vmem:[%s29853_s1 + $0x1684] ss:$16 sps:$4 sm:$0xff]   ;;  %v20948_v1 = vld [vmem:[%s29853_s1 + $0x12c8] ss:$16 sps:$4 sm:$0xff]   ;;  %v20956_v24 = vld [vmem:[%s29853_s1 + $0x12ac] ss:$16 sps:$4 sm:$0xff]  }
 0x295   :  { %v4354_v11 = vpop.f32.mrf.mxu1  ;;  %5861 = vmatprep.subr.bf16.mxu1 %v20914_v2  ;;  %v25136_v48 = vadd.f32 %v4352_v3, %v4312_v4  ;;  %v4314_v13 = vadd.f32 %v4313_v10, %v23831_v46  ;;  %v20951_v2 = vld [vmem:[%s29853_s1 + $0x1680] ss:$16 sps:$4 sm:$0xff]   ;;  %v20959_v3 = vld [vmem:[%s29853_s1 + $0x1664] ss:$16 sps:$4 sm:$0xff]   ;;  %v20954_v4 = vld [vmem:[%s29853_s1 + $0x12a8] ss:$16 sps:$4 sm:$0xff]  }
 0x296   :  { %v4315_v14 = vpop.f32.mrf.mxu0  ;;  %v20965_v10 = vld [vmem:[%s29853_s1 + $0x1844] ss:$16 sps:$4 sm:$0xff]  }
 0x297   :  { %v4356_v17 = vpop.f32.mrf.mxu1  ;;  %v25139_v18 = vadd.f32 %v4354_v11, %v4314_v13  ;;  %5821 = vmatpush2.bf16.msra.mxu0 %v20909_v15  ;;  %v20957_v15 = vld [vmem:[%s29853_s1 + $0x1660] ss:$16 sps:$4 sm:$0xff]   ;;  %v20960_v11 = vld [vmem:[%s29853_s1 + $0x1288] ss:$16 sps:$4 sm:$0xff]   ;;  %v20971_v13 = vld [vmem:[%s29853_s1 + $0x1824] ss:$16 sps:$4 sm:$0xff]  }
 0x298   :  { %5862 = vmatpush2.bf16.msra.mxu1 %v20912_v5  ;;  %v4316_v58 = vpop.f32.mrf.mxu0  ;;  %5872 = vmatprep.subr.bf16.mxu0 %v20917_v0  ;;  %v20962_v5 = vld [vmem:[%s29853_s1 + $0x128c] ss:$16 sps:$4 sm:$0xff]   ;;  %v20963_v0 = vld [vmem:[%s29853_s1 + $0x1840] ss:$16 sps:$4 sm:$0xff]   ;;  %v20966_v14 = vld [vmem:[%s29853_s1 + $0x1268] ss:$16 sps:$4 sm:$0xff]  }
 0x299   :  { %v4357_v20 = vpop.f32.mrf.mxu1  ;;  %5927 = vmatprep.subr.bf16.mxu1 %v20920_v12  ;;  %v20968_v12 = vld [vmem:[%s29853_s1 + $0x126c] ss:$16 sps:$4 sm:$0xff]   ;;  %v20969_v17 = vld [vmem:[%s29853_s1 + $0x1820] ss:$16 sps:$4 sm:$0xff]   ;;  %v20972_v58 = vld [vmem:[%s29853_s1 + $0x1448] ss:$16 sps:$4 sm:$0xff]  }
 0x29a   :  { %5823 = vmatmul.mubr.bf16.vlgmr.msra.gmra.mxu0 %v23199_v8  ;;  %v20975_v20 = vld [vmem:[%s29853_s1 + $0x1800] ss:$16 sps:$4 sm:$0xff]  }
 0x29b   :  { %5864 = vmatmul.mubr.bf16.vlgmr.msra.gmra.mxu1 %v23201_v9  ;;  %v25155_v34 = vpop.f32.mrf.mxu1  ;;  %5873 = vmatpush1.bf16.msra.mxu0 %v20915_v29  ;;  %v20974_v29 = vld [vmem:[%s29853_s1 + $0x144c] ss:$16 sps:$4 sm:$0xff]  }
 0x29c   :  { %5928 = vmatpush1.bf16.msra.mxu1 %v20918_v53  ;;  %5874 = vmatprep.subr.bf16.mxu0 %v20923_v22  ;;  %v20977_v53 = vld [vmem:[%s29853_s1 + $0x1804] ss:$16 sps:$4 sm:$0xff]   ;;  %v20980_v22 = vld [vmem:[%s29853_s1 + $0x142c] ss:$16 sps:$4 sm:$0xff]  }
 0x29d   :  { %v25160_v28 = vpop.f32.mrf.mxu1  ;;  %5945 = vmatprep.mubr.bf16.mxu1 %v22920_v16  ;;  %5954 = vmatprep.subr.bf16.mxu1 %v20926_v25  ;;  %v20983_v25 = vld [vmem:[%s29853_s1 + $0x17e4] ss:$16 sps:$4 sm:$0xff]  }
 0x29e   :  { %5904 = vmatprep.mubr.bf16.mxu0 %v23283_v36 }
 0x29f   :  { %v4438_v6 = vpop.f32.mrf.mxu1  ;;  %5875 = vmatpush1.bf16.msra.mxu0 %v20921_v27  ;;  %v20978_v27 = vld [vmem:[%s29853_s1 + $0x1428] ss:$16 sps:$4 sm:$0xff]  }
 0x2a0   :  { %5876 = vmatprep.subr.bf16.mxu0 %v20929_v33  ;;  %v20981_v33 = vld [vmem:[%s29853_s1 + $0x17e0] ss:$16 sps:$4 sm:$0xff]   ;;  %v20986_v6 = vld [vmem:[%s29853_s1 + $0x140c] ss:$16 sps:$4 sm:$0xff]  }
 0x2a1   :  { %v4439_v30 = vpop.f32.mrf.mxu1 }
 0x2a2   :  { %v20987_v30 = vld [vmem:[%s29853_s1 + $0x17c0] ss:$16 sps:$4 sm:$0xff]  }
 0x2a3   :  { %18214 = vmatmul.mubr.msk.bf16.vlgmr.msra.gmra.mxu1 %vm1251_vm0, %v23230_v19  ;;  %5877 = vmatpush1.bf16.msra.mxu0 %v20927_v41  ;;  %v20984_v41 = vld [vmem:[%s29853_s1 + $0x1408] ss:$16 sps:$4 sm:$0xff]  }
 0x2a4   :  { %5955 = vmatpush1.bf16.msra.mxu1 %v20924_v7  ;;  %5878 = vmatprep.subr.bf16.mxu0 %v20935_v50  ;;  %v20989_v7 = vld [vmem:[%s29853_s1 + $0x17c4] ss:$16 sps:$4 sm:$0xff]  }
 0x2a5   :  { %5956 = vmatprep.subr.bf16.mxu1 %v20932_v45  ;;  %5986 = vmatprep.mubr.bf16.mxu1 %v23130_v49  ;;  %v20947_v49 = vld [vmem:[%s29853_s1 + $0x16a4] ss:$16 sps:$4 sm:$0xff]   ;;  %v20992_v45 = vld [vmem:[%s29853_s1 + $0x13ec] ss:$16 sps:$4 sm:$0xff]  }
 0x2a6   :  { %v20995_v50 = vld [vmem:[%s29853_s1 + $0x17a4] ss:$16 sps:$4 sm:$0xff]  }
 0x2a7   :  { %5879 = vmatpush1.bf16.msra.mxu0 %v20933_v44  ;;  %v20993_v44 = vld [vmem:[%s29853_s1 + $0x17a0] ss:$16 sps:$4 sm:$0xff]  }
 0x2a8   :  { %5957 = vmatpush1.bf16.msra.mxu1 %v20930_v51  ;;  %5880 = vmatprep.subr.bf16.mxu0 %v20941_v55  ;;  %v20990_v51 = vld [vmem:[%s29853_s1 + $0x13e8] ss:$16 sps:$4 sm:$0xff]   ;;  %v21001_v55 = vld [vmem:[%s29853_s1 + $0x1784] ss:$16 sps:$4 sm:$0xff]  }
 0x2a9   :  { %5958 = vmatprep.subr.bf16.mxu1 %v20938_v54  ;;  %v20998_v54 = vld [vmem:[%s29853_s1 + $0x13cc] ss:$16 sps:$4 sm:$0xff]  }
 0x2ab   :  { %5881 = vmatpush1.bf16.msra.mxu0 %v20939_v57  ;;  %v20999_v57 = vld [vmem:[%s29853_s1 + $0x1780] ss:$16 sps:$4 sm:$0xff]  }
 0x2ac   :  { %5959 = vmatpush1.bf16.msra.mxu1 %v20936_v56  ;;  %5882 = vmatprep.subr.bf16.mxu0 %v20947_v49  ;;  %v20996_v56 = vld [vmem:[%s29853_s1 + $0x13c8] ss:$16 sps:$4 sm:$0xff]   ;;  %v21007_v49 = vld [vmem:[%s29853_s1 + $0x1764] ss:$16 sps:$4 sm:$0xff]  }
 0x2ad   :  { %5960 = vmatprep.subr.bf16.mxu1 %v20944_v59  ;;  %v21004_v59 = vld [vmem:[%s29853_s1 + $0x13ac] ss:$16 sps:$4 sm:$0xff]  }
 0x2af   :  { %5883 = vmatpush1.bf16.msra.mxu0 %v20945_v61 }
 0x2b0   :  { %5961 = vmatpush1.bf16.msra.mxu1 %v20942_v60  ;;  %5884 = vmatprep.subr.bf16.mxu0 %v20953_v63  ;;  %v21005_v63 = vld [vmem:[%s29853_s1 + $0x1760] ss:$16 sps:$4 sm:$0xff]  }
 0x2b1   :  { %5962 = vmatprep.subr.bf16.mxu1 %v20950_v62  ;;  %v21002_v62 = vld [vmem:[%s29853_s1 + $0x13a8] ss:$16 sps:$4 sm:$0xff]  }
 0x2b3   :  { %5885 = vmatpush1.bf16.msra.mxu0 %v20951_v2  ;;  %v21010_v2 = vld [vmem:[%s29853_s1 + $0x138c] ss:$16 sps:$4 sm:$0xff]  }
 0x2b4   :  { %5963 = vmatpush1.bf16.msra.mxu1 %v20948_v1  ;;  %5886 = vmatprep.subr.bf16.mxu0 %v20959_v3 }
 0x2b5   :  { %5964 = vmatprep.subr.bf16.mxu1 %v20956_v24 }
 0x2b7   :  { %5887 = vmatpush1.bf16.msra.mxu0 %v20957_v15 }
 0x2b8   :  { %5965 = vmatpush1.bf16.msra.mxu1 %v20954_v4  ;;  %5888 = vmatprep.subr.bf16.mxu0 %v20965_v10  ;;  %v21008_v10 = vld [vmem:[%s29853_s1 + $0x1388] ss:$16 sps:$4 sm:$0xff]  }
 0x2b9   :  { %5966 = vmatprep.subr.bf16.mxu1 %v20962_v5 }
 0x2bb   :  { %5889 = vmatpush2.bf16.msra.mxu0 %v20963_v0 }
 0x2bc   :  { %5967 = vmatpush1.bf16.msra.mxu1 %v20960_v11  ;;  %5890 = vmatprep.subr.bf16.mxu0 %v20971_v13  ;;  %v21011_v11 = vld [vmem:[%s29853_s1 + $0x1548] ss:$16 sps:$4 sm:$0xff]  }
 0x2bd   :  { %5968 = vmatprep.subr.bf16.mxu1 %v20968_v12 }
 0x2bf   :  { %5891 = vmatpush2.bf16.msra.mxu0 %v20969_v17 }
 0x2c0   :  { %5969 = vmatpush1.bf16.msra.mxu1 %v20966_v14  ;;  %5892 = vmatprep.subr.bf16.mxu0 %v20977_v53 }
 0x2c1   :  { %5970 = vmatprep.subr.bf16.mxu1 %v20974_v29  ;;  %v21014_v29 = vld [vmem:[%s29853_s1 + $0x1368] ss:$16 sps:$4 sm:$0xff]  }
 0x2c3   :  { %5893 = vmatpush2.bf16.msra.mxu0 %v20975_v20 }
 0x2c4   :  { %5971 = vmatpush2.bf16.msra.mxu1 %v20972_v58  ;;  %5894 = vmatprep.subr.bf16.mxu0 %v20983_v25  ;;  %v21025_v58 = vld [vmem:[%s29853_s1 + $0x150c] ss:$16 sps:$4 sm:$0xff]   ;;  %v21020_v25 = vld [vmem:[%s29853_s1 + $0x1748] ss:$16 sps:$4 sm:$0xff]  }
 0x2c5   :  { %5972 = vmatprep.subr.bf16.mxu1 %v20980_v22 }
 0x2c7   :  { %5895 = vmatpush2.bf16.msra.mxu0 %v20981_v33 }
 0x2c8   :  { %5973 = vmatpush2.bf16.msra.mxu1 %v20978_v27  ;;  %5896 = vmatprep.subr.bf16.mxu0 %v20989_v7  ;;  %v21023_v27 = vld [vmem:[%s29853_s1 + $0x1508] ss:$16 sps:$4 sm:$0xff]  }
 0x2c9   :  { %5974 = vmatprep.subr.bf16.mxu1 %v20986_v6  ;;  %v21028_v6 = vld [vmem:[%s29853_s1 + $0x172c] ss:$16 sps:$4 sm:$0xff]   ;;  %v21026_v7 = vld [vmem:[%s29853_s1 + $0x1728] ss:$16 sps:$4 sm:$0xff]  }
 0x2cb   :  { %5897 = vmatpush2.bf16.msra.mxu0 %v20987_v30  ;;  %v21034_v30 = vld [vmem:[%s29853_s1 + $0x170c] ss:$16 sps:$4 sm:$0xff]  }
 0x2cc   :  { %5975 = vmatpush2.bf16.msra.mxu1 %v20984_v41  ;;  %5898 = vmatprep.subr.bf16.mxu0 %v20995_v50  ;;  %v21029_v41 = vld [vmem:[%s29853_s1 + $0x14e8] ss:$16 sps:$4 sm:$0xff]  }
 0x2cd   :  { %5976 = vmatprep.subr.bf16.mxu1 %v20992_v45  ;;  %v21032_v45 = vld [vmem:[%s29853_s1 + $0x1708] ss:$16 sps:$4 sm:$0xff]  }
 0x2ce   :  { %v21035_v50 = vld [vmem:[%s29853_s1 + $0x14c8] ss:$16 sps:$4 sm:$0xff]  }
 0x2cf   :  { %5899 = vmatpush2.bf16.msra.mxu0 %v20993_v44  ;;  %v21038_v44 = vld [vmem:[%s29853_s1 + $0x16e8] ss:$16 sps:$4 sm:$0xff]  }
 0x2d0   :  { %5977 = vmatpush2.bf16.msra.mxu1 %v20990_v51  ;;  %5900 = vmatprep.subr.bf16.mxu0 %v21001_v55  ;;  %v21040_v51 = vld [vmem:[%s29853_s1 + $0x16ec] ss:$16 sps:$4 sm:$0xff]  }
 0x2d1   :  { %5978 = vmatprep.subr.bf16.mxu1 %v20998_v54  ;;  %v21041_v54 = vld [vmem:[%s29853_s1 + $0x14a8] ss:$16 sps:$4 sm:$0xff]   ;;  %v21046_v55 = vld [vmem:[%s29853_s1 + $0x16cc] ss:$16 sps:$4 sm:$0xff]  }
 0x2d2   :  { %v4393_v60 = vpop.f32.mrf.mxu0 }
 0x2d3   :  { %v4394_v61 = vadd.f32 %v4393_v60, %v25136_v48  ;;  %5901 = vmatpush2.bf16.msra.mxu0 %v20999_v57  ;;  %v21013_v48 = vld [vmem:[%s29853_s1 + $0x154c] ss:$16 sps:$4 sm:$0xff]   ;;  %v21044_v57 = vld [vmem:[%s29853_s1 + $0x16c8] ss:$16 sps:$4 sm:$0xff]  }
 0x2d4   :  { %5979 = vmatpush2.bf16.msra.mxu1 %v20996_v56  ;;  %v4395_v1 = vpop.f32.mrf.mxu0  ;;  %5902 = vmatprep.subr.bf16.mxu0 %v21007_v49  ;;  %v21049_v56 = vld [vmem:[%s29853_s1 + $0x148c] ss:$16 sps:$4 sm:$0xff]  }
 0x2d5   :  { %5980 = vmatprep.subr.bf16.mxu1 %v21004_v59  ;;  %v4435_v24 = vadd.f32 %v25155_v34, %v4394_v61  ;;  %v4396_v3 = vadd.f32 %v4395_v1, %v25139_v18  ;;  %v21016_v18 = vld [vmem:[%s29853_s1 + $0x136c] ss:$16 sps:$4 sm:$0xff]   ;;  %v21047_v59 = vld [vmem:[%s29853_s1 + $0x1488] ss:$16 sps:$4 sm:$0xff]  }
 0x2d6   :  { %v4397_v4 = vpop.f32.mrf.mxu0  ;;  %v21019_v34 = vld [vmem:[%s29853_s1 + $0x152c] ss:$16 sps:$4 sm:$0xff]   ;;  %v21050_v61 = vld [vmem:[%s29853_s1 + $0x16a8] ss:$16 sps:$4 sm:$0xff]  }
 0x2d7   :  { %v4605_v15 = vmax.f32 %v4435_v24, 0.0  ;;  %v4437_v5 = vadd.f32 %v25160_v28, %v4396_v3  ;;  %5903 = vmatpush2.bf16.msra.mxu0 %v21005_v63  ;;  %v21052_v49 = vld [vmem:[%s29853_s1 + $0x16ac] ss:$16 sps:$4 sm:$0xff]   ;;  %v21062_v4 = vld [vmem:[%s29853_s1 + $0x1668] ss:$16 sps:$4 sm:$0xff]  }
 0x2d8   :  { %5981 = vmatpush2.bf16.msra.mxu1 %v21002_v62  ;;  %v4398_v0 = vpop.f32.mrf.mxu0  ;;  %5995 = vmatprep.subr.bf16.mxu0 %v21013_v48  ;;  %v21055_v60 = vld [vmem:[%s29853_s1 + $0x146c] ss:$16 sps:$4 sm:$0xff]   ;;  %v21053_v62 = vld [vmem:[%s29853_s1 + $0x1468] ss:$16 sps:$4 sm:$0xff]  }
 0x2d9   :  { %5982 = vmatprep.subr.bf16.mxu1 %v21010_v2  ;;  %v25355_v28 = vmax.f32 %v24716_v35, %v4605_v15  ;;  %v4606_v12 = vmax.f32 %v4437_v5, 0.0  ;;  %v21017_v35 = vld [vmem:[%s29853_s1 + $0x1528] ss:$16 sps:$4 sm:$0xff]   ;;  %v21058_v63 = vld [vmem:[%s29853_s1 + $0x168c] ss:$16 sps:$4 sm:$0xff]  }
 0x2da   :  { %5905 = vmatmul.mubr.bf16.vlgmr.msra.gmra.mxu0 %v23412_v21  ;;  %v21061_v1 = vld [vmem:[%s29853_s1 + $0x164c] ss:$16 sps:$4 sm:$0xff]   ;;  %v21056_v2 = vld [vmem:[%s29853_s1 + $0x1688] ss:$16 sps:$4 sm:$0xff]  }
 0x2db   :  { %v4475_v13 = vpop.f32.mrf.mxu1  ;;  %v25359_v14 = vmax.f32 %v24719_v23, %v4606_v12  ;;  %5996 = vmatpush1.bf16.msra.mxu0 %v21011_v11  ;;  %v21022_v23 = vld [vmem:[%s29853_s1 + $0x174c] ss:$16 sps:$4 sm:$0xff]   ;;  %6027 = vmatprep.mubr.bf16.mxu0 %v23138_v52  ;;  %v21059_v48 = vld [vmem:[%s29853_s1 + $0x1648] ss:$16 sps:$4 sm:$0xff]  }
 0x2dc   :  { %v25362_v17 = vadd.f32 %v4475_v13, %v24067_v37  ;;  %5983 = vmatpush2.bf16.msra.mxu1 %v21008_v10  ;;  %5997 = vmatprep.subr.bf16.mxu0 %v21019_v34  ;;  %v21031_v52 = vld [vmem:[%s29853_s1 + $0x14ec] ss:$16 sps:$4 sm:$0xff]   ;;  %v21065_v15 = vld [vmem:[%s29853_s1 + $0x1628] ss:$16 sps:$4 sm:$0xff]  }
 0x2dd   :  { %v4477_v53 = vpop.f32.mrf.mxu1  ;;  %5984 = vmatprep.subr.bf16.mxu1 %v21016_v18  ;;  %v21064_v24 = vld [vmem:[%s29853_s1 + $0x166c] ss:$16 sps:$4 sm:$0xff]   ;;  %v21068_v11 = vld [vmem:[%s29853_s1 + $0x1848] ss:$16 sps:$4 sm:$0xff]  }
 0x2de   :  { %v25377_v20 = vadd.f32 %v4477_v53, %v24080_v42  ;;  %v21067_v3 = vld [vmem:[%s29853_s1 + $0x162c] ss:$16 sps:$4 sm:$0xff]   ;;  %v21071_v0 = vld [vmem:[%s29853_s1 + $0x1608] ss:$16 sps:$4 sm:$0xff]  }
 0x2df   :  { %v4479_v22 = vpop.f32.mrf.mxu1  ;;  %5998 = vmatpush1.bf16.msra.mxu0 %v21017_v35  ;;  %v21070_v5 = vld [vmem:[%s29853_s1 + $0x184c] ss:$16 sps:$4 sm:$0xff]   ;;  %v21074_v12 = vld [vmem:[%s29853_s1 + $0x1828] ss:$16 sps:$4 sm:$0xff]  }
 0x2e0   :  { %5985 = vmatpush2.bf16.msra.mxu1 %v21014_v29  ;;  %5999 = vmatprep.subr.bf16.mxu0 %v21025_v58  ;;  %v21073_v10 = vld [vmem:[%s29853_s1 + $0x160c] ss:$16 sps:$4 sm:$0xff]   ;;  %v21077_v13 = vld [vmem:[%s29853_s1 + $0x15e8] ss:$16 sps:$4 sm:$0xff]  }
 0x2e1   :  { %v4480_v33 = vpop.f32.mrf.mxu1  ;;  %6036 = vmatprep.subr.bf16.mxu1 %v21022_v23  ;;  %v21076_v18 = vld [vmem:[%s29853_s1 + $0x182c] ss:$16 sps:$4 sm:$0xff]   ;;  %v21080_v53 = vld [vmem:[%s29853_s1 + $0x1808] ss:$16 sps:$4 sm:$0xff]  }
 0x2e2   :  { %v21079_v34 = vld [vmem:[%s29853_s1 + $0x15ec] ss:$16 sps:$4 sm:$0xff]   ;;  %v21083_v23 = vld [vmem:[%s29853_s1 + $0x15c8] ss:$16 sps:$4 sm:$0xff]  }
 0x2e3   :  { %5987 = vmatmul.mubr.bf16.vlgmr.msra.gmra.mxu1 %v23199_v8  ;;  %6000 = vmatpush1.bf16.msra.mxu0 %v21023_v27  ;;  %v21037_v8 = vld [vmem:[%s29853_s1 + $0x14cc] ss:$16 sps:$4 sm:$0xff]   ;;  %v21089_v27 = vld [vmem:[%s29853_s1 + $0x15a8] ss:$16 sps:$4 sm:$0xff]  }
 0x2e4   :  { %6037 = vmatpush1.bf16.msra.mxu1 %v21020_v25  ;;  %6001 = vmatprep.subr.bf16.mxu0 %v21031_v52  ;;  %v21082_v29 = vld [vmem:[%s29853_s1 + $0x180c] ss:$16 sps:$4 sm:$0xff]   ;;  %v21086_v25 = vld [vmem:[%s29853_s1 + $0x17e8] ss:$16 sps:$4 sm:$0xff]  }
 0x2e5   :  { %6038 = vmatprep.subr.bf16.mxu1 %v21028_v6  ;;  %6068 = vmatprep.mubr.bf16.mxu1 %v23283_v36  ;;  %v21043_v36 = vld [vmem:[%s29853_s1 + $0x14ac] ss:$16 sps:$4 sm:$0xff]   ;;  %v21092_v52 = vld [vmem:[%s29853_s1 + $0x17c8] ss:$16 sps:$4 sm:$0xff]  }
 0x2e6   :  { %v21085_v35 = vld [vmem:[%s29853_s1 + $0x15cc] ss:$16 sps:$4 sm:$0xff]  }
 0x2e7   :  { %6002 = vmatpush1.bf16.msra.mxu0 %v21029_v41  ;;  %v21088_v58 = vld [vmem:[%s29853_s1 + $0x17ec] ss:$16 sps:$4 sm:$0xff]  }
 0x2e8   :  { %6039 = vmatpush1.bf16.msra.mxu1 %v21026_v7  ;;  %6003 = vmatprep.subr.bf16.mxu0 %v21037_v8  ;;  %v21091_v22 = vld [vmem:[%s29853_s1 + $0x15ac] ss:$16 sps:$4 sm:$0xff]   ;;  %v21095_v7 = vld [vmem:[%s29853_s1 + $0x1588] ss:$16 sps:$4 sm:$0xff]  }
 0x2e9   :  { %6040 = vmatprep.subr.bf16.mxu1 %v21034_v30  ;;  %v21094_v33 = vld [vmem:[%s29853_s1 + $0x17cc] ss:$16 sps:$4 sm:$0xff]   ;;  %v21098_v8 = vld [vmem:[%s29853_s1 + $0x17a8] ss:$16 sps:$4 sm:$0xff]  }
 0x2ea   :  { %v21097_v6 = vld [vmem:[%s29853_s1 + $0x158c] ss:$16 sps:$4 sm:$0xff]  }
 0x2eb   :  { %6004 = vmatpush1.bf16.msra.mxu0 %v21035_v50  ;;  %v21100_v41 = vld [vmem:[%s29853_s1 + $0x17ac] ss:$16 sps:$4 sm:$0xff]  }
 0x2ec   :  { %6041 = vmatpush1.bf16.msra.mxu1 %v21032_v45  ;;  %6005 = vmatprep.subr.bf16.mxu0 %v21043_v36  ;;  %v21103_v30 = vld [vmem:[%s29853_s1 + $0x156c] ss:$16 sps:$4 sm:$0xff]   ;;  %v21101_v45 = vld [vmem:[%s29853_s1 + $0x1568] ss:$16 sps:$4 sm:$0xff]  }
 0x2ed   :  { %6042 = vmatprep.subr.bf16.mxu1 %v21040_v51  ;;  %v21106_v51 = vld [vmem:[%s29853_s1 + $0x178c] ss:$16 sps:$4 sm:$0xff]  }
 0x2ee   :  { %v21109_v36 = vld [vmem:[%s29853_s1 + $0x186c] ss:$16 sps:$4 sm:$0xff]  }
 0x2ef   :  { %6006 = vmatpush1.bf16.msra.mxu0 %v21041_v54 }
 0x2f0   :  { %6043 = vmatpush1.bf16.msra.mxu1 %v21038_v44  ;;  %6007 = vmatprep.subr.bf16.mxu0 %v21049_v56  ;;  %v21104_v56 = vld [vmem:[%s29853_s1 + $0x1788] ss:$16 sps:$4 sm:$0xff]  }
 0x2f1   :  { %6044 = vmatprep.subr.bf16.mxu1 %v21046_v55 }
 0x2f3   :  { %6008 = vmatpush1.bf16.msra.mxu0 %v21047_v59 }
 0x2f4   :  { %6045 = vmatpush1.bf16.msra.mxu1 %v21044_v57  ;;  %6009 = vmatprep.subr.bf16.mxu0 %v21055_v60  ;;  %v21107_v57 = vld [vmem:[%s29853_s1 + $0x1868] ss:$16 sps:$4 sm:$0xff]  }
 0x2f5   :  { %6046 = vmatprep.subr.bf16.mxu1 %v21052_v49  ;;  %v21112_v49 = vld [vmem:[%s29853_s1 + $0x176c] ss:$16 sps:$4 sm:$0xff]  }
 0x2f7   :  { %6010 = vmatpush1.bf16.msra.mxu0 %v21053_v62 }
 0x2f8   :  { %6047 = vmatpush1.bf16.msra.mxu1 %v21050_v61  ;;  %6011 = vmatprep.subr.bf16.mxu0 %v21061_v1 }
 0x2f9   :  { %6048 = vmatprep.subr.bf16.mxu1 %v21058_v63  ;;  %v21110_v63 = vld [vmem:[%s29853_s1 + $0x1768] ss:$16 sps:$4 sm:$0xff]  }
 0x2fb   :  { %6012 = vmatpush2.bf16.msra.mxu0 %v21059_v48 }
 0x2fc   :  { %6049 = vmatpush1.bf16.msra.mxu1 %v21056_v2  ;;  %6013 = vmatprep.subr.bf16.mxu0 %v21067_v3 }
 0x2fd   :  { %6050 = vmatprep.subr.bf16.mxu1 %v21064_v24 }
 0x2ff   :  { %6014 = vmatpush2.bf16.msra.mxu0 %v21065_v15 }
 0x300   :  { %6051 = vmatpush1.bf16.msra.mxu1 %v21062_v4  ;;  %6015 = vmatprep.subr.bf16.mxu0 %v21073_v10  ;;  %v21115_v10 = vld [vmem:[%s29856_s2 + $0x70] sm:$0xff]  }
 0x301   :  { %6052 = vmatprep.subr.bf16.mxu1 %v21070_v5 }
 0x303   :  { %6016 = vmatpush2.bf16.msra.mxu0 %v21071_v0 }
 0x304   :  { %6053 = vmatpush2.bf16.msra.mxu1 %v21068_v11  ;;  %6017 = vmatprep.subr.bf16.mxu0 %v21079_v34 }
 0x305   :  { %6054 = vmatprep.subr.bf16.mxu1 %v21076_v18 }
 0x307   :  { %6018 = vmatpush2.bf16.msra.mxu0 %v21077_v13 }
 0x308   :  { %6055 = vmatpush2.bf16.msra.mxu1 %v21074_v12  ;;  %6019 = vmatprep.subr.bf16.mxu0 %v21085_v35  ;;  %v21116_v12 = vld [vmem:[%s29856_s2 + $0x30] sm:$0xff]   ;;  %v21122_v35 = vld [vmem:[%s29856_s2 + $0x18] sm:$0xff]  }
 0x309   :  { %6056 = vmatprep.subr.bf16.mxu1 %v21082_v29  ;;  %v21117_v29 = vld [vmem:[%s29856_s2 + $0x68] sm:$0xff]  }
 0x30b   :  { %6020 = vmatpush2.bf16.msra.mxu0 %v21083_v23  ;;  %v21124_v23 = vld [vmem:[%s29856_s2 + $0x10] sm:$0xff]  }
 0x30c   :  { %6057 = vmatpush2.bf16.msra.mxu1 %v21080_v53  ;;  %6021 = vmatprep.subr.bf16.mxu0 %v21091_v22  ;;  %v21123_v53 = vld [vmem:[%s29856_s2 + $0x50] sm:$0xff]   ;;  %v21126_v22 = vld [vmem:[%s29856_s2 + $0x8] sm:$0xff]  }
 0x30d   :  { %6058 = vmatprep.subr.bf16.mxu1 %v21088_v58  ;;  %v21125_v58 = vld [vmem:[%s29856_s2 + $0x48] sm:$0xff]  }
 0x30f   :  { %6022 = vmatpush2.bf16.msra.mxu0 %v21089_v27  ;;  %v21128_v27 = vld [vmem:[%s29856_s2] sm:$0xff]  }
 0x310   :  { %6059 = vmatpush2.bf16.msra.mxu1 %v21086_v25  ;;  %6023 = vmatprep.subr.bf16.mxu0 %v21097_v6  ;;  %v21127_v25 = vld [vmem:[%s29856_s2 + $0x40] sm:$0xff]   ;;  %v21147_v6 = vld [vmem:[%s29856_s2 + $0xb8] sm:$0xff]  }
 0x311   :  { %6060 = vmatprep.subr.bf16.mxu1 %v21094_v33  ;;  %v21129_v33 = vld [vmem:[%s29856_s2 + $0x140] sm:$0xff]  }
 0x312   :  { %v4516_v50 = vpop.f32.mrf.mxu0 }
 0x313   :  { %v4517_v44 = vadd.f32 %v4516_v50, %v25362_v17  ;;  %6024 = vmatpush2.bf16.msra.mxu0 %v21095_v7  ;;  %v21113_v17 = vld [vmem:[%s29856_s2 + $0x78] sm:$0xff]   ;;  %v21153_v7 = vld [vmem:[%s29856_s2 + $0xa8] sm:$0xff]  }
 0x314   :  { %6061 = vmatpush2.bf16.msra.mxu1 %v21092_v52  ;;  %v4518_v54 = vpop.f32.mrf.mxu0  ;;  %6025 = vmatprep.subr.bf16.mxu0 %v21103_v30  ;;  %v21150_v52 = vld [vmem:[%s29856_s2 + $0xb0] sm:$0xff]  }
 0x315   :  { %6062 = vmatprep.subr.bf16.mxu1 %v21100_v41  ;;  %v4519_v55 = vadd.f32 %v4518_v54, %v25377_v20  ;;  %v21156_v41 = vld [vmem:[%s29856_s2 + $0xa0] sm:$0xff]   ;;  %v21162_v54 = vld [vmem:[%s29856_s2 + $0x90] sm:$0xff]  }
 0x316   :  { %v4520_v59 = vpop.f32.mrf.mxu0 }
 0x317   :  { %6026 = vmatpush2.bf16.msra.mxu0 %v21101_v45  ;;  %v21159_v45 = vld [vmem:[%s29856_s2 + $0x98] sm:$0xff]   ;;  %v21165_v59 = vld [vmem:[%s29856_s2 + $0x88] sm:$0xff]  }
 0x318   :  { %6063 = vmatpush2.bf16.msra.mxu1 %v21098_v8  ;;  %v4521_v20 = vpop.f32.mrf.mxu0  ;;  %6091 = vmatprep.subr.bf16.mxu0 %v21109_v36 }
 0x319   :  { %6064 = vmatprep.subr.bf16.mxu1 %v21106_v51  ;;  %v21168_v20 = vld [vmem:[%s29856_s2 + $0x80] sm:$0xff]  }
 0x31a   :  { %6028 = vmatmul.mubr.bf16.vlgmr.msra.gmra.mxu0 %v23201_v9  ;;  %v4598_v61 = vpop.f32.mrf.mxu0  ;;  %v21114_v9 = vld [vmem:[%s29856_s2 + $0x38] sm:$0xff]  }
 0x31b   :  { %v4557_v60 = vpop.f32.mrf.mxu1  ;;  %6092 = vmatpush1.bf16.msra.mxu0 %v21107_v57  ;;  %6109 = vmatprep.mubr.bf16.mxu0 %v22920_v16 }
 0x31c   :  { %v4558_v62 = vadd.f32 %v4557_v60, %v4517_v44  ;;  %6065 = vmatpush2.bf16.msra.mxu1 %v21104_v56  ;;  %v4600_v2 = vpop.f32.mrf.mxu0  ;;  %19662 = vmatprep.subr.bf16.mxu0 %v21113_v17 }
 0x31d   :  { %v4559_v1 = vpop.f32.mrf.mxu1  ;;  %6066 = vmatprep.subr.bf16.mxu1 %v21112_v49 }
 0x31e   :  { %v4599_v48 = vadd.f32 %v4598_v61, %v4558_v62  ;;  %v4560_v24 = vadd.f32 %v4559_v1, %v4519_v55  ;;  %v4602_v4 = vpop.f32.mrf.mxu0  ;;  %v21171_v61 = vld [vmem:[%s29856_s2 + $0xc0] sm:$0xff]  }
 0x31f   :  { %v4561_v3 = vpop.f32.mrf.mxu1 }
 0x320   :  { %v4607_v15 = vmax.f32 %v4599_v48, 0.0  ;;  %v4601_v5 = vadd.f32 %v4600_v2, %v4560_v24  ;;  %6067 = vmatpush2.bf16.msra.mxu1 %v21110_v63  ;;  %v4603_v0 = vpop.f32.mrf.mxu0 }
 0x321   :  { %v4562_v11 = vpop.f32.mrf.mxu1  ;;  %6380 = vmatprep.subr.bf16.mxu1 %v22920_v16 }
 0x322   :  { %v25577_v18 = vmax.f32 %v24946_v47, %v4607_v15  ;;  %v4608_v34 = vmax.f32 %v4601_v5, 0.0  ;;  %18215 = vmatmul.mubr.msk.bf16.vlgmr.msra.gmra.mxu0 %vm1251_vm0, %v23230_v19  ;;  %v21119_v19 = vld [vmem:[%s29856_s2 + $0x60] sm:$0xff]  }
 0x323   :  { %6069 = vmatmul.mubr.bf16.vlgmr.msra.gmra.mxu1 %v23412_v21  ;;  %19663 = vmatpush3.bf16.msra.mxu0 %v21114_v9  ;;  %v21118_v21 = vld [vmem:[%s29856_s2 + $0x28] sm:$0xff]   ;;  %v21120_v47 = vld [vmem:[%s29856_s2 + $0x20] sm:$0xff]  }
 0x324   :  { %v25586_v13 = vmax.f32 %v24951_v39, %v4608_v34  ;;  %19664 = vmatprep.subr.bf16.mxu0 %v21115_v10  ;;  %v21121_v39 = vld [vmem:[%s29856_s2 + $0x58] sm:$0xff]   ;;  %6381 = vmatpush1.bf16.msra.mxu1 %v21147_v6  ;;  %v21141_v6 = vld [vmem:[%s29856_s2 + $0x110] sm:$0xff]  }
 0x325   :  { %6382 = vmatprep.subr.bf16.mxu1 %v22920_v16 }
 0x327   :  { %19665 = vmatpush3.bf16.msra.mxu0 %v21116_v12 }
 0x328   :  { %19666 = vmatprep.subr.bf16.mxu0 %v21117_v29  ;;  %6383 = vmatpush1.bf16.msra.mxu1 %v21150_v52  ;;  %v21142_v52 = vld [vmem:[%s29856_s2 + $0xd0] sm:$0xff]  }
 0x329   :  { %6384 = vmatprep.subr.bf16.mxu1 %v22920_v16 }
 0x32b   :  { %19667 = vmatpush3.bf16.msra.mxu0 %v21118_v21  ;;  %v21130_v21 = vld [vmem:[%s29856_s2 + $0x100] sm:$0xff]  }
 0x32c   :  { %19668 = vmatprep.subr.bf16.mxu0 %v21119_v19  ;;  %6385 = vmatpush1.bf16.msra.mxu1 %v21153_v7  ;;  %v21143_v7 = vld [vmem:[%s29856_s2 + $0x108] sm:$0xff]  }
 0x32d   :  { %6386 = vmatprep.subr.bf16.mxu1 %v22920_v16 }
 0x32f   :  { %19669 = vmatpush3.bf16.msra.mxu0 %v21120_v47 }
 0x330   :  { %19670 = vmatprep.subr.bf16.mxu0 %v21121_v39  ;;  %6387 = vmatpush1.bf16.msra.mxu1 %v21156_v41  ;;  %v21144_v41 = vld [vmem:[%s29856_s2 + $0xc8] sm:$0xff]  }
 0x331   :  { %6388 = vmatprep.subr.bf16.mxu1 %v22920_v16 }
 0x333   :  { %19671 = vmatpush3.bf16.msra.mxu0 %v21122_v35  ;;  %v21133_v35 = vld [vmem:[%s29856_s2 + $0x130] sm:$0xff]  }
 0x334   :  { %19672 = vmatprep.subr.bf16.mxu0 %v21123_v53  ;;  %6389 = vmatpush1.bf16.msra.mxu1 %v21159_v45  ;;  %v21134_v53 = vld [vmem:[%s29856_s2 + $0xf0] sm:$0xff]   ;;  %v21148_v45 = vld [vmem:[%s29856_s2 + $0x200] sm:$0xff]  }
 0x335   :  { %6390 = vmatprep.subr.bf16.mxu1 %v22920_v16 }
 0x337   :  { %19673 = vmatpush3.bf16.msra.mxu0 %v21124_v23  ;;  %v21135_v23 = vld [vmem:[%s29856_s2 + $0x128] sm:$0xff]  }
 0x338   :  { %19674 = vmatprep.subr.bf16.mxu0 %v21125_v58  ;;  %6391 = vmatpush1.bf16.msra.mxu1 %v21162_v54  ;;  %v21136_v58 = vld [vmem:[%s29856_s2 + $0xe8] sm:$0xff]   ;;  %v21155_v54 = vld [vmem:[%s29856_s2 + $0x1b0] sm:$0xff]  }
 0x339   :  { %6392 = vmatprep.subr.bf16.mxu1 %v22920_v16 }
 0x33b   :  { %19675 = vmatpush3.bf16.msra.mxu0 %v21126_v22  ;;  %v21137_v22 = vld [vmem:[%s29856_s2 + $0x120] sm:$0xff]  }
 0x33c   :  { %19676 = vmatprep.subr.bf16.mxu0 %v21127_v25  ;;  %6393 = vmatpush1.bf16.msra.mxu1 %v21165_v59  ;;  %v21138_v25 = vld [vmem:[%s29856_s2 + $0xe0] sm:$0xff]  }
 0x33d   :  { %6394 = vmatprep.subr.bf16.mxu1 %v22920_v16  ;;  %v21161_v59 = vld [vmem:[%s29856_s2 + $0x1a0] sm:$0xff]  }
 0x33f   :  { %19677 = vmatpush3.bf16.msra.mxu0 %v21128_v27  ;;  %v21139_v27 = vld [vmem:[%s29856_s2 + $0x118] sm:$0xff]  }
 0x340   :  { %19684 = vmatprep.subr.bf16.mxu0 %v21129_v33  ;;  %6395 = vmatpush1.bf16.msra.mxu1 %v21168_v20  ;;  %v21140_v33 = vld [vmem:[%s29856_s2 + $0xd8] sm:$0xff]  }
 0x341   :  { %6410 = vmatprep.subr.bf16.mxu1 %v22920_v16 }
 0x344   :  { %6411 = vmatpush2.bf16.msra.mxu1 %v21171_v61 }
 0x345   :  { %6662 = vmatprep.subr.bf16.mxu1 %v22920_v16 }
 0x35a   :  { %v5824_v30 = vpop.f32.mrf.mxu0 }
 0x35b   :  { %v5865_v8 = vpop.f32.mrf.mxu1  ;;  %v5825_v62 = vadd.f32 %v5824_v30, %v23821_v43  ;;  %v21145_v30 = vld [vmem:[%s29856_s2 + $0x208] sm:$0xff]  }
 0x35c   :  { %v5826_v50 = vpop.f32.mrf.mxu0 }
 0x35d   :  { %v5867_v51 = vpop.f32.mrf.mxu1  ;;  %v5827_v63 = vadd.f32 %v5826_v50, %v23831_v46  ;;  %v5866_v1 = vadd.f32 %v5865_v8, %v5825_v62  ;;  %v21146_v8 = vld [vmem:[%s29856_s2 + $0x1c8] sm:$0xff]   ;;  %v21149_v50 = vld [vmem:[%s29856_s2 + $0x1c0] sm:$0xff]   ;;  %v21166_v62 = vld [vmem:[%s29856_s2 + $0x1d0] sm:$0xff]  }
 0x35e   :  { %v5828_v36 = vpop.f32.mrf.mxu0 }
 0x35f   :  { %v5869_v44 = vpop.f32.mrf.mxu1  ;;  %v5868_v48 = vadd.f32 %v5867_v51, %v5827_v63  ;;  %v21151_v51 = vld [vmem:[%s29856_s2 + $0x1f8] sm:$0xff]  }
 0x360   :  { %v5829_v55 = vpop.f32.mrf.mxu0  ;;  %v21152_v36 = vld [vmem:[%s29856_s2 + $0x1b8] sm:$0xff]   ;;  %v21154_v44 = vld [vmem:[%s29856_s2 + $0x1f0] sm:$0xff]  }
 0x361   :  { %v5870_v56 = vpop.f32.mrf.mxu1  ;;  %v21157_v55 = vld [vmem:[%s29856_s2 + $0x1e8] sm:$0xff]  }
 0x362   :  { %v21158_v56 = vld [vmem:[%s29856_s2 + $0x1a8] sm:$0xff]  }
 0x363   :  { %v5947_v57 = vpop.f32.mrf.mxu1 }
 0x365   :  { %v5949_v49 = vpop.f32.mrf.mxu1 }
 0x367   :  { %v5951_v17 = vpop.f32.mrf.mxu1 }
 0x368   :  { %v21163_v17 = vld [vmem:[%s29856_s2 + $0x1d8] sm:$0xff]  }
 0x369   :  { %v5952_v60 = vpop.f32.mrf.mxu1 }
 0x36a   :  { %v21164_v60 = vld [vmem:[%s29856_s2 + $0x198] sm:$0xff]  }
 0x39a   :  { %v5906_v2 = vpop.f32.mrf.mxu0 }
 0x39b   :  { %v5907_v24 = vadd.f32 %v5906_v2, %v5866_v1 }
 0x39c   :  { %v5908_v3 = vpop.f32.mrf.mxu0 }
 0x39d   :  { %v5948_v4 = vadd.f32 %v5947_v57, %v5907_v24  ;;  %v5909_v9 = vadd.f32 %v5908_v3, %v5868_v48  ;;  %v21160_v57 = vld [vmem:[%s29856_s2 + $0x1e0] sm:$0xff]   ;;  %v21167_v24 = vld [vmem:[%s29856_s2 + $0x190] sm:$0xff]  }
 0x39e   :  { %v5910_v15 = vpop.f32.mrf.mxu0 }
 0x39f   :  { %v6118_v5 = vmax.f32 %v5948_v4, 0.0  ;;  %v5950_v10 = vadd.f32 %v5949_v49, %v5909_v9  ;;  %v21169_v9 = vld [vmem:[%s29856_s2 + $0x2d0] sm:$0xff]  }
 0x3a0   :  { %v5911_v11 = vpop.f32.mrf.mxu0 }
 0x3a1   :  { %v6122_v0 = vmax.f32 %v25355_v28, %v6118_v5  ;;  %v6119_v34 = vmax.f32 %v5950_v10, 0.0  ;;  %v21131_v28 = vld [vmem:[%s29856_s2 + $0x138] sm:$0xff]  }
 0x3a3   :  { %v25666_v12 = vpop.f32.mrf.mxu1  ;;  %v6123_v43 = vmax.f32 %v25359_v14, %v6119_v34  ;;  %v25676_v19 = vpack.c.bf16 %v6122_v0, %v6122_v0  ;;  %v21132_v14 = vld [vmem:[%s29856_s2 + $0xf8] sm:$0xff]  }
 0x3a4   :  { %v5989_v63 = vadd.f32 %v25666_v12, %v24067_v37 }
 0x3a5   :  { %v25669_v29 = vpop.f32.mrf.mxu1  ;;  %v25671_v46 = vpack.c.bf16 %v6123_v43, %v6123_v43  ;;  %v21172_v43 = vld [vmem:[%s29856_s2 + $0x2c8] sm:$0xff]  }
 0x3a6   :  { %v5991_v2 = vadd.f32 %v25669_v29, %v24080_v42  ;;  %v21170_v42 = vld [vmem:[%s29856_s2 + $0x290] sm:$0xff]  }
 0x3a7   :  { %v5992_v47 = vpop.f32.mrf.mxu1  ;;  %6372 = vmatprep.mubr.bf16.mxu0 %v25671_v46 }
 0x3a8   :  { %6373 = vmatmul.mubr.bf16.vlgmr.msra.gmra.mxu0 %v25676_v19 }
 0x3a9   :  { %v5993_v39 = vpop.f32.mrf.mxu1  ;;  %19685 = vmatpush3.bf16.msra.mxu0 %v21130_v21  ;;  %6654 = vmatprep.mubr.bf16.mxu0 %v25671_v46 }
 0x3aa   :  { %19686 = vmatprep.subr.bf16.mxu0 %v21131_v28 }
 0x3ad   :  { %19687 = vmatpush3.bf16.msra.mxu0 %v21132_v14 }
 0x3ae   :  { %19688 = vmatprep.subr.bf16.mxu0 %v21133_v35  ;;  %v21173_v35 = vld [vmem:[%s29856_s2 + $0x288] sm:$0xff]  }
 0x3b1   :  { %19689 = vmatpush3.bf16.msra.mxu0 %v21134_v53  ;;  %v21175_v53 = vld [vmem:[%s29856_s2 + $0x2c0] sm:$0xff]  }
 0x3b2   :  { %19690 = vmatprep.subr.bf16.mxu0 %v21135_v23 }
 0x3b5   :  { %19691 = vmatpush3.bf16.msra.mxu0 %v21136_v58 }
 0x3b6   :  { %19692 = vmatprep.subr.bf16.mxu0 %v21137_v22 }
 0x3b9   :  { %19693 = vmatpush3.bf16.msra.mxu0 %v21138_v25  ;;  %v21177_v25 = vld [vmem:[%s29856_s2 + $0x178] sm:$0xff]  }
 0x3ba   :  { %19694 = vmatprep.subr.bf16.mxu0 %v21139_v27  ;;  %v21179_v27 = vld [vmem:[%s29856_s2 + $0x278] sm:$0xff]  }
 0x3bd   :  { %19695 = vmatpush3.bf16.msra.mxu0 %v21140_v33  ;;  %v21181_v33 = vld [vmem:[%s29856_s2 + $0x2b0] sm:$0xff]  }
 0x3be   :  { %19696 = vmatprep.subr.bf16.mxu0 %v21141_v6  ;;  %v21180_v6 = vld [vmem:[%s29856_s2 + $0x170] sm:$0xff]  }
 0x3c1   :  { %19697 = vmatpush3.bf16.msra.mxu0 %v21142_v52  ;;  %v21182_v52 = vld [vmem:[%s29856_s2 + $0x270] sm:$0xff]  }
 0x3c2   :  { %19698 = vmatprep.subr.bf16.mxu0 %v21143_v7  ;;  %v21184_v7 = vld [vmem:[%s29856_s2 + $0x2a8] sm:$0xff]  }
 0x3c5   :  { %19699 = vmatpush3.bf16.msra.mxu0 %v21144_v41  ;;  %v21183_v41 = vld [vmem:[%s29856_s2 + $0x168] sm:$0xff]  }
 0x3c6   :  { %19706 = vmatprep.subr.bf16.mxu0 %v21145_v30  ;;  %v21185_v30 = vld [vmem:[%s29856_s2 + $0x268] sm:$0xff]  }
 0x3c8   :  { %6655 = vmatmul.mubr.bf16.vlgmr.msra.gmra.mxu0 %v25676_v19 }
 0x3c9   :  { %19707 = vmatpush3.bf16.msra.mxu0 %v21146_v8  ;;  %6937 = vmatprep.mubr.bf16.mxu0 %v25671_v46  ;;  %v21187_v8 = vld [vmem:[%s29856_s2 + $0x2a0] sm:$0xff]  }
 0x3ca   :  { %19708 = vmatprep.subr.bf16.mxu0 %v21148_v45  ;;  %v21186_v45 = vld [vmem:[%s29856_s2 + $0x160] sm:$0xff]  }
 0x3cd   :  { %19709 = vmatpush3.bf16.msra.mxu0 %v21149_v50  ;;  %v21188_v50 = vld [vmem:[%s29856_s2 + $0x260] sm:$0xff]  }
 0x3ce   :  { %19710 = vmatprep.subr.bf16.mxu0 %v21151_v51  ;;  %v21190_v51 = vld [vmem:[%s29856_s2 + $0x298] sm:$0xff]  }
 0x3d1   :  { %19711 = vmatpush3.bf16.msra.mxu0 %v21152_v36  ;;  %v21189_v36 = vld [vmem:[%s29856_s2 + $0x158] sm:$0xff]  }
 0x3d2   :  { %19712 = vmatprep.subr.bf16.mxu0 %v21154_v44  ;;  %v21191_v44 = vld [vmem:[%s29856_s2 + $0x258] sm:$0xff]  }
 0x3d5   :  { %19713 = vmatpush3.bf16.msra.mxu0 %v21155_v54  ;;  %v21192_v54 = vld [vmem:[%s29856_s2 + $0x150] sm:$0xff]  }
 0x3d6   :  { %19714 = vmatprep.subr.bf16.mxu0 %v21157_v55  ;;  %v21193_v55 = vld [vmem:[%s29856_s2 + $0x148] sm:$0xff]  }
 0x3d9   :  { %19715 = vmatpush3.bf16.msra.mxu0 %v21158_v56  ;;  %v21194_v56 = vld [vmem:[%s29856_s2 + $0x188] sm:$0xff]  }
 0x3da   :  { %v6029_v49 = vpop.f32.mrf.mxu0  ;;  %19716 = vmatprep.subr.bf16.mxu0 %v21160_v57  ;;  %v21196_v57 = vld [vmem:[%s29856_s2 + $0x240] sm:$0xff]  }
 0x3db   :  { %v6030_v48 = vadd.f32 %v6029_v49, %v5989_v63  ;;  %v21198_v49 = vld [vmem:[%s29856_s2 + $0x230] sm:$0xff]  }
 0x3dc   :  { %v6031_v20 = vpop.f32.mrf.mxu0  ;;  %v21204_v63 = vld [vmem:[%s29856_s2 + $0x310] sm:$0xff]  }
 0x3dd   :  { %19717 = vmatpush3.bf16.msra.mxu0 %v21161_v59  ;;  %v6032_v15 = vadd.f32 %v6031_v20, %v5991_v2  ;;  %v21197_v59 = vld [vmem:[%s29856_s2 + $0x238] sm:$0xff]   ;;  %v21200_v20 = vld [vmem:[%s29856_s2 + $0x220] sm:$0xff]  }
 0x3de   :  { %v6033_v61 = vpop.f32.mrf.mxu0  ;;  %19718 = vmatprep.subr.bf16.mxu0 %v21163_v17  ;;  %v21199_v17 = vld [vmem:[%s29856_s2 + $0x228] sm:$0xff]   ;;  %v21206_v2 = vld [vmem:[%s29856_s2 + $0x300] sm:$0xff]  }
 0x3df   :  { %v21202_v61 = vld [vmem:[%s29856_s2 + $0x210] sm:$0xff]  }
 0x3e0   :  { %v6034_v1 = vpop.f32.mrf.mxu0 }
 0x3e1   :  { %19719 = vmatpush3.bf16.msra.mxu0 %v21164_v60  ;;  %v21201_v60 = vld [vmem:[%s29856_s2 + $0x218] sm:$0xff]   ;;  %v21205_v1 = vld [vmem:[%s29856_s2 + $0x308] sm:$0xff]  }
 0x3e2   :  { %v6111_v4 = vpop.f32.mrf.mxu0  ;;  %19720 = vmatprep.subr.bf16.mxu0 %v21166_v62  ;;  %v21203_v62 = vld [vmem:[%s29856_s2 + $0x250] sm:$0xff]  }
 0x3e3   :  { %v6070_v3 = vpop.f32.mrf.mxu1 }
 0x3e4   :  { %v6071_v5 = vadd.f32 %v6070_v3, %v6030_v48  ;;  %v6113_v10 = vpop.f32.mrf.mxu0  ;;  %v21207_v48 = vld [vmem:[%s29856_s2 + $0x2f8] sm:$0xff]   ;;  %v21209_v3 = vld [vmem:[%s29856_s2 + $0x2e8] sm:$0xff]  }
 0x3e5   :  { %v6072_v37 = vpop.f32.mrf.mxu1  ;;  %19721 = vmatpush3.bf16.msra.mxu0 %v21167_v24  ;;  %v21208_v24 = vld [vmem:[%s29856_s2 + $0x2f0] sm:$0xff]  }
 0x3e6   :  { %v6112_v11 = vadd.f32 %v6111_v4, %v6071_v5  ;;  %v6073_v0 = vadd.f32 %v6072_v37, %v6032_v15  ;;  %v6115_v12 = vpop.f32.mrf.mxu0  ;;  %19728 = vmatprep.subr.bf16.mxu0 %v21169_v9  ;;  %v21210_v4 = vld [vmem:[%s29856_s2 + $0x2e0] sm:$0xff]   ;;  %v21211_v9 = vld [vmem:[%s29856_s2 + $0x2d8] sm:$0xff]  }
 0x3e7   :  { %v6074_v34 = vpop.f32.mrf.mxu1  ;;  %v21212_v15 = vld [vmem:[%s29856_s2 + $0x318] sm:$0xff]  }
 0x3e8   :  { %v6120_v29 = vmax.f32 %v6112_v11, 0.0  ;;  %v6114_v21 = vadd.f32 %v6113_v10, %v6073_v0  ;;  %6938 = vmatmul.mubr.bf16.vlgmr.msra.gmra.mxu0 %v25676_v19  ;;  %v6116_v28 = vpop.f32.mrf.mxu0 }
 0x3e9   :  { %v6075_v47 = vpop.f32.mrf.mxu1  ;;  %19729 = vmatpush3.bf16.msra.mxu0 %v21170_v42  ;;  %7220 = vmatprep.mubr.bf16.mxu0 %v25671_v46  ;;  %v21176_v46 = vld [vmem:[%s29856_s2 + $0x280] sm:$0xff]  }
 0x3ea   :  { %v6124_v39 = vmax.f32 %v25577_v18, %v6120_v29  ;;  %v6121_v14 = vmax.f32 %v6114_v21, 0.0  ;;  %19730 = vmatprep.subr.bf16.mxu0 %v21172_v43  ;;  %v21174_v18 = vld [vmem:[%s29856_s2 + $0x180] sm:$0xff]  }
 0x3eb   :  { %v21215_v21 = vld [vmem:[%s29857_s3 + $0x24] ss:$16 sps:$4 sm:$0xff]   ;;  %v21213_v47 = vld [vmem:[%s29857_s3 + $0x20] ss:$16 sps:$4 sm:$0xff]  }
 0x3ec   :  { %v6125_v23 = vmax.f32 %v25586_v13, %v6121_v14  ;;  %v25801_v22 = vpack.c.bf16 %v6124_v39, %v6124_v39  ;;  %v21178_v13 = vld [vmem:[%s29856_s2 + $0x2b8] sm:$0xff]   ;;  %v21218_v28 = vld [vmem:[%s29857_s3 + $0x4] ss:$16 sps:$4 sm:$0xff]   ;;  %v21216_v39 = vld [vmem:[%s29857_s3] ss:$16 sps:$4 sm:$0xff]  }
 0x3ed   :  { %19731 = vmatpush3.bf16.msra.mxu0 %v21173_v35  ;;  %v21221_v14 = vld [vmem:[%s29857_s3 + $0x2c] ss:$16 sps:$4 sm:$0xff]  }
 0x3ee   :  { %v25796_v58 = vpack.c.bf16 %v6125_v23, %v6125_v23  ;;  %19732 = vmatprep.subr.bf16.mxu0 %v21175_v53 }
 0x3f0   :  { %18242 = vmatprep.mubr.msk.bf16.mxu1 %vm1251_vm0, %v25796_v58 }
 0x3f1   :  { %6413 = vmatmul.mubr.bf16.vlgmr.msra.gmra.mxu1 %v25801_v22  ;;  %19733 = vmatpush3.bf16.msra.mxu0 %v21176_v46 }
 0x3f2   :  { %6663 = vmatpush1.bf16.msra.mxu1 %v21174_v18  ;;  %18318 = vmatprep.mubr.msk.bf16.mxu1 %vm1251_vm0, %v25796_v58  ;;  %v18216_v18 = vld [vmem:[%s29858_s7] ss:$0 sm:$0xff] }
 0x3f3   :  { %6664 = vmatprep.subr.bf16.mxu1 %v22920_v16  ;;  %19734 = vmatprep.subr.bf16.mxu0 %v21178_v13 }
 0x3f5   :  { %19735 = vmatpush3.bf16.msra.mxu0 %v21179_v27 }
 0x3f6   :  { %6665 = vmatpush1.bf16.msra.mxu1 %v21177_v25  ;;  %19736 = vmatprep.subr.bf16.mxu0 %v21181_v33 }
 0x3f7   :  { %6666 = vmatprep.subr.bf16.mxu1 %v22920_v16 }
 0x3f9   :  { %19737 = vmatpush3.bf16.msra.mxu0 %v21182_v52 }
 0x3fa   :  { %6667 = vmatpush1.bf16.msra.mxu1 %v21180_v6  ;;  %19738 = vmatprep.subr.bf16.mxu0 %v21184_v7 }
 0x3fb   :  { %6668 = vmatprep.subr.bf16.mxu1 %v22920_v16 }
 0x3fd   :  { %19739 = vmatpush3.bf16.msra.mxu0 %v21185_v30 }
 0x3fe   :  { %6669 = vmatpush1.bf16.msra.mxu1 %v21183_v41  ;;  %19740 = vmatprep.subr.bf16.mxu0 %v21187_v8 }
 0x3ff   :  { %6670 = vmatprep.subr.bf16.mxu1 %v22920_v16 }
 0x401   :  { %19741 = vmatpush3.bf16.msra.mxu0 %v21188_v50  ;;  %v21257_v50 = vld [vmem:[%s29859_s4 + $0xacc] ss:$60 sps:$4 sm:$0xff]  }
 0x402   :  { %6671 = vmatpush1.bf16.msra.mxu1 %v21186_v45  ;;  %19742 = vmatprep.subr.bf16.mxu0 %v21190_v51  ;;  %v21255_v45 = vld [vmem:[%s29859_s4 + $0xac8] ss:$60 sps:$4 sm:$0xff]  }
 0x403   :  { %6672 = vmatprep.subr.bf16.mxu1 %v22920_v16 }
 0x405   :  { %19743 = vmatpush3.bf16.msra.mxu0 %v21191_v44  ;;  %v21263_v44 = vld [vmem:[%s29859_s4 + $0xa54] ss:$60 sps:$4 sm:$0xff]  }
 0x406   :  { %6673 = vmatpush1.bf16.msra.mxu1 %v21189_v36  ;;  %7357 = vmatprep.subr.bf16.mxu0 %v21215_v21  ;;  %v21261_v36 = vld [vmem:[%s29859_s4 + $0xa50] ss:$60 sps:$4 sm:$0xff]  }
 0x407   :  { %6674 = vmatprep.subr.bf16.mxu1 %v22920_v16 }
 0x408   :  { %7221 = vmatmul.mubr.bf16.vlgmr.msra.gmra.mxu0 %v25676_v19  ;;  %v21195_v19 = vld [vmem:[%s29856_s2 + $0x248] sm:$0xff]  }
 0x409   :  { %7377 = vmatprep.mubr.bf16.mxu0 %v22920_v16  ;;  %7358 = vmatpush1.bf16.msra.mxu0 %v21213_v47 }
 0x40a   :  { %6675 = vmatpush1.bf16.msra.mxu1 %v21192_v54  ;;  %7359 = vmatprep.subr.bf16.mxu0 %v21218_v28  ;;  %v21222_v28 = vld [vmem:[%s29857_s3 + $0x8] ss:$16 sps:$4 sm:$0xff]  }
 0x40b   :  { %6676 = vmatprep.subr.bf16.mxu1 %v22920_v16 }
 0x40d   :  { %7360 = vmatpush1.bf16.msra.mxu0 %v21216_v39  ;;  %v21227_v39 = vld [vmem:[%s29859_s4 + $0x34c] ss:$60 sps:$4 sm:$0xff]  }
 0x40e   :  { %6677 = vmatpush1.bf16.msra.mxu1 %v21193_v55  ;;  %7398 = vmatprep.subr.bf16.mxu0 %v21221_v14  ;;  %v21225_v14 = vld [vmem:[%s29859_s4 + $0x348] ss:$60 sps:$4 sm:$0xff]  }
 0x40f   :  { %6692 = vmatprep.subr.bf16.mxu1 %v22920_v16 }
 0x412   :  { %6693 = vmatpush2.bf16.msra.mxu1 %v21194_v56 }
 0x413   :  { %6945 = vmatprep.subr.bf16.mxu1 %v22920_v16 }
 0x415   :  { %6695 = vmatmul.mubr.bf16.vlgmr.msra.gmra.mxu1 %v25801_v22 }
 0x416   :  { %6946 = vmatpush1.bf16.msra.mxu1 %v21195_v19  ;;  %18394 = vmatprep.mubr.msk.bf16.mxu1 %vm1251_vm0, %v25796_v58 }
 0x417   :  { %6947 = vmatprep.subr.bf16.mxu1 %v22920_v16 }
 0x41a   :  { %6948 = vmatpush1.bf16.msra.mxu1 %v21196_v57 }
 0x41b   :  { %6949 = vmatprep.subr.bf16.mxu1 %v22920_v16 }
 0x41e   :  { %6950 = vmatpush1.bf16.msra.mxu1 %v21197_v59  ;;  %v21267_v59 = vld [vmem:[%s29859_s4 + $0x9d8] ss:$60 sps:$4 sm:$0xff]  }
 0x41f   :  { %6951 = vmatprep.subr.bf16.mxu1 %v22920_v16 }
 0x422   :  { %6952 = vmatpush1.bf16.msra.mxu1 %v21198_v49  ;;  %v21269_v49 = vld [vmem:[%s29859_s4 + $0x9dc] ss:$60 sps:$4 sm:$0xff]  }
 0x423   :  { %6953 = vmatprep.subr.bf16.mxu1 %v22920_v16 }
 0x426   :  { %6954 = vmatpush1.bf16.msra.mxu1 %v21199_v17 }
 0x427   :  { %6955 = vmatprep.subr.bf16.mxu1 %v22920_v16 }
 0x42a   :  { %6956 = vmatpush1.bf16.msra.mxu1 %v21200_v20 }
 0x42b   :  { %6957 = vmatprep.subr.bf16.mxu1 %v22920_v16 }
 0x42e   :  { %6958 = vmatpush1.bf16.msra.mxu1 %v21201_v60 }
 0x42f   :  { %6959 = vmatprep.subr.bf16.mxu1 %v22920_v16 }
 0x432   :  { %6960 = vmatpush1.bf16.msra.mxu1 %v21202_v61  ;;  %v21273_v61 = vld [vmem:[%s29859_s4 + $0x960] ss:$60 sps:$4 sm:$0xff]  }
 0x433   :  { %6975 = vmatprep.subr.bf16.mxu1 %v22920_v16 }
 0x436   :  { %6976 = vmatpush2.bf16.msra.mxu1 %v21203_v62  ;;  %v21275_v62 = vld [vmem:[%s29859_s4 + $0x964] ss:$60 sps:$4 sm:$0xff]  }
 0x437   :  { %7228 = vmatprep.subr.bf16.mxu1 %v22920_v16 }
 0x439   :  { %6978 = vmatmul.mubr.bf16.vlgmr.msra.gmra.mxu1 %v25801_v22 }
 0x43a   :  { %7229 = vmatpush1.bf16.msra.mxu1 %v21204_v63  ;;  %18470 = vmatprep.mubr.msk.bf16.mxu1 %vm1251_vm0, %v25796_v58  ;;  %v21279_v63 = vld [vmem:[%s29859_s4 + $0x8e8] ss:$60 sps:$4 sm:$0xff]  }
 0x43b   :  { %7230 = vmatprep.subr.bf16.mxu1 %v22920_v16 }
 0x43e   :  { %7231 = vmatpush1.bf16.msra.mxu1 %v21205_v1  ;;  %v21281_v1 = vld [vmem:[%s29859_s4 + $0x8ec] ss:$60 sps:$4 sm:$0xff]  }
 0x43f   :  { %7232 = vmatprep.subr.bf16.mxu1 %v22920_v16 }
 0x442   :  { %7233 = vmatpush1.bf16.msra.mxu1 %v21206_v2 }
 0x443   :  { %7234 = vmatprep.subr.bf16.mxu1 %v22920_v16 }
 0x446   :  { %7235 = vmatpush1.bf16.msra.mxu1 %v21207_v48 }
 0x447   :  { %7236 = vmatprep.subr.bf16.mxu1 %v22920_v16 }
 0x44a   :  { %7237 = vmatpush1.bf16.msra.mxu1 %v21208_v24 }
 0x44b   :  { %7238 = vmatprep.subr.bf16.mxu1 %v22920_v16 }
 0x44e   :  { %7239 = vmatpush1.bf16.msra.mxu1 %v21209_v3 }
 0x44f   :  { %7240 = vmatprep.subr.bf16.mxu1 %v22920_v16 }
 0x452   :  { %7241 = vmatpush1.bf16.msra.mxu1 %v21210_v4 }
 0x453   :  { %7242 = vmatprep.subr.bf16.mxu1 %v22920_v16 }
 0x456   :  { %7243 = vmatpush1.bf16.msra.mxu1 %v21211_v9 }
 0x457   :  { %7258 = vmatprep.subr.bf16.mxu1 %v22920_v16 }
 0x45a   :  { %7259 = vmatpush2.bf16.msra.mxu1 %v21212_v15 }
 0x45b   :  { %9858 = vmatprep.subr.bf16.mxu1 %v21257_v50  ;;  %v21260_v50 = vld [vmem:[%s29859_s4 + $0x61c] ss:$60 sps:$4 sm:$0xff]  }
 0x45d   :  { %7261 = vmatmul.mubr.bf16.vlgmr.msra.gmra.mxu1 %v25801_v22 }
 0x45e   :  { %9859 = vmatpush1.bf16.msra.mxu1 %v21255_v45  ;;  %v21252_v45 = vld [vmem:[%s29859_s4 + $0x690] ss:$60 sps:$4 sm:$0xff]  }
 0x45f   :  { %9860 = vmatprep.subr.bf16.mxu1 %v21263_v44  ;;  %v21264_v44 = vld [vmem:[%s29859_s4 + $0x5a0] ss:$60 sps:$4 sm:$0xff]  }
 0x462   :  { %9861 = vmatpush1.bf16.msra.mxu1 %v21261_v36  ;;  %v21266_v36 = vld [vmem:[%s29859_s4 + $0x5a4] ss:$60 sps:$4 sm:$0xff]  }
 0x463   :  { %9862 = vmatprep.subr.bf16.mxu1 %v21269_v49  ;;  %v21282_v49 = vld [vmem:[%s29859_s4 + $0x438] ss:$60 sps:$4 sm:$0xff]  }
 0x466   :  { %9863 = vmatpush1.bf16.msra.mxu1 %v21267_v59  ;;  %v21287_v59 = vld [vmem:[%s29859_s4 + $0x874] ss:$60 sps:$4 sm:$0xff]  }
 0x467   :  { %9864 = vmatprep.subr.bf16.mxu1 %v21275_v62  ;;  %v21291_v62 = vld [vmem:[%s29859_s4 + $0x7f8] ss:$60 sps:$4 sm:$0xff]  }
 0x468   :  { %v19678_v5 = vpop.f32.mrf.mxu0 }
 0x46a   :  { %v19679_v37 = vpop.f32.mrf.mxu0  ;;  %9865 = vmatpush1.bf16.msra.mxu1 %v21273_v61  ;;  %v21288_v61 = vld [vmem:[%s29859_s4 + $0x3c0] ss:$60 sps:$4 sm:$0xff]  }
 0x46b   :  { %v19680_v10 = vadd.f32 %v19679_v37, %v19678_v5  ;;  %9866 = vmatprep.subr.bf16.mxu1 %v21281_v1  ;;  %v21299_v1 = vld [vmem:[%s29859_s4 + $0xad4] ss:$60 sps:$4 sm:$0xff]  }
 0x46c   :  { %v19681_v11 = vpop.f32.mrf.mxu0 }
 0x46d   :  { %v6375_v46 = vadd.f32 %v19680_v10, %v18216_v18 }
 0x46e   :  { %v19682_v0 = vpop.f32.mrf.mxu0  ;;  %9867 = vmatpush1.bf16.msra.mxu1 %v21279_v63  ;;  %v21296_v63 = vld [vmem:[%s29859_s4 + $0x784] ss:$60 sps:$4 sm:$0xff]  }
 0x46f   :  { %9868 = vmatprep.subr.bf16.mxu1 %v21287_v59  ;;  %v21330_v59 = vld [vmem:[%s29859_s4 + $0x170] ss:$60 sps:$4 sm:$0xff]  }
 0x488   :  { %v19700_v42 = vpop.f32.mrf.mxu0 }
 0x48a   :  { %v19701_v34 = vpop.f32.mrf.mxu0 }
 0x48b   :  { %v19702_v12 = vadd.f32 %v19701_v34, %v19700_v42 }
 0x48c   :  { %v19703_v43 = vpop.f32.mrf.mxu0 }
 0x48d   :  { %v6657_v51 = vadd.f32 %v19702_v12, %v18216_v18  ;;  %v21219_v12 = vld [vmem:[%s29857_s3 + $0x28] ss:$16 sps:$4 sm:$0xff]  }
 0x48e   :  { %v19704_v29 = vpop.f32.mrf.mxu0 }
 0x48f   :  { %v21224_v29 = vld [vmem:[%s29857_s3 + $0xc] ss:$16 sps:$4 sm:$0xff]  }
 0x4a8   :  { %v19722_v35 = vpop.f32.mrf.mxu0 }
 0x4aa   :  { %v19723_v53 = vpop.f32.mrf.mxu0 }
 0x4ab   :  { %v19724_v23 = vadd.f32 %v19723_v53, %v19722_v35  ;;  %v21230_v35 = vld [vmem:[%s29859_s4 + $0x2d4] ss:$60 sps:$4 sm:$0xff]  }
 0x4ac   :  { %v19725_v58 = vpop.f32.mrf.mxu0  ;;  %v21228_v53 = vld [vmem:[%s29859_s4 + $0x2d0] ss:$60 sps:$4 sm:$0xff]  }
 0x4ad   :  { %v6940_v2 = vadd.f32 %v19724_v23, %v18216_v18  ;;  %v21233_v23 = vld [vmem:[%s29859_s4 + $0x25c] ss:$60 sps:$4 sm:$0xff]  }
 0x4ae   :  { %v19726_v22 = vpop.f32.mrf.mxu0  ;;  %v21231_v58 = vld [vmem:[%s29859_s4 + $0x258] ss:$60 sps:$4 sm:$0xff]  }
 0x4af   :  { %v21234_v22 = vld [vmem:[%s29859_s4 + $0x1e0] ss:$60 sps:$4 sm:$0xff]  }
 0x4b1   :  { %v6414_v13 = vpop.f32.mrf.mxu1 }
 0x4b2   :  { %v6415_v25 = vadd.f32 %v6414_v13, %v6375_v46  ;;  %v21239_v46 = vld [vmem:[%s29859_s4 + $0x16c] ss:$60 sps:$4 sm:$0xff]  }
 0x4b3   :  { %v6416_v27 = vpop.f32.mrf.mxu1  ;;  %v21237_v13 = vld [vmem:[%s29859_s4 + $0x168] ss:$60 sps:$4 sm:$0xff]  }
 0x4b4   :  { %v6420_v56 = vmax.f32 %v6415_v25, 0.0  ;;  %v21242_v25 = vld [vmem:[%s29859_s4 + $0xf4] ss:$60 sps:$4 sm:$0xff]  }
 0x4b5   :  { %v6417_v33 = vpop.f32.mrf.mxu1  ;;  %v21240_v27 = vld [vmem:[%s29859_s4 + $0xf0] ss:$60 sps:$4 sm:$0xff]  }
 0x4b6   :  { %v21245_v33 = vld [vmem:[%s29859_s4 + $0x7c] ss:$60 sps:$4 sm:$0xff]  }
 0x4b7   :  { %v6418_v6 = vpop.f32.mrf.mxu1 }
 0x4b8   :  { %v21243_v6 = vld [vmem:[%s29859_s4 + $0x78] ss:$60 sps:$4 sm:$0xff]  }
 0x4c8   :  { %v19744_v52 = vpop.f32.mrf.mxu0 }
 0x4ca   :  { %v19745_v7 = vpop.f32.mrf.mxu0 }
 0x4cb   :  { %v19746_v41 = vadd.f32 %v19745_v7, %v19744_v52  ;;  %v21248_v52 = vld [vmem:[%s29859_s4 + $0x4] ss:$60 sps:$4 sm:$0xff]  }
 0x4cc   :  { %v19747_v30 = vpop.f32.mrf.mxu0  ;;  %v21246_v7 = vld [vmem:[%s29859_s4] ss:$60 sps:$4 sm:$0xff]  }
 0x4cd   :  { %v7223_v37 = vadd.f32 %v19746_v41, %v18216_v18  ;;  %v21236_v18 = vld [vmem:[%s29859_s4 + $0x1e4] ss:$60 sps:$4 sm:$0xff]   ;;  %v21251_v41 = vld [vmem:[%s29859_s4 + $0x70c] ss:$60 sps:$4 sm:$0xff]  }
 0x4ce   :  { %v19748_v8 = vpop.f32.mrf.mxu0  ;;  %v21249_v30 = vld [vmem:[%s29859_s4 + $0x708] ss:$60 sps:$4 sm:$0xff]  }
 0x4cf   :  { %v21254_v8 = vld [vmem:[%s29859_s4 + $0x694] ss:$60 sps:$4 sm:$0xff]  }
 0x4d5   :  { %v6696_v54 = vpop.f32.mrf.mxu1 }
 0x4d6   :  { %v6697_v55 = vadd.f32 %v6696_v54, %v6657_v51  ;;  %v21258_v51 = vld [vmem:[%s29859_s4 + $0x618] ss:$60 sps:$4 sm:$0xff]   ;;  %v21272_v54 = vld [vmem:[%s29859_s4 + $0x52c] ss:$60 sps:$4 sm:$0xff]  }
 0x4d7   :  { %v6698_v19 = vpop.f32.mrf.mxu1 }
 0x4d8   :  { %v6702_v57 = vmax.f32 %v6697_v55, 0.0  ;;  %v21270_v55 = vld [vmem:[%s29859_s4 + $0x528] ss:$60 sps:$4 sm:$0xff]   ;;  %v21276_v19 = vld [vmem:[%s29859_s4 + $0x4b0] ss:$60 sps:$4 sm:$0xff]  }
 0x4d9   :  { %v6699_v17 = vpop.f32.mrf.mxu1 }
 0x4da   :  { %v6703_v20 = vmax.f32 %v6420_v56, %v6702_v57  ;;  %v21278_v56 = vld [vmem:[%s29859_s4 + $0x4b4] ss:$60 sps:$4 sm:$0xff]   ;;  %v21284_v57 = vld [vmem:[%s29859_s4 + $0x43c] ss:$60 sps:$4 sm:$0xff]  }
 0x4db   :  { %v6700_v60 = vpop.f32.mrf.mxu1  ;;  %v21285_v17 = vld [vmem:[%s29859_s4 + $0x870] ss:$60 sps:$4 sm:$0xff]  }
 0x4dc   :  { %9869 = vmatpush1.bf16.msra.mxu1 %v21285_v17  ;;  %v21293_v60 = vld [vmem:[%s29859_s4 + $0x7fc] ss:$60 sps:$4 sm:$0xff]  }
 0x4dd   :  { %9870 = vmatprep.subr.bf16.mxu1 %v21293_v60  ;;  %v21338_v17 = vld [vmem:[%s29859_s4 + $0xfc] ss:$60 sps:$4 sm:$0xff]  }
 0x4de   :  { %v21336_v60 = vld [vmem:[%s29859_s4 + $0xf8] ss:$60 sps:$4 sm:$0xff]  }
 0x4e0   :  { %9871 = vmatpush1.bf16.msra.mxu1 %v21291_v62  ;;  %v21344_v62 = vld [vmem:[%s29859_s4 + $0x84] ss:$60 sps:$4 sm:$0xff]  }
 0x4e1   :  { %9872 = vmatprep.subr.bf16.mxu1 %v21296_v63  ;;  %v21347_v63 = vld [vmem:[%s29859_s4 + $0xb4c] ss:$60 sps:$4 sm:$0xff]  }
 0x4f9   :  { %v6979_v48 = vpop.f32.mrf.mxu1 }
 0x4fa   :  { %v6980_v24 = vadd.f32 %v6979_v48, %v6940_v2  ;;  %v21294_v2 = vld [vmem:[%s29859_s4 + $0x780] ss:$60 sps:$4 sm:$0xff]  }
 0x4fb   :  { %v6981_v3 = vpop.f32.mrf.mxu1  ;;  %9873 = vmatpush1.bf16.msra.mxu1 %v21294_v2  ;;  %v21302_v48 = vld [vmem:[%s29859_s4 + $0xb44] ss:$60 sps:$4 sm:$0xff]  }
 0x4fc   :  { %v6985_v4 = vmax.f32 %v6980_v24, 0.0  ;;  %v21300_v24 = vld [vmem:[%s29859_s4 + $0xb40] ss:$60 sps:$4 sm:$0xff]   ;;  %9888 = vmatprep.subr.bf16.mxu1 %v21302_v48  ;;  %v21308_v3 = vld [vmem:[%s29859_s4 + $0x354] ss:$60 sps:$4 sm:$0xff]  }
 0x4fd   :  { %v6982_v9 = vpop.f32.mrf.mxu1  ;;  %v21345_v2 = vld [vmem:[%s29859_s4 + $0xb48] ss:$60 sps:$4 sm:$0xff]  }
 0x4fe   :  { %v6986_v15 = vmax.f32 %v6703_v20, %v6985_v4  ;;  %v21290_v20 = vld [vmem:[%s29859_s4 + $0x3c4] ss:$60 sps:$4 sm:$0xff]   ;;  %v21350_v48 = vld [vmem:[%s29859_s4 + $0xc] ss:$60 sps:$4 sm:$0xff]  }
 0x4ff   :  { %v6983_v5 = vpop.f32.mrf.mxu1  ;;  %9889 = vmatpush2.bf16.msra.mxu1 %v21300_v24  ;;  %v7270_v4 = vld [vmem:[%s29860_s8] sm:$0xf]  ;;  %v21353_v24 = vld [vmem:[%s29859_s4 + $0x35c] ss:$60 sps:$4 sm:$0xff]  }
 0x500   :  { %9899 = vmatprep.subr.bf16.mxu1 %v21308_v3  ;;  %v7284_v9 = vrot.slane %v7270_v4, %v23803_v38  ;;  %v21348_v3 = vld [vmem:[%s29859_s4 + $0x8] ss:$60 sps:$4 sm:$0xff]  }
 0x51d   :  { %v7262_v10 = vpop.f32.mrf.mxu1 }
 0x51e   :  { %v7263_v11 = vadd.f32 %v7262_v10, %v7223_v37 }
 0x51f   :  { %v7264_v0 = vpop.f32.mrf.mxu1 }
 0x520   :  { %v7268_v42 = vmax.f32 %v7263_v11, 0.0 }
 0x521   :  { %v7265_v34 = vpop.f32.mrf.mxu1 }
 0x522   :  { %v7269_v43 = vmax.f32 %v6986_v15, %v7268_v42  ;;  %v7288_v15 = vrot.slane %v7270_v4, %v23811_v40 }
 0x523   :  { %v7266_v21 = vpop.f32.mrf.mxu1 }
 0x524   :  { %v7271_v47 = vpack.c.bf16 %v7269_v43, %v7269_v43  ;;  %v21297_v21 = vld [vmem:[%s29859_s4 + $0xad0] ss:$60 sps:$4 sm:$0xff]  }
 0x526   :  { %18479 = vmatmul.mubr.msk.bf16.vlgmr.msra.gmra.mxu0 %vm7341_vm1, %v7271_v47 }
 0x527   :  { %7399 = vmatpush1.bf16.msra.mxu0 %v21219_v12  ;;  %7418 = vmatprep.mubr.bf16.mxu0 %v22920_v16  ;;  %v7292_v12 = vrot.slane %v7270_v4, %v24044_v26 }
 0x528   :  { %7400 = vmatprep.subr.bf16.mxu0 %v21224_v29 }
 0x52b   :  { %7401 = vmatpush1.bf16.msra.mxu0 %v21222_v28 }
 0x52c   :  { %9817 = vmatprep.subr.bf16.mxu0 %v21227_v39 }
 0x52e   :  { %18480 = vmatmul.mubr.msk.bf16.vlgmr.msra.gmra.mxu0 %vm7341_vm1, %v7271_v47  ;;  %v7296_v47 = vrot.slane %v7270_v4, %v24057_v32  ;;  %v21351_v4 = vld [vmem:[%s29859_s4 + $0x358] ss:$60 sps:$4 sm:$0xff]  }
 0x52f   :  { %9818 = vmatpush1.bf16.msra.mxu0 %v21225_v14  ;;  %v21305_v14 = vld [vmem:[%s29859_s4 + $0xa5c] ss:$60 sps:$4 sm:$0xff]  }
 0x530   :  { %9819 = vmatprep.subr.bf16.mxu0 %v21230_v35 }
 0x533   :  { %9820 = vmatpush1.bf16.msra.mxu0 %v21228_v53 }
 0x534   :  { %9821 = vmatprep.subr.bf16.mxu0 %v21233_v23 }
 0x537   :  { %9822 = vmatpush1.bf16.msra.mxu0 %v21231_v58  ;;  %v21303_v58 = vld [vmem:[%s29859_s4 + $0xa58] ss:$60 sps:$4 sm:$0xff]  }
 0x538   :  { %9823 = vmatprep.subr.bf16.mxu0 %v21236_v18 }
 0x53b   :  { %9824 = vmatpush1.bf16.msra.mxu0 %v21234_v22 }
 0x53c   :  { %9825 = vmatprep.subr.bf16.mxu0 %v21239_v46  ;;  %v21311_v46 = vld [vmem:[%s29859_s4 + $0x9e4] ss:$60 sps:$4 sm:$0xff]  }
 0x53f   :  { %9826 = vmatpush1.bf16.msra.mxu0 %v21237_v13 }
 0x540   :  { %9827 = vmatprep.subr.bf16.mxu0 %v21242_v25 }
 0x543   :  { %9828 = vmatpush1.bf16.msra.mxu0 %v21240_v27 }
 0x544   :  { %9829 = vmatprep.subr.bf16.mxu0 %v21245_v33  ;;  %v21306_v33 = vld [vmem:[%s29859_s4 + $0x350] ss:$60 sps:$4 sm:$0xff]  }
 0x547   :  { %9830 = vmatpush1.bf16.msra.mxu0 %v21243_v6  ;;  %v21309_v6 = vld [vmem:[%s29859_s4 + $0x9e0] ss:$60 sps:$4 sm:$0xff]  }
 0x548   :  { %9831 = vmatprep.subr.bf16.mxu0 %v21248_v52 }
 0x54b   :  { %9832 = vmatpush1.bf16.msra.mxu0 %v21246_v7  ;;  %v21314_v7 = vld [vmem:[%s29859_s4 + $0x2dc] ss:$60 sps:$4 sm:$0xff]  }
 0x54c   :  { %9833 = vmatprep.subr.bf16.mxu0 %v21251_v41  ;;  %v21317_v41 = vld [vmem:[%s29859_s4 + $0x96c] ss:$60 sps:$4 sm:$0xff]  }
 0x54f   :  { %9834 = vmatpush2.bf16.msra.mxu0 %v21249_v30  ;;  %v21312_v30 = vld [vmem:[%s29859_s4 + $0x2d8] ss:$60 sps:$4 sm:$0xff]  }
 0x550   :  { %9835 = vmatprep.subr.bf16.mxu0 %v21254_v8  ;;  %v21315_v8 = vld [vmem:[%s29859_s4 + $0x968] ss:$60 sps:$4 sm:$0xff]  }
 0x553   :  { %9836 = vmatpush2.bf16.msra.mxu0 %v21252_v45  ;;  %v21320_v45 = vld [vmem:[%s29859_s4 + $0x264] ss:$60 sps:$4 sm:$0xff]  }
 0x554   :  { %9837 = vmatprep.subr.bf16.mxu0 %v21260_v50  ;;  %v21323_v50 = vld [vmem:[%s29859_s4 + $0x8f4] ss:$60 sps:$4 sm:$0xff]  }
 0x557   :  { %9838 = vmatpush2.bf16.msra.mxu0 %v21258_v51  ;;  %v21318_v51 = vld [vmem:[%s29859_s4 + $0x260] ss:$60 sps:$4 sm:$0xff]  }
 0x558   :  { %9839 = vmatprep.subr.bf16.mxu0 %v21266_v36  ;;  %v21321_v36 = vld [vmem:[%s29859_s4 + $0x8f0] ss:$60 sps:$4 sm:$0xff]  }
 0x55b   :  { %9840 = vmatpush2.bf16.msra.mxu0 %v21264_v44  ;;  %v21326_v44 = vld [vmem:[%s29859_s4 + $0x1ec] ss:$60 sps:$4 sm:$0xff]  }
 0x55c   :  { %9841 = vmatprep.subr.bf16.mxu0 %v21272_v54  ;;  %v21329_v54 = vld [vmem:[%s29859_s4 + $0x87c] ss:$60 sps:$4 sm:$0xff]  }
 0x55f   :  { %9842 = vmatpush2.bf16.msra.mxu0 %v21270_v55  ;;  %v21324_v55 = vld [vmem:[%s29859_s4 + $0x1e8] ss:$60 sps:$4 sm:$0xff]  }
 0x560   :  { %9843 = vmatprep.subr.bf16.mxu0 %v21278_v56  ;;  %v21327_v56 = vld [vmem:[%s29859_s4 + $0x878] ss:$60 sps:$4 sm:$0xff]  }
 0x563   :  { %9844 = vmatpush2.bf16.msra.mxu0 %v21276_v19  ;;  %v21332_v19 = vld [vmem:[%s29859_s4 + $0x174] ss:$60 sps:$4 sm:$0xff]  }
 0x564   :  { %9845 = vmatprep.subr.bf16.mxu0 %v21284_v57  ;;  %v21335_v57 = vld [vmem:[%s29859_s4 + $0x804] ss:$60 sps:$4 sm:$0xff]  }
 0x567   :  { %9846 = vmatpush2.bf16.msra.mxu0 %v21282_v49  ;;  %v21333_v49 = vld [vmem:[%s29859_s4 + $0x800] ss:$60 sps:$4 sm:$0xff]  }
 0x568   :  { %9847 = vmatprep.subr.bf16.mxu0 %v21290_v20  ;;  %v21341_v20 = vld [vmem:[%s29859_s4 + $0x78c] ss:$60 sps:$4 sm:$0xff]  }
 0x56b   :  { %9848 = vmatpush2.bf16.msra.mxu0 %v21288_v61  ;;  %v21339_v61 = vld [vmem:[%s29859_s4 + $0x788] ss:$60 sps:$4 sm:$0xff]  }
 0x56c   :  { %9940 = vmatprep.subr.bf16.mxu0 %v21299_v1  ;;  %v21342_v1 = vld [vmem:[%s29859_s4 + $0x80] ss:$60 sps:$4 sm:$0xff]  }
 0x5e6   :  { %v7379_v5 = vpop.f32.mrf.mxu0 }
 0x5e7   :  { %v7380_v37 = vadd.f32 %v7379_v5, %v7284_v9  ;;  %v21356_v9 = vld [vmem:[%s29859_s4 + $0x714] ss:$60 sps:$4 sm:$0xff]  }
 0x5e8   :  { %v7381_v10 = vpop.f32.mrf.mxu0  ;;  %v21354_v5 = vld [vmem:[%s29859_s4 + $0x710] ss:$60 sps:$4 sm:$0xff]  }
 0x5e9   :  { %v7382_v11 = vadd.f32 %v7381_v10, %v7288_v15  ;;  %v7427_v0 = vmax.f32 %v7380_v37, 0.0  ;;  %v21359_v15 = vld [vmem:[%s29859_s4 + $0x2e4] ss:$60 sps:$4 sm:$0xff]   ;;  %v21362_v10 = vld [vmem:[%s29859_s4 + $0x69c] ss:$60 sps:$4 sm:$0xff]  }
 0x5ea   :  { %v7383_v42 = vpop.f32.mrf.mxu0  ;;  %v21357_v37 = vld [vmem:[%s29859_s4 + $0x2e0] ss:$60 sps:$4 sm:$0xff]  }
 0x5eb   :  { %v7428_v34 = vmax.f32 %v7382_v11, 0.0  ;;  %v26150_v28 = vpack.c.bf16 %v7427_v0, %v7427_v0  ;;  %v21365_v11 = vld [vmem:[%s29859_s4 + $0x26c] ss:$60 sps:$4 sm:$0xff]   ;;  %v21360_v0 = vld [vmem:[%s29859_s4 + $0x698] ss:$60 sps:$4 sm:$0xff]  }
 0x5ec   :  { %v7384_v43 = vpop.f32.mrf.mxu0  ;;  %v21363_v42 = vld [vmem:[%s29859_s4 + $0x268] ss:$60 sps:$4 sm:$0xff]  }
 0x5ed   :  { %v26144_v29 = vpack.c.bf16 %v7428_v34, %v7428_v34  ;;  %v21368_v34 = vld [vmem:[%s29859_s4 + $0x624] ss:$60 sps:$4 sm:$0xff]  }
 0x5ee   :  { %v7420_v39 = vpop.f32.mrf.mxu0  ;;  %v21366_v43 = vld [vmem:[%s29859_s4 + $0x620] ss:$60 sps:$4 sm:$0xff]  }
 0x5ef   :  { %v7421_v35 = vadd.f32 %v7420_v39, %v7292_v12  ;;  %9849 = vmatprep.mubr.bf16.mxu0 %v26144_v29  ;;  %v21371_v12 = vld [vmem:[%s29859_s4 + $0x1f4] ss:$60 sps:$4 sm:$0xff]   ;;  %v21377_v39 = vld [vmem:[%s29859_s4 + $0x17c] ss:$60 sps:$4 sm:$0xff]  }
 0x5f0   :  { %v7422_v53 = vpop.f32.mrf.mxu0  ;;  %9850 = vmatmul.mubr.bf16.vlgmr.msra.gmra.mxu0 %v26150_v28 }
 0x5f1   :  { %v7423_v23 = vadd.f32 %v7422_v53, %v7296_v47  ;;  %9941 = vmatpush1.bf16.msra.mxu0 %v21297_v21  ;;  %v7429_v18 = vmax.f32 %v7421_v35, 0.0  ;;  %v21369_v21 = vld [vmem:[%s29859_s4 + $0x1f0] ss:$60 sps:$4 sm:$0xff]   ;;  %v21375_v35 = vld [vmem:[%s29859_s4 + $0x178] ss:$60 sps:$4 sm:$0xff]  }
 0x5f2   :  { %v7424_v22 = vpop.f32.mrf.mxu0  ;;  %9942 = vmatprep.subr.bf16.mxu0 %v21305_v14  ;;  %v21374_v47 = vld [vmem:[%s29859_s4 + $0x5ac] ss:$60 sps:$4 sm:$0xff]   ;;  %v21380_v53 = vld [vmem:[%s29859_s4 + $0x534] ss:$60 sps:$4 sm:$0xff]  }
 0x5f3   :  { %v7430_v13 = vmax.f32 %v7423_v23, 0.0  ;;  %v26171_v52 = vpack.c.bf16 %v7429_v18, %v7429_v18  ;;  %v21372_v14 = vld [vmem:[%s29859_s4 + $0x5a8] ss:$60 sps:$4 sm:$0xff]   ;;  %v21381_v18 = vld [vmem:[%s29859_s4 + $0x100] ss:$60 sps:$4 sm:$0xff]  }
 0x5f4   :  { %v7425_v25 = vpop.f32.mrf.mxu0  ;;  %v21383_v23 = vld [vmem:[%s29859_s4 + $0x104] ss:$60 sps:$4 sm:$0xff]   ;;  %v21386_v22 = vld [vmem:[%s29859_s4 + $0x4bc] ss:$60 sps:$4 sm:$0xff]  }
 0x5f5   :  { %v26163_v27 = vpack.c.bf16 %v7430_v13, %v7430_v13  ;;  %9943 = vmatpush1.bf16.msra.mxu0 %v21303_v58  ;;  %v21378_v58 = vld [vmem:[%s29859_s4 + $0x530] ss:$60 sps:$4 sm:$0xff]   ;;  %v21384_v13 = vld [vmem:[%s29859_s4 + $0x4b8] ss:$60 sps:$4 sm:$0xff]   ;;  %v21387_v25 = vld [vmem:[%s29859_s4 + $0x88] ss:$60 sps:$4 sm:$0xff]  }
 0x5f6   :  { %9944 = vmatprep.subr.bf16.mxu0 %v21311_v46  ;;  %v21389_v46 = vld [vmem:[%s29859_s4 + $0x8c] ss:$60 sps:$4 sm:$0xff]  }
 0x5f7   :  { %18856 = vmatprep.mubr.msk.bf16.mxu1 %vm1251_vm0, %v26163_v27  ;;  %18857 = vmatprep.mubr.msk.bf16.mxu0 %vm1251_vm0, %v26163_v27 }
 0x5f8   :  { %9891 = vmatmul.mubr.bf16.vlgmr.msra.gmra.mxu1 %v26171_v52 }
 0x5f9   :  { %9900 = vmatpush1.bf16.msra.mxu1 %v21306_v33  ;;  %9945 = vmatpush1.bf16.msra.mxu0 %v21309_v6  ;;  %v21392_v33 = vld [vmem:[%s29859_s4 + $0x444] ss:$60 sps:$4 sm:$0xff]   ;;  %v21395_v6 = vld [vmem:[%s29859_s4 + $0x14] ss:$60 sps:$4 sm:$0xff]  }
 0x5fa   :  { %9931 = vmatprep.mubr.bf16.mxu1 %v26144_v29  ;;  %9901 = vmatprep.subr.bf16.mxu1 %v21314_v7  ;;  %v21390_v7 = vld [vmem:[%s29859_s4 + $0x440] ss:$60 sps:$4 sm:$0xff]  }
 0x5fb   :  { %9946 = vmatprep.subr.bf16.mxu0 %v21317_v41  ;;  %v21393_v41 = vld [vmem:[%s29859_s4 + $0x10] ss:$60 sps:$4 sm:$0xff]  }
 0x5fd   :  { %9902 = vmatpush1.bf16.msra.mxu1 %v21312_v30  ;;  %9947 = vmatpush1.bf16.msra.mxu0 %v21315_v8  ;;  %v21398_v30 = vld [vmem:[%s29859_s4 + $0x3cc] ss:$60 sps:$4 sm:$0xff]   ;;  %v21401_v8 = vld [vmem:[%s29859_s4 + $0x71c] ss:$60 sps:$4 sm:$0xff]  }
 0x5fe   :  { %9903 = vmatprep.subr.bf16.mxu1 %v21320_v45  ;;  %9948 = vmatprep.subr.bf16.mxu0 %v21323_v50  ;;  %v21396_v45 = vld [vmem:[%s29859_s4 + $0x3c8] ss:$60 sps:$4 sm:$0xff]   ;;  %v21399_v50 = vld [vmem:[%s29859_s4 + $0x718] ss:$60 sps:$4 sm:$0xff]  }
 0x601   :  { %9904 = vmatpush1.bf16.msra.mxu1 %v21318_v51  ;;  %9949 = vmatpush1.bf16.msra.mxu0 %v21321_v36  ;;  %v21404_v51 = vld [vmem:[%s29859_s4 + $0x6a4] ss:$60 sps:$4 sm:$0xff]   ;;  %v21407_v36 = vld [vmem:[%s29859_s4 + $0xadc] ss:$60 sps:$4 sm:$0xff]  }
 0x602   :  { %9905 = vmatprep.subr.bf16.mxu1 %v21326_v44  ;;  %9950 = vmatprep.subr.bf16.mxu0 %v21329_v54  ;;  %v21402_v44 = vld [vmem:[%s29859_s4 + $0x6a0] ss:$60 sps:$4 sm:$0xff]   ;;  %v21405_v54 = vld [vmem:[%s29859_s4 + $0xad8] ss:$60 sps:$4 sm:$0xff]  }
 0x605   :  { %9906 = vmatpush1.bf16.msra.mxu1 %v21324_v55  ;;  %9951 = vmatpush1.bf16.msra.mxu0 %v21327_v56  ;;  %v21410_v55 = vld [vmem:[%s29859_s4 + $0x62c] ss:$60 sps:$4 sm:$0xff]   ;;  %v21413_v56 = vld [vmem:[%s29859_s4 + $0xa64] ss:$60 sps:$4 sm:$0xff]  }
 0x606   :  { %9907 = vmatprep.subr.bf16.mxu1 %v21332_v19  ;;  %9952 = vmatprep.subr.bf16.mxu0 %v21335_v57  ;;  %v21408_v19 = vld [vmem:[%s29859_s4 + $0x628] ss:$60 sps:$4 sm:$0xff]   ;;  %v21411_v57 = vld [vmem:[%s29859_s4 + $0xa60] ss:$60 sps:$4 sm:$0xff]  }
 0x609   :  { %9908 = vmatpush1.bf16.msra.mxu1 %v21330_v59  ;;  %9953 = vmatpush1.bf16.msra.mxu0 %v21333_v49  ;;  %v21416_v59 = vld [vmem:[%s29859_s4 + $0x5b4] ss:$60 sps:$4 sm:$0xff]   ;;  %v21419_v49 = vld [vmem:[%s29859_s4 + $0x9ec] ss:$60 sps:$4 sm:$0xff]  }
 0x60a   :  { %9909 = vmatprep.subr.bf16.mxu1 %v21338_v17  ;;  %9954 = vmatprep.subr.bf16.mxu0 %v21341_v20  ;;  %v21414_v17 = vld [vmem:[%s29859_s4 + $0x5b0] ss:$60 sps:$4 sm:$0xff]   ;;  %v21417_v20 = vld [vmem:[%s29859_s4 + $0x9e8] ss:$60 sps:$4 sm:$0xff]  }
 0x60d   :  { %9910 = vmatpush1.bf16.msra.mxu1 %v21336_v60  ;;  %9955 = vmatpush1.bf16.msra.mxu0 %v21339_v61  ;;  %v21422_v60 = vld [vmem:[%s29859_s4 + $0x53c] ss:$60 sps:$4 sm:$0xff]   ;;  %v21425_v61 = vld [vmem:[%s29859_s4 + $0x974] ss:$60 sps:$4 sm:$0xff]  }
 0x60e   :  { %9911 = vmatprep.subr.bf16.mxu1 %v21344_v62  ;;  %9970 = vmatprep.subr.bf16.mxu0 %v21347_v63  ;;  %v21420_v62 = vld [vmem:[%s29859_s4 + $0x538] ss:$60 sps:$4 sm:$0xff]   ;;  %v21423_v63 = vld [vmem:[%s29859_s4 + $0x970] ss:$60 sps:$4 sm:$0xff]  }
 0x611   :  { %9912 = vmatpush1.bf16.msra.mxu1 %v21342_v1  ;;  %9971 = vmatpush2.bf16.msra.mxu0 %v21345_v2  ;;  %v21428_v1 = vld [vmem:[%s29859_s4 + $0x4c4] ss:$60 sps:$4 sm:$0xff]   ;;  %v21431_v2 = vld [vmem:[%s29859_s4 + $0x8fc] ss:$60 sps:$4 sm:$0xff]  }
 0x612   :  { %9913 = vmatprep.subr.bf16.mxu1 %v21350_v48  ;;  %9981 = vmatprep.subr.bf16.mxu0 %v21353_v24  ;;  %v21426_v48 = vld [vmem:[%s29859_s4 + $0x4c0] ss:$60 sps:$4 sm:$0xff]   ;;  %v21429_v24 = vld [vmem:[%s29859_s4 + $0x8f8] ss:$60 sps:$4 sm:$0xff]  }
 0x614   :  { %9973 = vmatmul.mubr.bf16.vlgmr.msra.gmra.mxu0 %v26171_v52 }
 0x615   :  { %9914 = vmatpush1.bf16.msra.mxu1 %v21348_v3  ;;  %9982 = vmatpush1.bf16.msra.mxu0 %v21351_v4  ;;  %v21434_v3 = vld [vmem:[%s29859_s4 + $0x44c] ss:$60 sps:$4 sm:$0xff]   ;;  %v21437_v4 = vld [vmem:[%s29859_s4 + $0x884] ss:$60 sps:$4 sm:$0xff]  }
 0x616   :  { %10013 = vmatprep.mubr.bf16.mxu0 %v26144_v29  ;;  %9915 = vmatprep.subr.bf16.mxu1 %v21356_v9  ;;  %v21432_v9 = vld [vmem:[%s29859_s4 + $0x448] ss:$60 sps:$4 sm:$0xff]  }
 0x617   :  { %9983 = vmatprep.subr.bf16.mxu0 %v21359_v15  ;;  %v21435_v15 = vld [vmem:[%s29859_s4 + $0x880] ss:$60 sps:$4 sm:$0xff]  }
 0x619   :  { %9916 = vmatpush2.bf16.msra.mxu1 %v21354_v5  ;;  %9984 = vmatpush1.bf16.msra.mxu0 %v21357_v37  ;;  %v21440_v5 = vld [vmem:[%s29859_s4 + $0x3d4] ss:$60 sps:$4 sm:$0xff]   ;;  %v21443_v37 = vld [vmem:[%s29859_s4 + $0x80c] ss:$60 sps:$4 sm:$0xff]  }
 0x61a   :  { %9917 = vmatprep.subr.bf16.mxu1 %v21362_v10  ;;  %9985 = vmatprep.subr.bf16.mxu0 %v21365_v11  ;;  %v21438_v10 = vld [vmem:[%s29859_s4 + $0x3d0] ss:$60 sps:$4 sm:$0xff]   ;;  %v21441_v11 = vld [vmem:[%s29859_s4 + $0x808] ss:$60 sps:$4 sm:$0xff]  }
 0x61d   :  { %9918 = vmatpush2.bf16.msra.mxu1 %v21360_v0  ;;  %9986 = vmatpush1.bf16.msra.mxu0 %v21363_v42  ;;  %v21446_v0 = vld [vmem:[%s29859_s4 + $0x794] ss:$60 sps:$4 sm:$0xff]   ;;  %v21449_v42 = vld [vmem:[%s29859_s4 + $0xae4] ss:$60 sps:$4 sm:$0xff]  }
 0x61e   :  { %9919 = vmatprep.subr.bf16.mxu1 %v21368_v34  ;;  %9987 = vmatprep.subr.bf16.mxu0 %v21371_v12  ;;  %v21444_v34 = vld [vmem:[%s29859_s4 + $0x790] ss:$60 sps:$4 sm:$0xff]   ;;  %v21447_v12 = vld [vmem:[%s29859_s4 + $0xae0] ss:$60 sps:$4 sm:$0xff]  }
 0x621   :  { %9920 = vmatpush2.bf16.msra.mxu1 %v21366_v43  ;;  %9988 = vmatpush1.bf16.msra.mxu0 %v21369_v21  ;;  %v21452_v43 = vld [vmem:[%s29859_s4 + $0xb54] ss:$60 sps:$4 sm:$0xff]   ;;  %v21455_v21 = vld [vmem:[%s29859_s4 + $0xa6c] ss:$60 sps:$4 sm:$0xff]  }
 0x622   :  { %9921 = vmatprep.subr.bf16.mxu1 %v21374_v47  ;;  %9989 = vmatprep.subr.bf16.mxu0 %v21377_v39  ;;  %v21450_v47 = vld [vmem:[%s29859_s4 + $0xb50] ss:$60 sps:$4 sm:$0xff]   ;;  %v21453_v39 = vld [vmem:[%s29859_s4 + $0xa68] ss:$60 sps:$4 sm:$0xff]  }
 0x625   :  { %9922 = vmatpush2.bf16.msra.mxu1 %v21372_v14  ;;  %9990 = vmatpush1.bf16.msra.mxu0 %v21375_v35  ;;  %v21458_v14 = vld [vmem:[%s29859_s4 + $0x364] ss:$60 sps:$4 sm:$0xff]   ;;  %v21461_v35 = vld [vmem:[%s29859_s4 + $0x9f4] ss:$60 sps:$4 sm:$0xff]  }
 0x626   :  { %9923 = vmatprep.subr.bf16.mxu1 %v21380_v53  ;;  %9991 = vmatprep.subr.bf16.mxu0 %v21383_v23  ;;  %v21456_v53 = vld [vmem:[%s29859_s4 + $0x360] ss:$60 sps:$4 sm:$0xff]   ;;  %v21459_v23 = vld [vmem:[%s29859_s4 + $0x9f0] ss:$60 sps:$4 sm:$0xff]  }
 0x629   :  { %9924 = vmatpush2.bf16.msra.mxu1 %v21378_v58  ;;  %9992 = vmatpush1.bf16.msra.mxu0 %v21381_v18  ;;  %v21464_v58 = vld [vmem:[%s29859_s4 + $0x2ec] ss:$60 sps:$4 sm:$0xff]   ;;  %v21467_v18 = vld [vmem:[%s29859_s4 + $0x97c] ss:$60 sps:$4 sm:$0xff]  }
 0x62a   :  { %9925 = vmatprep.subr.bf16.mxu1 %v21386_v22  ;;  %9993 = vmatprep.subr.bf16.mxu0 %v21389_v46  ;;  %v21462_v22 = vld [vmem:[%s29859_s4 + $0x2e8] ss:$60 sps:$4 sm:$0xff]   ;;  %v21465_v46 = vld [vmem:[%s29859_s4 + $0x978] ss:$60 sps:$4 sm:$0xff]  }
 0x62d   :  { %9926 = vmatpush2.bf16.msra.mxu1 %v21384_v13  ;;  %9994 = vmatpush1.bf16.msra.mxu0 %v21387_v25  ;;  %v21470_v13 = vld [vmem:[%s29859_s4 + $0x274] ss:$60 sps:$4 sm:$0xff]   ;;  %v21473_v25 = vld [vmem:[%s29859_s4 + $0x904] ss:$60 sps:$4 sm:$0xff]  }
 0x62e   :  { %9927 = vmatprep.subr.bf16.mxu1 %v21392_v33  ;;  %9995 = vmatprep.subr.bf16.mxu0 %v21395_v6  ;;  %v21468_v33 = vld [vmem:[%s29859_s4 + $0x270] ss:$60 sps:$4 sm:$0xff]   ;;  %v21471_v6 = vld [vmem:[%s29859_s4 + $0x900] ss:$60 sps:$4 sm:$0xff]  }
 0x631   :  { %9928 = vmatpush2.bf16.msra.mxu1 %v21390_v7  ;;  %9996 = vmatpush1.bf16.msra.mxu0 %v21393_v41  ;;  %v21476_v7 = vld [vmem:[%s29859_s4 + $0x1fc] ss:$60 sps:$4 sm:$0xff]   ;;  %v21479_v41 = vld [vmem:[%s29859_s4 + $0x88c] ss:$60 sps:$4 sm:$0xff]  }
 0x632   :  { %9929 = vmatprep.subr.bf16.mxu1 %v21398_v30  ;;  %9997 = vmatprep.subr.bf16.mxu0 %v21401_v8  ;;  %v21474_v30 = vld [vmem:[%s29859_s4 + $0x1f8] ss:$60 sps:$4 sm:$0xff]   ;;  %v21477_v8 = vld [vmem:[%s29859_s4 + $0x888] ss:$60 sps:$4 sm:$0xff]  }
 0x635   :  { %9930 = vmatpush2.bf16.msra.mxu1 %v21396_v45  ;;  %9998 = vmatpush2.bf16.msra.mxu0 %v21399_v50  ;;  %v21482_v45 = vld [vmem:[%s29859_s4 + $0x184] ss:$60 sps:$4 sm:$0xff]   ;;  %v21485_v50 = vld [vmem:[%s29859_s4 + $0x814] ss:$60 sps:$4 sm:$0xff]  }
 0x636   :  { %9999 = vmatprep.subr.bf16.mxu0 %v21404_v51  ;;  %10022 = vmatprep.subr.bf16.mxu1 %v21407_v36  ;;  %v21480_v51 = vld [vmem:[%s29859_s4 + $0x180] ss:$60 sps:$4 sm:$0xff]   ;;  %v21483_v36 = vld [vmem:[%s29859_s4 + $0x810] ss:$60 sps:$4 sm:$0xff]  }
 0x638   :  { %9932 = vmatmul.mubr.bf16.vlgmr.msra.gmra.mxu1 %v26150_v28 }
 0x639   :  { %10000 = vmatpush2.bf16.msra.mxu0 %v21402_v44  ;;  %10023 = vmatpush1.bf16.msra.mxu1 %v21405_v54  ;;  %v21488_v44 = vld [vmem:[%s29859_s4 + $0x10c] ss:$60 sps:$4 sm:$0xff]   ;;  %v21491_v54 = vld [vmem:[%s29859_s4 + $0x79c] ss:$60 sps:$4 sm:$0xff]  }
 0x63a   :  { %18858 = vmatprep.mubr.msk.bf16.mxu1 %vm1251_vm0, %v26163_v27  ;;  %10001 = vmatprep.subr.bf16.mxu0 %v21410_v55  ;;  %v21486_v55 = vld [vmem:[%s29859_s4 + $0x108] ss:$60 sps:$4 sm:$0xff]  }
 0x63b   :  { %10024 = vmatprep.subr.bf16.mxu1 %v21413_v56  ;;  %v21489_v56 = vld [vmem:[%s29859_s4 + $0x798] ss:$60 sps:$4 sm:$0xff]  }
 0x63d   :  { %10002 = vmatpush2.bf16.msra.mxu0 %v21408_v19  ;;  %10025 = vmatpush1.bf16.msra.mxu1 %v21411_v57  ;;  %v21494_v19 = vld [vmem:[%s29859_s4 + $0x94] ss:$60 sps:$4 sm:$0xff]   ;;  %v21497_v57 = vld [vmem:[%s29859_s4 + $0xb5c] ss:$60 sps:$4 sm:$0xff]  }
 0x63e   :  { %10003 = vmatprep.subr.bf16.mxu0 %v21416_v59  ;;  %10026 = vmatprep.subr.bf16.mxu1 %v21419_v49  ;;  %v21492_v59 = vld [vmem:[%s29859_s4 + $0x90] ss:$60 sps:$4 sm:$0xff]   ;;  %v21495_v49 = vld [vmem:[%s29859_s4 + $0xb58] ss:$60 sps:$4 sm:$0xff]  }
 0x641   :  { %10004 = vmatpush2.bf16.msra.mxu0 %v21414_v17  ;;  %10027 = vmatpush1.bf16.msra.mxu1 %v21417_v20  ;;  %v21500_v17 = vld [vmem:[%s29859_s4 + $0x1c] ss:$60 sps:$4 sm:$0xff]   ;;  %v21503_v20 = vld [vmem:[%s29859_s4 + $0x36c] ss:$60 sps:$4 sm:$0xff]  }
 0x642   :  { %10005 = vmatprep.subr.bf16.mxu0 %v21422_v60  ;;  %10028 = vmatprep.subr.bf16.mxu1 %v21425_v61  ;;  %v21498_v60 = vld [vmem:[%s29859_s4 + $0x18] ss:$60 sps:$4 sm:$0xff]   ;;  %v21501_v61 = vld [vmem:[%s29859_s4 + $0x368] ss:$60 sps:$4 sm:$0xff]  }
 0x645   :  { %10006 = vmatpush2.bf16.msra.mxu0 %v21420_v62  ;;  %10029 = vmatpush1.bf16.msra.mxu1 %v21423_v63  ;;  %v21506_v62 = vld [vmem:[%s29859_s4 + $0x724] ss:$60 sps:$4 sm:$0xff]   ;;  %v21509_v63 = vld [vmem:[%s29859_s4 + $0x2f4] ss:$60 sps:$4 sm:$0xff]  }
 0x646   :  { %10007 = vmatprep.subr.bf16.mxu0 %v21428_v1  ;;  %10030 = vmatprep.subr.bf16.mxu1 %v21431_v2  ;;  %v21504_v1 = vld [vmem:[%s29859_s4 + $0x720] ss:$60 sps:$4 sm:$0xff]   ;;  %v21507_v2 = vld [vmem:[%s29859_s4 + $0x2f0] ss:$60 sps:$4 sm:$0xff]  }
 0x649   :  { %10008 = vmatpush2.bf16.msra.mxu0 %v21426_v48  ;;  %10031 = vmatpush1.bf16.msra.mxu1 %v21429_v24  ;;  %v21512_v48 = vld [vmem:[%s29859_s4 + $0x6ac] ss:$60 sps:$4 sm:$0xff]   ;;  %v21515_v24 = vld [vmem:[%s29859_s4 + $0x27c] ss:$60 sps:$4 sm:$0xff]  }
 0x64a   :  { %10009 = vmatprep.subr.bf16.mxu0 %v21434_v3  ;;  %10032 = vmatprep.subr.bf16.mxu1 %v21437_v4  ;;  %v21510_v3 = vld [vmem:[%s29859_s4 + $0x6a8] ss:$60 sps:$4 sm:$0xff]   ;;  %v21513_v4 = vld [vmem:[%s29859_s4 + $0x278] ss:$60 sps:$4 sm:$0xff]  }
 0x64d   :  { %10010 = vmatpush2.bf16.msra.mxu0 %v21432_v9  ;;  %10033 = vmatpush1.bf16.msra.mxu1 %v21435_v15  ;;  %v21518_v9 = vld [vmem:[%s29859_s4 + $0x634] ss:$60 sps:$4 sm:$0xff]   ;;  %v21521_v15 = vld [vmem:[%s29859_s4 + $0x204] ss:$60 sps:$4 sm:$0xff]  }
 0x64e   :  { %10011 = vmatprep.subr.bf16.mxu0 %v21440_v5  ;;  %10034 = vmatprep.subr.bf16.mxu1 %v21443_v37  ;;  %v21516_v5 = vld [vmem:[%s29859_s4 + $0x630] ss:$60 sps:$4 sm:$0xff]   ;;  %v21519_v37 = vld [vmem:[%s29859_s4 + $0x200] ss:$60 sps:$4 sm:$0xff]  }
 0x651   :  { %10012 = vmatpush2.bf16.msra.mxu0 %v21438_v10  ;;  %10035 = vmatpush1.bf16.msra.mxu1 %v21441_v11  ;;  %v21524_v10 = vld [vmem:[%s29859_s4 + $0x5bc] ss:$60 sps:$4 sm:$0xff]   ;;  %v21527_v11 = vld [vmem:[%s29859_s4 + $0x18c] ss:$60 sps:$4 sm:$0xff]  }
 0x652   :  { %10036 = vmatprep.subr.bf16.mxu1 %v21446_v0  ;;  %10104 = vmatprep.subr.bf16.mxu0 %v21449_v42  ;;  %v21522_v0 = vld [vmem:[%s29859_s4 + $0x5b8] ss:$60 sps:$4 sm:$0xff]   ;;  %v21525_v42 = vld [vmem:[%s29859_s4 + $0x188] ss:$60 sps:$4 sm:$0xff]  }
 0x654   :  { %10014 = vmatmul.mubr.bf16.vlgmr.msra.gmra.mxu0 %v26150_v28 }
 0x655   :  { %10037 = vmatpush1.bf16.msra.mxu1 %v21444_v34  ;;  %10105 = vmatpush1.bf16.msra.mxu0 %v21447_v12  ;;  %v21530_v34 = vld [vmem:[%s29859_s4 + $0x544] ss:$60 sps:$4 sm:$0xff]   ;;  %v21533_v12 = vld [vmem:[%s29859_s4 + $0x114] ss:$60 sps:$4 sm:$0xff]  }
 0x656   :  { %18859 = vmatprep.mubr.msk.bf16.mxu0 %vm1251_vm0, %v26163_v27  ;;  %10052 = vmatprep.subr.bf16.mxu1 %v21452_v43  ;;  %v21528_v43 = vld [vmem:[%s29859_s4 + $0x540] ss:$60 sps:$4 sm:$0xff]  }
 0x657   :  { %10106 = vmatprep.subr.bf16.mxu0 %v21455_v21  ;;  %v21531_v21 = vld [vmem:[%s29859_s4 + $0x110] ss:$60 sps:$4 sm:$0xff]  }
 0x659   :  { %10053 = vmatpush2.bf16.msra.mxu1 %v21450_v47  ;;  %10107 = vmatpush1.bf16.msra.mxu0 %v21453_v39  ;;  %v21536_v47 = vld [vmem:[%s29859_s4 + $0x4cc] ss:$60 sps:$4 sm:$0xff]   ;;  %v21539_v39 = vld [vmem:[%s29859_s4 + $0x9c] ss:$60 sps:$4 sm:$0xff]  }
 0x65a   :  { %10063 = vmatprep.subr.bf16.mxu1 %v21458_v14  ;;  %10108 = vmatprep.subr.bf16.mxu0 %v21461_v35  ;;  %v21534_v14 = vld [vmem:[%s29859_s4 + $0x4c8] ss:$60 sps:$4 sm:$0xff]   ;;  %v21537_v35 = vld [vmem:[%s29859_s4 + $0x98] ss:$60 sps:$4 sm:$0xff]  }
 0x65c   :  { %10055 = vmatmul.mubr.bf16.vlgmr.msra.gmra.mxu1 %v26171_v52 }
 0x65d   :  { %10064 = vmatpush1.bf16.msra.mxu1 %v21456_v53  ;;  %10095 = vmatprep.mubr.bf16.mxu1 %v26144_v29  ;;  %v21542_v53 = vld [vmem:[%s29859_s4 + $0x454] ss:$60 sps:$4 sm:$0xff]  }
 0x65e   :  { %10109 = vmatpush1.bf16.msra.mxu0 %v21459_v23  ;;  %10065 = vmatprep.subr.bf16.mxu1 %v21464_v58  ;;  %v21545_v23 = vld [vmem:[%s29859_s4 + $0x24] ss:$60 sps:$4 sm:$0xff]   ;;  %v21540_v58 = vld [vmem:[%s29859_s4 + $0x450] ss:$60 sps:$4 sm:$0xff]  }
 0x65f   :  { %10110 = vmatprep.subr.bf16.mxu0 %v21467_v18  ;;  %v21543_v18 = vld [vmem:[%s29859_s4 + $0x20] ss:$60 sps:$4 sm:$0xff]  }
 0x661   :  { %10066 = vmatpush1.bf16.msra.mxu1 %v21462_v22  ;;  %v21548_v22 = vld [vmem:[%s29859_s4 + $0x3dc] ss:$60 sps:$4 sm:$0xff]  }
 0x662   :  { %10111 = vmatpush1.bf16.msra.mxu0 %v21465_v46  ;;  %10067 = vmatprep.subr.bf16.mxu1 %v21470_v13  ;;  %v21551_v46 = vld [vmem:[%s29859_s4 + $0x72c] ss:$60 sps:$4 sm:$0xff]   ;;  %v21546_v13 = vld [vmem:[%s29859_s4 + $0x3d8] ss:$60 sps:$4 sm:$0xff]  }
 0x663   :  { %10112 = vmatprep.subr.bf16.mxu0 %v21473_v25  ;;  %v21549_v25 = vld [vmem:[%s29859_s4 + $0x728] ss:$60 sps:$4 sm:$0xff]  }
 0x665   :  { %10068 = vmatpush1.bf16.msra.mxu1 %v21468_v33  ;;  %v21557_v33 = vld [vmem:[%s29859_s4 + $0xaec] ss:$60 sps:$4 sm:$0xff]  }
 0x666   :  { %10113 = vmatpush1.bf16.msra.mxu0 %v21471_v6  ;;  %10069 = vmatprep.subr.bf16.mxu1 %v21476_v7  ;;  %v21554_v6 = vld [vmem:[%s29859_s4 + $0x6b4] ss:$60 sps:$4 sm:$0xff]   ;;  %v21555_v7 = vld [vmem:[%s29859_s4 + $0xae8] ss:$60 sps:$4 sm:$0xff]  }
 0x667   :  { %10114 = vmatprep.subr.bf16.mxu0 %v21479_v41  ;;  %v21552_v41 = vld [vmem:[%s29859_s4 + $0x6b0] ss:$60 sps:$4 sm:$0xff]  }
 0x669   :  { %10070 = vmatpush1.bf16.msra.mxu1 %v21474_v30  ;;  %v21563_v30 = vld [vmem:[%s29859_s4 + $0xa74] ss:$60 sps:$4 sm:$0xff]  }
 0x66a   :  { %10115 = vmatpush1.bf16.msra.mxu0 %v21477_v8  ;;  %10071 = vmatprep.subr.bf16.mxu1 %v21482_v45  ;;  %v21560_v8 = vld [vmem:[%s29859_s4 + $0x63c] ss:$60 sps:$4 sm:$0xff]   ;;  %v21561_v45 = vld [vmem:[%s29859_s4 + $0xa70] ss:$60 sps:$4 sm:$0xff]  }
 0x66b   :  { %10116 = vmatprep.subr.bf16.mxu0 %v21485_v50  ;;  %v21558_v50 = vld [vmem:[%s29859_s4 + $0x638] ss:$60 sps:$4 sm:$0xff]  }
 0x66d   :  { %10072 = vmatpush1.bf16.msra.mxu1 %v21480_v51  ;;  %v21569_v51 = vld [vmem:[%s29859_s4 + $0x9fc] ss:$60 sps:$4 sm:$0xff]  }
 0x66e   :  { %10117 = vmatpush1.bf16.msra.mxu0 %v21483_v36  ;;  %10073 = vmatprep.subr.bf16.mxu1 %v21488_v44  ;;  %v21566_v36 = vld [vmem:[%s29859_s4 + $0x5c4] ss:$60 sps:$4 sm:$0xff]   ;;  %v21567_v44 = vld [vmem:[%s29859_s4 + $0x9f8] ss:$60 sps:$4 sm:$0xff]  }
 0x66f   :  { %10118 = vmatprep.subr.bf16.mxu0 %v21491_v54  ;;  %v21564_v54 = vld [vmem:[%s29859_s4 + $0x5c0] ss:$60 sps:$4 sm:$0xff]  }
 0x671   :  { %10074 = vmatpush1.bf16.msra.mxu1 %v21486_v55  ;;  %v21575_v55 = vld [vmem:[%s29859_s4 + $0x984] ss:$60 sps:$4 sm:$0xff]  }
 0x672   :  { %10119 = vmatpush1.bf16.msra.mxu0 %v21489_v56  ;;  %10075 = vmatprep.subr.bf16.mxu1 %v21494_v19  ;;  %v21572_v56 = vld [vmem:[%s29859_s4 + $0x54c] ss:$60 sps:$4 sm:$0xff]   ;;  %v21573_v19 = vld [vmem:[%s29859_s4 + $0x980] ss:$60 sps:$4 sm:$0xff]  }
 0x673   :  { %10134 = vmatprep.subr.bf16.mxu0 %v21497_v57  ;;  %v21570_v57 = vld [vmem:[%s29859_s4 + $0x548] ss:$60 sps:$4 sm:$0xff]  }
 0x675   :  { %10076 = vmatpush1.bf16.msra.mxu1 %v21492_v59  ;;  %v21581_v59 = vld [vmem:[%s29859_s4 + $0x90c] ss:$60 sps:$4 sm:$0xff]  }
 0x676   :  { %10135 = vmatpush2.bf16.msra.mxu0 %v21495_v49  ;;  %10077 = vmatprep.subr.bf16.mxu1 %v21500_v17  ;;  %v21578_v49 = vld [vmem:[%s29859_s4 + $0x4d4] ss:$60 sps:$4 sm:$0xff]   ;;  %v21579_v17 = vld [vmem:[%s29859_s4 + $0x908] ss:$60 sps:$4 sm:$0xff]  }
 0x677   :  { %10145 = vmatprep.subr.bf16.mxu0 %v21503_v20  ;;  %v21576_v20 = vld [vmem:[%s29859_s4 + $0x4d0] ss:$60 sps:$4 sm:$0xff]  }
 0x679   :  { %10137 = vmatmul.mubr.bf16.vlgmr.msra.gmra.mxu0 %v26171_v52  ;;  %10078 = vmatpush1.bf16.msra.mxu1 %v21498_v60  ;;  %v21587_v60 = vld [vmem:[%s29859_s4 + $0x894] ss:$60 sps:$4 sm:$0xff]  }
 0x67a   :  { %10146 = vmatpush1.bf16.msra.mxu0 %v21501_v61  ;;  %10177 = vmatprep.mubr.bf16.mxu0 %v26144_v29  ;;  %v21584_v61 = vld [vmem:[%s29859_s4 + $0x45c] ss:$60 sps:$4 sm:$0xff]  }
 0x67b   :  { %10079 = vmatprep.subr.bf16.mxu1 %v21506_v62  ;;  %10147 = vmatprep.subr.bf16.mxu0 %v21509_v63  ;;  %v21585_v62 = vld [vmem:[%s29859_s4 + $0x890] ss:$60 sps:$4 sm:$0xff]   ;;  %v21582_v63 = vld [vmem:[%s29859_s4 + $0x458] ss:$60 sps:$4 sm:$0xff]  }
 0x67d   :  { %10080 = vmatpush2.bf16.msra.mxu1 %v21504_v1  ;;  %v21593_v1 = vld [vmem:[%s29859_s4 + $0x81c] ss:$60 sps:$4 sm:$0xff]  }
 0x67e   :  { %10148 = vmatpush1.bf16.msra.mxu0 %v21507_v2  ;;  %10081 = vmatprep.subr.bf16.mxu1 %v21512_v48  ;;  %v21590_v2 = vld [vmem:[%s29859_s4 + $0x3e4] ss:$60 sps:$4 sm:$0xff]  }
 0x67f   :  { %10149 = vmatprep.subr.bf16.mxu0 %v21515_v24  ;;  %v26755_v48 = vld [vmem:[%s29861_s9] sm:$0xff] }
 0x681   :  { %10082 = vmatpush2.bf16.msra.mxu1 %v21510_v3  ;;  %v21591_v3 = vld [vmem:[%s29859_s4 + $0x818] ss:$60 sps:$4 sm:$0xff]  }
 0x682   :  { %10150 = vmatpush1.bf16.msra.mxu0 %v21513_v4  ;;  %10083 = vmatprep.subr.bf16.mxu1 %v21518_v9  ;;  %v21588_v9 = vld [vmem:[%s29859_s4 + $0x3e0] ss:$60 sps:$4 sm:$0xff]  }
 0x683   :  { %10151 = vmatprep.subr.bf16.mxu0 %v21521_v15  ;;  %v21596_v15 = vld [vmem:[%s29859_s4 + $0x7a4] ss:$60 sps:$4 sm:$0xff]  }
 0x685   :  { %10084 = vmatpush2.bf16.msra.mxu1 %v21516_v5  ;;  %v7842_v5 = vrot.slane %v26755_v48, %v23803_v38 }
 0x686   :  { %10152 = vmatpush1.bf16.msra.mxu0 %v21519_v37  ;;  %10085 = vmatprep.subr.bf16.mxu1 %v21524_v10  ;;  %v21599_v37 = vld [vmem:[%s29859_s4 + $0xaf4] ss:$60 sps:$4 sm:$0xff]  }
 0x687   :  { %10153 = vmatprep.subr.bf16.mxu0 %v21527_v11  ;;  %v7846_v11 = vrot.slane %v26755_v48, %v23811_v40 }
 0x689   :  { %10086 = vmatpush2.bf16.msra.mxu1 %v21522_v0  ;;  %v21594_v0 = vld [vmem:[%s29859_s4 + $0x7a0] ss:$60 sps:$4 sm:$0xff]  }
 0x68a   :  { %10154 = vmatpush1.bf16.msra.mxu0 %v21525_v42  ;;  %10087 = vmatprep.subr.bf16.mxu1 %v21530_v34  ;;  %v21597_v34 = vld [vmem:[%s29859_s4 + $0xaf0] ss:$60 sps:$4 sm:$0xff]  }
 0x68b   :  { %10155 = vmatprep.subr.bf16.mxu0 %v21533_v12 }
 0x68d   :  { %10088 = vmatpush2.bf16.msra.mxu1 %v21528_v43  ;;  %v21602_v43 = vld [vmem:[%s29859_s4 + $0xb64] ss:$60 sps:$4 sm:$0xff]  }
 0x68e   :  { %10156 = vmatpush1.bf16.msra.mxu0 %v21531_v21  ;;  %10089 = vmatprep.subr.bf16.mxu1 %v21536_v47  ;;  %v21605_v21 = vld [vmem:[%s29859_s4 + $0xa7c] ss:$60 sps:$4 sm:$0xff]  }
 0x68f   :  { %10157 = vmatprep.subr.bf16.mxu0 %v21539_v39 }
 0x691   :  { %10090 = vmatpush2.bf16.msra.mxu1 %v21534_v14 }
 0x692   :  { %10158 = vmatpush1.bf16.msra.mxu0 %v21537_v35  ;;  %10091 = vmatprep.subr.bf16.mxu1 %v21542_v53  ;;  %v21600_v35 = vld [vmem:[%s29859_s4 + $0xb60] ss:$60 sps:$4 sm:$0xff]  }
 0x693   :  { %10159 = vmatprep.subr.bf16.mxu0 %v21545_v23  ;;  %v21603_v23 = vld [vmem:[%s29859_s4 + $0xa78] ss:$60 sps:$4 sm:$0xff]  }
 0x695   :  { %10092 = vmatpush2.bf16.msra.mxu1 %v21540_v58  ;;  %v21608_v58 = vld [vmem:[%s29859_s4 + $0x374] ss:$60 sps:$4 sm:$0xff]  }
 0x696   :  { %10160 = vmatpush1.bf16.msra.mxu0 %v21543_v18  ;;  %10093 = vmatprep.subr.bf16.mxu1 %v21548_v22  ;;  %v21611_v22 = vld [vmem:[%s29859_s4 + $0xa04] ss:$60 sps:$4 sm:$0xff]  }
 0x697   :  { %10161 = vmatprep.subr.bf16.mxu0 %v21551_v46 }
 0x699   :  { %10094 = vmatpush2.bf16.msra.mxu1 %v21546_v13  ;;  %v21606_v13 = vld [vmem:[%s29859_s4 + $0x370] ss:$60 sps:$4 sm:$0xff]  }
 0x69a   :  { %10162 = vmatpush2.bf16.msra.mxu0 %v21549_v25  ;;  %10186 = vmatprep.subr.bf16.mxu1 %v21557_v33  ;;  %v21609_v33 = vld [vmem:[%s29859_s4 + $0xa00] ss:$60 sps:$4 sm:$0xff]  }
 0x69b   :  { %10163 = vmatprep.subr.bf16.mxu0 %v21554_v6  ;;  %v21614_v6 = vld [vmem:[%s29859_s4 + $0x2fc] ss:$60 sps:$4 sm:$0xff]  }
 0x69c   :  { %10096 = vmatmul.mubr.bf16.vlgmr.msra.gmra.mxu1 %v26150_v28 }
 0x69d   :  { %10187 = vmatpush1.bf16.msra.mxu1 %v21555_v7  ;;  %18860 = vmatprep.mubr.msk.bf16.mxu1 %vm1251_vm0, %v26163_v27  ;;  %v21617_v7 = vld [vmem:[%s29859_s4 + $0x98c] ss:$60 sps:$4 sm:$0xff]  }
 0x69e   :  { %10164 = vmatpush2.bf16.msra.mxu0 %v21552_v41  ;;  %10188 = vmatprep.subr.bf16.mxu1 %v21563_v30  ;;  %v21612_v41 = vld [vmem:[%s29859_s4 + $0x2f8] ss:$60 sps:$4 sm:$0xff]   ;;  %v21615_v30 = vld [vmem:[%s29859_s4 + $0x988] ss:$60 sps:$4 sm:$0xff]  }
 0x69f   :  { %10165 = vmatprep.subr.bf16.mxu0 %v21560_v8  ;;  %v21620_v8 = vld [vmem:[%s29859_s4 + $0x284] ss:$60 sps:$4 sm:$0xff]  }
 0x6a1   :  { %10189 = vmatpush1.bf16.msra.mxu1 %v21561_v45  ;;  %v21623_v45 = vld [vmem:[%s29859_s4 + $0x914] ss:$60 sps:$4 sm:$0xff]  }
 0x6a2   :  { %10166 = vmatpush2.bf16.msra.mxu0 %v21558_v50  ;;  %10190 = vmatprep.subr.bf16.mxu1 %v21569_v51  ;;  %v21618_v50 = vld [vmem:[%s29859_s4 + $0x280] ss:$60 sps:$4 sm:$0xff]   ;;  %v21621_v51 = vld [vmem:[%s29859_s4 + $0x910] ss:$60 sps:$4 sm:$0xff]  }
 0x6a3   :  { %10167 = vmatprep.subr.bf16.mxu0 %v21566_v36  ;;  %v21626_v36 = vld [vmem:[%s29859_s4 + $0x20c] ss:$60 sps:$4 sm:$0xff]  }
 0x6a5   :  { %10191 = vmatpush1.bf16.msra.mxu1 %v21567_v44  ;;  %v21624_v44 = vld [vmem:[%s29859_s4 + $0x208] ss:$60 sps:$4 sm:$0xff]  }
 0x6a6   :  { %10168 = vmatpush2.bf16.msra.mxu0 %v21564_v54  ;;  %10192 = vmatprep.subr.bf16.mxu1 %v21575_v55  ;;  %v21629_v54 = vld [vmem:[%s29859_s4 + $0x89c] ss:$60 sps:$4 sm:$0xff]  }
 0x6a7   :  { %10169 = vmatprep.subr.bf16.mxu0 %v21572_v56  ;;  %v21627_v55 = vld [vmem:[%s29859_s4 + $0x898] ss:$60 sps:$4 sm:$0xff]  }
 0x6a8   :  { %v21632_v56 = vld [vmem:[%s29859_s4 + $0x194] ss:$60 sps:$4 sm:$0xff]  }
 0x6a9   :  { %10193 = vmatpush1.bf16.msra.mxu1 %v21573_v19  ;;  %v21630_v19 = vld [vmem:[%s29859_s4 + $0x190] ss:$60 sps:$4 sm:$0xff]  }
 0x6aa   :  { %10170 = vmatpush2.bf16.msra.mxu0 %v21570_v57  ;;  %10194 = vmatprep.subr.bf16.mxu1 %v21581_v59  ;;  %v21635_v57 = vld [vmem:[%s29859_s4 + $0x824] ss:$60 sps:$4 sm:$0xff]  }
 0x6ab   :  { %10171 = vmatprep.subr.bf16.mxu0 %v21578_v49  ;;  %v21633_v59 = vld [vmem:[%s29859_s4 + $0x820] ss:$60 sps:$4 sm:$0xff]  }
 0x6ac   :  { %v21638_v49 = vld [vmem:[%s29859_s4 + $0x11c] ss:$60 sps:$4 sm:$0xff]  }
 0x6ad   :  { %10195 = vmatpush1.bf16.msra.mxu1 %v21579_v17  ;;  %v21641_v17 = vld [vmem:[%s29859_s4 + $0x7ac] ss:$60 sps:$4 sm:$0xff]  }
 0x6ae   :  { %10172 = vmatpush2.bf16.msra.mxu0 %v21576_v20  ;;  %10196 = vmatprep.subr.bf16.mxu1 %v21587_v60  ;;  %v21636_v20 = vld [vmem:[%s29859_s4 + $0x118] ss:$60 sps:$4 sm:$0xff]   ;;  %v21639_v60 = vld [vmem:[%s29859_s4 + $0x7a8] ss:$60 sps:$4 sm:$0xff]  }
 0x6af   :  { %10173 = vmatprep.subr.bf16.mxu0 %v21584_v61  ;;  %v21644_v61 = vld [vmem:[%s29859_s4 + $0xa4] ss:$60 sps:$4 sm:$0xff]  }
 0x6b0   :  { %v9851_v24 = vpop.f32.mrf.mxu0 }
 0x6b1   :  { %10197 = vmatpush1.bf16.msra.mxu1 %v21585_v62  ;;  %v9852_v12 = vadd.f32 %v9851_v24, %v7842_v5  ;;  %v21647_v62 = vld [vmem:[%s29859_s4 + $0xb6c] ss:$60 sps:$4 sm:$0xff]   ;;  %v21651_v5 = vld [vmem:[%s29859_s4 + $0x378] ss:$60 sps:$4 sm:$0xff]  }
 0x6b2   :  { %10174 = vmatpush2.bf16.msra.mxu0 %v21582_v63  ;;  %v9853_v4 = vpop.f32.mrf.mxu0  ;;  %10198 = vmatprep.subr.bf16.mxu1 %v21593_v1  ;;  %v21642_v63 = vld [vmem:[%s29859_s4 + $0xa0] ss:$60 sps:$4 sm:$0xff]   ;;  %v21645_v24 = vld [vmem:[%s29859_s4 + $0xb68] ss:$60 sps:$4 sm:$0xff]  }
 0x6b3   :  { %10175 = vmatprep.subr.bf16.mxu0 %v21590_v2  ;;  %v9854_v39 = vadd.f32 %v9853_v4, %v7846_v11  ;;  %v21648_v4 = vld [vmem:[%s29859_s4 + $0x28] ss:$60 sps:$4 sm:$0xff]   ;;  %v21656_v11 = vld [vmem:[%s29859_s4 + $0x734] ss:$60 sps:$4 sm:$0xff]  }
 0x6b4   :  { %v9855_v10 = vpop.f32.mrf.mxu0 }
 0x6b5   :  { %10199 = vmatpush1.bf16.msra.mxu1 %v21591_v3  ;;  %v21650_v3 = vld [vmem:[%s29859_s4 + $0x2c] ss:$60 sps:$4 sm:$0xff]  }
 0x6b6   :  { %10176 = vmatpush2.bf16.msra.mxu0 %v21588_v9  ;;  %v9856_v42 = vpop.f32.mrf.mxu0  ;;  %10200 = vmatprep.subr.bf16.mxu1 %v21596_v15  ;;  %v21653_v9 = vld [vmem:[%s29859_s4 + $0x37c] ss:$60 sps:$4 sm:$0xff]   ;;  %v21654_v10 = vld [vmem:[%s29859_s4 + $0x730] ss:$60 sps:$4 sm:$0xff]  }
 0x6b7   :  { %10268 = vmatprep.subr.bf16.mxu0 %v21599_v37  ;;  %v21657_v42 = vld [vmem:[%s29859_s4 + $0x300] ss:$60 sps:$4 sm:$0xff]  }
 0x6b8   :  { %v9892_v47 = vpop.f32.mrf.mxu1 }
 0x6b9   :  { %10178 = vmatmul.mubr.bf16.vlgmr.msra.gmra.mxu0 %v26150_v28  ;;  %v26786_v14 = vadd.f32 %v9892_v47, %v9852_v12  ;;  %10201 = vmatpush1.bf16.msra.mxu1 %v21594_v0  ;;  %v21659_v0 = vld [vmem:[%s29859_s4 + $0x304] ss:$60 sps:$4 sm:$0xff]   ;;  %v21660_v12 = vld [vmem:[%s29859_s4 + $0x6b8] ss:$60 sps:$4 sm:$0xff]  }
 0x6ba   :  { %10269 = vmatpush1.bf16.msra.mxu0 %v21597_v34  ;;  %18861 = vmatprep.mubr.msk.bf16.mxu0 %vm1251_vm0, %v26163_v27  ;;  %v9894_v53 = vpop.f32.mrf.mxu1  ;;  %v21662_v34 = vld [vmem:[%s29859_s4 + $0x6bc] ss:$60 sps:$4 sm:$0xff]   ;;  %v21668_v47 = vld [vmem:[%s29859_s4 + $0x644] ss:$60 sps:$4 sm:$0xff]  }
 0x6bb   :  { %v26799_v18 = vadd.f32 %v9894_v53, %v9854_v39  ;;  %10216 = vmatprep.subr.bf16.mxu1 %v21602_v43  ;;  %10270 = vmatprep.subr.bf16.mxu0 %v21605_v21  ;;  %v21665_v43 = vld [vmem:[%s29859_s4 + $0x28c] ss:$60 sps:$4 sm:$0xff]   ;;  %v21671_v39 = vld [vmem:[%s29859_s4 + $0x214] ss:$60 sps:$4 sm:$0xff]  }
 0x6bc   :  { %v9896_v46 = vpop.f32.mrf.mxu1  ;;  %v21663_v21 = vld [vmem:[%s29859_s4 + $0x288] ss:$60 sps:$4 sm:$0xff]   ;;  %v21669_v53 = vld [vmem:[%s29859_s4 + $0x210] ss:$60 sps:$4 sm:$0xff]  }
 0x6bd   :  { %10217 = vmatpush2.bf16.msra.mxu1 %v21600_v35  ;;  %v21666_v35 = vld [vmem:[%s29859_s4 + $0x640] ss:$60 sps:$4 sm:$0xff]   ;;  %v21675_v46 = vld [vmem:[%s29859_s4 + $0x198] ss:$60 sps:$4 sm:$0xff]  }
 0x6be   :  { %10271 = vmatpush1.bf16.msra.mxu0 %v21603_v23  ;;  %v9897_v25 = vpop.f32.mrf.mxu1  ;;  %10227 = vmatprep.subr.bf16.mxu1 %v21608_v58  ;;  %v21674_v23 = vld [vmem:[%s29859_s4 + $0x5cc] ss:$60 sps:$4 sm:$0xff]  }
 0x6bf   :  { %10272 = vmatprep.subr.bf16.mxu0 %v21611_v22  ;;  %v21672_v58 = vld [vmem:[%s29859_s4 + $0x5c8] ss:$60 sps:$4 sm:$0xff]   ;;  %v21677_v22 = vld [vmem:[%s29859_s4 + $0x19c] ss:$60 sps:$4 sm:$0xff]   ;;  %v21678_v25 = vld [vmem:[%s29859_s4 + $0x550] ss:$60 sps:$4 sm:$0xff]  }
 0x6c0   :  { %10219 = vmatmul.mubr.bf16.vlgmr.msra.gmra.mxu1 %v26171_v52 }
 0x6c1   :  { %10228 = vmatpush1.bf16.msra.mxu1 %v21606_v13  ;;  %10259 = vmatprep.mubr.bf16.mxu1 %v26144_v29  ;;  %v21680_v13 = vld [vmem:[%s29859_s4 + $0x554] ss:$60 sps:$4 sm:$0xff]  }
 0x6c2   :  { %10273 = vmatpush1.bf16.msra.mxu0 %v21609_v33  ;;  %10229 = vmatprep.subr.bf16.mxu1 %v21614_v6  ;;  %v21683_v33 = vld [vmem:[%s29859_s4 + $0x124] ss:$60 sps:$4 sm:$0xff]  }
 0x6c3   :  { %10274 = vmatprep.subr.bf16.mxu0 %v21617_v7  ;;  %v21681_v6 = vld [vmem:[%s29859_s4 + $0x120] ss:$60 sps:$4 sm:$0xff]  }
 0x6c4   :  { %v21686_v7 = vld [vmem:[%s29859_s4 + $0x4dc] ss:$60 sps:$4 sm:$0xff]  }
 0x6c5   :  { %10230 = vmatpush1.bf16.msra.mxu1 %v21612_v41  ;;  %v21684_v41 = vld [vmem:[%s29859_s4 + $0x4d8] ss:$60 sps:$4 sm:$0xff]  }
 0x6c6   :  { %10275 = vmatpush1.bf16.msra.mxu0 %v21615_v30  ;;  %10231 = vmatprep.subr.bf16.mxu1 %v21620_v8  ;;  %v21689_v30 = vld [vmem:[%s29859_s4 + $0xac] ss:$60 sps:$4 sm:$0xff]  }
 0x6c7   :  { %10276 = vmatprep.subr.bf16.mxu0 %v21623_v45  ;;  %v21687_v8 = vld [vmem:[%s29859_s4 + $0xa8] ss:$60 sps:$4 sm:$0xff]  }
 0x6c8   :  { %v21692_v45 = vld [vmem:[%s29859_s4 + $0x464] ss:$60 sps:$4 sm:$0xff]  }
 0x6c9   :  { %10232 = vmatpush1.bf16.msra.mxu1 %v21618_v50  ;;  %v21695_v50 = vld [vmem:[%s29859_s4 + $0x34] ss:$60 sps:$4 sm:$0xff]  }
 0x6ca   :  { %10277 = vmatpush1.bf16.msra.mxu0 %v21621_v51  ;;  %10233 = vmatprep.subr.bf16.mxu1 %v21626_v36  ;;  %v21690_v51 = vld [vmem:[%s29859_s4 + $0x460] ss:$60 sps:$4 sm:$0xff]   ;;  %v21693_v36 = vld [vmem:[%s29859_s4 + $0x30] ss:$60 sps:$4 sm:$0xff]  }
 0x6cb   :  { %10278 = vmatprep.subr.bf16.mxu0 %v21629_v54  ;;  %v21698_v54 = vld [vmem:[%s29859_s4 + $0x3ec] ss:$60 sps:$4 sm:$0xff]  }
 0x6cd   :  { %10234 = vmatpush1.bf16.msra.mxu1 %v21624_v44  ;;  %v7850_v44 = vrot.slane %v26755_v48, %v24044_v26 }
 0x6ce   :  { %10279 = vmatpush1.bf16.msra.mxu0 %v21627_v55  ;;  %10235 = vmatprep.subr.bf16.mxu1 %v21632_v56  ;;  %v21696_v55 = vld [vmem:[%s29859_s4 + $0x3e8] ss:$60 sps:$4 sm:$0xff]   ;;  %v21701_v56 = vld [vmem:[%s29859_s4 + $0x73c] ss:$60 sps:$4 sm:$0xff]  }
 0x6cf   :  { %10280 = vmatprep.subr.bf16.mxu0 %v21635_v57  ;;  %v21699_v57 = vld [vmem:[%s29859_s4 + $0x738] ss:$60 sps:$4 sm:$0xff]  }
 0x6d1   :  { %10236 = vmatpush1.bf16.msra.mxu1 %v21630_v19 }
 0x6d2   :  { %10281 = vmatpush1.bf16.msra.mxu0 %v21633_v59  ;;  %10237 = vmatprep.subr.bf16.mxu1 %v21638_v49  ;;  %v21707_v59 = vld [vmem:[%s29859_s4 + $0xafc] ss:$60 sps:$4 sm:$0xff]  }
 0x6d3   :  { %10282 = vmatprep.subr.bf16.mxu0 %v21641_v17 }
 0x6d4   :  { %v26881_v1 = vpop.f32.mrf.mxu0 }
 0x6d5   :  { %10238 = vmatpush1.bf16.msra.mxu1 %v21636_v20 }
 0x6d6   :  { %10283 = vmatpush1.bf16.msra.mxu0 %v21639_v60  ;;  %v26883_v2 = vpop.f32.mrf.mxu0  ;;  %10239 = vmatprep.subr.bf16.mxu1 %v21644_v61  ;;  %v21704_v60 = vld [vmem:[%s29859_s4 + $0x6c4] ss:$60 sps:$4 sm:$0xff]  }
 0x6d7   :  { %10298 = vmatprep.subr.bf16.mxu0 %v21647_v62  ;;  %v21702_v62 = vld [vmem:[%s29859_s4 + $0x6c0] ss:$60 sps:$4 sm:$0xff]  }
 0x6d8   :  { %v9978_v15 = vpop.f32.mrf.mxu0 }
 0x6d9   :  { %10240 = vmatpush1.bf16.msra.mxu1 %v21642_v63  ;;  %v21705_v63 = vld [vmem:[%s29859_s4 + $0xaf8] ss:$60 sps:$4 sm:$0xff]   ;;  %v21719_v15 = vld [vmem:[%s29859_s4 + $0xa0c] ss:$60 sps:$4 sm:$0xff]  }
 0x6da   :  { %10299 = vmatpush2.bf16.msra.mxu0 %v21645_v24  ;;  %v9979_v37 = vpop.f32.mrf.mxu0  ;;  %10241 = vmatprep.subr.bf16.mxu1 %v21650_v3  ;;  %v21713_v24 = vld [vmem:[%s29859_s4 + $0xa84] ss:$60 sps:$4 sm:$0xff]   ;;  %v21710_v3 = vld [vmem:[%s29859_s4 + $0x64c] ss:$60 sps:$4 sm:$0xff]  }
 0x6db   :  { %10309 = vmatprep.subr.bf16.mxu0 %v21653_v9  ;;  %v21711_v9 = vld [vmem:[%s29859_s4 + $0xa80] ss:$60 sps:$4 sm:$0xff]   ;;  %v21714_v37 = vld [vmem:[%s29859_s4 + $0x5d0] ss:$60 sps:$4 sm:$0xff]  }
 0x6dd   :  { %10301 = vmatmul.mubr.bf16.vlgmr.msra.gmra.mxu0 %v26171_v52  ;;  %10242 = vmatpush1.bf16.msra.mxu1 %v21648_v4  ;;  %v21708_v4 = vld [vmem:[%s29859_s4 + $0x648] ss:$60 sps:$4 sm:$0xff]  }
 0x6de   :  { %10310 = vmatpush1.bf16.msra.mxu0 %v21651_v5  ;;  %10341 = vmatprep.mubr.bf16.mxu0 %v26144_v29  ;;  %v21716_v5 = vld [vmem:[%s29859_s4 + $0x5d4] ss:$60 sps:$4 sm:$0xff]  }
 0x6df   :  { %10243 = vmatprep.subr.bf16.mxu1 %v21656_v11  ;;  %10311 = vmatprep.subr.bf16.mxu0 %v21659_v0  ;;  %v21725_v11 = vld [vmem:[%s29859_s4 + $0x994] ss:$60 sps:$4 sm:$0xff]   ;;  %v21722_v0 = vld [vmem:[%s29859_s4 + $0x55c] ss:$60 sps:$4 sm:$0xff]  }
 0x6e1   :  { %10244 = vmatpush2.bf16.msra.mxu1 %v21654_v10  ;;  %v21717_v10 = vld [vmem:[%s29859_s4 + $0xa08] ss:$60 sps:$4 sm:$0xff]  }
 0x6e2   :  { %10312 = vmatpush1.bf16.msra.mxu0 %v21657_v42  ;;  %10245 = vmatprep.subr.bf16.mxu1 %v21662_v34  ;;  %v21723_v42 = vld [vmem:[%s29859_s4 + $0x990] ss:$60 sps:$4 sm:$0xff]   ;;  %v21720_v34 = vld [vmem:[%s29859_s4 + $0x558] ss:$60 sps:$4 sm:$0xff]  }
 0x6e3   :  { %10313 = vmatprep.subr.bf16.mxu0 %v21665_v43  ;;  %v21731_v43 = vld [vmem:[%s29859_s4 + $0x91c] ss:$60 sps:$4 sm:$0xff]  }
 0x6e5   :  { %10246 = vmatpush2.bf16.msra.mxu1 %v21660_v12  ;;  %v21728_v12 = vld [vmem:[%s29859_s4 + $0x4e4] ss:$60 sps:$4 sm:$0xff]  }
 0x6e6   :  { %10314 = vmatpush1.bf16.msra.mxu0 %v21663_v21  ;;  %10247 = vmatprep.subr.bf16.mxu1 %v21668_v47  ;;  %v21729_v21 = vld [vmem:[%s29859_s4 + $0x918] ss:$60 sps:$4 sm:$0xff]   ;;  %v21726_v47 = vld [vmem:[%s29859_s4 + $0x4e0] ss:$60 sps:$4 sm:$0xff]  }
 0x6e7   :  { %10315 = vmatprep.subr.bf16.mxu0 %v21671_v39  ;;  %v21734_v39 = vld [vmem:[%s29859_s4 + $0x46c] ss:$60 sps:$4 sm:$0xff]  }
 0x6e9   :  { %10248 = vmatpush2.bf16.msra.mxu1 %v21666_v35  ;;  %v21737_v35 = vld [vmem:[%s29859_s4 + $0x8a4] ss:$60 sps:$4 sm:$0xff]  }
 0x6ea   :  { %10316 = vmatpush1.bf16.msra.mxu0 %v21669_v53  ;;  %10249 = vmatprep.subr.bf16.mxu1 %v21674_v23  ;;  %v21735_v53 = vld [vmem:[%s29859_s4 + $0x8a0] ss:$60 sps:$4 sm:$0xff]   ;;  %v21732_v23 = vld [vmem:[%s29859_s4 + $0x468] ss:$60 sps:$4 sm:$0xff]  }
 0x6eb   :  { %10317 = vmatprep.subr.bf16.mxu0 %v21677_v22  ;;  %v21743_v22 = vld [vmem:[%s29859_s4 + $0x82c] ss:$60 sps:$4 sm:$0xff]  }
 0x6ed   :  { %10250 = vmatpush2.bf16.msra.mxu1 %v21672_v58  ;;  %v21740_v58 = vld [vmem:[%s29859_s4 + $0x3f4] ss:$60 sps:$4 sm:$0xff]  }
 0x6ee   :  { %10318 = vmatpush1.bf16.msra.mxu0 %v21675_v46  ;;  %10251 = vmatprep.subr.bf16.mxu1 %v21680_v13  ;;  %v27087_v46 = vsub.s32 4, %v23785_v31  ;;  %v21741_v13 = vld [vmem:[%s29859_s4 + $0x828] ss:$60 sps:$4 sm:$0xff]  }
 0x6ef   :  { %10319 = vmatprep.subr.bf16.mxu0 %v21683_v33  ;;  %v27093_v33 = vsub.s32 5, %v23785_v31 }
 0x6f1   :  { %10252 = vmatpush2.bf16.msra.mxu1 %v21678_v25 }
 0x6f2   :  { %10320 = vmatpush1.bf16.msra.mxu0 %v21681_v6  ;;  %10253 = vmatprep.subr.bf16.mxu1 %v21686_v7  ;;  %v21738_v7 = vld [vmem:[%s29859_s4 + $0x3f0] ss:$60 sps:$4 sm:$0xff]  }
 0x6f3   :  { %10321 = vmatprep.subr.bf16.mxu0 %v21689_v30  ;;  %v7858_v30 = vrot.slane %v26755_v48, %v27087_v46 }
 0x6f5   :  { %10254 = vmatpush2.bf16.msra.mxu1 %v21684_v41  ;;  %v21746_v41 = vld [vmem:[%s29859_s4 + $0x7b4] ss:$60 sps:$4 sm:$0xff]  }
 0x6f6   :  { %10322 = vmatpush1.bf16.msra.mxu0 %v21687_v8  ;;  %10255 = vmatprep.subr.bf16.mxu1 %v21692_v45  ;;  %v21744_v8 = vld [vmem:[%s29859_s4 + $0x7b0] ss:$60 sps:$4 sm:$0xff]  }
 0x6f7   :  { %10323 = vmatprep.subr.bf16.mxu0 %v21695_v50  ;;  %v21747_v50 = vld [vmem:[%s29859_s4 + $0xb00] ss:$60 sps:$4 sm:$0xff]  }
 0x6f8   :  { %v9933_v19 = vpop.f32.mrf.mxu1 }
 0x6f9   :  { %v9934_v49 = vadd.f32 %v9933_v19, %v7850_v44  ;;  %10256 = vmatpush2.bf16.msra.mxu1 %v21690_v51  ;;  %v7862_v51 = vrot.slane %v26755_v48, %v27093_v33  ;;  %v21751_v48 = vld [vmem:[%s29859_s4 + $0xa88] ss:$60 sps:$4 sm:$0xff]   ;;  %v21752_v19 = vld [vmem:[%s29859_s4 + $0x740] ss:$60 sps:$4 sm:$0xff]  }
 0x6fa   :  { %10324 = vmatpush1.bf16.msra.mxu0 %v21693_v36  ;;  %v27003_v17 = vpop.f32.mrf.mxu1  ;;  %10257 = vmatprep.subr.bf16.mxu1 %v21698_v54  ;;  %v21748_v54 = vld [vmem:[%s29859_s4 + $0xb70] ss:$60 sps:$4 sm:$0xff]  }
 0x6fb   :  { %v27006_v20 = vadd.f32 %v26881_v1, %v9934_v49  ;;  %10325 = vmatprep.subr.bf16.mxu0 %v21701_v56 }
 0x6fc   :  { %v9937_v61 = vpop.f32.mrf.mxu1 }
 0x6fd   :  { %10258 = vmatpush2.bf16.msra.mxu1 %v21696_v55  ;;  %v21750_v55 = vld [vmem:[%s29859_s4 + $0xb74] ss:$60 sps:$4 sm:$0xff]   ;;  %v21753_v61 = vld [vmem:[%s29859_s4 + $0x380] ss:$60 sps:$4 sm:$0xff]  }
 0x6fe   :  { %10326 = vmatpush2.bf16.msra.mxu0 %v21699_v57  ;;  %v9938_v1 = vpop.f32.mrf.mxu1  ;;  %10350 = vmatprep.subr.bf16.mxu1 %v21707_v59 }
 0x6ff   :  { %10327 = vmatprep.subr.bf16.mxu0 %v21704_v60  ;;  %v21756_v1 = vld [vmem:[%s29859_s4 + $0x308] ss:$60 sps:$4 sm:$0xff]  }
 0x700   :  { %10260 = vmatmul.mubr.bf16.vlgmr.msra.gmra.mxu1 %v26150_v28 }
 0x701   :  { %10351 = vmatpush1.bf16.msra.mxu1 %v21705_v63  ;;  %18862 = vmatprep.mubr.msk.bf16.mxu1 %vm1251_vm0, %v26163_v27  ;;  %v21754_v63 = vld [vmem:[%s29859_s4 + $0xa10] ss:$60 sps:$4 sm:$0xff]  }
 0x702   :  { %10328 = vmatpush2.bf16.msra.mxu0 %v21702_v62  ;;  %10352 = vmatprep.subr.bf16.mxu1 %v21713_v24  ;;  %v21755_v24 = vld [vmem:[%s29859_s4 + $0x6c8] ss:$60 sps:$4 sm:$0xff]  }
 0x703   :  { %10329 = vmatprep.subr.bf16.mxu0 %v21710_v3  ;;  %v21757_v3 = vld [vmem:[%s29859_s4 + $0x998] ss:$60 sps:$4 sm:$0xff]  }
 0x705   :  { %10353 = vmatpush1.bf16.msra.mxu1 %v21711_v9  ;;  %v21759_v9 = vld [vmem:[%s29859_s4 + $0x290] ss:$60 sps:$4 sm:$0xff]  }
 0x706   :  { %10330 = vmatpush2.bf16.msra.mxu0 %v21708_v4  ;;  %10354 = vmatprep.subr.bf16.mxu1 %v21719_v15  ;;  %v21758_v4 = vld [vmem:[%s29859_s4 + $0x650] ss:$60 sps:$4 sm:$0xff]   ;;  %v21761_v15 = vld [vmem:[%s29859_s4 + $0x5d8] ss:$60 sps:$4 sm:$0xff]  }
 0x707   :  { %10331 = vmatprep.subr.bf16.mxu0 %v21716_v5  ;;  %v21762_v5 = vld [vmem:[%s29859_s4 + $0x218] ss:$60 sps:$4 sm:$0xff]  }
 0x709   :  { %10355 = vmatpush1.bf16.msra.mxu1 %v21717_v10  ;;  %v21764_v10 = vld [vmem:[%s29859_s4 + $0x560] ss:$60 sps:$4 sm:$0xff]  }
 0x70a   :  { %10332 = vmatpush2.bf16.msra.mxu0 %v21714_v37  ;;  %10356 = vmatprep.subr.bf16.mxu1 %v21725_v11  ;;  %v21763_v37 = vld [vmem:[%s29859_s4 + $0x8a8] ss:$60 sps:$4 sm:$0xff]   ;;  %v21765_v11 = vld [vmem:[%s29859_s4 + $0x1a0] ss:$60 sps:$4 sm:$0xff]  }
 0x70b   :  { %10333 = vmatprep.subr.bf16.mxu0 %v21722_v0  ;;  %v27180_v0 = vld [vmem:[%s29861_s9] sm:$0xff] }
 0x70d   :  { %10357 = vmatpush1.bf16.msra.mxu1 %v21723_v42  ;;  %v7854_v42 = vrot.slane %v27180_v0, %v24057_v32 }
 0x70e   :  { %10334 = vmatpush2.bf16.msra.mxu0 %v21720_v34  ;;  %10358 = vmatprep.subr.bf16.mxu1 %v21731_v43  ;;  %v21766_v34 = vld [vmem:[%s29859_s4 + $0x830] ss:$60 sps:$4 sm:$0xff]   ;;  %v21768_v43 = vld [vmem:[%s29859_s4 + $0x128] ss:$60 sps:$4 sm:$0xff]  }
 0x70f   :  { %10335 = vmatprep.subr.bf16.mxu0 %v21728_v12  ;;  %v21767_v12 = vld [vmem:[%s29859_s4 + $0x4e8] ss:$60 sps:$4 sm:$0xff]  }
 0x711   :  { %10359 = vmatpush1.bf16.msra.mxu1 %v21729_v21  ;;  %v9936_v21 = vadd.f32 %v27003_v17, %v7854_v42  ;;  %v21822_v42 = vld [vmem:[%s29862_s5 + $0x4] ss:$28 sps:$4 sm:$0xff]  }
 0x712   :  { %10336 = vmatpush2.bf16.msra.mxu0 %v21726_v47  ;;  %10360 = vmatprep.subr.bf16.mxu1 %v21737_v35  ;;  %v21769_v47 = vld [vmem:[%s29859_s4 + $0x7b8] ss:$60 sps:$4 sm:$0xff]   ;;  %v21771_v35 = vld [vmem:[%s29859_s4 + $0xb0] ss:$60 sps:$4 sm:$0xff]  }
 0x713   :  { %10337 = vmatprep.subr.bf16.mxu0 %v21734_v39  ;;  %v21770_v39 = vld [vmem:[%s29859_s4 + $0x470] ss:$60 sps:$4 sm:$0xff]  }
 0x714   :  { %v10015_v25 = vpop.f32.mrf.mxu0 }
 0x715   :  { %10361 = vmatpush1.bf16.msra.mxu1 %v21735_v53  ;;  %v10016_v44 = vadd.f32 %v10015_v25, %v7858_v30  ;;  %v9977_v53 = vadd.f32 %v26883_v2, %v9936_v21  ;;  %v21777_v2 = vld [vmem:[%s29859_s4 + $0x38] ss:$60 sps:$4 sm:$0xff]   ;;  %v10472_v30 = vmax.f32 %v26799_v18, 0.0 }
 0x716   :  { %10338 = vmatpush2.bf16.msra.mxu0 %v21732_v23  ;;  %v10017_v6 = vpop.f32.mrf.mxu0  ;;  %10362 = vmatprep.subr.bf16.mxu1 %v21743_v22  ;;  %v21772_v23 = vld [vmem:[%s29859_s4 + $0xb78] ss:$60 sps:$4 sm:$0xff]   ;;  %v21776_v22 = vld [vmem:[%s29862_s5 + $0x50c] ss:$28 sps:$4 sm:$0xff]  }
 0x717   :  { %10339 = vmatprep.subr.bf16.mxu0 %v21740_v58  ;;  %v10018_v57 = vadd.f32 %v10017_v6, %v7862_v51  ;;  %v21773_v58 = vld [vmem:[%s29859_s4 + $0x3f8] ss:$60 sps:$4 sm:$0xff]   ;;  %v10474_v25 = vmax.f32 %v9977_v53, 0.0  ;;  %v21774_v6 = vld [vmem:[%s29862_s5 + $0x508] ss:$28 sps:$4 sm:$0xff]  }
 0x718   :  { %v10019_v45 = vpop.f32.mrf.mxu0  ;;  %v21786_v18 = vld [vmem:[%s29862_s5 + $0x154] ss:$28 sps:$4 sm:$0xff]  }
 0x719   :  { %10363 = vmatpush1.bf16.msra.mxu1 %v21741_v13  ;;  %v21778_v45 = vld [vmem:[%s29862_s5 + $0x188] ss:$28 sps:$4 sm:$0xff]   ;;  %v27236_v51 = vpack.c.bf16 %v10474_v25, %v10474_v25  ;;  %v21829_v25 = vld [vmem:[%s29862_s5 + $0x690] ss:$28 sps:$4 sm:$0xff]  }
 0x71a   :  { %10340 = vmatpush2.bf16.msra.mxu0 %v21738_v7  ;;  %v10020_v36 = vpop.f32.mrf.mxu0  ;;  %10364 = vmatprep.subr.bf16.mxu1 %v21746_v41  ;;  %v21780_v41 = vld [vmem:[%s29862_s5 + $0x18c] ss:$28 sps:$4 sm:$0xff]  }
 0x71b   :  { %10431 = vmatprep.subr.bf16.mxu0 %v22920_v16  ;;  %v21781_v36 = vld [vmem:[%s29862_s5 + $0x4d0] ss:$28 sps:$4 sm:$0xff]  }
 0x71c   :  { %v10056_v56 = vpop.f32.mrf.mxu1 }
 0x71d   :  { %v27124_v59 = vadd.f32 %v10056_v56, %v10016_v44  ;;  %10342 = vmatmul.mubr.bf16.vlgmr.msra.gmra.mxu0 %v26150_v28  ;;  %10365 = vmatpush1.bf16.msra.mxu1 %v21744_v8  ;;  %v27246_v44 = vpack.c.bf16 %v10472_v30, %v10472_v30  ;;  %v21792_v56 = vld [vmem:[%s29862_s5 + $0x11c] ss:$28 sps:$4 sm:$0xff]  }
 0x71e   :  { %10432 = vmatpush1.bf16.msra.mxu0 %v21747_v50  ;;  %18863 = vmatprep.mubr.msk.bf16.mxu0 %vm1251_vm0, %v26163_v27  ;;  %v10058_v49 = vpop.f32.mrf.mxu1  ;;  %v21783_v50 = vld [vmem:[%s29862_s5 + $0x4d4] ss:$28 sps:$4 sm:$0xff]  }
 0x71f   :  { %v27129_v60 = vadd.f32 %v10058_v49, %v10018_v57  ;;  %10380 = vmatprep.subr.bf16.mxu1 %v21750_v55  ;;  %10433 = vmatprep.subr.bf16.mxu0 %v22920_v16  ;;  %v21789_v55 = vld [vmem:[%s29862_s5 + $0x49c] ss:$28 sps:$4 sm:$0xff]   ;;  %v21798_v57 = vld [vmem:[%s29862_s5 + $0xe4] ss:$28 sps:$4 sm:$0xff]   ;;  %v21801_v49 = vld [vmem:[%s29862_s5 + $0x42c] ss:$28 sps:$4 sm:$0xff]  }
 0x720   :  { %v10060_v62 = vpop.f32.mrf.mxu1  ;;  %v21835_v30 = vld [vmem:[%s29862_s5 + $0x658] ss:$28 sps:$4 sm:$0xff]  }
 0x721   :  { %10381 = vmatpush2.bf16.msra.mxu1 %v21748_v54  ;;  %v21784_v54 = vld [vmem:[%s29862_s5 + $0x150] ss:$28 sps:$4 sm:$0xff]   ;;  %v21799_v62 = vld [vmem:[%s29862_s5 + $0x428] ss:$28 sps:$4 sm:$0xff]  }
 0x722   :  { %10434 = vmatpush1.bf16.msra.mxu0 %v21751_v48  ;;  %v10061_v27 = vpop.f32.mrf.mxu1  ;;  %19750 = vmatprep.subr.bf16.mxu1 %v21752_v19  ;;  %v21790_v48 = vld [vmem:[%s29862_s5 + $0x118] ss:$28 sps:$4 sm:$0xff]   ;;  %v21793_v19 = vld [vmem:[%s29862_s5 + $0x460] ss:$28 sps:$4 sm:$0xff]  }
 0x723   :  { %10435 = vmatprep.subr.bf16.mxu0 %v22920_v16  ;;  %v21807_v27 = vld [vmem:[%s29862_s5 + $0x3f4] ss:$28 sps:$4 sm:$0xff]  }
 0x724   :  { %10383 = vmatmul.mubr.bf16.vlgmr.msra.gmra.mxu1 %v26171_v52 }
 0x725   :  { %19751 = vmatpush3.bf16.msra.mxu1 %v21753_v61  ;;  %10423 = vmatprep.mubr.bf16.mxu1 %v26144_v29  ;;  %v21760_v29 = vld [vmem:[%s29859_s4 + $0x920] ss:$60 sps:$4 sm:$0xff]  }
 0x726   :  { %10436 = vmatpush1.bf16.msra.mxu0 %v21754_v63  ;;  %19752 = vmatprep.subr.bf16.mxu1 %v21755_v24  ;;  %v21796_v61 = vld [vmem:[%s29862_s5 + $0xe0] ss:$28 sps:$4 sm:$0xff]   ;;  %v21804_v63 = vld [vmem:[%s29862_s5 + $0xac] ss:$28 sps:$4 sm:$0xff]  }
 0x727   :  { %10437 = vmatprep.subr.bf16.mxu0 %v22920_v16  ;;  %v21802_v24 = vld [vmem:[%s29862_s5 + $0xa8] ss:$28 sps:$4 sm:$0xff]  }
 0x729   :  { %19753 = vmatpush3.bf16.msra.mxu1 %v21756_v1  ;;  %v21805_v1 = vld [vmem:[%s29862_s5 + $0x3f0] ss:$28 sps:$4 sm:$0xff]  }
 0x72a   :  { %10438 = vmatpush1.bf16.msra.mxu0 %v21757_v3  ;;  %19754 = vmatprep.subr.bf16.mxu1 %v21758_v4  ;;  %v21810_v3 = vld [vmem:[%s29862_s5 + $0x74] ss:$28 sps:$4 sm:$0xff]  }
 0x72b   :  { %10439 = vmatprep.subr.bf16.mxu0 %v22920_v16  ;;  %v21808_v4 = vld [vmem:[%s29862_s5 + $0x70] ss:$28 sps:$4 sm:$0xff]  }
 0x72d   :  { %19755 = vmatpush3.bf16.msra.mxu1 %v21759_v9  ;;  %v21813_v9 = vld [vmem:[%s29862_s5 + $0x3bc] ss:$28 sps:$4 sm:$0xff]  }
 0x72e   :  { %10440 = vmatpush1.bf16.msra.mxu0 %v21760_v29  ;;  %19756 = vmatprep.subr.bf16.mxu1 %v21761_v15  ;;  %v27305_v29 = vsub.s32 6, %v23785_v31  ;;  %v21811_v15 = vld [vmem:[%s29862_s5 + $0x3b8] ss:$28 sps:$4 sm:$0xff]  }
 0x72f   :  { %10441 = vmatprep.subr.bf16.mxu0 %v22920_v16 }
 0x731   :  { %19757 = vmatpush3.bf16.msra.mxu1 %v21762_v5  ;;  %v21816_v5 = vld [vmem:[%s29862_s5 + $0x3c] ss:$28 sps:$4 sm:$0xff]  }
 0x732   :  { %10442 = vmatpush1.bf16.msra.mxu0 %v21763_v37  ;;  %19758 = vmatprep.subr.bf16.mxu1 %v21764_v10  ;;  %v21819_v37 = vld [vmem:[%s29862_s5 + $0x384] ss:$28 sps:$4 sm:$0xff]   ;;  %v21814_v10 = vld [vmem:[%s29862_s5 + $0x38] ss:$28 sps:$4 sm:$0xff]  }
 0x733   :  { %10443 = vmatprep.subr.bf16.mxu0 %v22920_v16 }
 0x735   :  { %19759 = vmatpush3.bf16.msra.mxu1 %v21765_v11  ;;  %v21817_v11 = vld [vmem:[%s29862_s5 + $0x380] ss:$28 sps:$4 sm:$0xff]  }
 0x736   :  { %10444 = vmatpush1.bf16.msra.mxu0 %v21766_v34  ;;  %19760 = vmatprep.subr.bf16.mxu1 %v21767_v12  ;;  %v7866_v34 = vrot.slane %v27180_v0, %v27305_v29  ;;  %v21820_v12 = vld [vmem:[%s29862_s5] ss:$28 sps:$4 sm:$0xff]  }
 0x737   :  { %10445 = vmatprep.subr.bf16.mxu0 %v22920_v16 }
 0x739   :  { %v27206_v17 = vpop.f32.mrf.mxu0  ;;  %19761 = vmatpush3.bf16.msra.mxu1 %v21768_v43  ;;  %v21825_v43 = vld [vmem:[%s29862_s5 + $0x6cc] ss:$28 sps:$4 sm:$0xff]  }
 0x73a   :  { %10446 = vmatpush1.bf16.msra.mxu0 %v21769_v47  ;;  %19762 = vmatprep.subr.bf16.mxu1 %v21770_v39  ;;  %v21823_v47 = vld [vmem:[%s29862_s5 + $0x6c8] ss:$28 sps:$4 sm:$0xff]  }
 0x73b   :  { %v27217_v13 = vpop.f32.mrf.mxu0  ;;  %10461 = vmatprep.subr.bf16.mxu0 %v22920_v16  ;;  %v21828_v39 = vld [vmem:[%s29862_s5 + $0x34c] ss:$28 sps:$4 sm:$0xff]  }
 0x73d   :  { %v10142_v7 = vpop.f32.mrf.mxu0  ;;  %19763 = vmatpush3.bf16.msra.mxu1 %v21771_v35 }
 0x73e   :  { %10462 = vmatpush2.bf16.msra.mxu0 %v21772_v23  ;;  %19764 = vmatprep.subr.bf16.mxu1 %v21773_v58  ;;  %v21826_v58 = vld [vmem:[%s29862_s5 + $0x348] ss:$28 sps:$4 sm:$0xff]   ;;  %v21832_v7 = vld [vmem:[%s29862_s5 + $0x310] ss:$28 sps:$4 sm:$0xff]  }
 0x73f   :  { %v10143_v8 = vpop.f32.mrf.mxu0  ;;  %15555 = vmatprep.subr.bf16.mxu0 %v21776_v22  ;;  %v21831_v22 = vld [vmem:[%s29862_s5 + $0x694] ss:$28 sps:$4 sm:$0xff]  }
 0x740   :  { %v21840_v8 = vld [vmem:[%s29862_s5 + $0x2dc] ss:$28 sps:$4 sm:$0xff]  }
 0x741   :  { %10464 = vmatmul.mubr.bf16.vlgmr.msra.gmra.mxu0 %v26171_v52  ;;  %19765 = vmatpush3.bf16.msra.mxu1 %v21777_v2  ;;  %v21787_v52 = vld [vmem:[%s29862_s5 + $0x498] ss:$28 sps:$4 sm:$0xff]  }
 0x742   :  { %15556 = vmatpush1.bf16.msra.mxu0 %v21774_v6  ;;  %15587 = vmatprep.mubr.bf16.mxu0 %v27236_v51  ;;  %v21834_v6 = vld [vmem:[%s29862_s5 + $0x314] ss:$28 sps:$4 sm:$0xff]  }
 0x743   :  { %15514 = vmatprep.subr.bf16.mxu1 %v21780_v41  ;;  %15557 = vmatprep.subr.bf16.mxu0 %v21783_v50  ;;  %v21837_v41 = vld [vmem:[%s29862_s5 + $0x65c] ss:$28 sps:$4 sm:$0xff]   ;;  %v21843_v50 = vld [vmem:[%s29862_s5 + $0x624] ss:$28 sps:$4 sm:$0xff]  }
 0x744   :  { %10424 = vmatmul.mubr.bf16.vlgmr.msra.gmra.mxu1 %v26150_v28  ;;  %v21795_v28 = vld [vmem:[%s29862_s5 + $0x464] ss:$28 sps:$4 sm:$0xff]  }
 0x745   :  { %15515 = vmatpush1.bf16.msra.mxu1 %v21778_v45  ;;  %15546 = vmatprep.mubr.bf16.mxu1 %v27246_v44  ;;  %v21838_v45 = vld [vmem:[%s29862_s5 + $0x2d8] ss:$28 sps:$4 sm:$0xff]  }
 0x746   :  { %15558 = vmatpush1.bf16.msra.mxu0 %v21781_v36  ;;  %15516 = vmatprep.subr.bf16.mxu1 %v21786_v18  ;;  %v21841_v36 = vld [vmem:[%s29862_s5 + $0x620] ss:$28 sps:$4 sm:$0xff]  }
 0x747   :  { %15559 = vmatprep.subr.bf16.mxu0 %v21789_v55  ;;  %v21846_v18 = vld [vmem:[%s29862_s5 + $0x2a4] ss:$28 sps:$4 sm:$0xff]   ;;  %v7869_v55 = vsub.s32 7, %v23785_v31 }
 0x748   :  { %v21850_v31 = vld [vmem:[%s29862_s5 + $0x268] ss:$28 sps:$4 sm:$0xff]  }
 0x749   :  { %15517 = vmatpush1.bf16.msra.mxu1 %v21784_v54  ;;  %v21849_v54 = vld [vmem:[%s29862_s5 + $0x5ec] ss:$28 sps:$4 sm:$0xff]  }
 0x74a   :  { %15560 = vmatpush1.bf16.msra.mxu0 %v21787_v52  ;;  %15518 = vmatprep.subr.bf16.mxu1 %v21792_v56  ;;  %v21844_v52 = vld [vmem:[%s29862_s5 + $0x2a0] ss:$28 sps:$4 sm:$0xff]   ;;  %v21847_v56 = vld [vmem:[%s29862_s5 + $0x5e8] ss:$28 sps:$4 sm:$0xff]  }
 0x74b   :  { %15561 = vmatprep.subr.bf16.mxu0 %v21795_v28  ;;  %v21855_v28 = vld [vmem:[%s29862_s5 + $0x5b4] ss:$28 sps:$4 sm:$0xff]  }
 0x74d   :  { %15519 = vmatpush1.bf16.msra.mxu1 %v21790_v48  ;;  %v21852_v48 = vld [vmem:[%s29862_s5 + $0x26c] ss:$28 sps:$4 sm:$0xff]  }
 0x74e   :  { %15562 = vmatpush1.bf16.msra.mxu0 %v21793_v19  ;;  %15520 = vmatprep.subr.bf16.mxu1 %v21798_v57  ;;  %v7870_v19 = vrot.slane %v27180_v0, %v7869_v55  ;;  %v21853_v57 = vld [vmem:[%s29862_s5 + $0x5b0] ss:$28 sps:$4 sm:$0xff]   ;;  %v21891_v55 = vld [vmem:[%s29862_s5 + $0xb64] ss:$28 sps:$4 sm:$0xff]  }
 0x74f   :  { %15563 = vmatprep.subr.bf16.mxu0 %v21801_v49  ;;  %v21858_v49 = vld [vmem:[%s29862_s5 + $0x234] ss:$28 sps:$4 sm:$0xff]  }
 0x750   :  { %v21856_v0 = vld [vmem:[%s29862_s5 + $0x230] ss:$28 sps:$4 sm:$0xff]  }
 0x751   :  { %15521 = vmatpush1.bf16.msra.mxu1 %v21796_v61  ;;  %v21861_v61 = vld [vmem:[%s29862_s5 + $0x57c] ss:$28 sps:$4 sm:$0xff]  }
 0x752   :  { %15564 = vmatpush1.bf16.msra.mxu0 %v21799_v62  ;;  %15522 = vmatprep.subr.bf16.mxu1 %v21804_v63  ;;  %v27413_v63 = vld [vmem:[%s29861_s9 + $0x8] sm:$0x7f] }
 0x753   :  { %15565 = vmatprep.subr.bf16.mxu0 %v21807_v27  ;;  %v21864_v27 = vld [vmem:[%s29862_s5 + $0x1fc] ss:$28 sps:$4 sm:$0xff]  }
 0x755   :  { %15523 = vmatpush1.bf16.msra.mxu1 %v21802_v24  ;;  %v21859_v24 = vld [vmem:[%s29862_s5 + $0x578] ss:$28 sps:$4 sm:$0xff]  }
 0x756   :  { %15566 = vmatpush1.bf16.msra.mxu0 %v21805_v1  ;;  %15524 = vmatprep.subr.bf16.mxu1 %v21810_v3  ;;  %v21867_v1 = vld [vmem:[%s29862_s5 + $0x544] ss:$28 sps:$4 sm:$0xff]   ;;  %v21862_v3 = vld [vmem:[%s29862_s5 + $0x1f8] ss:$28 sps:$4 sm:$0xff]  }
 0x757   :  { %15567 = vmatprep.subr.bf16.mxu0 %v21813_v9 }
 0x759   :  { %15525 = vmatpush1.bf16.msra.mxu1 %v21808_v4 }
 0x75a   :  { %15568 = vmatpush1.bf16.msra.mxu0 %v21811_v15  ;;  %15526 = vmatprep.subr.bf16.mxu1 %v21816_v5  ;;  %v21865_v15 = vld [vmem:[%s29862_s5 + $0x540] ss:$28 sps:$4 sm:$0xff]  }
 0x75b   :  { %15569 = vmatprep.subr.bf16.mxu0 %v21819_v37  ;;  %v21870_v5 = vld [vmem:[%s29862_s5 + $0x1c4] ss:$28 sps:$4 sm:$0xff]   ;;  %v21873_v37 = vld [vmem:[%s29862_s5 + $0xc0c] ss:$28 sps:$4 sm:$0xff]  }
 0x75c   :  { %v10097_v21 = vpop.f32.mrf.mxu1 }
 0x75d   :  { %v10098_v35 = vadd.f32 %v10097_v21, %v7866_v34  ;;  %15527 = vmatpush1.bf16.msra.mxu1 %v21814_v10  ;;  %v10473_v10 = vmax.f32 %v27006_v20, 0.0  ;;  %v21876_v20 = vld [vmem:[%s29862_s5 + $0x88c] ss:$28 sps:$4 sm:$0xff]   ;;  %v21879_v21 = vld [vmem:[%s29862_s5 + $0xbd4] ss:$28 sps:$4 sm:$0xff]  }
 0x75e   :  { %15570 = vmatpush1.bf16.msra.mxu0 %v21817_v11  ;;  %v10099_v53 = vpop.f32.mrf.mxu1  ;;  %15528 = vmatprep.subr.bf16.mxu1 %v21822_v42  ;;  %v21868_v42 = vld [vmem:[%s29862_s5 + $0x1c0] ss:$28 sps:$4 sm:$0xff]  }
 0x75f   :  { %v27340_v23 = vadd.f32 %v27206_v17, %v10098_v35  ;;  %15571 = vmatprep.subr.bf16.mxu0 %v21825_v43  ;;  %v10100_v62 = vadd.f32 %v10099_v53, %v7870_v19  ;;  %v10476_v35 = vmax.f32 %v27129_v60, 0.0  ;;  %v21900_v19 = vld [vmem:[%s29862_s5 + $0x7ac] ss:$28 sps:$4 sm:$0xff]  }
 0x760   :  { %v10101_v2 = vpop.f32.mrf.mxu1 }
 0x761   :  { %15529 = vmatpush1.bf16.msra.mxu1 %v21820_v12  ;;  %v10141_v4 = vadd.f32 %v27217_v13, %v10100_v62  ;;  %v7874_v13 = vrot.slane %v27413_v63, %v23803_v38  ;;  %v21871_v12 = vld [vmem:[%s29862_s5 + $0xc08] ss:$28 sps:$4 sm:$0xff]   ;;  %v21904_v62 = vld [vmem:[%s29862_s5 + $0x770] ss:$28 sps:$4 sm:$0xff]  }
 0x762   :  { %15572 = vmatpush2.bf16.msra.mxu0 %v21823_v47  ;;  %v10102_v17 = vpop.f32.mrf.mxu1  ;;  %15530 = vmatprep.subr.bf16.mxu1 %v21828_v39  ;;  %v10471_v47 = vmax.f32 %v26786_v14, 0.0  ;;  %v27455_v39 = vpack.c.bf16 %v10473_v10, %v10473_v10  ;;  %v21877_v14 = vld [vmem:[%s29862_s5 + $0xbd0] ss:$28 sps:$4 sm:$0xff]  }
 0x763   :  { %15573 = vmatprep.subr.bf16.mxu0 %v21831_v22  ;;  %v10478_v34 = vmax.f32 %v10141_v4, 0.0  ;;  %v21874_v22 = vld [vmem:[%s29862_s5 + $0x888] ss:$28 sps:$4 sm:$0xff]   ;;  %v21910_v4 = vld [vmem:[%s29862_s5 + $0x738] ss:$28 sps:$4 sm:$0xff]  }
 0x764   :  { %v27472_v60 = vpack.c.bf16 %v10471_v47, %v10471_v47  ;;  %v21930_v47 = vld [vmem:[%s29862_s5 + $0xa14] ss:$28 sps:$4 sm:$0xff]  }
 0x765   :  { %15531 = vmatpush2.bf16.msra.mxu1 %v21826_v58  ;;  %v27461_v2 = vpack.c.bf16 %v10478_v34, %v10478_v34 }
 0x766   :  { %15574 = vmatpush2.bf16.msra.mxu0 %v21829_v25  ;;  %15532 = vmatprep.subr.bf16.mxu1 %v21834_v6  ;;  %v21882_v6 = vld [vmem:[%s29862_s5 + $0x854] ss:$28 sps:$4 sm:$0xff]  }
 0x767   :  { %15575 = vmatprep.subr.bf16.mxu0 %v21837_v41  ;;  %v27477_v41 = vpack.c.bf16 %v10476_v35, %v10476_v35 }
 0x769   :  { %15533 = vmatpush2.bf16.msra.mxu1 %v21832_v7 }
 0x76a   :  { %15576 = vmatpush2.bf16.msra.mxu0 %v21835_v30  ;;  %15534 = vmatprep.subr.bf16.mxu1 %v21840_v8  ;;  %v21880_v30 = vld [vmem:[%s29862_s5 + $0x850] ss:$28 sps:$4 sm:$0xff]   ;;  %v21885_v8 = vld [vmem:[%s29862_s5 + $0xb9c] ss:$28 sps:$4 sm:$0xff]  }
 0x76b   :  { %15577 = vmatprep.subr.bf16.mxu0 %v21843_v50  ;;  %v21883_v50 = vld [vmem:[%s29862_s5 + $0xb98] ss:$28 sps:$4 sm:$0xff]  }
 0x76d   :  { %15535 = vmatpush2.bf16.msra.mxu1 %v21838_v45 }
 0x76e   :  { %15578 = vmatpush2.bf16.msra.mxu0 %v21841_v36  ;;  %15536 = vmatprep.subr.bf16.mxu1 %v21846_v18  ;;  %v21888_v36 = vld [vmem:[%s29862_s5 + $0x81c] ss:$28 sps:$4 sm:$0xff]  }
 0x76f   :  { %15579 = vmatprep.subr.bf16.mxu0 %v21849_v54  ;;  %v21886_v54 = vld [vmem:[%s29862_s5 + $0x818] ss:$28 sps:$4 sm:$0xff]  }
 0x771   :  { %15537 = vmatpush2.bf16.msra.mxu1 %v21844_v52  ;;  %v21889_v52 = vld [vmem:[%s29862_s5 + $0xb60] ss:$28 sps:$4 sm:$0xff]  }
 0x772   :  { %15580 = vmatpush2.bf16.msra.mxu0 %v21847_v56  ;;  %15538 = vmatprep.subr.bf16.mxu1 %v21852_v48  ;;  %v21894_v56 = vld [vmem:[%s29862_s5 + $0x7e4] ss:$28 sps:$4 sm:$0xff]  }
 0x773   :  { %15581 = vmatprep.subr.bf16.mxu0 %v21855_v28  ;;  %v21892_v48 = vld [vmem:[%s29862_s5 + $0x7e0] ss:$28 sps:$4 sm:$0xff]   ;;  %v21895_v28 = vld [vmem:[%s29862_s5 + $0xb28] ss:$28 sps:$4 sm:$0xff]  }
 0x775   :  { %15539 = vmatpush2.bf16.msra.mxu1 %v21850_v31  ;;  %v21897_v31 = vld [vmem:[%s29862_s5 + $0xb2c] ss:$28 sps:$4 sm:$0xff]  }
 0x776   :  { %15582 = vmatpush2.bf16.msra.mxu0 %v21853_v57  ;;  %15540 = vmatprep.subr.bf16.mxu1 %v21858_v49  ;;  %v21903_v57 = vld [vmem:[%s29862_s5 + $0xaf4] ss:$28 sps:$4 sm:$0xff]   ;;  %v21898_v49 = vld [vmem:[%s29862_s5 + $0x7a8] ss:$28 sps:$4 sm:$0xff]  }
 0x777   :  { %15583 = vmatprep.subr.bf16.mxu0 %v21861_v61  ;;  %v21901_v61 = vld [vmem:[%s29862_s5 + $0xaf0] ss:$28 sps:$4 sm:$0xff]  }
 0x779   :  { %v10179_v9 = vpop.f32.mrf.mxu0  ;;  %15541 = vmatpush2.bf16.msra.mxu1 %v21856_v0  ;;  %v21906_v0 = vld [vmem:[%s29862_s5 + $0x774] ss:$28 sps:$4 sm:$0xff]  }
 0x77a   :  { %15584 = vmatpush2.bf16.msra.mxu0 %v21859_v24  ;;  %15542 = vmatprep.subr.bf16.mxu1 %v21864_v27  ;;  %v10180_v53 = vadd.f32 %v10179_v9, %v7874_v13  ;;  %v21909_v24 = vld [vmem:[%s29862_s5 + $0xabc] ss:$28 sps:$4 sm:$0xff]   ;;  %v21919_v13 = vld [vmem:[%s29862_s5 + $0xdc8] ss:$28 sps:$4 sm:$0xff]  }
 0x77b   :  { %v27440_v11 = vpop.f32.mrf.mxu0  ;;  %15585 = vmatprep.subr.bf16.mxu0 %v21867_v1  ;;  %v21907_v27 = vld [vmem:[%s29862_s5 + $0xab8] ss:$28 sps:$4 sm:$0xff]   ;;  %v21913_v9 = vld [vmem:[%s29862_s5 + $0xa80] ss:$28 sps:$4 sm:$0xff]  }
 0x77c   :  { %v21912_v1 = vld [vmem:[%s29862_s5 + $0x73c] ss:$28 sps:$4 sm:$0xff]  }
 0x77d   :  { %v10183_v43 = vpop.f32.mrf.mxu0  ;;  %15543 = vmatpush2.bf16.msra.mxu1 %v21862_v3  ;;  %v21915_v3 = vld [vmem:[%s29862_s5 + $0xa84] ss:$28 sps:$4 sm:$0xff]  }
 0x77e   :  { %15586 = vmatpush2.bf16.msra.mxu0 %v21865_v15  ;;  %15544 = vmatprep.subr.bf16.mxu1 %v21870_v5  ;;  %v21918_v15 = vld [vmem:[%s29862_s5 + $0x704] ss:$28 sps:$4 sm:$0xff]   ;;  %v21921_v5 = vld [vmem:[%s29862_s5 + $0xdcc] ss:$28 sps:$4 sm:$0xff]   ;;  %v21927_v43 = vld [vmem:[%s29862_s5 + $0xd94] ss:$28 sps:$4 sm:$0xff]  }
 0x77f   :  { %v10184_v58 = vpop.f32.mrf.mxu0  ;;  %15637 = vmatprep.subr.bf16.mxu0 %v21873_v37  ;;  %v21916_v37 = vld [vmem:[%s29862_s5 + $0x700] ss:$28 sps:$4 sm:$0xff]  }
 0x780   :  { %v10220_v25 = vpop.f32.mrf.mxu1  ;;  %v21933_v58 = vld [vmem:[%s29862_s5 + $0xd5c] ss:$28 sps:$4 sm:$0xff]  }
 0x781   :  { %v27469_v17 = vadd.f32 %v10220_v25, %v10180_v53  ;;  %15588 = vmatmul.mubr.bf16.vlgmr.msra.gmra.mxu0 %v27455_v39  ;;  %15545 = vmatpush2.bf16.msra.mxu1 %v21868_v42  ;;  %v21924_v42 = vld [vmem:[%s29862_s5 + $0xa4c] ss:$28 sps:$4 sm:$0xff]   ;;  %v21936_v25 = vld [vmem:[%s29862_s5 + $0x9dc] ss:$28 sps:$4 sm:$0xff]  }
 0x782   :  { %15638 = vmatpush1.bf16.msra.mxu0 %v21871_v12  ;;  %15669 = vmatprep.mubr.bf16.mxu0 %v27461_v2  ;;  %v27475_v7 = vpop.f32.mrf.mxu1  ;;  %v21922_v12 = vld [vmem:[%s29862_s5 + $0xa48] ss:$28 sps:$4 sm:$0xff]   ;;  %v21928_v53 = vld [vmem:[%s29862_s5 + $0xa10] ss:$28 sps:$4 sm:$0xff]  }
 0x783   :  { %15596 = vmatprep.subr.bf16.mxu1 %v21876_v20  ;;  %15639 = vmatprep.subr.bf16.mxu0 %v21879_v21  ;;  %v21925_v21 = vld [vmem:[%s29862_s5 + $0xd90] ss:$28 sps:$4 sm:$0xff]  }
 0x784   :  { %v10224_v45 = vpop.f32.mrf.mxu1  ;;  %15547 = vmatmul.mubr.bf16.vlgmr.msra.gmra.mxu1 %v27472_v60 }
 0x785   :  { %15597 = vmatpush1.bf16.msra.mxu1 %v21874_v22  ;;  %15628 = vmatprep.mubr.bf16.mxu1 %v27477_v41  ;;  %v21931_v22 = vld [vmem:[%s29862_s5 + $0xd58] ss:$28 sps:$4 sm:$0xff]   ;;  %v21940_v45 = vld [vmem:[%s29862_s5 + $0x9a0] ss:$28 sps:$4 sm:$0xff]  }
 0x786   :  { %15640 = vmatpush1.bf16.msra.mxu0 %v21877_v14  ;;  %v10225_v18 = vpop.f32.mrf.mxu1  ;;  %15598 = vmatprep.subr.bf16.mxu1 %v21882_v6  ;;  %v21934_v14 = vld [vmem:[%s29862_s5 + $0x9d8] ss:$28 sps:$4 sm:$0xff]   ;;  %v21939_v6 = vld [vmem:[%s29862_s5 + $0xd24] ss:$28 sps:$4 sm:$0xff]  }
 0x787   :  { %15641 = vmatprep.subr.bf16.mxu0 %v21885_v8  ;;  %v21942_v8 = vld [vmem:[%s29862_s5 + $0x9a4] ss:$28 sps:$4 sm:$0xff]   ;;  %v21948_v18 = vld [vmem:[%s29862_s5 + $0x96c] ss:$28 sps:$4 sm:$0xff]  }
 0x789   :  { %15599 = vmatpush1.bf16.msra.mxu1 %v21880_v30  ;;  %v21937_v30 = vld [vmem:[%s29862_s5 + $0xd20] ss:$28 sps:$4 sm:$0xff]  }
 0x78a   :  { %15642 = vmatpush1.bf16.msra.mxu0 %v21883_v50  ;;  %15600 = vmatprep.subr.bf16.mxu1 %v21888_v36  ;;  %v21945_v50 = vld [vmem:[%s29862_s5 + $0xcec] ss:$28 sps:$4 sm:$0xff]  }
 0x78b   :  { %15643 = vmatprep.subr.bf16.mxu0 %v21891_v55  ;;  %v21943_v36 = vld [vmem:[%s29862_s5 + $0xce8] ss:$28 sps:$4 sm:$0xff]   ;;  %v21951_v55 = vld [vmem:[%s29862_s5 + $0xcb4] ss:$28 sps:$4 sm:$0xff]  }
 0x78d   :  { %15601 = vmatpush1.bf16.msra.mxu1 %v21886_v54  ;;  %v21946_v54 = vld [vmem:[%s29862_s5 + $0x968] ss:$28 sps:$4 sm:$0xff]  }
 0x78e   :  { %15644 = vmatpush1.bf16.msra.mxu0 %v21889_v52  ;;  %15602 = vmatprep.subr.bf16.mxu1 %v21894_v56  ;;  %v21949_v52 = vld [vmem:[%s29862_s5 + $0xcb0] ss:$28 sps:$4 sm:$0xff]  }
 0x78f   :  { %15645 = vmatprep.subr.bf16.mxu0 %v21897_v31  ;;  %v21954_v56 = vld [vmem:[%s29862_s5 + $0x934] ss:$28 sps:$4 sm:$0xff]   ;;  %v21957_v31 = vld [vmem:[%s29862_s5 + $0xc7c] ss:$28 sps:$4 sm:$0xff]  }
 0x791   :  { %15603 = vmatpush1.bf16.msra.mxu1 %v21892_v48  ;;  %v21952_v48 = vld [vmem:[%s29862_s5 + $0x930] ss:$28 sps:$4 sm:$0xff]  }
 0x792   :  { %15646 = vmatpush1.bf16.msra.mxu0 %v21895_v28  ;;  %15604 = vmatprep.subr.bf16.mxu1 %v21900_v19  ;;  %v7878_v28 = vrot.slane %v27413_v63, %v23811_v40  ;;  %v21955_v19 = vld [vmem:[%s29862_s5 + $0xc78] ss:$28 sps:$4 sm:$0xff]  }
 0x793   :  { %15647 = vmatprep.subr.bf16.mxu0 %v21903_v57  ;;  %v21960_v57 = vld [vmem:[%s29862_s5 + $0x8fc] ss:$28 sps:$4 sm:$0xff]  }
 0x795   :  { %15605 = vmatpush1.bf16.msra.mxu1 %v21898_v49  ;;  %v21958_v49 = vld [vmem:[%s29862_s5 + $0x8f8] ss:$28 sps:$4 sm:$0xff]  }
 0x796   :  { %15648 = vmatpush1.bf16.msra.mxu0 %v21901_v61  ;;  %15606 = vmatprep.subr.bf16.mxu1 %v21906_v0  ;;  %v21963_v61 = vld [vmem:[%s29862_s5 + $0xc44] ss:$28 sps:$4 sm:$0xff]   ;;  %v10182_v0 = vadd.f32 %v27440_v11, %v7878_v28  ;;  %v22002_v28 = vld [vmem:[%s29862_s5 + $0xe74] ss:$28 sps:$4 sm:$0xff]  }
 0x797   :  { %15649 = vmatprep.subr.bf16.mxu0 %v21909_v24  ;;  %v21966_v24 = vld [vmem:[%s29862_s5 + $0x8c4] ss:$28 sps:$4 sm:$0xff]  }
 0x798   :  { %v21964_v11 = vld [vmem:[%s29862_s5 + $0x8c0] ss:$28 sps:$4 sm:$0xff]  }
 0x799   :  { %15607 = vmatpush1.bf16.msra.mxu1 %v21904_v62  ;;  %v21961_v62 = vld [vmem:[%s29862_s5 + $0xc40] ss:$28 sps:$4 sm:$0xff]  }
 0x79a   :  { %15650 = vmatpush1.bf16.msra.mxu0 %v21907_v27  ;;  %15608 = vmatprep.subr.bf16.mxu1 %v21912_v1  ;;  %v21969_v27 = vld [vmem:[%s29862_s5 + $0x130c] ss:$28 sps:$4 sm:$0xff]   ;;  %v10477_v1 = vmax.f32 %v27340_v23, 0.0 }
 0x79b   :  { %15651 = vmatprep.subr.bf16.mxu0 %v21915_v3  ;;  %v10223_v3 = vadd.f32 %v27475_v7, %v10182_v0  ;;  %v22011_v0 = vld [vmem:[%s29862_s5 + $0x1184] ss:$28 sps:$4 sm:$0xff]  }
 0x79c   :  { %v27671_v23 = vpack.c.bf16 %v10477_v1, %v10477_v1  ;;  %v22017_v1 = vld [vmem:[%s29862_s5 + $0x14cc] ss:$28 sps:$4 sm:$0xff]  }
 0x79d   :  { %v27559_v10 = vpop.f32.mrf.mxu0  ;;  %15609 = vmatpush1.bf16.msra.mxu1 %v21910_v4  ;;  %v21967_v4 = vld [vmem:[%s29862_s5 + $0x1308] ss:$28 sps:$4 sm:$0xff]   ;;  %v10480_v7 = vmax.f32 %v10223_v3, 0.0  ;;  %v22012_v3 = vld [vmem:[%s29862_s5 + $0xe00] ss:$28 sps:$4 sm:$0xff]  }
 0x79e   :  { %15652 = vmatpush1.bf16.msra.mxu0 %v21913_v9  ;;  %15610 = vmatprep.subr.bf16.mxu1 %v21918_v15  ;;  %v21972_v9 = vld [vmem:[%s29862_s5 + $0xf8c] ss:$28 sps:$4 sm:$0xff]   ;;  %v10475_v15 = vmax.f32 %v27124_v59, 0.0 }
 0x79f   :  { %v27567_v34 = vpop.f32.mrf.mxu0  ;;  %15653 = vmatprep.subr.bf16.mxu0 %v21921_v5  ;;  %v7886_v5 = vrot.slane %v27413_v63, %v24057_v32  ;;  %v21973_v59 = vld [vmem:[%s29862_s5 + $0x12d0] ss:$28 sps:$4 sm:$0xff]  }
 0x7a1   :  { %v10306_v20 = vpop.f32.mrf.mxu0  ;;  %15611 = vmatpush1.bf16.msra.mxu1 %v21916_v37  ;;  %v21970_v37 = vld [vmem:[%s29862_s5 + $0xf88] ss:$28 sps:$4 sm:$0xff]  }
 0x7a2   :  { %15654 = vmatpush2.bf16.msra.mxu0 %v21919_v13  ;;  %15612 = vmatprep.subr.bf16.mxu1 %v21924_v42  ;;  %v21975_v13 = vld [vmem:[%s29862_s5 + $0x12d4] ss:$28 sps:$4 sm:$0xff]  }
 0x7a3   :  { %v10307_v35 = vpop.f32.mrf.mxu0  ;;  %15655 = vmatprep.subr.bf16.mxu0 %v21927_v43  ;;  %v27690_v43 = vpack.c.bf16 %v10475_v15, %v10475_v15  ;;  %v22023_v15 = vld [vmem:[%s29862_s5 + $0x1494] ss:$28 sps:$4 sm:$0xff]  }
 0x7a4   :  { %v21976_v35 = vld [vmem:[%s29862_s5 + $0xf50] ss:$28 sps:$4 sm:$0xff]  }
 0x7a5   :  { %15613 = vmatpush2.bf16.msra.mxu1 %v21922_v12  ;;  %v21978_v12 = vld [vmem:[%s29862_s5 + $0xf54] ss:$28 sps:$4 sm:$0xff]  }
 0x7a6   :  { %15656 = vmatpush2.bf16.msra.mxu0 %v21925_v21  ;;  %15614 = vmatprep.subr.bf16.mxu1 %v21930_v47  ;;  %v27692_v21 = vpack.c.bf16 %v10480_v7, %v10480_v7  ;;  %v7890_v7 = vrot.slane %v27413_v63, %v27087_v46  ;;  %v22029_v63 = vld [vmem:[%s29862_s5 + $0x145c] ss:$28 sps:$4 sm:$0xff]  }
 0x7a7   :  { %15657 = vmatprep.subr.bf16.mxu0 %v21933_v58 }
 0x7a9   :  { %15615 = vmatpush2.bf16.msra.mxu1 %v21928_v53  ;;  %v21981_v53 = vld [vmem:[%s29862_s5 + $0x129c] ss:$28 sps:$4 sm:$0xff]  }
 0x7aa   :  { %15658 = vmatpush2.bf16.msra.mxu0 %v21931_v22  ;;  %15616 = vmatprep.subr.bf16.mxu1 %v21936_v25  ;;  %v21979_v22 = vld [vmem:[%s29862_s5 + $0x1298] ss:$28 sps:$4 sm:$0xff]  }
 0x7ab   :  { %15659 = vmatprep.subr.bf16.mxu0 %v21939_v6  ;;  %v21984_v25 = vld [vmem:[%s29862_s5 + $0xf1c] ss:$28 sps:$4 sm:$0xff]  }
 0x7ad   :  { %15617 = vmatpush2.bf16.msra.mxu1 %v21934_v14 }
 0x7ae   :  { %15660 = vmatpush2.bf16.msra.mxu0 %v21937_v30  ;;  %15618 = vmatprep.subr.bf16.mxu1 %v21942_v8  ;;  %v21987_v8 = vld [vmem:[%s29862_s5 + $0x1264] ss:$28 sps:$4 sm:$0xff]  }
 0x7af   :  { %15661 = vmatprep.subr.bf16.mxu0 %v21945_v50 }
 0x7b1   :  { %15619 = vmatpush2.bf16.msra.mxu1 %v21940_v45  ;;  %v21982_v45 = vld [vmem:[%s29862_s5 + $0xf18] ss:$28 sps:$4 sm:$0xff]  }
 0x7b2   :  { %15662 = vmatpush2.bf16.msra.mxu0 %v21943_v36  ;;  %15620 = vmatprep.subr.bf16.mxu1 %v21948_v18  ;;  %v21990_v36 = vld [vmem:[%s29862_s5 + $0xee4] ss:$28 sps:$4 sm:$0xff]  }
 0x7b3   :  { %15663 = vmatprep.subr.bf16.mxu0 %v21951_v55  ;;  %v21988_v18 = vld [vmem:[%s29862_s5 + $0xee0] ss:$28 sps:$4 sm:$0xff]   ;;  %v21991_v55 = vld [vmem:[%s29862_s5 + $0x1228] ss:$28 sps:$4 sm:$0xff]  }
 0x7b5   :  { %15621 = vmatpush2.bf16.msra.mxu1 %v21946_v54  ;;  %v21993_v54 = vld [vmem:[%s29862_s5 + $0x122c] ss:$28 sps:$4 sm:$0xff]  }
 0x7b6   :  { %15664 = vmatpush2.bf16.msra.mxu0 %v21949_v52  ;;  %15622 = vmatprep.subr.bf16.mxu1 %v21954_v56  ;;  %v21996_v52 = vld [vmem:[%s29862_s5 + $0xeac] ss:$28 sps:$4 sm:$0xff]   ;;  %v21999_v56 = vld [vmem:[%s29862_s5 + $0x11f4] ss:$28 sps:$4 sm:$0xff]  }
 0x7b7   :  { %15665 = vmatprep.subr.bf16.mxu0 %v21957_v31  ;;  %v21997_v31 = vld [vmem:[%s29862_s5 + $0x11f0] ss:$28 sps:$4 sm:$0xff]  }
 0x7b9   :  { %15623 = vmatpush2.bf16.msra.mxu1 %v21952_v48  ;;  %v21994_v48 = vld [vmem:[%s29862_s5 + $0xea8] ss:$28 sps:$4 sm:$0xff]  }
 0x7ba   :  { %15666 = vmatpush2.bf16.msra.mxu0 %v21955_v19  ;;  %15624 = vmatprep.subr.bf16.mxu1 %v21960_v57  ;;  %v22000_v19 = vld [vmem:[%s29862_s5 + $0xe70] ss:$28 sps:$4 sm:$0xff]   ;;  %v22005_v57 = vld [vmem:[%s29862_s5 + $0x11bc] ss:$28 sps:$4 sm:$0xff]  }
 0x7bb   :  { %15667 = vmatprep.subr.bf16.mxu0 %v21963_v61  ;;  %v22008_v61 = vld [vmem:[%s29862_s5 + $0xe3c] ss:$28 sps:$4 sm:$0xff]  }
 0x7bd   :  { %15625 = vmatpush2.bf16.msra.mxu1 %v21958_v49  ;;  %v22003_v49 = vld [vmem:[%s29862_s5 + $0x11b8] ss:$28 sps:$4 sm:$0xff]  }
 0x7be   :  { %15668 = vmatpush2.bf16.msra.mxu0 %v21961_v62  ;;  %15626 = vmatprep.subr.bf16.mxu1 %v21966_v24  ;;  %v22006_v62 = vld [vmem:[%s29862_s5 + $0xe38] ss:$28 sps:$4 sm:$0xff]   ;;  %v22009_v24 = vld [vmem:[%s29862_s5 + $0x1180] ss:$28 sps:$4 sm:$0xff]  }
 0x7bf   :  { %15719 = vmatprep.subr.bf16.mxu0 %v21969_v27  ;;  %v22014_v27 = vld [vmem:[%s29862_s5 + $0xe04] ss:$28 sps:$4 sm:$0xff]  }
 0x7c0   :  { %v27681_v42 = vpop.f32.mrf.mxu1 }
 0x7c1   :  { %15670 = vmatmul.mubr.bf16.vlgmr.msra.gmra.mxu0 %v27671_v23  ;;  %15627 = vmatpush2.bf16.msra.mxu1 %v21964_v11 }
 0x7c2   :  { %15720 = vmatpush1.bf16.msra.mxu0 %v21967_v4  ;;  %v10263_v20 = vpop.f32.mrf.mxu1  ;;  %15678 = vmatprep.subr.bf16.mxu1 %v21972_v9  ;;  %v22015_v4 = vld [vmem:[%s29862_s5 + $0x14c8] ss:$28 sps:$4 sm:$0xff]  }
 0x7c3   :  { %v10264_v47 = vadd.f32 %v10263_v20, %v7886_v5  ;;  %15721 = vmatprep.subr.bf16.mxu0 %v21975_v13  ;;  %v22020_v9 = vld [vmem:[%s29862_s5 + $0x114c] ss:$28 sps:$4 sm:$0xff]  }
 0x7c4   :  { %v10265_v58 = vpop.f32.mrf.mxu1  ;;  %15629 = vmatmul.mubr.bf16.vlgmr.msra.gmra.mxu1 %v27690_v43 }
 0x7c5   :  { %v10305_v14 = vadd.f32 %v27567_v34, %v10264_v47  ;;  %15679 = vmatpush1.bf16.msra.mxu1 %v21970_v37  ;;  %15710 = vmatprep.mubr.bf16.mxu1 %v27692_v21  ;;  %v21985_v34 = vld [vmem:[%s29862_s5 + $0x1260] ss:$28 sps:$4 sm:$0xff]   ;;  %v22018_v37 = vld [vmem:[%s29862_s5 + $0x1148] ss:$28 sps:$4 sm:$0xff]  }
 0x7c6   :  { %15722 = vmatpush1.bf16.msra.mxu0 %v21973_v59  ;;  %v10266_v6 = vpop.f32.mrf.mxu1  ;;  %15680 = vmatprep.subr.bf16.mxu1 %v21978_v12  ;;  %v22021_v59 = vld [vmem:[%s29862_s5 + $0x1490] ss:$28 sps:$4 sm:$0xff]  }
 0x7c7   :  { %v10482_v30 = vmax.f32 %v10305_v14, 0.0  ;;  %15723 = vmatprep.subr.bf16.mxu0 %v21981_v53  ;;  %v22026_v12 = vld [vmem:[%s29862_s5 + $0x1114] ss:$28 sps:$4 sm:$0xff]   ;;  %v22032_v14 = vld [vmem:[%s29862_s5 + $0x10dc] ss:$28 sps:$4 sm:$0xff]  }
 0x7c8   :  { %v22030_v6 = vld [vmem:[%s29862_s5 + $0x10d8] ss:$28 sps:$4 sm:$0xff]  }
 0x7c9   :  { %v27715_v50 = vpack.c.bf16 %v10482_v30, %v10482_v30  ;;  %15681 = vmatpush1.bf16.msra.mxu1 %v21976_v35  ;;  %v22024_v35 = vld [vmem:[%s29862_s5 + $0x1110] ss:$28 sps:$4 sm:$0xff]   ;;  %v22035_v30 = vld [vmem:[%s29862_s5 + $0x1424] ss:$28 sps:$4 sm:$0xff]  }
 0x7ca   :  { %15724 = vmatpush1.bf16.msra.mxu0 %v21979_v22  ;;  %15682 = vmatprep.subr.bf16.mxu1 %v21984_v25  ;;  %v22027_v25 = vld [vmem:[%s29862_s5 + $0x1458] ss:$28 sps:$4 sm:$0xff]  }
 0x7cb   :  { %15751 = vmatprep.mubr.bf16.mxu0 %v27715_v50  ;;  %15725 = vmatprep.subr.bf16.mxu0 %v21987_v8 }
 0x7cd   :  { %15683 = vmatpush1.bf16.msra.mxu1 %v21982_v45 }
 0x7ce   :  { %15726 = vmatpush1.bf16.msra.mxu0 %v21985_v34  ;;  %15684 = vmatprep.subr.bf16.mxu1 %v21990_v36  ;;  %v22033_v34 = vld [vmem:[%s29862_s5 + $0x1420] ss:$28 sps:$4 sm:$0xff]  }
 0x7cf   :  { %15727 = vmatprep.subr.bf16.mxu0 %v21993_v54  ;;  %v22038_v36 = vld [vmem:[%s29862_s5 + $0x10a4] ss:$28 sps:$4 sm:$0xff]   ;;  %v22041_v54 = vld [vmem:[%s29862_s5 + $0x13ec] ss:$28 sps:$4 sm:$0xff]  }
 0x7d1   :  { %15685 = vmatpush1.bf16.msra.mxu1 %v21988_v18  ;;  %v22036_v18 = vld [vmem:[%s29862_s5 + $0x10a0] ss:$28 sps:$4 sm:$0xff]  }
 0x7d2   :  { %15728 = vmatpush1.bf16.msra.mxu0 %v21991_v55  ;;  %15686 = vmatprep.subr.bf16.mxu1 %v21996_v52  ;;  %v22039_v55 = vld [vmem:[%s29862_s5 + $0x13e8] ss:$28 sps:$4 sm:$0xff]  }
 0x7d3   :  { %15729 = vmatprep.subr.bf16.mxu0 %v21999_v56  ;;  %v22044_v52 = vld [vmem:[%s29862_s5 + $0x106c] ss:$28 sps:$4 sm:$0xff]  }
 0x7d4   :  { %v27841_v56 = vld [vmem:[%s29861_s9 + $0x8] sm:$0x7f] }
 0x7d5   :  { %15687 = vmatpush1.bf16.msra.mxu1 %v21994_v48  ;;  %v7882_v48 = vrot.slane %v27841_v56, %v24044_v26 }
 0x7d6   :  { %15730 = vmatpush1.bf16.msra.mxu0 %v21997_v31  ;;  %15688 = vmatprep.subr.bf16.mxu1 %v22002_v28  ;;  %v22042_v31 = vld [vmem:[%s29862_s5 + $0x1068] ss:$28 sps:$4 sm:$0xff]   ;;  %v22047_v28 = vld [vmem:[%s29862_s5 + $0x13b4] ss:$28 sps:$4 sm:$0xff]  }
 0x7d7   :  { %15731 = vmatprep.subr.bf16.mxu0 %v22005_v57  ;;  %v22050_v57 = vld [vmem:[%s29862_s5 + $0x1034] ss:$28 sps:$4 sm:$0xff]  }
 0x7d9   :  { %15689 = vmatpush1.bf16.msra.mxu1 %v22000_v19  ;;  %v22045_v19 = vld [vmem:[%s29862_s5 + $0x13b0] ss:$28 sps:$4 sm:$0xff]  }
 0x7da   :  { %15732 = vmatpush1.bf16.msra.mxu0 %v22003_v49  ;;  %15690 = vmatprep.subr.bf16.mxu1 %v22008_v61  ;;  %v10262_v49 = vadd.f32 %v27681_v42, %v7882_v48  ;;  %v22048_v61 = vld [vmem:[%s29862_s5 + $0x1030] ss:$28 sps:$4 sm:$0xff]   ;;  %v22056_v42 = vld [vmem:[%s29862_s5 + $0xffc] ss:$28 sps:$4 sm:$0xff]  }
 0x7db   :  { %15733 = vmatprep.subr.bf16.mxu0 %v22011_v0  ;;  %v22053_v0 = vld [vmem:[%s29862_s5 + $0x137c] ss:$28 sps:$4 sm:$0xff]  }
 0x7dc   :  { %v22069_v48 = vld [vmem:[%s29862_s5 + $0x1618] ss:$28 sps:$4 sm:$0xff]  }
 0x7dd   :  { %v10343_v11 = vpop.f32.mrf.mxu0  ;;  %15691 = vmatpush1.bf16.msra.mxu1 %v22006_v62  ;;  %v7894_v62 = vrot.slane %v27841_v56, %v27093_v33 }
 0x7de   :  { %15734 = vmatpush1.bf16.msra.mxu0 %v22009_v24  ;;  %15692 = vmatprep.subr.bf16.mxu1 %v22014_v27  ;;  %v10344_v20 = vadd.f32 %v10343_v11, %v7890_v7  ;;  %v22051_v24 = vld [vmem:[%s29862_s5 + $0x1378] ss:$28 sps:$4 sm:$0xff]   ;;  %v22059_v27 = vld [vmem:[%s29862_s5 + $0x1344] ss:$28 sps:$4 sm:$0xff]  }
 0x7df   :  { %v27789_v5 = vpop.f32.mrf.mxu0  ;;  %15735 = vmatprep.subr.bf16.mxu0 %v22017_v1  ;;  %v10303_v1 = vadd.f32 %v27559_v10, %v10262_v49  ;;  %v11398_v11 = vld [vmem:[%s29862_s5 + $0x1880] sm:$0xff]  ;;  %v22077_v49 = vld [vmem:[%s29862_s5 + $0x190] ss:$28 sps:$4 sm:$0xff]  }
 0x7e0   :  { %v22062_v10 = vld [vmem:[%s29862_s5 + $0xfc4] ss:$28 sps:$4 sm:$0xff]  }
 0x7e1   :  { %v10347_v13 = vpop.f32.mrf.mxu0  ;;  %15693 = vmatpush1.bf16.msra.mxu1 %v22012_v3  ;;  %v22054_v3 = vld [vmem:[%s29862_s5 + $0xff8] ss:$28 sps:$4 sm:$0xff]  }
 0x7e2   :  { %15736 = vmatpush2.bf16.msra.mxu0 %v22015_v4  ;;  %15694 = vmatprep.subr.bf16.mxu1 %v22020_v9  ;;  %v10346_v4 = vadd.f32 %v27789_v5, %v7894_v62  ;;  %v22057_v9 = vld [vmem:[%s29862_s5 + $0x1340] ss:$28 sps:$4 sm:$0xff]   ;;  %v19649_v13 = vcombine.high %v11398_v11, %v11398_v11  ;;  %v19648_v5 = vcombine.low %v11398_v11, %v11398_v11  ;;  %v22082_v62 = vld [vmem:[%s29862_s5 + $0x15ac] ss:$28 sps:$4 sm:$0xff]  }
 0x7e3   :  { %v10348_v47 = vpop.f32.mrf.mxu0  ;;  %15737 = vmatprep.subr.bf16.mxu0 %v22023_v15  ;;  %v10481_v15 = vmax.f32 %v10303_v1, 0.0  ;;  %v22088_v1 = vld [vmem:[%s29862_s5 + $0x1574] ss:$28 sps:$4 sm:$0xff]   ;;  %v22091_v11 = vld [vmem:[%s29862_s5 + $0x124] ss:$28 sps:$4 sm:$0xff]  }
 0x7e4   :  { %v10384_v53 = vpop.f32.mrf.mxu1  ;;  %v15494_v47 = vsel %vm15492_vm2, %v19648_v5, 0  ;;  %v22103_v5 = vld [vmem:[%s29862_s5 + $0xb4] ss:$28 sps:$4 sm:$0xff]  }
 0x7e5   :  { %v27806_v58 = vadd.f32 %v10384_v53, %v10344_v20  ;;  %15695 = vmatpush2.bf16.msra.mxu1 %v22018_v37  ;;  %v22060_v37 = vld [vmem:[%s29862_s5 + $0xfc0] ss:$28 sps:$4 sm:$0xff]   ;;  %v22063_v53 = vld [vmem:[%s29862_s5 + $0x1688] ss:$28 sps:$4 sm:$0xff]  }
 0x7e6   :  { %15738 = vmatpush2.bf16.msra.mxu0 %v22021_v59  ;;  %v10386_v22 = vpop.f32.mrf.mxu1  ;;  %15696 = vmatprep.subr.bf16.mxu1 %v22026_v12  ;;  %v22065_v59 = vld [vmem:[%s29862_s5 + $0x168c] ss:$28 sps:$4 sm:$0xff]   ;;  %v10479_v12 = vmax.f32 %v27469_v17, 0.0  ;;  %v22068_v17 = vld [vmem:[%s29862_s5 + $0x1654] ss:$28 sps:$4 sm:$0xff]  }
 0x7e7   :  { %15739 = vmatprep.subr.bf16.mxu0 %v22029_v63  ;;  %v10387_v7 = vadd.f32 %v10386_v22, %v10346_v4  ;;  %v27896_v63 = vpack.c.bf16 %v10481_v15, %v10481_v15  ;;  %v22089_v4 = vld [vmem:[%s29862_s5 + $0x120] ss:$28 sps:$4 sm:$0xff]   ;;  %v22097_v15 = vld [vmem:[%s29862_s5 + $0xec] ss:$28 sps:$4 sm:$0xff]  }
 0x7e8   :  { %v10388_v8 = vpop.f32.mrf.mxu1 }
 0x7e9   :  { %15697 = vmatpush2.bf16.msra.mxu1 %v22024_v35  ;;  %v10484_v20 = vmax.f32 %v10387_v7, 0.0  ;;  %v22079_v35 = vld [vmem:[%s29862_s5 + $0x194] ss:$28 sps:$4 sm:$0xff]   ;;  %v22095_v7 = vld [vmem:[%s29862_s5 + $0xe8] ss:$28 sps:$4 sm:$0xff]  }
 0x7ea   :  { %15740 = vmatpush2.bf16.msra.mxu0 %v22027_v25  ;;  %v10389_v45 = vpop.f32.mrf.mxu1  ;;  %15698 = vmatprep.subr.bf16.mxu1 %v22032_v14  ;;  %v27910_v25 = vpack.c.bf16 %v10479_v12, %v10479_v12  ;;  %v22066_v8 = vld [vmem:[%s29862_s5 + $0x1650] ss:$28 sps:$4 sm:$0xff]  }
 0x7eb   :  { %15741 = vmatprep.subr.bf16.mxu0 %v22035_v30  ;;  %v27912_v14 = vpack.c.bf16 %v10484_v20, %v10484_v20  ;;  %v22071_v45 = vld [vmem:[%s29862_s5 + $0x161c] ss:$28 sps:$4 sm:$0xff]   ;;  %v22106_v12 = vld [vmem:[%s29862_s5 + $0x184c] ss:$28 sps:$4 sm:$0xff]  }
 0x7ec   :  { %v22104_v20 = vld [vmem:[%s29862_s5 + $0x1848] ss:$28 sps:$4 sm:$0xff]  }
 0x7ed   :  { %15699 = vmatpush2.bf16.msra.mxu1 %v22030_v6 }
 0x7ee   :  { %15742 = vmatpush2.bf16.msra.mxu0 %v22033_v34  ;;  %15700 = vmatprep.subr.bf16.mxu1 %v22038_v36  ;;  %v7898_v36 = vrot.slane %v27841_v56, %v27305_v29  ;;  %v22074_v56 = vld [vmem:[%s29862_s5 + $0x15e0] ss:$28 sps:$4 sm:$0xff]  }
 0x7ef   :  { %15743 = vmatprep.subr.bf16.mxu0 %v22041_v54 }
 0x7f1   :  { %15701 = vmatpush2.bf16.msra.mxu1 %v22036_v18 }
 0x7f2   :  { %15744 = vmatpush2.bf16.msra.mxu0 %v22039_v55  ;;  %15702 = vmatprep.subr.bf16.mxu1 %v22044_v52 }
 0x7f3   :  { %15745 = vmatprep.subr.bf16.mxu0 %v22047_v28 }
 0x7f5   :  { %15703 = vmatpush2.bf16.msra.mxu1 %v22042_v31 }
 0x7f6   :  { %15746 = vmatpush2.bf16.msra.mxu0 %v22045_v19  ;;  %15704 = vmatprep.subr.bf16.mxu1 %v22050_v57  ;;  %v22076_v19 = vld [vmem:[%s29862_s5 + $0x15e4] ss:$28 sps:$4 sm:$0xff]  }
 0x7f7   :  { %15747 = vmatprep.subr.bf16.mxu0 %v22053_v0 }
 0x7f9   :  { %15705 = vmatpush2.bf16.msra.mxu1 %v22048_v61 }
 0x7fa   :  { %15748 = vmatpush2.bf16.msra.mxu0 %v22051_v24  ;;  %15706 = vmatprep.subr.bf16.mxu1 %v22056_v42  ;;  %v22085_v24 = vld [vmem:[%s29862_s5 + $0x15c] ss:$28 sps:$4 sm:$0xff]   ;;  %v22080_v42 = vld [vmem:[%s29862_s5 + $0x15a8] ss:$28 sps:$4 sm:$0xff]  }
 0x7fb   :  { %15749 = vmatprep.subr.bf16.mxu0 %v22059_v27  ;;  %v22083_v27 = vld [vmem:[%s29862_s5 + $0x158] ss:$28 sps:$4 sm:$0xff]  }
 0x7fd   :  { %15707 = vmatpush2.bf16.msra.mxu1 %v22054_v3  ;;  %v22086_v3 = vld [vmem:[%s29862_s5 + $0x1570] ss:$28 sps:$4 sm:$0xff]  }
 0x7fe   :  { %15750 = vmatpush2.bf16.msra.mxu0 %v22057_v9  ;;  %15708 = vmatprep.subr.bf16.mxu1 %v22062_v10  ;;  %v22094_v9 = vld [vmem:[%s29862_s5 + $0x153c] ss:$28 sps:$4 sm:$0xff]  }
 0x7ff   :  { %19655 = vmatprep.subr.msk.bf16.mxu0 %vm15492_vm2, %v19649_v13  ;;  %v22092_v10 = vld [vmem:[%s29862_s5 + $0x1538] ss:$28 sps:$4 sm:$0xff]   ;;  %v22098_v13 = vld [vmem:[%s29862_s5 + $0x1500] ss:$28 sps:$4 sm:$0xff]  }
 0x801   :  { %v10465_v22 = vpop.f32.mrf.mxu0  ;;  %15752 = vmatmul.mubr.bf16.vlgmr.msra.gmra.mxu0 %v27896_v63  ;;  %15709 = vmatpush2.bf16.msra.mxu1 %v22060_v37  ;;  %v22100_v37 = vld [vmem:[%s29862_s5 + $0x1504] ss:$28 sps:$4 sm:$0xff]  }
 0x802   :  { %15760 = vmatprep.subr.bf16.mxu1 %v22065_v59  ;;  %15816 = vmatpush1.bf16.msra.mxu0 %v15494_v47  ;;  %v22101_v59 = vld [vmem:[%s29862_s5 + $0xb0] ss:$28 sps:$4 sm:$0xff]   ;;  %v22109_v47 = vld [vmem:[%s29862_s5 + $0x7c] ss:$28 sps:$4 sm:$0xff]  }
 0x803   :  { %v10467_v6 = vpop.f32.mrf.mxu0  ;;  %15833 = vmatprep.mubr.bf16.mxu0 %v22920_v16  ;;  %15842 = vmatprep.subr.bf16.mxu0 %v22079_v35  ;;  %v22107_v35 = vld [vmem:[%s29862_s5 + $0x78] ss:$28 sps:$4 sm:$0xff]  }
 0x804   :  { %v19766_v30 = vpop.f32.mrf.mxu1  ;;  %15711 = vmatmul.mubr.bf16.vlgmr.msra.gmra.mxu1 %v27910_v25  ;;  %v22113_v6 = vld [vmem:[%s29862_s5 + $0x40] ss:$28 sps:$4 sm:$0xff]  }
 0x805   :  { %v10468_v34 = vpop.f32.mrf.mxu0  ;;  %15761 = vmatpush1.bf16.msra.mxu1 %v22063_v53  ;;  %15792 = vmatprep.mubr.bf16.mxu1 %v27912_v14  ;;  %v22112_v53 = vld [vmem:[%s29862_s5 + $0x1814] ss:$28 sps:$4 sm:$0xff]  }
 0x806   :  { %v19767_v18 = vpop.f32.mrf.mxu1  ;;  %15762 = vmatprep.subr.bf16.mxu1 %v22068_v17  ;;  %v22110_v17 = vld [vmem:[%s29862_s5 + $0x1810] ss:$28 sps:$4 sm:$0xff]   ;;  %v22119_v34 = vld [vmem:[%s29862_s5 + $0x8] ss:$28 sps:$4 sm:$0xff]  }
 0x807   :  { %v19768_v54 = vadd.f32 %v19767_v18, %v19766_v30  ;;  %v10469_v55 = vpop.f32.mrf.mxu0  ;;  %v22118_v30 = vld [vmem:[%s29862_s5 + $0x17dc] ss:$28 sps:$4 sm:$0xff]  }
 0x808   :  { %v19769_v52 = vpop.f32.mrf.mxu1  ;;  %v22122_v18 = vld [vmem:[%s29862_s5 + $0x17a0] ss:$28 sps:$4 sm:$0xff]   ;;  %v22125_v55 = vld [vmem:[%s29862_s5 + $0x350] ss:$28 sps:$4 sm:$0xff]  }
 0x809   :  { %v10426_v31 = vadd.f32 %v19768_v54, %v7898_v36  ;;  %15763 = vmatpush1.bf16.msra.mxu1 %v22066_v8  ;;  %v22116_v8 = vld [vmem:[%s29862_s5 + $0x17d8] ss:$28 sps:$4 sm:$0xff]   ;;  %v22124_v36 = vld [vmem:[%s29862_s5 + $0x17a4] ss:$28 sps:$4 sm:$0xff]   ;;  %v22130_v52 = vld [vmem:[%s29862_s5 + $0x176c] ss:$28 sps:$4 sm:$0xff]  }
 0x80a   :  { %v19770_v28 = vpop.f32.mrf.mxu1  ;;  %15764 = vmatprep.subr.bf16.mxu1 %v22071_v45  ;;  %v22121_v45 = vld [vmem:[%s29862_s5 + $0xc] ss:$28 sps:$4 sm:$0xff]   ;;  %v22127_v54 = vld [vmem:[%s29862_s5 + $0x354] ss:$28 sps:$4 sm:$0xff]  }
 0x80b   :  { %v10466_v57 = vadd.f32 %v10465_v22, %v10426_v31  ;;  %v22115_v22 = vld [vmem:[%s29862_s5 + $0x44] ss:$28 sps:$4 sm:$0xff]   ;;  %v22133_v31 = vld [vmem:[%s29862_s5 + $0x31c] ss:$28 sps:$4 sm:$0xff]  }
 0x80c   :  { %v22131_v28 = vld [vmem:[%s29862_s5 + $0x318] ss:$28 sps:$4 sm:$0xff]  }
 0x80d   :  { %v10485_v61 = vmax.f32 %v10466_v57, 0.0  ;;  %15765 = vmatpush1.bf16.msra.mxu1 %v22069_v48  ;;  %v22128_v48 = vld [vmem:[%s29862_s5 + $0x1768] ss:$28 sps:$4 sm:$0xff]   ;;  %v22134_v57 = vld [vmem:[%s29862_s5 + $0x1730] ss:$28 sps:$4 sm:$0xff]  }
 0x80e   :  { %15766 = vmatprep.subr.bf16.mxu1 %v22076_v19  ;;  %v22136_v19 = vld [vmem:[%s29862_s5 + $0x1734] ss:$28 sps:$4 sm:$0xff]  }
 0x80f   :  { %v27937_v0 = vpack.c.bf16 %v10485_v61, %v10485_v61  ;;  %v22142_v61 = vld [vmem:[%s29862_s5 + $0x16fc] ss:$28 sps:$4 sm:$0xff]  }
 0x811   :  { %15767 = vmatpush1.bf16.msra.mxu1 %v22074_v56  ;;  %19656 = vmatmul.mubr.msk.bf16.vlgmr.msra.gmra.mxu0 %vm15488_vm3, %v27937_v0  ;;  %v22139_v56 = vld [vmem:[%s29862_s5 + $0x2e4] ss:$28 sps:$4 sm:$0xff]  }
 0x812   :  { %15843 = vmatpush1.bf16.msra.mxu0 %v22077_v49  ;;  %15874 = vmatprep.mubr.bf16.mxu0 %v27246_v44  ;;  %v22137_v49 = vld [vmem:[%s29862_s5 + $0x2e0] ss:$28 sps:$4 sm:$0xff]  }
 0x813   :  { %15768 = vmatprep.subr.bf16.mxu1 %v22082_v62  ;;  %15844 = vmatprep.subr.bf16.mxu0 %v22085_v24  ;;  %v22140_v62 = vld [vmem:[%s29862_s5 + $0x16f8] ss:$28 sps:$4 sm:$0xff]   ;;  %v22145_v24 = vld [vmem:[%s29862_s5 + $0x2ac] ss:$28 sps:$4 sm:$0xff]  }
 0x815   :  { %15769 = vmatpush1.bf16.msra.mxu1 %v22080_v42  ;;  %v22143_v42 = vld [vmem:[%s29862_s5 + $0x2a8] ss:$28 sps:$4 sm:$0xff]  }
 0x816   :  { %15845 = vmatpush1.bf16.msra.mxu0 %v22083_v27  ;;  %15770 = vmatprep.subr.bf16.mxu1 %v22088_v1  ;;  %v22148_v27 = vld [vmem:[%s29862_s5 + $0x16c4] ss:$28 sps:$4 sm:$0xff]   ;;  %v22151_v1 = vld [vmem:[%s29862_s5 + $0x274] ss:$28 sps:$4 sm:$0xff]  }
 0x817   :  { %15846 = vmatprep.subr.bf16.mxu0 %v22091_v11  ;;  %v22146_v11 = vld [vmem:[%s29862_s5 + $0x16c0] ss:$28 sps:$4 sm:$0xff]  }
 0x819   :  { %15771 = vmatpush1.bf16.msra.mxu1 %v22086_v3  ;;  %v10483_v3 = vmax.f32 %v27806_v58, 0.0  ;;  %v22154_v58 = vld [vmem:[%s29862_s5 + $0x23c] ss:$28 sps:$4 sm:$0xff]  }
 0x81a   :  { %15847 = vmatpush1.bf16.msra.mxu0 %v22089_v4  ;;  %15772 = vmatprep.subr.bf16.mxu1 %v22094_v9  ;;  %v22149_v4 = vld [vmem:[%s29862_s5 + $0x270] ss:$28 sps:$4 sm:$0xff]   ;;  %v10486_v9 = vld [vmem:[%s29863_s10] sm:$0x7f] }
 0x81b   :  { %15848 = vmatprep.subr.bf16.mxu0 %v22097_v15  ;;  %v22152_v15 = vld [vmem:[%s29862_s5 + $0x238] ss:$28 sps:$4 sm:$0xff]  }
 0x81d   :  { %15773 = vmatpush1.bf16.msra.mxu1 %v22092_v10  ;;  %v22157_v10 = vld [vmem:[%s29862_s5 + $0x514] ss:$28 sps:$4 sm:$0xff]  }
 0x81e   :  { %15849 = vmatpush1.bf16.msra.mxu0 %v22095_v7  ;;  %15774 = vmatprep.subr.bf16.mxu1 %v22100_v37  ;;  %v22155_v7 = vld [vmem:[%s29862_s5 + $0x510] ss:$28 sps:$4 sm:$0xff]   ;;  %v22163_v37 = vld [vmem:[%s29862_s5 + $0x4dc] ss:$28 sps:$4 sm:$0xff]  }
 0x81f   :  { %15850 = vmatprep.subr.bf16.mxu0 %v22103_v5  ;;  %v11406_v5 = vrot.slane %v10486_v9, %v23803_v38  ;;  %v22161_v38 = vld [vmem:[%s29862_s5 + $0x4d8] ss:$28 sps:$4 sm:$0xff]  }
 0x821   :  { %15775 = vmatpush1.bf16.msra.mxu1 %v22098_v13 }
 0x822   :  { %15851 = vmatpush1.bf16.msra.mxu0 %v22101_v59  ;;  %15776 = vmatprep.subr.bf16.mxu1 %v22106_v12  ;;  %v28106_v59 = vpack.c.bf16 %v10483_v3, %v10483_v3  ;;  %v22193_v3 = vld [vmem:[%s29862_s5 + $0x7ec] ss:$28 sps:$4 sm:$0xff]  }
 0x823   :  { %15852 = vmatprep.subr.bf16.mxu0 %v22109_v47  ;;  %v22160_v47 = vld [vmem:[%s29862_s5 + $0x204] ss:$28 sps:$4 sm:$0xff]  }
 0x825   :  { %15777 = vmatpush2.bf16.msra.mxu1 %v22104_v20  ;;  %v11410_v20 = vrot.slane %v10486_v9, %v23811_v40  ;;  %v22196_v9 = vld [vmem:[%s29862_s5 + $0x38c] ss:$28 sps:$4 sm:$0xff]  }
 0x826   :  { %15853 = vmatpush1.bf16.msra.mxu0 %v22107_v35  ;;  %15778 = vmatprep.subr.bf16.mxu1 %v22112_v53  ;;  %v22158_v53 = vld [vmem:[%s29862_s5 + $0x200] ss:$28 sps:$4 sm:$0xff]  }
 0x827   :  { %15854 = vmatprep.subr.bf16.mxu0 %v22115_v22 }
 0x829   :  { %15779 = vmatpush2.bf16.msra.mxu1 %v22110_v17  ;;  %v22169_v17 = vld [vmem:[%s29862_s5 + $0x4a4] ss:$28 sps:$4 sm:$0xff]  }
 0x82a   :  { %15855 = vmatpush1.bf16.msra.mxu0 %v22113_v6  ;;  %15780 = vmatprep.subr.bf16.mxu1 %v22118_v30 }
 0x82b   :  { %15856 = vmatprep.subr.bf16.mxu0 %v22121_v45  ;;  %v22166_v45 = vld [vmem:[%s29862_s5 + $0x1cc] ss:$28 sps:$4 sm:$0xff]  }
 0x82d   :  { %15781 = vmatpush2.bf16.msra.mxu1 %v22116_v8 }
 0x82e   :  { %15857 = vmatpush1.bf16.msra.mxu0 %v22119_v34  ;;  %15782 = vmatprep.subr.bf16.mxu1 %v22124_v36 }
 0x82f   :  { %15858 = vmatprep.subr.bf16.mxu0 %v22127_v54 }
 0x831   :  { %15783 = vmatpush2.bf16.msra.mxu1 %v22122_v18  ;;  %v22167_v18 = vld [vmem:[%s29862_s5 + $0x4a0] ss:$28 sps:$4 sm:$0xff]  }
 0x832   :  { %15859 = vmatpush2.bf16.msra.mxu0 %v22125_v55  ;;  %15784 = vmatprep.subr.bf16.mxu1 %v22130_v52  ;;  %v22164_v52 = vld [vmem:[%s29862_s5 + $0x1c8] ss:$28 sps:$4 sm:$0xff]  }
 0x833   :  { %15860 = vmatprep.subr.bf16.mxu0 %v22133_v31  ;;  %v22170_v31 = vld [vmem:[%s29862_s5 + $0x468] ss:$28 sps:$4 sm:$0xff]  }
 0x835   :  { %15785 = vmatpush2.bf16.msra.mxu1 %v22128_v48  ;;  %v22172_v48 = vld [vmem:[%s29862_s5 + $0x46c] ss:$28 sps:$4 sm:$0xff]  }
 0x836   :  { %15861 = vmatpush2.bf16.msra.mxu0 %v22131_v28  ;;  %15786 = vmatprep.subr.bf16.mxu1 %v22136_v19  ;;  %v22175_v28 = vld [vmem:[%s29862_s5 + $0x894] ss:$28 sps:$4 sm:$0xff]  }
 0x837   :  { %15862 = vmatprep.subr.bf16.mxu0 %v22139_v56  ;;  %v22173_v19 = vld [vmem:[%s29862_s5 + $0x890] ss:$28 sps:$4 sm:$0xff]  }
 0x838   :  { %v22178_v56 = vld [vmem:[%s29862_s5 + $0x434] ss:$28 sps:$4 sm:$0xff]  }
 0x839   :  { %15787 = vmatpush2.bf16.msra.mxu1 %v22134_v57  ;;  %v22176_v57 = vld [vmem:[%s29862_s5 + $0x430] ss:$28 sps:$4 sm:$0xff]  }
 0x83a   :  { %15863 = vmatpush2.bf16.msra.mxu0 %v22137_v49  ;;  %15788 = vmatprep.subr.bf16.mxu1 %v22142_v61  ;;  %v22181_v49 = vld [vmem:[%s29862_s5 + $0x85c] ss:$28 sps:$4 sm:$0xff]  }
 0x83b   :  { %15864 = vmatprep.subr.bf16.mxu0 %v22145_v24  ;;  %v22179_v61 = vld [vmem:[%s29862_s5 + $0x858] ss:$28 sps:$4 sm:$0xff]  }
 0x83c   :  { %v22182_v24 = vld [vmem:[%s29862_s5 + $0x3f8] ss:$28 sps:$4 sm:$0xff]  }
 0x83d   :  { %15789 = vmatpush2.bf16.msra.mxu1 %v22140_v62  ;;  %v22184_v62 = vld [vmem:[%s29862_s5 + $0x3fc] ss:$28 sps:$4 sm:$0xff]  }
 0x83e   :  { %15865 = vmatpush2.bf16.msra.mxu0 %v22143_v42  ;;  %15790 = vmatprep.subr.bf16.mxu1 %v22148_v27  ;;  %v22187_v42 = vld [vmem:[%s29862_s5 + $0x824] ss:$28 sps:$4 sm:$0xff]  }
 0x83f   :  { %15866 = vmatprep.subr.bf16.mxu0 %v22151_v1  ;;  %v22185_v27 = vld [vmem:[%s29862_s5 + $0x820] ss:$28 sps:$4 sm:$0xff]  }
 0x840   :  { %v22190_v1 = vld [vmem:[%s29862_s5 + $0x3c4] ss:$28 sps:$4 sm:$0xff]  }
 0x841   :  { %v15589_v13 = vpop.f32.mrf.mxu0  ;;  %15791 = vmatpush2.bf16.msra.mxu1 %v22146_v11  ;;  %v22188_v11 = vld [vmem:[%s29862_s5 + $0x3c0] ss:$28 sps:$4 sm:$0xff]  }
 0x842   :  { %15867 = vmatpush2.bf16.msra.mxu0 %v22149_v4  ;;  %15883 = vmatprep.subr.bf16.mxu1 %v22157_v10  ;;  %v22191_v4 = vld [vmem:[%s29862_s5 + $0x7e8] ss:$28 sps:$4 sm:$0xff]  }
 0x843   :  { %v15591_v12 = vpop.f32.mrf.mxu0  ;;  %15868 = vmatprep.subr.bf16.mxu0 %v22154_v58  ;;  %v22194_v10 = vld [vmem:[%s29862_s5 + $0x388] ss:$28 sps:$4 sm:$0xff]   ;;  %v22199_v58 = vld [vmem:[%s29862_s5 + $0x7b4] ss:$28 sps:$4 sm:$0xff]  }
 0x844   :  { %v15548_v35 = vpop.f32.mrf.mxu1  ;;  %15793 = vmatmul.mubr.bf16.vlgmr.msra.gmra.mxu1 %v28106_v59 }
 0x845   :  { %v15549_v40 = vadd.f32 %v15548_v35, %v11406_v5  ;;  %v15593_v22 = vpop.f32.mrf.mxu0  ;;  %15884 = vmatpush1.bf16.msra.mxu1 %v22155_v7  ;;  %15915 = vmatprep.mubr.bf16.mxu1 %v27236_v51  ;;  %v22202_v7 = vld [vmem:[%s29862_s5 + $0x6d4] ss:$28 sps:$4 sm:$0xff]   ;;  %v22209_v35 = vld [vmem:[%s29862_s5 + $0x740] ss:$28 sps:$4 sm:$0xff]  }
 0x846   :  { %15869 = vmatpush2.bf16.msra.mxu0 %v22152_v15  ;;  %v15550_v6 = vpop.f32.mrf.mxu1  ;;  %15885 = vmatprep.subr.bf16.mxu1 %v22163_v37  ;;  %v22197_v15 = vld [vmem:[%s29862_s5 + $0x7b0] ss:$28 sps:$4 sm:$0xff]   ;;  %v22203_v5 = vld [vmem:[%s29862_s5 + $0x778] ss:$28 sps:$4 sm:$0xff]  }
 0x847   :  { %v15551_v30 = vadd.f32 %v15550_v6, %v11410_v20  ;;  %v15594_v8 = vpop.f32.mrf.mxu0  ;;  %15870 = vmatprep.subr.bf16.mxu0 %v22160_v47  ;;  %v28126_v34 = vadd.f32 %v15589_v13, %v15549_v40  ;;  %v22200_v37 = vld [vmem:[%s29862_s5 + $0x6d0] ss:$28 sps:$4 sm:$0xff]   ;;  %v22205_v13 = vld [vmem:[%s29862_s5 + $0x77c] ss:$28 sps:$4 sm:$0xff]   ;;  %v22211_v47 = vld [vmem:[%s29862_s5 + $0x744] ss:$28 sps:$4 sm:$0xff]  }
 0x848   :  { %v15552_v36 = vpop.f32.mrf.mxu1  ;;  %v22206_v20 = vld [vmem:[%s29862_s5 + $0x698] ss:$28 sps:$4 sm:$0xff]   ;;  %v22215_v40 = vld [vmem:[%s29862_s5 + $0x708] ss:$28 sps:$4 sm:$0xff]   ;;  %v22221_v8 = vld [vmem:[%s29862_s5 + $0xa50] ss:$28 sps:$4 sm:$0xff]  }
 0x849   :  { %15886 = vmatpush1.bf16.msra.mxu1 %v22161_v38  ;;  %v28131_v54 = vadd.f32 %v15591_v12, %v15551_v30  ;;  %v22208_v12 = vld [vmem:[%s29862_s5 + $0x69c] ss:$28 sps:$4 sm:$0xff]   ;;  %v22220_v22 = vld [vmem:[%s29862_s5 + $0x62c] ss:$28 sps:$4 sm:$0xff]   ;;  %v22223_v30 = vld [vmem:[%s29862_s5 + $0xa54] ss:$28 sps:$4 sm:$0xff]  }
 0x84a   :  { %15871 = vmatpush2.bf16.msra.mxu0 %v22158_v53  ;;  %v15553_v55 = vpop.f32.mrf.mxu1  ;;  %15887 = vmatprep.subr.bf16.mxu1 %v22169_v17  ;;  %v22214_v53 = vld [vmem:[%s29862_s5 + $0x664] ss:$28 sps:$4 sm:$0xff]   ;;  %v22217_v17 = vld [vmem:[%s29862_s5 + $0x70c] ss:$28 sps:$4 sm:$0xff]  }
 0x84b   :  { %15872 = vmatprep.subr.bf16.mxu0 %v22166_v45  ;;  %v22212_v38 = vld [vmem:[%s29862_s5 + $0x660] ss:$28 sps:$4 sm:$0xff]   ;;  %v22218_v6 = vld [vmem:[%s29862_s5 + $0x628] ss:$28 sps:$4 sm:$0xff]   ;;  %v22226_v45 = vld [vmem:[%s29862_s5 + $0x5f4] ss:$28 sps:$4 sm:$0xff]  }
 0x84c   :  { %v22224_v36 = vld [vmem:[%s29862_s5 + $0x5f0] ss:$28 sps:$4 sm:$0xff]   ;;  %v22227_v55 = vld [vmem:[%s29862_s5 + $0xa18] ss:$28 sps:$4 sm:$0xff]  }
 0x84d   :  { %15888 = vmatpush1.bf16.msra.mxu1 %v22167_v18  ;;  %v22229_v18 = vld [vmem:[%s29862_s5 + $0xa1c] ss:$28 sps:$4 sm:$0xff]  }
 0x84e   :  { %15873 = vmatpush2.bf16.msra.mxu0 %v22164_v52  ;;  %15889 = vmatprep.subr.bf16.mxu1 %v22172_v48  ;;  %v22232_v52 = vld [vmem:[%s29862_s5 + $0x5bc] ss:$28 sps:$4 sm:$0xff]  }
 0x84f   :  { %15924 = vmatprep.subr.bf16.mxu0 %v22175_v28  ;;  %v22230_v48 = vld [vmem:[%s29862_s5 + $0x5b8] ss:$28 sps:$4 sm:$0xff]   ;;  %v22233_v28 = vld [vmem:[%s29862_s5 + $0x9e0] ss:$28 sps:$4 sm:$0xff]  }
 0x851   :  { %15875 = vmatmul.mubr.bf16.vlgmr.msra.gmra.mxu0 %v27472_v60  ;;  %15890 = vmatpush1.bf16.msra.mxu1 %v22170_v31  ;;  %v22235_v31 = vld [vmem:[%s29862_s5 + $0x9e4] ss:$28 sps:$4 sm:$0xff]  }
 0x852   :  { %15925 = vmatpush1.bf16.msra.mxu0 %v22173_v19  ;;  %15956 = vmatprep.mubr.bf16.mxu0 %v27477_v41  ;;  %v22238_v19 = vld [vmem:[%s29862_s5 + $0x584] ss:$28 sps:$4 sm:$0xff]  }
 0x853   :  { %15891 = vmatprep.subr.bf16.mxu1 %v22178_v56  ;;  %15926 = vmatprep.subr.bf16.mxu0 %v22181_v49  ;;  %v22241_v56 = vld [vmem:[%s29862_s5 + $0x9ac] ss:$28 sps:$4 sm:$0xff]  }
 0x854   :  { %v22239_v49 = vld [vmem:[%s29862_s5 + $0x9a8] ss:$28 sps:$4 sm:$0xff]  }
 0x855   :  { %15892 = vmatpush1.bf16.msra.mxu1 %v22176_v57  ;;  %v22236_v57 = vld [vmem:[%s29862_s5 + $0x580] ss:$28 sps:$4 sm:$0xff]  }
 0x856   :  { %15927 = vmatpush1.bf16.msra.mxu0 %v22179_v61  ;;  %15893 = vmatprep.subr.bf16.mxu1 %v22184_v62  ;;  %v22244_v61 = vld [vmem:[%s29862_s5 + $0x54c] ss:$28 sps:$4 sm:$0xff]   ;;  %v22247_v62 = vld [vmem:[%s29862_s5 + $0x974] ss:$28 sps:$4 sm:$0xff]  }
 0x857   :  { %15928 = vmatprep.subr.bf16.mxu0 %v22187_v42  ;;  %v22245_v42 = vld [vmem:[%s29862_s5 + $0x970] ss:$28 sps:$4 sm:$0xff]  }
 0x859   :  { %15894 = vmatpush1.bf16.msra.mxu1 %v22182_v24  ;;  %v22242_v24 = vld [vmem:[%s29862_s5 + $0x548] ss:$28 sps:$4 sm:$0xff]  }
 0x85a   :  { %15929 = vmatpush1.bf16.msra.mxu0 %v22185_v27  ;;  %15895 = vmatprep.subr.bf16.mxu1 %v22190_v1  ;;  %v22253_v27 = vld [vmem:[%s29862_s5 + $0xc14] ss:$28 sps:$4 sm:$0xff]   ;;  %v22250_v1 = vld [vmem:[%s29862_s5 + $0x93c] ss:$28 sps:$4 sm:$0xff]  }
 0x85b   :  { %15930 = vmatprep.subr.bf16.mxu0 %v22193_v3 }
 0x85d   :  { %15896 = vmatpush1.bf16.msra.mxu1 %v22188_v11  ;;  %v22251_v11 = vld [vmem:[%s29862_s5 + $0xc10] ss:$28 sps:$4 sm:$0xff]  }
 0x85e   :  { %15931 = vmatpush1.bf16.msra.mxu0 %v22191_v4  ;;  %15897 = vmatprep.subr.bf16.mxu1 %v22196_v9  ;;  %v22248_v4 = vld [vmem:[%s29862_s5 + $0x938] ss:$28 sps:$4 sm:$0xff]  }
 0x85f   :  { %15932 = vmatprep.subr.bf16.mxu0 %v22199_v58  ;;  %v22259_v9 = vld [vmem:[%s29862_s5 + $0xbdc] ss:$28 sps:$4 sm:$0xff]   ;;  %v22256_v58 = vld [vmem:[%s29862_s5 + $0x904] ss:$28 sps:$4 sm:$0xff]  }
 0x861   :  { %15898 = vmatpush1.bf16.msra.mxu1 %v22194_v10 }
 0x862   :  { %15933 = vmatpush1.bf16.msra.mxu0 %v22197_v15  ;;  %15899 = vmatprep.subr.bf16.mxu1 %v22202_v7 }
 0x863   :  { %15934 = vmatprep.subr.bf16.mxu0 %v22205_v13  ;;  %v22257_v13 = vld [vmem:[%s29862_s5 + $0xbd8] ss:$28 sps:$4 sm:$0xff]  }
 0x865   :  { %15900 = vmatpush2.bf16.msra.mxu1 %v22200_v37 }
 0x866   :  { %15935 = vmatpush1.bf16.msra.mxu0 %v22203_v5  ;;  %15901 = vmatprep.subr.bf16.mxu1 %v22208_v12  ;;  %v22254_v12 = vld [vmem:[%s29862_s5 + $0x900] ss:$28 sps:$4 sm:$0xff]  }
 0x867   :  { %15936 = vmatprep.subr.bf16.mxu0 %v22211_v47 }
 0x869   :  { %15902 = vmatpush2.bf16.msra.mxu1 %v22206_v20  ;;  %v22265_v20 = vld [vmem:[%s29862_s5 + $0xba4] ss:$28 sps:$4 sm:$0xff]  }
 0x86a   :  { %15937 = vmatpush1.bf16.msra.mxu0 %v22209_v35  ;;  %15903 = vmatprep.subr.bf16.mxu1 %v22214_v53  ;;  %v22262_v35 = vld [vmem:[%s29862_s5 + $0x8cc] ss:$28 sps:$4 sm:$0xff]  }
 0x86b   :  { %15938 = vmatprep.subr.bf16.mxu0 %v22217_v17  ;;  %v22263_v17 = vld [vmem:[%s29862_s5 + $0xba0] ss:$28 sps:$4 sm:$0xff]  }
 0x86d   :  { %15904 = vmatpush2.bf16.msra.mxu1 %v22212_v38 }
 0x86e   :  { %15939 = vmatpush1.bf16.msra.mxu0 %v22215_v40  ;;  %15905 = vmatprep.subr.bf16.mxu1 %v22220_v22 }
 0x86f   :  { %15940 = vmatprep.subr.bf16.mxu0 %v22223_v30  ;;  %v22271_v30 = vld [vmem:[%s29862_s5 + $0xf94] ss:$28 sps:$4 sm:$0xff]  }
 0x871   :  { %15906 = vmatpush2.bf16.msra.mxu1 %v22218_v6  ;;  %v22268_v6 = vld [vmem:[%s29862_s5 + $0xb6c] ss:$28 sps:$4 sm:$0xff]  }
 0x872   :  { %15941 = vmatpush2.bf16.msra.mxu0 %v22221_v8  ;;  %15907 = vmatprep.subr.bf16.mxu1 %v22226_v45  ;;  %v22266_v8 = vld [vmem:[%s29862_s5 + $0xb68] ss:$28 sps:$4 sm:$0xff]   ;;  %v22269_v45 = vld [vmem:[%s29862_s5 + $0xf90] ss:$28 sps:$4 sm:$0xff]  }
 0x873   :  { %15942 = vmatprep.subr.bf16.mxu0 %v22229_v18  ;;  %v22277_v18 = vld [vmem:[%s29862_s5 + $0xf5c] ss:$28 sps:$4 sm:$0xff]  }
 0x875   :  { %15908 = vmatpush2.bf16.msra.mxu1 %v22224_v36  ;;  %v22274_v36 = vld [vmem:[%s29862_s5 + $0xb34] ss:$28 sps:$4 sm:$0xff]  }
 0x876   :  { %15943 = vmatpush2.bf16.msra.mxu0 %v22227_v55  ;;  %15909 = vmatprep.subr.bf16.mxu1 %v22232_v52  ;;  %v22272_v55 = vld [vmem:[%s29862_s5 + $0xb30] ss:$28 sps:$4 sm:$0xff]   ;;  %v22275_v52 = vld [vmem:[%s29862_s5 + $0xf58] ss:$28 sps:$4 sm:$0xff]  }
 0x877   :  { %15944 = vmatprep.subr.bf16.mxu0 %v22235_v31  ;;  %v22283_v31 = vld [vmem:[%s29862_s5 + $0xf24] ss:$28 sps:$4 sm:$0xff]  }
 0x879   :  { %15910 = vmatpush2.bf16.msra.mxu1 %v22230_v48  ;;  %v22280_v48 = vld [vmem:[%s29862_s5 + $0xafc] ss:$28 sps:$4 sm:$0xff]  }
 0x87a   :  { %15945 = vmatpush2.bf16.msra.mxu0 %v22233_v28  ;;  %15911 = vmatprep.subr.bf16.mxu1 %v22238_v19  ;;  %v22278_v28 = vld [vmem:[%s29862_s5 + $0xaf8] ss:$28 sps:$4 sm:$0xff]   ;;  %v22281_v19 = vld [vmem:[%s29862_s5 + $0xf20] ss:$28 sps:$4 sm:$0xff]  }
 0x87b   :  { %15946 = vmatprep.subr.bf16.mxu0 %v22241_v56  ;;  %v22289_v56 = vld [vmem:[%s29862_s5 + $0xeec] ss:$28 sps:$4 sm:$0xff]  }
 0x87d   :  { %15912 = vmatpush2.bf16.msra.mxu1 %v22236_v57  ;;  %v22286_v57 = vld [vmem:[%s29862_s5 + $0xac4] ss:$28 sps:$4 sm:$0xff]  }
 0x87e   :  { %15947 = vmatpush2.bf16.msra.mxu0 %v22239_v49  ;;  %15913 = vmatprep.subr.bf16.mxu1 %v22244_v61  ;;  %v22284_v49 = vld [vmem:[%s29862_s5 + $0xac0] ss:$28 sps:$4 sm:$0xff]   ;;  %v22287_v61 = vld [vmem:[%s29862_s5 + $0xee8] ss:$28 sps:$4 sm:$0xff]  }
 0x87f   :  { %15948 = vmatprep.subr.bf16.mxu0 %v22247_v62  ;;  %v22292_v62 = vld [vmem:[%s29862_s5 + $0xa8c] ss:$28 sps:$4 sm:$0xff]  }
 0x881   :  { %v15671_v3 = vpop.f32.mrf.mxu0  ;;  %15914 = vmatpush2.bf16.msra.mxu1 %v22242_v24  ;;  %v22295_v24 = vld [vmem:[%s29862_s5 + $0xeb4] ss:$28 sps:$4 sm:$0xff]  }
 0x882   :  { %15949 = vmatpush2.bf16.msra.mxu0 %v22245_v42  ;;  %15965 = vmatprep.subr.bf16.mxu1 %v22253_v27  ;;  %v22290_v42 = vld [vmem:[%s29862_s5 + $0xa88] ss:$28 sps:$4 sm:$0xff]   ;;  %v22293_v27 = vld [vmem:[%s29862_s5 + $0xeb0] ss:$28 sps:$4 sm:$0xff]  }
 0x883   :  { %v15673_v10 = vpop.f32.mrf.mxu0  ;;  %15950 = vmatprep.subr.bf16.mxu0 %v22250_v1  ;;  %v22298_v1 = vld [vmem:[%s29862_s5 + $0xdd4] ss:$28 sps:$4 sm:$0xff]  }
 0x884   :  { %v15630_v15 = vpop.f32.mrf.mxu1  ;;  %15916 = vmatmul.mubr.bf16.vlgmr.msra.gmra.mxu1 %v27455_v39 }
 0x885   :  { %v15631_v7 = vadd.f32 %v15630_v15, %v28126_v34  ;;  %v15675_v37 = vpop.f32.mrf.mxu0  ;;  %15966 = vmatpush1.bf16.msra.mxu1 %v22251_v11  ;;  %15997 = vmatprep.mubr.bf16.mxu1 %v27461_v2  ;;  %v22296_v11 = vld [vmem:[%s29862_s5 + $0xdd0] ss:$28 sps:$4 sm:$0xff]   ;;  %v22305_v15 = vld [vmem:[%s29862_s5 + $0xe40] ss:$28 sps:$4 sm:$0xff]  }
 0x886   :  { %15951 = vmatpush2.bf16.msra.mxu0 %v22248_v4  ;;  %v15632_v5 = vpop.f32.mrf.mxu1  ;;  %15967 = vmatprep.subr.bf16.mxu1 %v22259_v9  ;;  %v22299_v4 = vld [vmem:[%s29862_s5 + $0xe78] ss:$28 sps:$4 sm:$0xff]   ;;  %v22313_v37 = vld [vmem:[%s29862_s5 + $0xe0c] ss:$28 sps:$4 sm:$0xff]  }
 0x887   :  { %v15633_v34 = vadd.f32 %v15632_v5, %v28131_v54  ;;  %v15676_v47 = vpop.f32.mrf.mxu0  ;;  %15952 = vmatprep.subr.bf16.mxu0 %v22256_v58  ;;  %v28328_v53 = vadd.f32 %v15671_v3, %v15631_v7  ;;  %v22260_v54 = vld [vmem:[%s29862_s5 + $0x8c8] ss:$28 sps:$4 sm:$0xff]   ;;  %v22301_v3 = vld [vmem:[%s29862_s5 + $0xe7c] ss:$28 sps:$4 sm:$0xff]  }
 0x888   :  { %v15634_v38 = vpop.f32.mrf.mxu1  ;;  %v22304_v9 = vld [vmem:[%s29862_s5 + $0xd9c] ss:$28 sps:$4 sm:$0xff]   ;;  %v22310_v7 = vld [vmem:[%s29862_s5 + $0xd64] ss:$28 sps:$4 sm:$0xff]   ;;  %v22317_v47 = vld [vmem:[%s29862_s5 + $0x1150] ss:$28 sps:$4 sm:$0xff]  }
 0x889   :  { %15968 = vmatpush1.bf16.msra.mxu1 %v22257_v13  ;;  %v28333_v40 = vadd.f32 %v15673_v10, %v15633_v34  ;;  %v22307_v10 = vld [vmem:[%s29862_s5 + $0xe44] ss:$28 sps:$4 sm:$0xff]   ;;  %v22302_v58 = vld [vmem:[%s29862_s5 + $0xd98] ss:$28 sps:$4 sm:$0xff]  }
 0x88a   :  { %15953 = vmatpush2.bf16.msra.mxu0 %v22254_v12  ;;  %v15635_v22 = vpop.f32.mrf.mxu1  ;;  %15969 = vmatprep.subr.bf16.mxu1 %v22265_v20  ;;  %v22308_v13 = vld [vmem:[%s29862_s5 + $0xd60] ss:$28 sps:$4 sm:$0xff]   ;;  %v22311_v5 = vld [vmem:[%s29862_s5 + $0xe08] ss:$28 sps:$4 sm:$0xff]   ;;  %v22319_v20 = vld [vmem:[%s29862_s5 + $0x1154] ss:$28 sps:$4 sm:$0xff]  }
 0x88b   :  { %15954 = vmatprep.subr.bf16.mxu0 %v22262_v35  ;;  %v22316_v12 = vld [vmem:[%s29862_s5 + $0xd2c] ss:$28 sps:$4 sm:$0xff]   ;;  %v22322_v35 = vld [vmem:[%s29862_s5 + $0xcf4] ss:$28 sps:$4 sm:$0xff]   ;;  %v22325_v38 = vld [vmem:[%s29862_s5 + $0x111c] ss:$28 sps:$4 sm:$0xff]  }
 0x88c   :  { %v22314_v34 = vld [vmem:[%s29862_s5 + $0xd28] ss:$28 sps:$4 sm:$0xff]   ;;  %v22323_v22 = vld [vmem:[%s29862_s5 + $0x1118] ss:$28 sps:$4 sm:$0xff]  }
 0x88d   :  { %15970 = vmatpush1.bf16.msra.mxu1 %v22263_v17  ;;  %v22320_v17 = vld [vmem:[%s29862_s5 + $0xcf0] ss:$28 sps:$4 sm:$0xff]  }
 0x88e   :  { %15955 = vmatpush2.bf16.msra.mxu0 %v22260_v54  ;;  %15971 = vmatprep.subr.bf16.mxu1 %v22268_v6  ;;  %v22328_v54 = vld [vmem:[%s29862_s5 + $0xcbc] ss:$28 sps:$4 sm:$0xff]   ;;  %v22331_v6 = vld [vmem:[%s29862_s5 + $0x10e4] ss:$28 sps:$4 sm:$0xff]  }
 0x88f   :  { %16006 = vmatprep.subr.bf16.mxu0 %v22271_v30  ;;  %v22326_v30 = vld [vmem:[%s29862_s5 + $0xcb8] ss:$28 sps:$4 sm:$0xff]  }
 0x891   :  { %15957 = vmatmul.mubr.bf16.vlgmr.msra.gmra.mxu0 %v27690_v43  ;;  %15972 = vmatpush1.bf16.msra.mxu1 %v22266_v8  ;;  %v22329_v8 = vld [vmem:[%s29862_s5 + $0x10e0] ss:$28 sps:$4 sm:$0xff]  }
 0x892   :  { %16007 = vmatpush1.bf16.msra.mxu0 %v22269_v45  ;;  %16038 = vmatprep.mubr.bf16.mxu0 %v27692_v21  ;;  %v22334_v45 = vld [vmem:[%s29862_s5 + $0xc84] ss:$28 sps:$4 sm:$0xff]  }
 0x893   :  { %15973 = vmatprep.subr.bf16.mxu1 %v22274_v36  ;;  %16008 = vmatprep.subr.bf16.mxu0 %v22277_v18  ;;  %v22337_v36 = vld [vmem:[%s29862_s5 + $0x10ac] ss:$28 sps:$4 sm:$0xff]   ;;  %v22332_v18 = vld [vmem:[%s29862_s5 + $0xc80] ss:$28 sps:$4 sm:$0xff]  }
 0x895   :  { %15974 = vmatpush1.bf16.msra.mxu1 %v22272_v55  ;;  %v22335_v55 = vld [vmem:[%s29862_s5 + $0x10a8] ss:$28 sps:$4 sm:$0xff]  }
 0x896   :  { %16009 = vmatpush1.bf16.msra.mxu0 %v22275_v52  ;;  %15975 = vmatprep.subr.bf16.mxu1 %v22280_v48  ;;  %v22340_v52 = vld [vmem:[%s29862_s5 + $0xc4c] ss:$28 sps:$4 sm:$0xff]   ;;  %v22343_v48 = vld [vmem:[%s29862_s5 + $0x1074] ss:$28 sps:$4 sm:$0xff]  }
 0x897   :  { %16010 = vmatprep.subr.bf16.mxu0 %v22283_v31  ;;  %v22338_v31 = vld [vmem:[%s29862_s5 + $0xc48] ss:$28 sps:$4 sm:$0xff]  }
 0x899   :  { %15976 = vmatpush1.bf16.msra.mxu1 %v22278_v28  ;;  %v22341_v28 = vld [vmem:[%s29862_s5 + $0x1070] ss:$28 sps:$4 sm:$0xff]  }
 0x89a   :  { %16011 = vmatpush1.bf16.msra.mxu0 %v22281_v19  ;;  %15977 = vmatprep.subr.bf16.mxu1 %v22286_v57  ;;  %v22349_v19 = vld [vmem:[%s29862_s5 + $0x1314] ss:$28 sps:$4 sm:$0xff]   ;;  %v22346_v57 = vld [vmem:[%s29862_s5 + $0x103c] ss:$28 sps:$4 sm:$0xff]  }
 0x89b   :  { %16012 = vmatprep.subr.bf16.mxu0 %v22289_v56 }
 0x89d   :  { %15978 = vmatpush1.bf16.msra.mxu1 %v22284_v49  ;;  %v22347_v49 = vld [vmem:[%s29862_s5 + $0x1310] ss:$28 sps:$4 sm:$0xff]  }
 0x89e   :  { %16013 = vmatpush1.bf16.msra.mxu0 %v22287_v61  ;;  %15979 = vmatprep.subr.bf16.mxu1 %v22292_v62  ;;  %v22344_v61 = vld [vmem:[%s29862_s5 + $0x1038] ss:$28 sps:$4 sm:$0xff]  }
 0x89f   :  { %16014 = vmatprep.subr.bf16.mxu0 %v22295_v24  ;;  %v22355_v62 = vld [vmem:[%s29862_s5 + $0x12dc] ss:$28 sps:$4 sm:$0xff]  }
 0x8a1   :  { %15980 = vmatpush1.bf16.msra.mxu1 %v22290_v42  ;;  %v22352_v42 = vld [vmem:[%s29862_s5 + $0x1004] ss:$28 sps:$4 sm:$0xff]  }
 0x8a2   :  { %16015 = vmatpush1.bf16.msra.mxu0 %v22293_v27  ;;  %15981 = vmatprep.subr.bf16.mxu1 %v22298_v1 }
 0x8a3   :  { %16016 = vmatprep.subr.bf16.mxu0 %v22301_v3 }
 0x8a5   :  { %15982 = vmatpush2.bf16.msra.mxu1 %v22296_v11  ;;  %v22353_v11 = vld [vmem:[%s29862_s5 + $0x12d8] ss:$28 sps:$4 sm:$0xff]  }
 0x8a6   :  { %16017 = vmatpush1.bf16.msra.mxu0 %v22299_v4  ;;  %15983 = vmatprep.subr.bf16.mxu1 %v22304_v9  ;;  %v22350_v9 = vld [vmem:[%s29862_s5 + $0x1000] ss:$28 sps:$4 sm:$0xff]  }
 0x8a7   :  { %16018 = vmatprep.subr.bf16.mxu0 %v22307_v10  ;;  %v22361_v10 = vld [vmem:[%s29862_s5 + $0x12a4] ss:$28 sps:$4 sm:$0xff]  }
 0x8a9   :  { %15984 = vmatpush2.bf16.msra.mxu1 %v22302_v58 }
 0x8aa   :  { %16019 = vmatpush1.bf16.msra.mxu0 %v22305_v15  ;;  %15985 = vmatprep.subr.bf16.mxu1 %v22310_v7  ;;  %v22358_v15 = vld [vmem:[%s29862_s5 + $0xfcc] ss:$28 sps:$4 sm:$0xff]  }
 0x8ab   :  { %16020 = vmatprep.subr.bf16.mxu0 %v22313_v37 }
 0x8ad   :  { %15986 = vmatpush2.bf16.msra.mxu1 %v22308_v13  ;;  %v22359_v13 = vld [vmem:[%s29862_s5 + $0x12a0] ss:$28 sps:$4 sm:$0xff]  }
 0x8ae   :  { %16021 = vmatpush1.bf16.msra.mxu0 %v22311_v5  ;;  %15987 = vmatprep.subr.bf16.mxu1 %v22316_v12 }
 0x8af   :  { %16022 = vmatprep.subr.bf16.mxu0 %v22319_v20  ;;  %v22364_v20 = vld [vmem:[%s29862_s5 + $0x126c] ss:$28 sps:$4 sm:$0xff]  }
 0x8b1   :  { %15988 = vmatpush2.bf16.msra.mxu1 %v22314_v34  ;;  %v22367_v34 = vld [vmem:[%s29862_s5 + $0x1694] ss:$28 sps:$4 sm:$0xff]  }
 0x8b2   :  { %16023 = vmatpush2.bf16.msra.mxu0 %v22317_v47  ;;  %15989 = vmatprep.subr.bf16.mxu1 %v22322_v35  ;;  %v22362_v47 = vld [vmem:[%s29862_s5 + $0x1268] ss:$28 sps:$4 sm:$0xff]   ;;  %v22365_v35 = vld [vmem:[%s29862_s5 + $0x1690] ss:$28 sps:$4 sm:$0xff]  }
 0x8b3   :  { %16024 = vmatprep.subr.bf16.mxu0 %v22325_v38  ;;  %v22370_v38 = vld [vmem:[%s29862_s5 + $0x1234] ss:$28 sps:$4 sm:$0xff]  }
 0x8b5   :  { %15990 = vmatpush2.bf16.msra.mxu1 %v22320_v17  ;;  %v22373_v17 = vld [vmem:[%s29862_s5 + $0x165c] ss:$28 sps:$4 sm:$0xff]  }
 0x8b6   :  { %16025 = vmatpush2.bf16.msra.mxu0 %v22323_v22  ;;  %15991 = vmatprep.subr.bf16.mxu1 %v22328_v54  ;;  %v22368_v54 = vld [vmem:[%s29862_s5 + $0x1230] ss:$28 sps:$4 sm:$0xff]  }
 0x8b7   :  { %16026 = vmatprep.subr.bf16.mxu0 %v22331_v6  ;;  %v22371_v6 = vld [vmem:[%s29862_s5 + $0x1658] ss:$28 sps:$4 sm:$0xff]  }
 0x8b9   :  { %15992 = vmatpush2.bf16.msra.mxu1 %v22326_v30  ;;  %v22376_v30 = vld [vmem:[%s29862_s5 + $0x11fc] ss:$28 sps:$4 sm:$0xff]  }
 0x8ba   :  { %16027 = vmatpush2.bf16.msra.mxu0 %v22329_v8  ;;  %15993 = vmatprep.subr.bf16.mxu1 %v22334_v45  ;;  %v22379_v45 = vld [vmem:[%s29862_s5 + $0x1624] ss:$28 sps:$4 sm:$0xff]  }
 0x8bb   :  { %16028 = vmatprep.subr.bf16.mxu0 %v22337_v36 }
 0x8bd   :  { %15994 = vmatpush2.bf16.msra.mxu1 %v22332_v18  ;;  %v22374_v18 = vld [vmem:[%s29862_s5 + $0x11f8] ss:$28 sps:$4 sm:$0xff]  }
 0x8be   :  { %16029 = vmatpush2.bf16.msra.mxu0 %v22335_v55  ;;  %15995 = vmatprep.subr.bf16.mxu1 %v22340_v52  ;;  %v22377_v55 = vld [vmem:[%s29862_s5 + $0x1620] ss:$28 sps:$4 sm:$0xff]  }
 0x8bf   :  { %16030 = vmatprep.subr.bf16.mxu0 %v22343_v48  ;;  %v22382_v52 = vld [vmem:[%s29862_s5 + $0x11c4] ss:$28 sps:$4 sm:$0xff]  }
 0x8c1   :  { %v15753_v56 = vpop.f32.mrf.mxu0  ;;  %15996 = vmatpush2.bf16.msra.mxu1 %v22338_v31  ;;  %v22385_v31 = vld [vmem:[%s29862_s5 + $0x15ec] ss:$28 sps:$4 sm:$0xff]  }
 0x8c2   :  { %16031 = vmatpush2.bf16.msra.mxu0 %v22341_v28  ;;  %16047 = vmatprep.subr.bf16.mxu1 %v22349_v19  ;;  %v22380_v28 = vld [vmem:[%s29862_s5 + $0x11c0] ss:$28 sps:$4 sm:$0xff]   ;;  %v22383_v19 = vld [vmem:[%s29862_s5 + $0x15e8] ss:$28 sps:$4 sm:$0xff]  }
 0x8c3   :  { %v15755_v24 = vpop.f32.mrf.mxu0  ;;  %16032 = vmatprep.subr.bf16.mxu0 %v22346_v57  ;;  %v22388_v57 = vld [vmem:[%s29862_s5 + $0x118c] ss:$28 sps:$4 sm:$0xff]  }
 0x8c4   :  { %v15712_v27 = vpop.f32.mrf.mxu1  ;;  %15998 = vmatmul.mubr.bf16.vlgmr.msra.gmra.mxu1 %v27671_v23 }
 0x8c5   :  { %v15713_v1 = vadd.f32 %v15712_v27, %v28328_v53  ;;  %v15757_v3 = vpop.f32.mrf.mxu0  ;;  %16048 = vmatpush1.bf16.msra.mxu1 %v22347_v49  ;;  %16079 = vmatprep.mubr.bf16.mxu1 %v27715_v50  ;;  %v22386_v49 = vld [vmem:[%s29862_s5 + $0x1188] ss:$28 sps:$4 sm:$0xff]   ;;  %v22395_v27 = vld [vmem:[%s29862_s5 + $0x1578] ss:$28 sps:$4 sm:$0xff]  }
 0x8c6   :  { %16033 = vmatpush2.bf16.msra.mxu0 %v22344_v61  ;;  %v15714_v4 = vpop.f32.mrf.mxu1  ;;  %16049 = vmatprep.subr.bf16.mxu1 %v22355_v62  ;;  %v22389_v61 = vld [vmem:[%s29862_s5 + $0x15b0] ss:$28 sps:$4 sm:$0xff]   ;;  %v22403_v3 = vld [vmem:[%s29862_s5 + $0x1544] ss:$28 sps:$4 sm:$0xff]  }
 0x8c7   :  { %v15715_v53 = vadd.f32 %v15714_v4, %v28333_v40  ;;  %v15758_v58 = vpop.f32.mrf.mxu0  ;;  %16034 = vmatprep.subr.bf16.mxu0 %v22352_v42  ;;  %v28530_v7 = vadd.f32 %v15753_v56, %v15713_v1  ;;  %v22356_v40 = vld [vmem:[%s29862_s5 + $0xfc8] ss:$28 sps:$4 sm:$0xff]   ;;  %v22391_v56 = vld [vmem:[%s29862_s5 + $0x15b4] ss:$28 sps:$4 sm:$0xff]   ;;  %v22400_v1 = vld [vmem:[%s29862_s5 + $0x149c] ss:$28 sps:$4 sm:$0xff]  }
 0x8c8   :  { %v15716_v37 = vpop.f32.mrf.mxu1  ;;  %v22394_v62 = vld [vmem:[%s29862_s5 + $0x14d4] ss:$28 sps:$4 sm:$0xff]   ;;  %v22401_v4 = vld [vmem:[%s29862_s5 + $0x1540] ss:$28 sps:$4 sm:$0xff]   ;;  %v22407_v58 = vld [vmem:[%s29862_s5 + $0x1508] ss:$28 sps:$4 sm:$0xff]  }
 0x8c9   :  { %16050 = vmatpush1.bf16.msra.mxu1 %v22353_v11  ;;  %v28535_v5 = vadd.f32 %v15755_v24, %v15715_v53  ;;  %v22397_v24 = vld [vmem:[%s29862_s5 + $0x157c] ss:$28 sps:$4 sm:$0xff]   ;;  %v22392_v42 = vld [vmem:[%s29862_s5 + $0x14d0] ss:$28 sps:$4 sm:$0xff]  }
 0x8ca   :  { %16035 = vmatpush2.bf16.msra.mxu0 %v22350_v9  ;;  %v15717_v12 = vpop.f32.mrf.mxu1  ;;  %16051 = vmatprep.subr.bf16.mxu1 %v22361_v10  ;;  %v22398_v11 = vld [vmem:[%s29862_s5 + $0x1498] ss:$28 sps:$4 sm:$0xff]   ;;  %v22406_v9 = vld [vmem:[%s29862_s5 + $0x1464] ss:$28 sps:$4 sm:$0xff]   ;;  %v22409_v10 = vld [vmem:[%s29862_s5 + $0x150c] ss:$28 sps:$4 sm:$0xff]  }
 0x8cb   :  { %16036 = vmatprep.subr.bf16.mxu0 %v22358_v15  ;;  %v22404_v53 = vld [vmem:[%s29862_s5 + $0x1460] ss:$28 sps:$4 sm:$0xff]   ;;  %v22412_v15 = vld [vmem:[%s29862_s5 + $0x142c] ss:$28 sps:$4 sm:$0xff]   ;;  %v22415_v37 = vld [vmem:[%s29862_s5 + $0x1854] ss:$28 sps:$4 sm:$0xff]  }
 0x8cc   :  { %v22413_v12 = vld [vmem:[%s29862_s5 + $0x1850] ss:$28 sps:$4 sm:$0xff]  }
 0x8cd   :  { %16052 = vmatpush1.bf16.msra.mxu1 %v22359_v13  ;;  %v22410_v13 = vld [vmem:[%s29862_s5 + $0x1428] ss:$28 sps:$4 sm:$0xff]  }
 0x8ce   :  { %16037 = vmatpush2.bf16.msra.mxu0 %v22356_v40  ;;  %16053 = vmatprep.subr.bf16.mxu1 %v22364_v20  ;;  %v22418_v40 = vld [vmem:[%s29862_s5 + $0x13f4] ss:$28 sps:$4 sm:$0xff]   ;;  %v22421_v20 = vld [vmem:[%s29862_s5 + $0x181c] ss:$28 sps:$4 sm:$0xff]  }
 0x8cf   :  { %16088 = vmatprep.subr.bf16.mxu0 %v22367_v34  ;;  %v22416_v34 = vld [vmem:[%s29862_s5 + $0x13f0] ss:$28 sps:$4 sm:$0xff]  }
 0x8d1   :  { %16039 = vmatmul.mubr.bf16.vlgmr.msra.gmra.mxu0 %v27910_v25  ;;  %v28559_v22 = vpop.f32.mrf.mxu0  ;;  %16054 = vmatpush1.bf16.msra.mxu1 %v22362_v47  ;;  %v22419_v47 = vld [vmem:[%s29862_s5 + $0x1818] ss:$28 sps:$4 sm:$0xff]  }
 0x8d2   :  { %16089 = vmatpush1.bf16.msra.mxu0 %v22365_v35  ;;  %16120 = vmatprep.mubr.bf16.mxu0 %v27912_v14  ;;  %v22424_v35 = vld [vmem:[%s29862_s5 + $0x13bc] ss:$28 sps:$4 sm:$0xff]  }
 0x8d3   :  { %v28571_v8 = vpop.f32.mrf.mxu0  ;;  %16055 = vmatprep.subr.bf16.mxu1 %v22370_v38  ;;  %16090 = vmatprep.subr.bf16.mxu0 %v22373_v17  ;;  %v22427_v38 = vld [vmem:[%s29862_s5 + $0x17e4] ss:$28 sps:$4 sm:$0xff]   ;;  %v22422_v17 = vld [vmem:[%s29862_s5 + $0x13b8] ss:$28 sps:$4 sm:$0xff]  }
 0x8d5   :  { %v15839_v36 = vpop.f32.mrf.mxu0  ;;  %16056 = vmatpush1.bf16.msra.mxu1 %v22368_v54  ;;  %v22425_v54 = vld [vmem:[%s29862_s5 + $0x17e0] ss:$28 sps:$4 sm:$0xff]  }
 0x8d6   :  { %16091 = vmatpush1.bf16.msra.mxu0 %v22371_v6  ;;  %16057 = vmatprep.subr.bf16.mxu1 %v22376_v30  ;;  %v22430_v6 = vld [vmem:[%s29862_s5 + $0x1384] ss:$28 sps:$4 sm:$0xff]   ;;  %v22433_v30 = vld [vmem:[%s29862_s5 + $0x17ac] ss:$28 sps:$4 sm:$0xff]  }
 0x8d7   :  { %v15840_v48 = vpop.f32.mrf.mxu0  ;;  %16092 = vmatprep.subr.bf16.mxu0 %v22379_v45  ;;  %v22428_v45 = vld [vmem:[%s29862_s5 + $0x1380] ss:$28 sps:$4 sm:$0xff]   ;;  %v22431_v36 = vld [vmem:[%s29862_s5 + $0x17a8] ss:$28 sps:$4 sm:$0xff]  }
 0x8d8   :  { %v22434_v48 = vld [vmem:[%s29862_s5 + $0x1348] ss:$28 sps:$4 sm:$0xff]  }
 0x8d9   :  { %16058 = vmatpush1.bf16.msra.mxu1 %v22374_v18  ;;  %v22436_v18 = vld [vmem:[%s29862_s5 + $0x134c] ss:$28 sps:$4 sm:$0xff]  }
 0x8da   :  { %16093 = vmatpush1.bf16.msra.mxu0 %v22377_v55  ;;  %16059 = vmatprep.subr.bf16.mxu1 %v22382_v52  ;;  %v22439_v55 = vld [vmem:[%s29862_s5 + $0x1774] ss:$28 sps:$4 sm:$0xff]   ;;  %v11399_v52 = vld [vmem:[%s29862_s5 + $0x1888] sm:$0xff] }
 0x8db   :  { %16094 = vmatprep.subr.bf16.mxu0 %v22385_v31  ;;  %v22437_v31 = vld [vmem:[%s29862_s5 + $0x1770] ss:$28 sps:$4 sm:$0xff]  }
 0x8dd   :  { %16060 = vmatpush1.bf16.msra.mxu1 %v22380_v28  ;;  %v19651_v28 = vcombine.high %v11399_v52, %v11399_v52 }
 0x8de   :  { %16095 = vmatpush1.bf16.msra.mxu0 %v22383_v19  ;;  %16061 = vmatprep.subr.bf16.mxu1 %v22388_v57  ;;  %v19650_v19 = vcombine.low %v11399_v52, %v11399_v52  ;;  %v22442_v57 = vld [vmem:[%s29862_s5 + $0x173c] ss:$28 sps:$4 sm:$0xff]   ;;  %v22475_v52 = vld [vmem:[%s29862_s5 + $0x470] ss:$28 sps:$4 sm:$0xff]  }
 0x8df   :  { %16096 = vmatprep.subr.bf16.mxu0 %v22391_v56  ;;  %v22440_v56 = vld [vmem:[%s29862_s5 + $0x1738] ss:$28 sps:$4 sm:$0xff]  }
 0x8e1   :  { %16062 = vmatpush1.bf16.msra.mxu1 %v22386_v49  ;;  %v15500_v49 = vsel %vm15492_vm2, %v19650_v19, 0  ;;  %v22481_v19 = vld [vmem:[%s29862_s5 + $0x438] ss:$28 sps:$4 sm:$0xff]  }
 0x8e2   :  { %16097 = vmatpush1.bf16.msra.mxu0 %v22389_v61  ;;  %16063 = vmatprep.subr.bf16.mxu1 %v22394_v62  ;;  %v22450_v61 = vld [vmem:[%s29862_s5 + $0x19c] ss:$28 sps:$4 sm:$0xff]   ;;  %v22447_v62 = vld [vmem:[%s29862_s5 + $0x1704] ss:$28 sps:$4 sm:$0xff]  }
 0x8e3   :  { %16098 = vmatprep.subr.bf16.mxu0 %v22397_v24 }
 0x8e5   :  { %16064 = vmatpush2.bf16.msra.mxu1 %v22392_v42 }
 0x8e6   :  { %16099 = vmatpush1.bf16.msra.mxu0 %v22395_v27  ;;  %16065 = vmatprep.subr.bf16.mxu1 %v22400_v1  ;;  %v22445_v1 = vld [vmem:[%s29862_s5 + $0x1700] ss:$28 sps:$4 sm:$0xff]  }
 0x8e7   :  { %16100 = vmatprep.subr.bf16.mxu0 %v22403_v3 }
 0x8e9   :  { %16066 = vmatpush2.bf16.msra.mxu1 %v22398_v11 }
 0x8ea   :  { %16101 = vmatpush1.bf16.msra.mxu0 %v22401_v4  ;;  %16067 = vmatprep.subr.bf16.mxu1 %v22406_v9  ;;  %v22453_v4 = vld [vmem:[%s29862_s5 + $0x16cc] ss:$28 sps:$4 sm:$0xff]  }
 0x8eb   :  { %16102 = vmatprep.subr.bf16.mxu0 %v22409_v10  ;;  %v22448_v10 = vld [vmem:[%s29862_s5 + $0x198] ss:$28 sps:$4 sm:$0xff]  }
 0x8ed   :  { %16068 = vmatpush2.bf16.msra.mxu1 %v22404_v53 }
 0x8ee   :  { %16103 = vmatpush1.bf16.msra.mxu0 %v22407_v58  ;;  %16069 = vmatprep.subr.bf16.mxu1 %v22412_v15  ;;  %v22454_v58 = vld [vmem:[%s29862_s5 + $0x160] ss:$28 sps:$4 sm:$0xff]   ;;  %v22457_v15 = vld [vmem:[%s29862_s5 + $0x518] ss:$28 sps:$4 sm:$0xff]  }
 0x8ef   :  { %16104 = vmatprep.subr.bf16.mxu0 %v22415_v37  ;;  %v22462_v37 = vld [vmem:[%s29862_s5 + $0x12c] ss:$28 sps:$4 sm:$0xff]  }
 0x8f1   :  { %16070 = vmatpush2.bf16.msra.mxu1 %v22410_v13  ;;  %v22465_v13 = vld [vmem:[%s29862_s5 + $0x4e4] ss:$28 sps:$4 sm:$0xff]  }
 0x8f2   :  { %16105 = vmatpush2.bf16.msra.mxu0 %v22413_v12  ;;  %16071 = vmatprep.subr.bf16.mxu1 %v22418_v40  ;;  %v22460_v40 = vld [vmem:[%s29862_s5 + $0x128] ss:$28 sps:$4 sm:$0xff]  }
 0x8f3   :  { %16106 = vmatprep.subr.bf16.mxu0 %v22421_v20  ;;  %v22463_v20 = vld [vmem:[%s29862_s5 + $0x4e0] ss:$28 sps:$4 sm:$0xff]  }
 0x8f5   :  { %16072 = vmatpush2.bf16.msra.mxu1 %v22416_v34  ;;  %v22468_v34 = vld [vmem:[%s29862_s5 + $0xf4] ss:$28 sps:$4 sm:$0xff]  }
 0x8f6   :  { %16107 = vmatpush2.bf16.msra.mxu0 %v22419_v47  ;;  %16073 = vmatprep.subr.bf16.mxu1 %v22424_v35  ;;  %v22471_v35 = vld [vmem:[%s29862_s5 + $0x4ac] ss:$28 sps:$4 sm:$0xff]  }
 0x8f7   :  { %16108 = vmatprep.subr.bf16.mxu0 %v22427_v38 }
 0x8f9   :  { %16074 = vmatpush2.bf16.msra.mxu1 %v22422_v17  ;;  %v22466_v17 = vld [vmem:[%s29862_s5 + $0xf0] ss:$28 sps:$4 sm:$0xff]  }
 0x8fa   :  { %16109 = vmatpush2.bf16.msra.mxu0 %v22425_v54  ;;  %16075 = vmatprep.subr.bf16.mxu1 %v22430_v6  ;;  %v22469_v6 = vld [vmem:[%s29862_s5 + $0x4a8] ss:$28 sps:$4 sm:$0xff]  }
 0x8fb   :  { %16110 = vmatprep.subr.bf16.mxu0 %v22433_v30  ;;  %v22474_v30 = vld [vmem:[%s29862_s5 + $0xbc] ss:$28 sps:$4 sm:$0xff]  }
 0x8fd   :  { %16076 = vmatpush2.bf16.msra.mxu1 %v22428_v45 }
 0x8fe   :  { %16111 = vmatpush2.bf16.msra.mxu0 %v22431_v36  ;;  %16077 = vmatprep.subr.bf16.mxu1 %v22436_v18  ;;  %v22477_v36 = vld [vmem:[%s29862_s5 + $0x474] ss:$28 sps:$4 sm:$0xff]  }
 0x8ff   :  { %16112 = vmatprep.subr.bf16.mxu0 %v22439_v55  ;;  %v22472_v55 = vld [vmem:[%s29862_s5 + $0xb8] ss:$28 sps:$4 sm:$0xff]  }
 0x901   :  { %16078 = vmatpush2.bf16.msra.mxu1 %v22434_v48  ;;  %v22480_v48 = vld [vmem:[%s29862_s5 + $0x84] ss:$28 sps:$4 sm:$0xff]  }
 0x902   :  { %16113 = vmatpush2.bf16.msra.mxu0 %v22437_v31  ;;  %19657 = vmatprep.subr.msk.bf16.mxu1 %vm15492_vm2, %v19651_v28  ;;  %v22483_v31 = vld [vmem:[%s29862_s5 + $0x43c] ss:$28 sps:$4 sm:$0xff]  }
 0x903   :  { %16114 = vmatprep.subr.bf16.mxu0 %v22442_v57  ;;  %v22478_v28 = vld [vmem:[%s29862_s5 + $0x80] ss:$28 sps:$4 sm:$0xff]   ;;  %v22486_v57 = vld [vmem:[%s29862_s5 + $0x4c] ss:$28 sps:$4 sm:$0xff]  }
 0x904   :  { %v15794_v24 = vpop.f32.mrf.mxu1  ;;  %16080 = vmatmul.mubr.bf16.vlgmr.msra.gmra.mxu1 %v27896_v63 }
 0x905   :  { %v15795_v42 = vadd.f32 %v15794_v24, %v28530_v7  ;;  %16144 = vmatpush1.bf16.msra.mxu1 %v15500_v49  ;;  %16161 = vmatprep.mubr.bf16.mxu1 %v22920_v16  ;;  %v22484_v49 = vld [vmem:[%s29862_s5 + $0x48] ss:$28 sps:$4 sm:$0xff]  }
 0x906   :  { %16115 = vmatpush2.bf16.msra.mxu0 %v22440_v56  ;;  %v15796_v27 = vpop.f32.mrf.mxu1  ;;  %16170 = vmatprep.subr.bf16.mxu1 %v22450_v61  ;;  %v22489_v56 = vld [vmem:[%s29862_s5 + $0x404] ss:$28 sps:$4 sm:$0xff]   ;;  %v22495_v24 = vld [vmem:[%s29862_s5 + $0x3cc] ss:$28 sps:$4 sm:$0xff]  }
 0x907   :  { %v15836_v3 = vadd.f32 %v28559_v22, %v15795_v42  ;;  %v15797_v11 = vadd.f32 %v15796_v27, %v28535_v5  ;;  %16116 = vmatprep.subr.bf16.mxu0 %v22447_v62  ;;  %v22451_v22 = vld [vmem:[%s29862_s5 + $0x16c8] ss:$28 sps:$4 sm:$0xff]   ;;  %v22487_v61 = vld [vmem:[%s29862_s5 + $0x400] ss:$28 sps:$4 sm:$0xff]   ;;  %v22492_v62 = vld [vmem:[%s29862_s5 + $0x14] ss:$28 sps:$4 sm:$0xff]  }
 0x908   :  { %v15798_v7 = vpop.f32.mrf.mxu1  ;;  %v22456_v5 = vld [vmem:[%s29862_s5 + $0x164] ss:$28 sps:$4 sm:$0xff]   ;;  %v22490_v42 = vld [vmem:[%s29862_s5 + $0x10] ss:$28 sps:$4 sm:$0xff]  }
 0x909   :  { %22902 = vtanh.f32 %v15836_v3  ;;  %v15838_v9 = vadd.f32 %v28571_v8, %v15797_v11  ;;  %v22459_v8 = vld [vmem:[%s29862_s5 + $0x51c] ss:$28 sps:$4 sm:$0xff]   ;;  %v22493_v27 = vld [vmem:[%s29862_s5 + $0x3c8] ss:$28 sps:$4 sm:$0xff]   ;;  %v22501_v3 = vld [vmem:[%s29862_s5 + $0x394] ss:$28 sps:$4 sm:$0xff]  }
 0x90a   :  { %16117 = vmatpush2.bf16.msra.mxu0 %v22445_v1  ;;  %v15799_v53 = vpop.f32.mrf.mxu1  ;;  %v22498_v1 = vld [vmem:[%s29862_s5 + $0x35c] ss:$28 sps:$4 sm:$0xff]   ;;  %v22504_v7 = vld [vmem:[%s29862_s5 + $0x324] ss:$28 sps:$4 sm:$0xff]  }
 0x90b   :  { %22904 = vtanh.f32 %v15838_v9  ;;  %16118 = vmatprep.subr.bf16.mxu0 %v22453_v4  ;;  %v22496_v11 = vld [vmem:[%s29862_s5 + $0x358] ss:$28 sps:$4 sm:$0xff]   ;;  %v22499_v4 = vld [vmem:[%s29862_s5 + $0x390] ss:$28 sps:$4 sm:$0xff]  }
 0x90c   :  { %19658 = vmatmul.mubr.msk.bf16.vlgmr.msra.gmra.mxu1 %vm15488_vm3, %v27937_v0  ;;  %v22507_v9 = vld [vmem:[%s29862_s5 + $0x6dc] ss:$28 sps:$4 sm:$0xff]  }
 0x90d   :  { %16171 = vmatpush1.bf16.msra.mxu1 %v22448_v10  ;;  %16202 = vmatprep.mubr.bf16.mxu1 %v27246_v44  ;;  %v22502_v10 = vld [vmem:[%s29862_s5 + $0x320] ss:$28 sps:$4 sm:$0xff]   ;;  %v22505_v53 = vld [vmem:[%s29862_s5 + $0x6d8] ss:$28 sps:$4 sm:$0xff]  }
 0x90e   :  { %16119 = vmatpush2.bf16.msra.mxu0 %v22451_v22  ;;  %16172 = vmatprep.subr.bf16.mxu1 %v22456_v5  ;;  %v22510_v22 = vld [vmem:[%s29862_s5 + $0x2ec] ss:$28 sps:$4 sm:$0xff]   ;;  %v22513_v5 = vld [vmem:[%s29862_s5 + $0x6a4] ss:$28 sps:$4 sm:$0xff]  }
 0x90f   :  { %16211 = vmatprep.subr.bf16.mxu0 %v22459_v8  ;;  %v22508_v8 = vld [vmem:[%s29862_s5 + $0x2e8] ss:$28 sps:$4 sm:$0xff]  }
 0x911   :  { %v28758_v12 = vpop.f32.mrf.mxu0  ;;  %16121 = vmatmul.mubr.bf16.vlgmr.msra.gmra.mxu0 %v28106_v59  ;;  %16173 = vmatpush1.bf16.msra.mxu1 %v22454_v58  ;;  %v22511_v58 = vld [vmem:[%s29862_s5 + $0x6a0] ss:$28 sps:$4 sm:$0xff]  }
 0x912   :  { %16212 = vmatpush1.bf16.msra.mxu0 %v22457_v15  ;;  %16243 = vmatprep.mubr.bf16.mxu0 %v27236_v51  ;;  %v22516_v15 = vld [vmem:[%s29862_s5 + $0x2b4] ss:$28 sps:$4 sm:$0xff]  }
 0x913   :  { %v28771_v47 = vpop.f32.mrf.mxu0  ;;  %16174 = vmatprep.subr.bf16.mxu1 %v22462_v37  ;;  %16213 = vmatprep.subr.bf16.mxu0 %v22465_v13  ;;  %v22519_v37 = vld [vmem:[%s29862_s5 + $0x66c] ss:$28 sps:$4 sm:$0xff]  }
 0x914   :  { %v22514_v13 = vld [vmem:[%s29862_s5 + $0x2b0] ss:$28 sps:$4 sm:$0xff]  }
 0x915   :  { %v15880_v38 = vpop.f32.mrf.mxu0  ;;  %16175 = vmatpush1.bf16.msra.mxu1 %v22460_v40  ;;  %v22517_v40 = vld [vmem:[%s29862_s5 + $0x668] ss:$28 sps:$4 sm:$0xff]  }
 0x916   :  { %v22903_v54 = vpop.eup %22902  ;;  %16214 = vmatpush1.bf16.msra.mxu0 %v22463_v20  ;;  %16176 = vmatprep.subr.bf16.mxu1 %v22468_v34  ;;  %v22522_v20 = vld [vmem:[%s29862_s5 + $0x27c] ss:$28 sps:$4 sm:$0xff]   ;;  %v22525_v34 = vld [vmem:[%s29862_s5 + $0x634] ss:$28 sps:$4 sm:$0xff]  }
 0x917   :  { %16825 = vst [vmem:[%s29864_s11] sm:$0xff] %v22903_v54  ;;  %v15881_v45 = vpop.f32.mrf.mxu0  ;;  %16215 = vmatprep.subr.bf16.mxu0 %v22471_v35  ;;  %v22520_v35 = vld [vmem:[%s29862_s5 + $0x278] ss:$28 sps:$4 sm:$0xff]   ;;  %v22523_v38 = vld [vmem:[%s29862_s5 + $0x630] ss:$28 sps:$4 sm:$0xff]  }
 0x918   :  { %v22905_v18 = vpop.eup %22904  ;;  %v22531_v54 = vld [vmem:[%s29862_s5 + $0x5fc] ss:$28 sps:$4 sm:$0xff]   ;;  %v22534_v45 = vld [vmem:[%s29862_s5 + $0x20c] ss:$28 sps:$4 sm:$0xff]  }
 0x919   :  { %16826 = vst [vmem:[%s29864_s11 + $0x8] sm:$0xff] %v22905_v18  ;;  %16177 = vmatpush1.bf16.msra.mxu1 %v22466_v17  ;;  %v22528_v17 = vld [vmem:[%s29862_s5 + $0x244] ss:$28 sps:$4 sm:$0xff]  }
 0x91a   :  { %16216 = vmatpush1.bf16.msra.mxu0 %v22469_v6  ;;  %16178 = vmatprep.subr.bf16.mxu1 %v22474_v30  ;;  %v22526_v6 = vld [vmem:[%s29862_s5 + $0x240] ss:$28 sps:$4 sm:$0xff]   ;;  %v22529_v30 = vld [vmem:[%s29862_s5 + $0x5f8] ss:$28 sps:$4 sm:$0xff]  }
 0x91b   :  { %16217 = vmatprep.subr.bf16.mxu0 %v22477_v36  ;;  %v28914_v36 = vld [vmem:[%s29863_s10] sm:$0x7f] }
 0x91c   :  { %v11414_v18 = vrot.slane %v28914_v36, %v24044_v26  ;;  %v22540_v26 = vld [vmem:[%s29862_s5 + $0x1d4] ss:$28 sps:$4 sm:$0xff]  }
 0x91d   :  { %16179 = vmatpush1.bf16.msra.mxu1 %v22472_v55  ;;  %v22537_v55 = vld [vmem:[%s29862_s5 + $0x5c4] ss:$28 sps:$4 sm:$0xff]  }
 0x91e   :  { %16218 = vmatpush1.bf16.msra.mxu0 %v22475_v52  ;;  %16180 = vmatprep.subr.bf16.mxu1 %v22480_v48  ;;  %v11418_v52 = vrot.slane %v28914_v36, %v24057_v32  ;;  %v22532_v48 = vld [vmem:[%s29862_s5 + $0x208] ss:$28 sps:$4 sm:$0xff]  }
 0x91f   :  { %16219 = vmatprep.subr.bf16.mxu0 %v22483_v31  ;;  %v22535_v31 = vld [vmem:[%s29862_s5 + $0x5c0] ss:$28 sps:$4 sm:$0xff]   ;;  %v22543_v32 = vld [vmem:[%s29862_s5 + $0x58c] ss:$28 sps:$4 sm:$0xff]  }
 0x921   :  { %16181 = vmatpush1.bf16.msra.mxu1 %v22478_v28  ;;  %v15877_v28 = vadd.f32 %v28758_v12, %v11414_v18  ;;  %v22541_v12 = vld [vmem:[%s29862_s5 + $0x588] ss:$28 sps:$4 sm:$0xff]   ;;  %v22579_v18 = vld [vmem:[%s29862_s5 + $0xb3c] ss:$28 sps:$4 sm:$0xff]  }
 0x922   :  { %16220 = vmatpush1.bf16.msra.mxu0 %v22481_v19  ;;  %16182 = vmatprep.subr.bf16.mxu1 %v22486_v57  ;;  %v15879_v57 = vadd.f32 %v28771_v47, %v11418_v52  ;;  %v22549_v47 = vld [vmem:[%s29862_s5 + $0x554] ss:$28 sps:$4 sm:$0xff]  }
 0x923   :  { %16221 = vmatprep.subr.bf16.mxu0 %v22489_v56  ;;  %v22577_v52 = vld [vmem:[%s29862_s5 + $0xb38] ss:$28 sps:$4 sm:$0xff]  }
 0x925   :  { %16183 = vmatpush1.bf16.msra.mxu1 %v22484_v49  ;;  %v22538_v49 = vld [vmem:[%s29862_s5 + $0x1d0] ss:$28 sps:$4 sm:$0xff]  }
 0x926   :  { %16222 = vmatpush1.bf16.msra.mxu0 %v22487_v61  ;;  %16184 = vmatprep.subr.bf16.mxu1 %v22492_v62  ;;  %v22546_v62 = vld [vmem:[%s29862_s5 + $0x89c] ss:$28 sps:$4 sm:$0xff]  }
 0x927   :  { %16223 = vmatprep.subr.bf16.mxu0 %v22495_v24 }
 0x929   :  { %16185 = vmatpush1.bf16.msra.mxu1 %v22490_v42 }
 0x92a   :  { %16224 = vmatpush1.bf16.msra.mxu0 %v22493_v27  ;;  %16186 = vmatprep.subr.bf16.mxu1 %v22498_v1  ;;  %v22544_v27 = vld [vmem:[%s29862_s5 + $0x898] ss:$28 sps:$4 sm:$0xff]  }
 0x92b   :  { %16225 = vmatprep.subr.bf16.mxu0 %v22501_v3  ;;  %v22547_v3 = vld [vmem:[%s29862_s5 + $0x550] ss:$28 sps:$4 sm:$0xff]  }
 0x92d   :  { %16187 = vmatpush2.bf16.msra.mxu1 %v22496_v11  ;;  %v22552_v11 = vld [vmem:[%s29862_s5 + $0x864] ss:$28 sps:$4 sm:$0xff]  }
 0x92e   :  { %16226 = vmatpush1.bf16.msra.mxu0 %v22499_v4  ;;  %16188 = vmatprep.subr.bf16.mxu1 %v22504_v7  ;;  %v22555_v4 = vld [vmem:[%s29862_s5 + $0xc1c] ss:$28 sps:$4 sm:$0xff]  }
 0x92f   :  { %16227 = vmatprep.subr.bf16.mxu0 %v22507_v9  ;;  %v22550_v7 = vld [vmem:[%s29862_s5 + $0x860] ss:$28 sps:$4 sm:$0xff]   ;;  %v22553_v9 = vld [vmem:[%s29862_s5 + $0xc18] ss:$28 sps:$4 sm:$0xff]  }
 0x931   :  { %16189 = vmatpush2.bf16.msra.mxu1 %v22502_v10  ;;  %v22558_v10 = vld [vmem:[%s29862_s5 + $0x82c] ss:$28 sps:$4 sm:$0xff]  }
 0x932   :  { %16228 = vmatpush2.bf16.msra.mxu0 %v22505_v53  ;;  %16190 = vmatprep.subr.bf16.mxu1 %v22510_v22  ;;  %v22561_v53 = vld [vmem:[%s29862_s5 + $0xbe4] ss:$28 sps:$4 sm:$0xff]  }
 0x933   :  { %16229 = vmatprep.subr.bf16.mxu0 %v22513_v5  ;;  %v22556_v5 = vld [vmem:[%s29862_s5 + $0x828] ss:$28 sps:$4 sm:$0xff]  }
 0x935   :  { %16191 = vmatpush2.bf16.msra.mxu1 %v22508_v8 }
 0x936   :  { %16230 = vmatpush2.bf16.msra.mxu0 %v22511_v58  ;;  %16192 = vmatprep.subr.bf16.mxu1 %v22516_v15  ;;  %v22559_v58 = vld [vmem:[%s29862_s5 + $0xbe0] ss:$28 sps:$4 sm:$0xff]   ;;  %v22564_v15 = vld [vmem:[%s29862_s5 + $0x7f4] ss:$28 sps:$4 sm:$0xff]  }
 0x937   :  { %16231 = vmatprep.subr.bf16.mxu0 %v22519_v37 }
 0x939   :  { %16193 = vmatpush2.bf16.msra.mxu1 %v22514_v13  ;;  %v22567_v13 = vld [vmem:[%s29862_s5 + $0xbac] ss:$28 sps:$4 sm:$0xff]  }
 0x93a   :  { %16232 = vmatpush2.bf16.msra.mxu0 %v22517_v40  ;;  %16194 = vmatprep.subr.bf16.mxu1 %v22522_v20 }
 0x93b   :  { %16233 = vmatprep.subr.bf16.mxu0 %v22525_v34  ;;  %v22562_v34 = vld [vmem:[%s29862_s5 + $0x7f0] ss:$28 sps:$4 sm:$0xff]  }
 0x93d   :  { %16195 = vmatpush2.bf16.msra.mxu1 %v22520_v35  ;;  %v22565_v35 = vld [vmem:[%s29862_s5 + $0xba8] ss:$28 sps:$4 sm:$0xff]  }
 0x93e   :  { %16234 = vmatpush2.bf16.msra.mxu0 %v22523_v38  ;;  %16196 = vmatprep.subr.bf16.mxu1 %v22528_v17  ;;  %v22570_v38 = vld [vmem:[%s29862_s5 + $0x7bc] ss:$28 sps:$4 sm:$0xff]  }
 0x93f   :  { %16235 = vmatprep.subr.bf16.mxu0 %v22531_v54  ;;  %v22573_v54 = vld [vmem:[%s29862_s5 + $0xb74] ss:$28 sps:$4 sm:$0xff]  }
 0x941   :  { %16197 = vmatpush2.bf16.msra.mxu1 %v22526_v6  ;;  %v22568_v6 = vld [vmem:[%s29862_s5 + $0x7b8] ss:$28 sps:$4 sm:$0xff]  }
 0x942   :  { %16236 = vmatpush2.bf16.msra.mxu0 %v22529_v30  ;;  %16198 = vmatprep.subr.bf16.mxu1 %v22534_v45  ;;  %v22571_v30 = vld [vmem:[%s29862_s5 + $0xb70] ss:$28 sps:$4 sm:$0xff]   ;;  %v22576_v45 = vld [vmem:[%s29862_s5 + $0x784] ss:$28 sps:$4 sm:$0xff]  }
 0x943   :  { %16237 = vmatprep.subr.bf16.mxu0 %v22537_v55  ;;  %v22574_v55 = vld [vmem:[%s29862_s5 + $0x780] ss:$28 sps:$4 sm:$0xff]  }
 0x944   :  { %v15917_v19 = vpop.f32.mrf.mxu1 }
 0x945   :  { %v15918_v56 = vadd.f32 %v15917_v19, %v15877_v28  ;;  %16199 = vmatpush2.bf16.msra.mxu1 %v22532_v48  ;;  %v22582_v48 = vld [vmem:[%s29862_s5 + $0x74c] ss:$28 sps:$4 sm:$0xff]   ;;  %v22583_v28 = vld [vmem:[%s29862_s5 + $0xb00] ss:$28 sps:$4 sm:$0xff]  }
 0x946   :  { %16238 = vmatpush2.bf16.msra.mxu0 %v22535_v31  ;;  %v15919_v61 = vpop.f32.mrf.mxu1  ;;  %16200 = vmatprep.subr.bf16.mxu1 %v22540_v26  ;;  %v22585_v31 = vld [vmem:[%s29862_s5 + $0xb04] ss:$28 sps:$4 sm:$0xff]   ;;  %v22591_v19 = vld [vmem:[%s29862_s5 + $0xacc] ss:$28 sps:$4 sm:$0xff]  }
 0x947   :  { %v15920_v24 = vadd.f32 %v15919_v61, %v15879_v57  ;;  %16239 = vmatprep.subr.bf16.mxu0 %v22543_v32  ;;  %v22580_v26 = vld [vmem:[%s29862_s5 + $0x748] ss:$28 sps:$4 sm:$0xff]   ;;  %v22588_v32 = vld [vmem:[%s29862_s5 + $0x714] ss:$28 sps:$4 sm:$0xff]  }
 0x948   :  { %v15921_v42 = vpop.f32.mrf.mxu1  ;;  %v22586_v57 = vld [vmem:[%s29862_s5 + $0x710] ss:$28 sps:$4 sm:$0xff]  }
 0x949   :  { %16201 = vmatpush2.bf16.msra.mxu1 %v22538_v49  ;;  %v22594_v49 = vld [vmem:[%s29862_s5 + $0xa5c] ss:$28 sps:$4 sm:$0xff]   ;;  %v22597_v61 = vld [vmem:[%s29862_s5 + $0xa94] ss:$28 sps:$4 sm:$0xff]  }
 0x94a   :  { %16240 = vmatpush2.bf16.msra.mxu0 %v22541_v12  ;;  %v15922_v1 = vpop.f32.mrf.mxu1  ;;  %16252 = vmatprep.subr.bf16.mxu1 %v22546_v62  ;;  %v22592_v12 = vld [vmem:[%s29862_s5 + $0xa58] ss:$28 sps:$4 sm:$0xff]   ;;  %v22595_v62 = vld [vmem:[%s29862_s5 + $0xa90] ss:$28 sps:$4 sm:$0xff]   ;;  %v22598_v42 = vld [vmem:[%s29862_s5 + $0xa20] ss:$28 sps:$4 sm:$0xff]  }
 0x94b   :  { %16241 = vmatprep.subr.bf16.mxu0 %v22549_v47  ;;  %v22603_v47 = vld [vmem:[%s29862_s5 + $0xddc] ss:$28 sps:$4 sm:$0xff]   ;;  %v22606_v1 = vld [vmem:[%s29862_s5 + $0x9ec] ss:$28 sps:$4 sm:$0xff]  }
 0x94c   :  { %16203 = vmatmul.mubr.bf16.vlgmr.msra.gmra.mxu1 %v27472_v60 }
 0x94d   :  { %16253 = vmatpush1.bf16.msra.mxu1 %v22544_v27  ;;  %16284 = vmatprep.mubr.bf16.mxu1 %v27477_v41  ;;  %v22601_v27 = vld [vmem:[%s29862_s5 + $0xdd8] ss:$28 sps:$4 sm:$0xff]  }
 0x94e   :  { %16242 = vmatpush2.bf16.msra.mxu0 %v22547_v3  ;;  %16254 = vmatprep.subr.bf16.mxu1 %v22552_v11  ;;  %v22609_v3 = vld [vmem:[%s29862_s5 + $0xda4] ss:$28 sps:$4 sm:$0xff]  }
 0x94f   :  { %16293 = vmatprep.subr.bf16.mxu0 %v22555_v4  ;;  %v22604_v11 = vld [vmem:[%s29862_s5 + $0x9e8] ss:$28 sps:$4 sm:$0xff]   ;;  %v22607_v4 = vld [vmem:[%s29862_s5 + $0xda0] ss:$28 sps:$4 sm:$0xff]  }
 0x951   :  { %v15958_v22 = vpop.f32.mrf.mxu0  ;;  %16244 = vmatmul.mubr.bf16.vlgmr.msra.gmra.mxu0 %v27455_v39  ;;  %16255 = vmatpush1.bf16.msra.mxu1 %v22550_v7  ;;  %v22612_v7 = vld [vmem:[%s29862_s5 + $0x9b4] ss:$28 sps:$4 sm:$0xff]  }
 0x952   :  { %v28979_v8 = vadd.f32 %v15958_v22, %v15918_v56  ;;  %16294 = vmatpush1.bf16.msra.mxu0 %v22553_v9  ;;  %16325 = vmatprep.mubr.bf16.mxu0 %v27461_v2  ;;  %v22589_v56 = vld [vmem:[%s29862_s5 + $0xac8] ss:$28 sps:$4 sm:$0xff]   ;;  %v22618_v22 = vld [vmem:[%s29862_s5 + $0x97c] ss:$28 sps:$4 sm:$0xff]  }
 0x953   :  { %v15960_v37 = vpop.f32.mrf.mxu0  ;;  %16256 = vmatprep.subr.bf16.mxu1 %v22558_v10  ;;  %16295 = vmatprep.subr.bf16.mxu0 %v22561_v53  ;;  %v22615_v9 = vld [vmem:[%s29862_s5 + $0xd6c] ss:$28 sps:$4 sm:$0xff]  }
 0x954   :  { %v28991_v40 = vadd.f32 %v15960_v37, %v15920_v24  ;;  %v22600_v24 = vld [vmem:[%s29862_s5 + $0xa24] ss:$28 sps:$4 sm:$0xff]   ;;  %v22610_v10 = vld [vmem:[%s29862_s5 + $0x9b0] ss:$28 sps:$4 sm:$0xff]  }
 0x955   :  { %v15962_v20 = vpop.f32.mrf.mxu0  ;;  %16257 = vmatpush1.bf16.msra.mxu1 %v22556_v5  ;;  %v22613_v53 = vld [vmem:[%s29862_s5 + $0xd68] ss:$28 sps:$4 sm:$0xff]   ;;  %v22621_v5 = vld [vmem:[%s29862_s5 + $0xd34] ss:$28 sps:$4 sm:$0xff]  }
 0x956   :  { %16296 = vmatpush1.bf16.msra.mxu0 %v22559_v58  ;;  %16258 = vmatprep.subr.bf16.mxu1 %v22564_v15  ;;  %v22616_v58 = vld [vmem:[%s29862_s5 + $0x978] ss:$28 sps:$4 sm:$0xff]   ;;  %v22619_v15 = vld [vmem:[%s29862_s5 + $0xd30] ss:$28 sps:$4 sm:$0xff]   ;;  %v22624_v37 = vld [vmem:[%s29862_s5 + $0x944] ss:$28 sps:$4 sm:$0xff]  }
 0x957   :  { %v15963_v17 = vpop.f32.mrf.mxu0  ;;  %16297 = vmatprep.subr.bf16.mxu0 %v22567_v13  ;;  %v22627_v13 = vld [vmem:[%s29862_s5 + $0xcfc] ss:$28 sps:$4 sm:$0xff]  }
 0x958   :  { %v22622_v20 = vld [vmem:[%s29862_s5 + $0x940] ss:$28 sps:$4 sm:$0xff]   ;;  %v22628_v17 = vld [vmem:[%s29862_s5 + $0x908] ss:$28 sps:$4 sm:$0xff]  }
 0x959   :  { %16259 = vmatpush1.bf16.msra.mxu1 %v22562_v34  ;;  %v22625_v34 = vld [vmem:[%s29862_s5 + $0xcf8] ss:$28 sps:$4 sm:$0xff]  }
 0x95a   :  { %16298 = vmatpush1.bf16.msra.mxu0 %v22565_v35  ;;  %16260 = vmatprep.subr.bf16.mxu1 %v22570_v38  ;;  %v22630_v35 = vld [vmem:[%s29862_s5 + $0x90c] ss:$28 sps:$4 sm:$0xff]   ;;  %v22633_v38 = vld [vmem:[%s29862_s5 + $0xcc4] ss:$28 sps:$4 sm:$0xff]  }
 0x95b   :  { %16299 = vmatprep.subr.bf16.mxu0 %v22573_v54  ;;  %v22631_v54 = vld [vmem:[%s29862_s5 + $0xcc0] ss:$28 sps:$4 sm:$0xff]  }
 0x95d   :  { %16261 = vmatpush1.bf16.msra.mxu1 %v22568_v6  ;;  %v22636_v6 = vld [vmem:[%s29862_s5 + $0x8d4] ss:$28 sps:$4 sm:$0xff]  }
 0x95e   :  { %16300 = vmatpush1.bf16.msra.mxu0 %v22571_v30  ;;  %16262 = vmatprep.subr.bf16.mxu1 %v22576_v45  ;;  %v22639_v30 = vld [vmem:[%s29862_s5 + $0xc8c] ss:$28 sps:$4 sm:$0xff]  }
 0x95f   :  { %16301 = vmatprep.subr.bf16.mxu0 %v22579_v18 }
 0x961   :  { %16263 = vmatpush1.bf16.msra.mxu1 %v22574_v55  ;;  %v22634_v55 = vld [vmem:[%s29862_s5 + $0x8d0] ss:$28 sps:$4 sm:$0xff]  }
 0x962   :  { %16302 = vmatpush1.bf16.msra.mxu0 %v22577_v52  ;;  %16264 = vmatprep.subr.bf16.mxu1 %v22582_v48  ;;  %v22637_v48 = vld [vmem:[%s29862_s5 + $0xc88] ss:$28 sps:$4 sm:$0xff]  }
 0x963   :  { %16303 = vmatprep.subr.bf16.mxu0 %v22585_v31  ;;  %v22642_v31 = vld [vmem:[%s29862_s5 + $0xf9c] ss:$28 sps:$4 sm:$0xff]  }
 0x965   :  { %16265 = vmatpush1.bf16.msra.mxu1 %v22580_v26 }
 0x966   :  { %16304 = vmatpush1.bf16.msra.mxu0 %v22583_v28  ;;  %16266 = vmatprep.subr.bf16.mxu1 %v22588_v32  ;;  %v22640_v32 = vld [vmem:[%s29862_s5 + $0xf98] ss:$28 sps:$4 sm:$0xff]  }
 0x967   :  { %16305 = vmatprep.subr.bf16.mxu0 %v22591_v19 }
 0x969   :  { %16267 = vmatpush1.bf16.msra.mxu1 %v22586_v57  ;;  %v22643_v57 = vld [vmem:[%s29862_s5 + $0xc50] ss:$28 sps:$4 sm:$0xff]  }
 0x96a   :  { %16306 = vmatpush1.bf16.msra.mxu0 %v22589_v56  ;;  %16268 = vmatprep.subr.bf16.mxu1 %v22594_v49  ;;  %v22651_v56 = vld [vmem:[%s29862_s5 + $0x131c] ss:$28 sps:$4 sm:$0xff]  }
 0x96b   :  { %16307 = vmatprep.subr.bf16.mxu0 %v22597_v61  ;;  %v22646_v49 = vld [vmem:[%s29862_s5 + $0xf60] ss:$28 sps:$4 sm:$0xff]   ;;  %v22649_v61 = vld [vmem:[%s29862_s5 + $0x1318] ss:$28 sps:$4 sm:$0xff]  }
 0x96d   :  { %16269 = vmatpush2.bf16.msra.mxu1 %v22592_v12  ;;  %v22654_v12 = vld [vmem:[%s29862_s5 + $0xf2c] ss:$28 sps:$4 sm:$0xff]  }
 0x96e   :  { %16308 = vmatpush1.bf16.msra.mxu0 %v22595_v62  ;;  %16270 = vmatprep.subr.bf16.mxu1 %v22600_v24  ;;  %v22657_v62 = vld [vmem:[%s29862_s5 + $0x12e4] ss:$28 sps:$4 sm:$0xff]  }
 0x96f   :  { %16309 = vmatprep.subr.bf16.mxu0 %v22603_v47  ;;  %v22652_v47 = vld [vmem:[%s29862_s5 + $0xf28] ss:$28 sps:$4 sm:$0xff]  }
 0x971   :  { %16271 = vmatpush2.bf16.msra.mxu1 %v22598_v42  ;;  %v22655_v42 = vld [vmem:[%s29862_s5 + $0x12e0] ss:$28 sps:$4 sm:$0xff]  }
 0x972   :  { %16310 = vmatpush2.bf16.msra.mxu0 %v22601_v27  ;;  %16272 = vmatprep.subr.bf16.mxu1 %v22606_v1  ;;  %v22660_v27 = vld [vmem:[%s29862_s5 + $0xef4] ss:$28 sps:$4 sm:$0xff]  }
 0x973   :  { %16311 = vmatprep.subr.bf16.mxu0 %v22609_v3  ;;  %v22663_v3 = vld [vmem:[%s29862_s5 + $0x12ac] ss:$28 sps:$4 sm:$0xff]  }
 0x975   :  { %16273 = vmatpush2.bf16.msra.mxu1 %v22604_v11 }
 0x976   :  { %16312 = vmatpush2.bf16.msra.mxu0 %v22607_v4  ;;  %16274 = vmatprep.subr.bf16.mxu1 %v22612_v7  ;;  %v22658_v4 = vld [vmem:[%s29862_s5 + $0xef0] ss:$28 sps:$4 sm:$0xff]   ;;  %v22661_v7 = vld [vmem:[%s29862_s5 + $0x12a8] ss:$28 sps:$4 sm:$0xff]  }
 0x977   :  { %16313 = vmatprep.subr.bf16.mxu0 %v22615_v9  ;;  %v22666_v9 = vld [vmem:[%s29862_s5 + $0xebc] ss:$28 sps:$4 sm:$0xff]  }
 0x979   :  { %16275 = vmatpush2.bf16.msra.mxu1 %v22610_v10 }
 0x97a   :  { %16314 = vmatpush2.bf16.msra.mxu0 %v22613_v53  ;;  %16276 = vmatprep.subr.bf16.mxu1 %v22618_v22  ;;  %v22669_v53 = vld [vmem:[%s29862_s5 + $0x1274] ss:$28 sps:$4 sm:$0xff]  }
 0x97b   :  { %16315 = vmatprep.subr.bf16.mxu0 %v22621_v5  ;;  %v22664_v22 = vld [vmem:[%s29862_s5 + $0xeb8] ss:$28 sps:$4 sm:$0xff]   ;;  %v22667_v5 = vld [vmem:[%s29862_s5 + $0x1270] ss:$28 sps:$4 sm:$0xff]  }
 0x97d   :  { %16277 = vmatpush2.bf16.msra.mxu1 %v22616_v58  ;;  %v22672_v58 = vld [vmem:[%s29862_s5 + $0xe84] ss:$28 sps:$4 sm:$0xff]  }
 0x97e   :  { %16316 = vmatpush2.bf16.msra.mxu0 %v22619_v15  ;;  %16278 = vmatprep.subr.bf16.mxu1 %v22624_v37  ;;  %v22675_v15 = vld [vmem:[%s29862_s5 + $0x123c] ss:$28 sps:$4 sm:$0xff]  }
 0x97f   :  { %16317 = vmatprep.subr.bf16.mxu0 %v22627_v13  ;;  %v22670_v37 = vld [vmem:[%s29862_s5 + $0xe80] ss:$28 sps:$4 sm:$0xff]   ;;  %v22673_v13 = vld [vmem:[%s29862_s5 + $0x1238] ss:$28 sps:$4 sm:$0xff]  }
 0x981   :  { %16279 = vmatpush2.bf16.msra.mxu1 %v22622_v20  ;;  %v22678_v20 = vld [vmem:[%s29862_s5 + $0xe4c] ss:$28 sps:$4 sm:$0xff]  }
 0x982   :  { %16318 = vmatpush2.bf16.msra.mxu0 %v22625_v34  ;;  %16280 = vmatprep.subr.bf16.mxu1 %v22630_v35  ;;  %v22681_v34 = vld [vmem:[%s29862_s5 + $0x1204] ss:$28 sps:$4 sm:$0xff]  }
 0x983   :  { %16319 = vmatprep.subr.bf16.mxu0 %v22633_v38  ;;  %v22676_v35 = vld [vmem:[%s29862_s5 + $0xe48] ss:$28 sps:$4 sm:$0xff]   ;;  %v22679_v38 = vld [vmem:[%s29862_s5 + $0x1200] ss:$28 sps:$4 sm:$0xff]  }
 0x984   :  { %v15999_v45 = vpop.f32.mrf.mxu1 }
 0x985   :  { %v29138_v18 = vadd.f32 %v15999_v45, %v28979_v8  ;;  %16281 = vmatpush2.bf16.msra.mxu1 %v22628_v17  ;;  %v22645_v8 = vld [vmem:[%s29862_s5 + $0xc54] ss:$28 sps:$4 sm:$0xff]   ;;  %v22690_v45 = vld [vmem:[%s29862_s5 + $0x115c] ss:$28 sps:$4 sm:$0xff]  }
 0x986   :  { %16320 = vmatpush2.bf16.msra.mxu0 %v22631_v54  ;;  %v16001_v52 = vpop.f32.mrf.mxu1  ;;  %16282 = vmatprep.subr.bf16.mxu1 %v22636_v6  ;;  %v22684_v17 = vld [vmem:[%s29862_s5 + $0xe14] ss:$28 sps:$4 sm:$0xff]   ;;  %v22687_v54 = vld [vmem:[%s29862_s5 + $0x11cc] ss:$28 sps:$4 sm:$0xff]  }
 0x987   :  { %v29150_v26 = vadd.f32 %v16001_v52, %v28991_v40  ;;  %16321 = vmatprep.subr.bf16.mxu0 %v22639_v30  ;;  %v22648_v40 = vld [vmem:[%s29862_s5 + $0xf64] ss:$28 sps:$4 sm:$0xff]   ;;  %v22682_v6 = vld [vmem:[%s29862_s5 + $0xe10] ss:$28 sps:$4 sm:$0xff]   ;;  %v22688_v52 = vld [vmem:[%s29862_s5 + $0x1158] ss:$28 sps:$4 sm:$0xff]  }
 0x988   :  { %v16003_v28 = vpop.f32.mrf.mxu1  ;;  %v22685_v30 = vld [vmem:[%s29862_s5 + $0x11c8] ss:$28 sps:$4 sm:$0xff]  }
 0x989   :  { %16283 = vmatpush2.bf16.msra.mxu1 %v22634_v55  ;;  %v22693_v55 = vld [vmem:[%s29862_s5 + $0x1194] ss:$28 sps:$4 sm:$0xff]   ;;  %v22694_v28 = vld [vmem:[%s29862_s5 + $0x1120] ss:$28 sps:$4 sm:$0xff]  }
 0x98a   :  { %16322 = vmatpush2.bf16.msra.mxu0 %v22637_v48  ;;  %v16004_v19 = vpop.f32.mrf.mxu1  ;;  %16334 = vmatprep.subr.bf16.mxu1 %v22642_v31  ;;  %v22691_v48 = vld [vmem:[%s29862_s5 + $0x1190] ss:$28 sps:$4 sm:$0xff]   ;;  %v22696_v31 = vld [vmem:[%s29862_s5 + $0x1124] ss:$28 sps:$4 sm:$0xff]  }
 0x98b   :  { %16323 = vmatprep.subr.bf16.mxu0 %v22645_v8  ;;  %v22699_v8 = vld [vmem:[%s29862_s5 + $0x14dc] ss:$28 sps:$4 sm:$0xff]   ;;  %v22702_v19 = vld [vmem:[%s29862_s5 + $0x10ec] ss:$28 sps:$4 sm:$0xff]  }
 0x98c   :  { %16285 = vmatmul.mubr.bf16.vlgmr.msra.gmra.mxu1 %v27690_v43 }
 0x98d   :  { %16335 = vmatpush1.bf16.msra.mxu1 %v22640_v32  ;;  %16366 = vmatprep.mubr.bf16.mxu1 %v27692_v21  ;;  %v22697_v32 = vld [vmem:[%s29862_s5 + $0x14d8] ss:$28 sps:$4 sm:$0xff]  }
 0x98e   :  { %16324 = vmatpush2.bf16.msra.mxu0 %v22643_v57  ;;  %16336 = vmatprep.subr.bf16.mxu1 %v22648_v40  ;;  %v22705_v57 = vld [vmem:[%s29862_s5 + $0x14a4] ss:$28 sps:$4 sm:$0xff]  }
 0x98f   :  { %16375 = vmatprep.subr.bf16.mxu0 %v22651_v56  ;;  %v22700_v40 = vld [vmem:[%s29862_s5 + $0x10e8] ss:$28 sps:$4 sm:$0xff]   ;;  %v22703_v56 = vld [vmem:[%s29862_s5 + $0x14a0] ss:$28 sps:$4 sm:$0xff]  }
 0x991   :  { %v29181_v24 = vpop.f32.mrf.mxu0  ;;  %16326 = vmatmul.mubr.bf16.vlgmr.msra.gmra.mxu0 %v27671_v23  ;;  %16337 = vmatpush1.bf16.msra.mxu1 %v22646_v49  ;;  %v22708_v49 = vld [vmem:[%s29862_s5 + $0x10b4] ss:$28 sps:$4 sm:$0xff]  }
 0x992   :  { %16376 = vmatpush1.bf16.msra.mxu0 %v22649_v61  ;;  %16407 = vmatprep.mubr.bf16.mxu0 %v27715_v50  ;;  %v22711_v61 = vld [vmem:[%s29862_s5 + $0x146c] ss:$28 sps:$4 sm:$0xff]  }
 0x993   :  { %v29194_v1 = vpop.f32.mrf.mxu0  ;;  %16338 = vmatprep.subr.bf16.mxu1 %v22654_v12  ;;  %16377 = vmatprep.subr.bf16.mxu0 %v22657_v62  ;;  %v22706_v12 = vld [vmem:[%s29862_s5 + $0x10b0] ss:$28 sps:$4 sm:$0xff]   ;;  %v22709_v62 = vld [vmem:[%s29862_s5 + $0x1468] ss:$28 sps:$4 sm:$0xff]  }
 0x995   :  { %v16044_v11 = vpop.f32.mrf.mxu0  ;;  %16339 = vmatpush1.bf16.msra.mxu1 %v22652_v47  ;;  %v22714_v47 = vld [vmem:[%s29862_s5 + $0x107c] ss:$28 sps:$4 sm:$0xff]  }
 0x996   :  { %16378 = vmatpush1.bf16.msra.mxu0 %v22655_v42  ;;  %16340 = vmatprep.subr.bf16.mxu1 %v22660_v27  ;;  %v22717_v42 = vld [vmem:[%s29862_s5 + $0x1434] ss:$28 sps:$4 sm:$0xff]   ;;  %v22720_v11 = vld [vmem:[%s29862_s5 + $0x1044] ss:$28 sps:$4 sm:$0xff]  }
 0x997   :  { %v16045_v10 = vpop.f32.mrf.mxu0  ;;  %16379 = vmatprep.subr.bf16.mxu0 %v22663_v3  ;;  %v22712_v27 = vld [vmem:[%s29862_s5 + $0x1078] ss:$28 sps:$4 sm:$0xff]   ;;  %v22715_v3 = vld [vmem:[%s29862_s5 + $0x1430] ss:$28 sps:$4 sm:$0xff]  }
 0x998   :  { %v22726_v10 = vld [vmem:[%s29862_s5 + $0x100c] ss:$28 sps:$4 sm:$0xff]  }
 0x999   :  { %16341 = vmatpush1.bf16.msra.mxu1 %v22658_v4  ;;  %v22723_v4 = vld [vmem:[%s29862_s5 + $0x13fc] ss:$28 sps:$4 sm:$0xff]  }
 0x99a   :  { %16380 = vmatpush1.bf16.msra.mxu0 %v22661_v7  ;;  %16342 = vmatprep.subr.bf16.mxu1 %v22666_v9  ;;  %v22718_v7 = vld [vmem:[%s29862_s5 + $0x1040] ss:$28 sps:$4 sm:$0xff]   ;;  %v22721_v9 = vld [vmem:[%s29862_s5 + $0x13f8] ss:$28 sps:$4 sm:$0xff]  }
 0x99b   :  { %16381 = vmatprep.subr.bf16.mxu0 %v22669_v53  ;;  %v22729_v53 = vld [vmem:[%s29862_s5 + $0x13c4] ss:$28 sps:$4 sm:$0xff]  }
 0x99d   :  { %16343 = vmatpush1.bf16.msra.mxu1 %v22664_v22  ;;  %v22724_v22 = vld [vmem:[%s29862_s5 + $0x1008] ss:$28 sps:$4 sm:$0xff]  }
 0x99e   :  { %16382 = vmatpush1.bf16.msra.mxu0 %v22667_v5  ;;  %16344 = vmatprep.subr.bf16.mxu1 %v22672_v58  ;;  %v22727_v5 = vld [vmem:[%s29862_s5 + $0x13c0] ss:$28 sps:$4 sm:$0xff]   ;;  %v22732_v58 = vld [vmem:[%s29862_s5 + $0xfd4] ss:$28 sps:$4 sm:$0xff]  }
 0x99f   :  { %16383 = vmatprep.subr.bf16.mxu0 %v22675_v15  ;;  %v22735_v15 = vld [vmem:[%s29862_s5 + $0x138c] ss:$28 sps:$4 sm:$0xff]  }
 0x9a1   :  { %16345 = vmatpush1.bf16.msra.mxu1 %v22670_v37 }
 0x9a2   :  { %16384 = vmatpush1.bf16.msra.mxu0 %v22673_v13  ;;  %16346 = vmatprep.subr.bf16.mxu1 %v22678_v20  ;;  %v22730_v13 = vld [vmem:[%s29862_s5 + $0xfd0] ss:$28 sps:$4 sm:$0xff]  }
 0x9a3   :  { %16385 = vmatprep.subr.bf16.mxu0 %v22681_v34  ;;  %v22733_v34 = vld [vmem:[%s29862_s5 + $0x1388] ss:$28 sps:$4 sm:$0xff]  }
 0x9a5   :  { %16347 = vmatpush1.bf16.msra.mxu1 %v22676_v35  ;;  %v22738_v35 = vld [vmem:[%s29862_s5 + $0x169c] ss:$28 sps:$4 sm:$0xff]  }
 0x9a6   :  { %16386 = vmatpush1.bf16.msra.mxu0 %v22679_v38  ;;  %16348 = vmatprep.subr.bf16.mxu1 %v22684_v17  ;;  %v22741_v38 = vld [vmem:[%s29862_s5 + $0x1354] ss:$28 sps:$4 sm:$0xff]  }
 0x9a7   :  { %16387 = vmatprep.subr.bf16.mxu0 %v22687_v54  ;;  %v11400_v54 = vld [vmem:[%s29862_s5 + $0x1890] sm:$0xff] }
 0x9a9   :  { %16349 = vmatpush1.bf16.msra.mxu1 %v22682_v6  ;;  %v22736_v6 = vld [vmem:[%s29862_s5 + $0x1698] ss:$28 sps:$4 sm:$0xff]  }
 0x9aa   :  { %16388 = vmatpush1.bf16.msra.mxu0 %v22685_v30  ;;  %16350 = vmatprep.subr.bf16.mxu1 %v22690_v45  ;;  %v22739_v45 = vld [vmem:[%s29862_s5 + $0x1350] ss:$28 sps:$4 sm:$0xff]  }
 0x9ab   :  { %16389 = vmatprep.subr.bf16.mxu0 %v22693_v55  ;;  %v22744_v55 = vld [vmem:[%s29862_s5 + $0x1664] ss:$28 sps:$4 sm:$0xff]  }
 0x9ad   :  { %16351 = vmatpush2.bf16.msra.mxu1 %v22688_v52  ;;  %v19653_v52 = vcombine.high %v11400_v54, %v11400_v54 }
 0x9ae   :  { %16390 = vmatpush1.bf16.msra.mxu0 %v22691_v48  ;;  %16352 = vmatprep.subr.bf16.mxu1 %v22696_v31  ;;  %v19652_v48 = vcombine.low %v11400_v54, %v11400_v54 }
 0x9af   :  { %16391 = vmatprep.subr.bf16.mxu0 %v22699_v8  ;;  %v22742_v8 = vld [vmem:[%s29862_s5 + $0x1660] ss:$28 sps:$4 sm:$0xff]  }
 0x9b1   :  { %16353 = vmatpush2.bf16.msra.mxu1 %v22694_v28  ;;  %v16041_v28 = vadd.f32 %v29181_v24, %v29138_v18 }
 0x9b2   :  { %16392 = vmatpush2.bf16.msra.mxu0 %v22697_v32  ;;  %16354 = vmatprep.subr.bf16.mxu1 %v22702_v19  ;;  %v22747_v19 = vld [vmem:[%s29862_s5 + $0x162c] ss:$28 sps:$4 sm:$0xff]  }
 0x9b3   :  { %16393 = vmatprep.subr.bf16.mxu0 %v22705_v57  ;;  %v15506_v57 = vsel %vm15492_vm2, %v19652_v48, 0  ;;  %v22779_v48 = vld [vmem:[%s29862_s5 + $0x88] ss:$28 sps:$4 sm:$0xff]  }
 0x9b5   :  { %16355 = vmatpush2.bf16.msra.mxu1 %v22700_v40  ;;  %v22753_v40 = vld [vmem:[%s29862_s5 + $0x360] ss:$28 sps:$4 sm:$0xff]  }
 0x9b6   :  { %16394 = vmatpush2.bf16.msra.mxu0 %v22703_v56  ;;  %16356 = vmatprep.subr.bf16.mxu1 %v22708_v49  ;;  %v16043_v56 = vadd.f32 %v29194_v1, %v29150_v26 }
 0x9b7   :  { %16395 = vmatprep.subr.bf16.mxu0 %v22711_v61  ;;  %v22745_v61 = vld [vmem:[%s29862_s5 + $0x1628] ss:$28 sps:$4 sm:$0xff]  }
 0x9b9   :  { %16357 = vmatpush2.bf16.msra.mxu1 %v22706_v12 }
 0x9ba   :  { %16396 = vmatpush2.bf16.msra.mxu0 %v22709_v62  ;;  %16358 = vmatprep.subr.bf16.mxu1 %v22714_v47 }
 0x9bb   :  { %16397 = vmatprep.subr.bf16.mxu0 %v22717_v42  ;;  %v22752_v42 = vld [vmem:[%s29862_s5 + $0x15f4] ss:$28 sps:$4 sm:$0xff]  }
 0x9bd   :  { %16359 = vmatpush2.bf16.msra.mxu1 %v22712_v27 }
 0x9be   :  { %16398 = vmatpush2.bf16.msra.mxu0 %v22715_v3  ;;  %16360 = vmatprep.subr.bf16.mxu1 %v22720_v11  ;;  %v22750_v11 = vld [vmem:[%s29862_s5 + $0x15f0] ss:$28 sps:$4 sm:$0xff]  }
 0x9bf   :  { %16399 = vmatprep.subr.bf16.mxu0 %v22723_v4 }
 0x9c1   :  { %16361 = vmatpush2.bf16.msra.mxu1 %v22718_v7  ;;  %v22754_v7 = vld [vmem:[%s29862_s5 + $0x1a0] ss:$28 sps:$4 sm:$0xff]  }
 0x9c2   :  { %16400 = vmatpush2.bf16.msra.mxu0 %v22721_v9  ;;  %16362 = vmatprep.subr.bf16.mxu1 %v22726_v10  ;;  %v22758_v10 = vld [vmem:[%s29862_s5 + $0x328] ss:$28 sps:$4 sm:$0xff]  }
 0x9c3   :  { %16401 = vmatprep.subr.bf16.mxu0 %v22729_v53  ;;  %v22755_v53 = vld [vmem:[%s29862_s5 + $0x15b8] ss:$28 sps:$4 sm:$0xff]  }
 0x9c4   :  { %v16081_v37 = vpop.f32.mrf.mxu1 }
 0x9c5   :  { %16363 = vmatpush2.bf16.msra.mxu1 %v22724_v22  ;;  %v16082_v49 = vadd.f32 %v16081_v37, %v16041_v28  ;;  %v22759_v22 = vld [vmem:[%s29862_s5 + $0x168] ss:$28 sps:$4 sm:$0xff]   ;;  %v22780_v28 = vld [vmem:[%s29862_s5 + $0x1820] ss:$28 sps:$4 sm:$0xff]  }
 0x9c6   :  { %16402 = vmatpush2.bf16.msra.mxu0 %v22727_v5  ;;  %v16083_v20 = vpop.f32.mrf.mxu1  ;;  %16364 = vmatprep.subr.bf16.mxu1 %v22732_v58  ;;  %v22762_v5 = vld [vmem:[%s29862_s5 + $0x1584] ss:$28 sps:$4 sm:$0xff]   ;;  %v22763_v58 = vld [vmem:[%s29862_s5 + $0x2f0] ss:$28 sps:$4 sm:$0xff]  }
 0x9c7   :  { %16403 = vmatprep.subr.bf16.mxu0 %v22735_v15  ;;  %v16084_v12 = vadd.f32 %v16083_v20, %v16043_v56  ;;  %v22760_v15 = vld [vmem:[%s29862_s5 + $0x1580] ss:$28 sps:$4 sm:$0xff]   ;;  %v22767_v37 = vld [vmem:[%s29862_s5 + $0x154c] ss:$28 sps:$4 sm:$0xff]   ;;  %v22789_v56 = vld [vmem:[%s29862_s5 + $0x18] ss:$28 sps:$4 sm:$0xff]  }
 0x9c8   :  { %v16085_v17 = vpop.f32.mrf.mxu1  ;;  %v22765_v20 = vld [vmem:[%s29862_s5 + $0x1548] ss:$28 sps:$4 sm:$0xff]  }
 0x9c9   :  { %16365 = vmatpush2.bf16.msra.mxu1 %v22730_v13  ;;  %v22768_v13 = vld [vmem:[%s29862_s5 + $0x2b8] ss:$28 sps:$4 sm:$0xff]   ;;  %v22773_v17 = vld [vmem:[%s29862_s5 + $0x280] ss:$28 sps:$4 sm:$0xff]  }
 0x9ca   :  { %16404 = vmatpush2.bf16.msra.mxu0 %v22733_v34  ;;  %v16086_v30 = vpop.f32.mrf.mxu1  ;;  %16416 = vmatprep.subr.bf16.mxu1 %v22738_v35  ;;  %v22769_v34 = vld [vmem:[%s29862_s5 + $0xf8] ss:$28 sps:$4 sm:$0xff]  }
 0x9cb   :  { %16405 = vmatprep.subr.bf16.mxu0 %v22741_v38  ;;  %v22772_v35 = vld [vmem:[%s29862_s5 + $0x1514] ss:$28 sps:$4 sm:$0xff]   ;;  %v22774_v30 = vld [vmem:[%s29862_s5 + $0xc0] ss:$28 sps:$4 sm:$0xff]  }
 0x9cc   :  { %16367 = vmatmul.mubr.bf16.vlgmr.msra.gmra.mxu1 %v27910_v25  ;;  %v16163_v31 = vpop.f32.mrf.mxu1 }
 0x9cd   :  { %16417 = vmatpush1.bf16.msra.mxu1 %v22736_v6  ;;  %16448 = vmatprep.mubr.bf16.mxu1 %v27912_v14  ;;  %v22770_v6 = vld [vmem:[%s29862_s5 + $0x1510] ss:$28 sps:$4 sm:$0xff]  }
 0x9ce   :  { %16406 = vmatpush2.bf16.msra.mxu0 %v22739_v45  ;;  %v16165_v32 = vpop.f32.mrf.mxu1  ;;  %16418 = vmatprep.subr.bf16.mxu1 %v22744_v55  ;;  %v22777_v45 = vld [vmem:[%s29862_s5 + $0x185c] ss:$28 sps:$4 sm:$0xff]   ;;  %v22778_v55 = vld [vmem:[%s29862_s5 + $0x248] ss:$28 sps:$4 sm:$0xff]  }
 0x9cf   :  { %19659 = vmatprep.subr.msk.bf16.mxu0 %vm15492_vm2, %v19653_v52  ;;  %v22775_v52 = vld [vmem:[%s29862_s5 + $0x1858] ss:$28 sps:$4 sm:$0xff]  }
 0x9d0   :  { %v16167_v18 = vpop.f32.mrf.mxu1 }
 0x9d1   :  { %v16122_v24 = vpop.f32.mrf.mxu0  ;;  %16408 = vmatmul.mubr.bf16.vlgmr.msra.gmra.mxu0 %v27896_v63  ;;  %16419 = vmatpush1.bf16.msra.mxu1 %v22742_v8  ;;  %v22783_v8 = vld [vmem:[%s29862_s5 + $0x210] ss:$28 sps:$4 sm:$0xff]   ;;  %v22793_v18 = vld [vmem:[%s29862_s5 + $0xa60] ss:$28 sps:$4 sm:$0xff]  }
 0x9d2   :  { %v16123_v62 = vadd.f32 %v16122_v24, %v16082_v49  ;;  %v16168_v47 = vpop.f32.mrf.mxu1  ;;  %16420 = vmatprep.subr.bf16.mxu1 %v22747_v19  ;;  %16472 = vmatpush1.bf16.msra.mxu0 %v15506_v57  ;;  %v22787_v19 = vld [vmem:[%s29862_s5 + $0x17ec] ss:$28 sps:$4 sm:$0xff]   ;;  %v22788_v57 = vld [vmem:[%s29862_s5 + $0x1d8] ss:$28 sps:$4 sm:$0xff]  }
 0x9d3   :  { %v16124_v26 = vpop.f32.mrf.mxu0  ;;  %16489 = vmatprep.mubr.bf16.mxu0 %v22920_v16  ;;  %19772 = vmatprep.subr.bf16.mxu0 %v22753_v40  ;;  %v22757_v16 = vld [vmem:[%s29862_s5 + $0x15bc] ss:$28 sps:$4 sm:$0xff]   ;;  %v22785_v40 = vld [vmem:[%s29862_s5 + $0x17e8] ss:$28 sps:$4 sm:$0xff]   ;;  %v22792_v49 = vld [vmem:[%s29862_s5 + $0x17b4] ss:$28 sps:$4 sm:$0xff]  }
 0x9d4   :  { %v16164_v1 = vadd.f32 %v16163_v31, %v16123_v62  ;;  %v16125_v27 = vadd.f32 %v16124_v26, %v16084_v12  ;;  %v22782_v31 = vld [vmem:[%s29862_s5 + $0x1824] ss:$28 sps:$4 sm:$0xff]   ;;  %v22790_v24 = vld [vmem:[%s29862_s5 + $0x17b0] ss:$28 sps:$4 sm:$0xff]   ;;  %v22797_v12 = vld [vmem:[%s29862_s5 + $0x177c] ss:$28 sps:$4 sm:$0xff]  }
 0x9d5   :  { %v16126_v3 = vpop.f32.mrf.mxu0  ;;  %16421 = vmatpush1.bf16.msra.mxu1 %v22745_v61  ;;  %v22794_v61 = vld [vmem:[%s29862_s5 + $0x8a0] ss:$28 sps:$4 sm:$0xff]   ;;  %v22798_v62 = vld [vmem:[%s29862_s5 + $0xa28] ss:$28 sps:$4 sm:$0xff]   ;;  %v22795_v47 = vld [vmem:[%s29862_s5 + $0x1778] ss:$28 sps:$4 sm:$0xff]  }
 0x9d6   :  { %22906 = vtanh.f32 %v16164_v1  ;;  %v16166_v4 = vadd.f32 %v16165_v32, %v16125_v27  ;;  %16422 = vmatprep.subr.bf16.mxu1 %v22752_v42  ;;  %v22784_v32 = vld [vmem:[%s29862_s5 + $0x50] ss:$28 sps:$4 sm:$0xff]   ;;  %v22799_v42 = vld [vmem:[%s29862_s5 + $0x868] ss:$28 sps:$4 sm:$0xff]   ;;  %v22800_v1 = vld [vmem:[%s29862_s5 + $0x1740] ss:$28 sps:$4 sm:$0xff]  }
 0x9d7   :  { %v16127_v9 = vpop.f32.mrf.mxu0  ;;  %v22802_v26 = vld [vmem:[%s29862_s5 + $0x1744] ss:$28 sps:$4 sm:$0xff]   ;;  %v22807_v27 = vld [vmem:[%s29862_s5 + $0x170c] ss:$28 sps:$4 sm:$0xff]   ;;  %v22808_v3 = vld [vmem:[%s29862_s5 + $0x9b8] ss:$28 sps:$4 sm:$0xff]  }
 0x9d8   :  { %22908 = vtanh.f32 %v16166_v4  ;;  %v22809_v4 = vld [vmem:[%s29862_s5 + $0x7f8] ss:$28 sps:$4 sm:$0xff]   ;;  %v22813_v9 = vld [vmem:[%s29862_s5 + $0x980] ss:$28 sps:$4 sm:$0xff]  }
 0x9d9   :  { %16423 = vmatpush1.bf16.msra.mxu1 %v22750_v11  ;;  %19660 = vmatmul.mubr.msk.bf16.vlgmr.msra.gmra.mxu0 %vm15488_vm3, %v27937_v0  ;;  %v22805_v11 = vld [vmem:[%s29862_s5 + $0x1708] ss:$28 sps:$4 sm:$0xff]  }
 0x9da   :  { %19773 = vmatpush3.bf16.msra.mxu0 %v22754_v7  ;;  %16530 = vmatprep.mubr.bf16.mxu0 %v27246_v44  ;;  %v22764_v44 = vld [vmem:[%s29862_s5 + $0x130] ss:$28 sps:$4 sm:$0xff]  }
 0x9db   :  { %16424 = vmatprep.subr.bf16.mxu1 %v22757_v16  ;;  %19774 = vmatprep.subr.bf16.mxu0 %v22758_v10  ;;  %v22812_v7 = vld [vmem:[%s29862_s5 + $0x16d4] ss:$28 sps:$4 sm:$0xff]   ;;  %v22814_v10 = vld [vmem:[%s29862_s5 + $0x7c0] ss:$28 sps:$4 sm:$0xff]  }
 0x9dc   :  { %v22810_v16 = vld [vmem:[%s29862_s5 + $0x16d0] ss:$28 sps:$4 sm:$0xff]  }
 0x9dd   :  { %16425 = vmatpush1.bf16.msra.mxu1 %v22755_v53  ;;  %v22815_v53 = vld [vmem:[%s29862_s5 + $0x6e0] ss:$28 sps:$4 sm:$0xff]  }
 0x9de   :  { %19775 = vmatpush3.bf16.msra.mxu0 %v22759_v22  ;;  %16426 = vmatprep.subr.bf16.mxu1 %v22762_v5  ;;  %v22816_v22 = vld [vmem:[%s29862_s5 + $0x948] ss:$28 sps:$4 sm:$0xff]   ;;  %v22817_v5 = vld [vmem:[%s29862_s5 + $0x520] ss:$28 sps:$4 sm:$0xff]  }
 0x9df   :  { %19776 = vmatprep.subr.bf16.mxu0 %v22763_v58  ;;  %v22818_v58 = vld [vmem:[%s29862_s5 + $0x788] ss:$28 sps:$4 sm:$0xff]  }
 0x9e1   :  { %16427 = vmatpush1.bf16.msra.mxu1 %v22760_v15  ;;  %v22819_v15 = vld [vmem:[%s29862_s5 + $0x6a8] ss:$28 sps:$4 sm:$0xff]  }
 0x9e2   :  { %19777 = vmatpush3.bf16.msra.mxu0 %v22764_v44  ;;  %16428 = vmatprep.subr.bf16.mxu1 %v22767_v37  ;;  %v22820_v44 = vld [vmem:[%s29862_s5 + $0x910] ss:$28 sps:$4 sm:$0xff]   ;;  %v11422_v37 = vrot.slane %v28914_v36, %v27087_v46 }
 0x9e3   :  { %v22907_v38 = vpop.eup %22906  ;;  %19778 = vmatprep.subr.bf16.mxu0 %v22768_v13  ;;  %v22822_v46 = vld [vmem:[%s29862_s5 + $0x750] ss:$28 sps:$4 sm:$0xff]  }
 0x9e4   :  { %16827 = vst [vmem:[%s29864_s11 + $0x10] sm:$0xff] %v22907_v38  ;;  %v22823_v38 = vld [vmem:[%s29862_s5 + $0x670] ss:$28 sps:$4 sm:$0xff]  }
 0x9e5   :  { %v22909_v54 = vpop.eup %22908  ;;  %16429 = vmatpush1.bf16.msra.mxu1 %v22765_v20  ;;  %v22821_v20 = vld [vmem:[%s29862_s5 + $0x4e8] ss:$28 sps:$4 sm:$0xff]  }
 0x9e6   :  { %16828 = vst [vmem:[%s29864_s11 + $0x18] sm:$0xff] %v22909_v54  ;;  %19779 = vmatpush3.bf16.msra.mxu0 %v22769_v34  ;;  %16430 = vmatprep.subr.bf16.mxu1 %v22772_v35  ;;  %v11426_v34 = vrot.slane %v28914_v36, %v27093_v33  ;;  %v22825_v33 = vld [vmem:[%s29862_s5 + $0x4b0] ss:$28 sps:$4 sm:$0xff]  }
 0x9e7   :  { %19780 = vmatprep.subr.bf16.mxu0 %v22773_v17 }
 0x9e9   :  { %16431 = vmatpush1.bf16.msra.mxu1 %v22770_v6 }
 0x9ea   :  { %19781 = vmatpush3.bf16.msra.mxu0 %v22774_v30  ;;  %16432 = vmatprep.subr.bf16.mxu1 %v22777_v45 }
 0x9eb   :  { %19782 = vmatprep.subr.bf16.mxu0 %v22778_v55  ;;  %v22826_v55 = vld [vmem:[%s29862_s5 + $0x718] ss:$28 sps:$4 sm:$0xff]  }
 0x9ed   :  { %16433 = vmatpush2.bf16.msra.mxu1 %v22775_v52  ;;  %v22827_v52 = vld [vmem:[%s29862_s5 + $0x638] ss:$28 sps:$4 sm:$0xff]  }
 0x9ee   :  { %19783 = vmatpush3.bf16.msra.mxu0 %v22779_v48  ;;  %16434 = vmatprep.subr.bf16.mxu1 %v22782_v31  ;;  %v22828_v31 = vld [vmem:[%s29862_s5 + $0x1160] ss:$28 sps:$4 sm:$0xff]  }
 0x9ef   :  { %19784 = vmatprep.subr.bf16.mxu0 %v22783_v8 }
 0x9f1   :  { %16435 = vmatpush2.bf16.msra.mxu1 %v22780_v28 }
 0x9f2   :  { %19785 = vmatpush3.bf16.msra.mxu0 %v22784_v32  ;;  %16436 = vmatprep.subr.bf16.mxu1 %v22787_v19  ;;  %v22829_v32 = vld [vmem:[%s29862_s5 + $0x478] ss:$28 sps:$4 sm:$0xff]   ;;  %v22830_v19 = vld [vmem:[%s29862_s5 + $0xfa0] ss:$28 sps:$4 sm:$0xff]  }
 0x9f3   :  { %19786 = vmatprep.subr.bf16.mxu0 %v22788_v57 }
 0x9f5   :  { %16437 = vmatpush2.bf16.msra.mxu1 %v22785_v40  ;;  %v22831_v40 = vld [vmem:[%s29862_s5 + $0x600] ss:$28 sps:$4 sm:$0xff]  }
 0x9f6   :  { %19787 = vmatpush3.bf16.msra.mxu0 %v22789_v56  ;;  %16438 = vmatprep.subr.bf16.mxu1 %v22792_v49  ;;  %v22832_v56 = vld [vmem:[%s29862_s5 + $0x1128] ss:$28 sps:$4 sm:$0xff]   ;;  %v22833_v49 = vld [vmem:[%s29862_s5 + $0x440] ss:$28 sps:$4 sm:$0xff]  }
 0x9f7   :  { %19816 = vmatprep.subr.bf16.mxu0 %v22793_v18  ;;  %v22834_v18 = vld [vmem:[%s29862_s5 + $0xf68] ss:$28 sps:$4 sm:$0xff]  }
 0x9f9   :  { %16531 = vmatmul.mubr.bf16.vlgmr.msra.gmra.mxu0 %v27472_v60  ;;  %16439 = vmatpush2.bf16.msra.mxu1 %v22790_v24  ;;  %v22803_v60 = vld [vmem:[%s29862_s5 + $0x9f0] ss:$28 sps:$4 sm:$0xff]   ;;  %v22835_v24 = vld [vmem:[%s29862_s5 + $0x5c8] ss:$28 sps:$4 sm:$0xff]  }
 0x9fa   :  { %19817 = vmatpush3.bf16.msra.mxu0 %v22794_v61  ;;  %16610 = vmatprep.mubr.bf16.mxu0 %v27477_v41  ;;  %v22804_v41 = vld [vmem:[%s29862_s5 + $0x830] ss:$28 sps:$4 sm:$0xff]   ;;  %v22837_v61 = vld [vmem:[%s29862_s5 + $0x408] ss:$28 sps:$4 sm:$0xff]  }
 0x9fb   :  { %16440 = vmatprep.subr.bf16.mxu1 %v22797_v12  ;;  %19818 = vmatprep.subr.bf16.mxu0 %v22798_v62  ;;  %v22839_v12 = vld [vmem:[%s29862_s5 + $0x590] ss:$28 sps:$4 sm:$0xff]   ;;  %v22840_v62 = vld [vmem:[%s29862_s5 + $0x10b8] ss:$28 sps:$4 sm:$0xff]  }
 0x9fd   :  { %16441 = vmatpush2.bf16.msra.mxu1 %v22795_v47  ;;  %v22841_v47 = vld [vmem:[%s29862_s5 + $0x3d0] ss:$28 sps:$4 sm:$0xff]  }
 0x9fe   :  { %19819 = vmatpush3.bf16.msra.mxu0 %v22799_v42  ;;  %16442 = vmatprep.subr.bf16.mxu1 %v22802_v26  ;;  %v22842_v42 = vld [vmem:[%s29862_s5 + $0xef8] ss:$28 sps:$4 sm:$0xff]  }
 0x9ff   :  { %19820 = vmatprep.subr.bf16.mxu0 %v22803_v60  ;;  %v22843_v26 = vld [vmem:[%s29862_s5 + $0x558] ss:$28 sps:$4 sm:$0xff]   ;;  %v22844_v60 = vld [vmem:[%s29862_s5 + $0x1080] ss:$28 sps:$4 sm:$0xff]  }
 0xa01   :  { %16443 = vmatpush2.bf16.msra.mxu1 %v22800_v1  ;;  %v22845_v1 = vld [vmem:[%s29862_s5 + $0x398] ss:$28 sps:$4 sm:$0xff]  }
 0xa02   :  { %19821 = vmatpush3.bf16.msra.mxu0 %v22804_v41  ;;  %16444 = vmatprep.subr.bf16.mxu1 %v22807_v27  ;;  %v22846_v41 = vld [vmem:[%s29862_s5 + $0xec0] ss:$28 sps:$4 sm:$0xff]  }
 0xa03   :  { %19822 = vmatprep.subr.bf16.mxu0 %v22808_v3  ;;  %v22847_v27 = vld [vmem:[%s29862_s5 + $0xde0] ss:$28 sps:$4 sm:$0xff]   ;;  %v22848_v3 = vld [vmem:[%s29862_s5 + $0x1048] ss:$28 sps:$4 sm:$0xff]  }
 0xa05   :  { %16445 = vmatpush2.bf16.msra.mxu1 %v22805_v11  ;;  %v22849_v11 = vld [vmem:[%s29862_s5 + $0xc20] ss:$28 sps:$4 sm:$0xff]  }
 0xa06   :  { %19823 = vmatpush3.bf16.msra.mxu0 %v22809_v4  ;;  %16446 = vmatprep.subr.bf16.mxu1 %v22812_v7  ;;  %v22850_v4 = vld [vmem:[%s29862_s5 + $0xe88] ss:$28 sps:$4 sm:$0xff]  }
 0xa07   :  { %19824 = vmatprep.subr.bf16.mxu0 %v22813_v9  ;;  %v22851_v7 = vld [vmem:[%s29862_s5 + $0xda8] ss:$28 sps:$4 sm:$0xff]   ;;  %v22852_v9 = vld [vmem:[%s29862_s5 + $0x1010] ss:$28 sps:$4 sm:$0xff]  }
 0xa09   :  { %16447 = vmatpush2.bf16.msra.mxu1 %v22810_v16  ;;  %v22853_v16 = vld [vmem:[%s29862_s5 + $0xbe8] ss:$28 sps:$4 sm:$0xff]  }
 0xa0a   :  { %19825 = vmatpush3.bf16.msra.mxu0 %v22814_v10  ;;  %19794 = vmatprep.subr.bf16.mxu1 %v22815_v53  ;;  %v22854_v10 = vld [vmem:[%s29862_s5 + $0xe50] ss:$28 sps:$4 sm:$0xff]  }
 0xa0b   :  { %19826 = vmatprep.subr.bf16.mxu0 %v22816_v22  ;;  %v22855_v53 = vld [vmem:[%s29862_s5 + $0xd70] ss:$28 sps:$4 sm:$0xff]   ;;  %v22858_v22 = vld [vmem:[%s29862_s5 + $0xe18] ss:$28 sps:$4 sm:$0xff]  }
 0xa0c   :  { %v16204_v13 = vpop.f32.mrf.mxu1  ;;  %16449 = vmatmul.mubr.bf16.vlgmr.msra.gmra.mxu1 %v28106_v59 }
 0xa0d   :  { %19795 = vmatpush3.bf16.msra.mxu1 %v22817_v5  ;;  %16570 = vmatprep.mubr.bf16.mxu1 %v27236_v51  ;;  %v22824_v51 = vld [vmem:[%s29862_s5 + $0x8d8] ss:$28 sps:$4 sm:$0xff]   ;;  %v16205_v17 = vadd.f32 %v16204_v13, %v11422_v37  ;;  %v22863_v37 = vld [vmem:[%s29862_s5 + $0xd00] ss:$28 sps:$4 sm:$0xff]   ;;  %v22864_v13 = vld [vmem:[%s29862_s5 + $0x1828] ss:$28 sps:$4 sm:$0xff]  }
 0xa0e   :  { %19827 = vmatpush3.bf16.msra.mxu0 %v22818_v58  ;;  %v16206_v35 = vpop.f32.mrf.mxu1  ;;  %19796 = vmatprep.subr.bf16.mxu1 %v22819_v15  ;;  %v22859_v5 = vld [vmem:[%s29862_s5 + $0xd38] ss:$28 sps:$4 sm:$0xff]   ;;  %v22860_v58 = vld [vmem:[%s29862_s5 + $0x1860] ss:$28 sps:$4 sm:$0xff]  }
 0xa0f   :  { %19828 = vmatprep.subr.bf16.mxu0 %v22820_v44  ;;  %v16207_v36 = vadd.f32 %v16206_v35, %v11426_v34  ;;  %v22861_v15 = vld [vmem:[%s29862_s5 + $0xb78] ss:$28 sps:$4 sm:$0xff]   ;;  %v22862_v44 = vld [vmem:[%s29862_s5 + $0x16a0] ss:$28 sps:$4 sm:$0xff]   ;;  %v22866_v34 = vld [vmem:[%s29862_s5 + $0x1668] ss:$28 sps:$4 sm:$0xff]  }
 0xa10   :  { %v16208_v54 = vpop.f32.mrf.mxu1  ;;  %v22867_v35 = vld [vmem:[%s29862_s5 + $0xcc8] ss:$28 sps:$4 sm:$0xff]  }
 0xa11   :  { %v16245_v6 = vpop.f32.mrf.mxu0  ;;  %19797 = vmatpush3.bf16.msra.mxu1 %v22821_v20  ;;  %v22865_v20 = vld [vmem:[%s29862_s5 + $0xb40] ss:$28 sps:$4 sm:$0xff]   ;;  %v22874_v54 = vld [vmem:[%s29862_s5 + $0x15f8] ss:$28 sps:$4 sm:$0xff]  }
 0xa12   :  { %v29592_v30 = vadd.f32 %v16245_v6, %v16205_v17  ;;  %19829 = vmatpush3.bf16.msra.mxu0 %v22822_v46  ;;  %v16209_v45 = vpop.f32.mrf.mxu1  ;;  %19798 = vmatprep.subr.bf16.mxu1 %v22823_v38  ;;  %v22869_v46 = vld [vmem:[%s29862_s5 + $0xb08] ss:$28 sps:$4 sm:$0xff]   ;;  %v22871_v38 = vld [vmem:[%s29862_s5 + $0xc90] ss:$28 sps:$4 sm:$0xff]   ;;  %v22875_v6 = vld [vmem:[%s29862_s5 + $0xc58] ss:$28 sps:$4 sm:$0xff]  }
 0xa13   :  { %v16247_v48 = vpop.f32.mrf.mxu0  ;;  %19830 = vmatprep.subr.bf16.mxu0 %v22824_v51  ;;  %v22872_v51 = vld [vmem:[%s29862_s5 + $0x17b8] ss:$28 sps:$4 sm:$0xff]   ;;  %v22873_v17 = vld [vmem:[%s29862_s5 + $0xad0] ss:$28 sps:$4 sm:$0xff]   ;;  %v22878_v45 = vld [vmem:[%s29862_s5 + $0x15c0] ss:$28 sps:$4 sm:$0xff]  }
 0xa14   :  { %v29603_v8 = vadd.f32 %v16247_v48, %v16207_v36  ;;  %v22877_v36 = vld [vmem:[%s29862_s5 + $0xa98] ss:$28 sps:$4 sm:$0xff]   ;;  %v22881_v48 = vld [vmem:[%s29862_s5 + $0x1320] ss:$28 sps:$4 sm:$0xff]  }
 0xa15   :  { %v16249_v28 = vpop.f32.mrf.mxu0  ;;  %19799 = vmatpush3.bf16.msra.mxu1 %v22825_v33  ;;  %v22876_v33 = vld [vmem:[%s29862_s5 + $0x1780] ss:$28 sps:$4 sm:$0xff]  }
 0xa16   :  { %19831 = vmatpush3.bf16.msra.mxu0 %v22826_v55  ;;  %19800 = vmatprep.subr.bf16.mxu1 %v22827_v52  ;;  %v22879_v55 = vld [vmem:[%s29862_s5 + $0x14e0] ss:$28 sps:$4 sm:$0xff]   ;;  %v22880_v52 = vld [vmem:[%s29862_s5 + $0x1748] ss:$28 sps:$4 sm:$0xff]  }
 0xa17   :  { %v16250_v57 = vpop.f32.mrf.mxu0  ;;  %19860 = vmatprep.subr.bf16.mxu0 %v22828_v31  ;;  %v22882_v31 = vld [vmem:[%s29862_s5 + $0x1588] ss:$28 sps:$4 sm:$0xff]  }
 0xa18   :  { %v22883_v28 = vld [vmem:[%s29862_s5 + $0x14a8] ss:$28 sps:$4 sm:$0xff]  }
 0xa19   :  { %16611 = vmatmul.mubr.bf16.vlgmr.msra.gmra.mxu0 %v27690_v43  ;;  %19801 = vmatpush3.bf16.msra.mxu1 %v22829_v32  ;;  %v22836_v43 = vld [vmem:[%s29862_s5 + $0x10f0] ss:$28 sps:$4 sm:$0xff]  }
 0xa1a   :  { %19861 = vmatpush3.bf16.msra.mxu0 %v22830_v19  ;;  %16690 = vmatprep.mubr.bf16.mxu0 %v27692_v21  ;;  %v22838_v21 = vld [vmem:[%s29862_s5 + $0xf30] ss:$28 sps:$4 sm:$0xff]  }
 0xa1b   :  { %19802 = vmatprep.subr.bf16.mxu1 %v22831_v40  ;;  %19862 = vmatprep.subr.bf16.mxu0 %v22832_v56  ;;  %v22884_v32 = vld [vmem:[%s29862_s5 + $0x1710] ss:$28 sps:$4 sm:$0xff]   ;;  %v22885_v40 = vld [vmem:[%s29862_s5 + $0x12e8] ss:$28 sps:$4 sm:$0xff]  }
 0xa1d   :  { %19803 = vmatpush3.bf16.msra.mxu1 %v22833_v49  ;;  %v22886_v49 = vld [vmem:[%s29862_s5 + $0x1550] ss:$28 sps:$4 sm:$0xff]  }
 0xa1e   :  { %19863 = vmatpush3.bf16.msra.mxu0 %v22834_v18  ;;  %19804 = vmatprep.subr.bf16.mxu1 %v22835_v24 }
 0xa1f   :  { %19864 = vmatprep.subr.bf16.mxu0 %v22836_v43  ;;  %v22889_v43 = vld [vmem:[%s29862_s5 + $0x12b0] ss:$28 sps:$4 sm:$0xff]  }
 0xa21   :  { %19805 = vmatpush3.bf16.msra.mxu1 %v22837_v61 }
 0xa22   :  { %19865 = vmatpush3.bf16.msra.mxu0 %v22838_v21  ;;  %19806 = vmatprep.subr.bf16.mxu1 %v22839_v12  ;;  %v22891_v12 = vld [vmem:[%s29862_s5 + $0x1438] ss:$28 sps:$4 sm:$0xff]  }
 0xa23   :  { %19866 = vmatprep.subr.bf16.mxu0 %v22840_v62 }
 0xa25   :  { %19807 = vmatpush3.bf16.msra.mxu1 %v22841_v47 }
 0xa26   :  { %19867 = vmatpush3.bf16.msra.mxu0 %v22842_v42  ;;  %19808 = vmatprep.subr.bf16.mxu1 %v22843_v26  ;;  %v22892_v26 = vld [vmem:[%s29862_s5 + $0x1278] ss:$28 sps:$4 sm:$0xff]  }
 0xa27   :  { %19868 = vmatprep.subr.bf16.mxu0 %v22844_v60  ;;  %v22893_v60 = vld [vmem:[%s29862_s5 + $0x1400] ss:$28 sps:$4 sm:$0xff]  }
 0xa29   :  { %19809 = vmatpush3.bf16.msra.mxu1 %v22845_v1 }
 0xa2a   :  { %19869 = vmatpush3.bf16.msra.mxu0 %v22846_v41  ;;  %19838 = vmatprep.subr.bf16.mxu1 %v22847_v27  ;;  %v22894_v41 = vld [vmem:[%s29862_s5 + $0x1240] ss:$28 sps:$4 sm:$0xff]   ;;  %v22895_v27 = vld [vmem:[%s29862_s5 + $0x13c8] ss:$28 sps:$4 sm:$0xff]  }
 0xa2b   :  { %19870 = vmatprep.subr.bf16.mxu0 %v22848_v3  ;;  %v22896_v3 = vld [vmem:[%s29862_s5 + $0x1208] ss:$28 sps:$4 sm:$0xff]  }
 0xa2c   :  { %16571 = vmatmul.mubr.bf16.vlgmr.msra.gmra.mxu1 %v27455_v39  ;;  %v22856_v39 = vld [vmem:[%s29862_s5 + $0xfd8] ss:$28 sps:$4 sm:$0xff]  }
 0xa2d   :  { %19839 = vmatpush3.bf16.msra.mxu1 %v22849_v11  ;;  %16650 = vmatprep.mubr.bf16.mxu1 %v27461_v2  ;;  %v22857_v2 = vld [vmem:[%s29862_s5 + $0xbb0] ss:$28 sps:$4 sm:$0xff]  }
 0xa2e   :  { %19871 = vmatpush3.bf16.msra.mxu0 %v22850_v4  ;;  %19840 = vmatprep.subr.bf16.mxu1 %v22851_v7  ;;  %v22898_v11 = vld [vmem:[%s29862_s5 + $0x11d0] ss:$28 sps:$4 sm:$0xff]   ;;  %v22899_v4 = vld [vmem:[%s29862_s5 + $0x1358] ss:$28 sps:$4 sm:$0xff]  }
 0xa2f   :  { %19872 = vmatprep.subr.bf16.mxu0 %v22852_v9  ;;  %v22900_v7 = vld [vmem:[%s29862_s5 + $0x1198] ss:$28 sps:$4 sm:$0xff]  }
 0xa30   :  { %v22901_v9 = vld [vmem:[%s29862_s5 + $0x1898] ss:$0 sps:$4 sm:$0xff]  }
 0xa31   :  { %19841 = vmatpush3.bf16.msra.mxu1 %v22853_v16  ;;  %v22921_v16 = vmov 0.0  }
 0xa32   :  { %19873 = vmatpush3.bf16.msra.mxu0 %v22854_v10  ;;  %19842 = vmatprep.subr.bf16.mxu1 %v22855_v53  ;;  %v15512_v10 = vsel %vm15492_vm2, %v22901_v9, 0 }
 0xa33   :  { %19874 = vmatprep.subr.bf16.mxu0 %v22856_v39 }
 0xa35   :  { %19843 = vmatpush3.bf16.msra.mxu1 %v22857_v2 }
 0xa36   :  { %19875 = vmatpush3.bf16.msra.mxu0 %v22858_v22  ;;  %19844 = vmatprep.subr.bf16.mxu1 %v22859_v5 }
 0xa37   :  { %19904 = vmatprep.subr.bf16.mxu0 %v22860_v58 }
 0xa39   :  { %16691 = vmatmul.mubr.bf16.vlgmr.msra.gmra.mxu0 %v27910_v25  ;;  %19845 = vmatpush3.bf16.msra.mxu1 %v22861_v15  ;;  %v22868_v25 = vld [vmem:[%s29862_s5 + $0x17f0] ss:$28 sps:$4 sm:$0xff]  }
 0xa3a   :  { %19905 = vmatpush3.bf16.msra.mxu0 %v22862_v44  ;;  %16770 = vmatprep.mubr.bf16.mxu0 %v27912_v14  ;;  %v22870_v14 = vld [vmem:[%s29862_s5 + $0x1630] ss:$28 sps:$4 sm:$0xff]  }
 0xa3b   :  { %19846 = vmatprep.subr.bf16.mxu1 %v22863_v37  ;;  %19906 = vmatprep.subr.bf16.mxu0 %v22864_v13 }
 0xa3d   :  { %19847 = vmatpush3.bf16.msra.mxu1 %v22865_v20 }
 0xa3e   :  { %19907 = vmatpush3.bf16.msra.mxu0 %v22866_v34  ;;  %19848 = vmatprep.subr.bf16.mxu1 %v22867_v35 }
 0xa3f   :  { %19908 = vmatprep.subr.bf16.mxu0 %v22868_v25 }
 0xa41   :  { %19849 = vmatpush3.bf16.msra.mxu1 %v22869_v46 }
 0xa42   :  { %19909 = vmatpush3.bf16.msra.mxu0 %v22870_v14  ;;  %19850 = vmatprep.subr.bf16.mxu1 %v22871_v38 }
 0xa43   :  { %19910 = vmatprep.subr.bf16.mxu0 %v22872_v51 }
 0xa45   :  { %19851 = vmatpush3.bf16.msra.mxu1 %v22873_v17 }
 0xa46   :  { %19911 = vmatpush3.bf16.msra.mxu0 %v22874_v54  ;;  %19852 = vmatprep.subr.bf16.mxu1 %v22875_v6 }
 0xa47   :  { %19912 = vmatprep.subr.bf16.mxu0 %v22876_v33 }
 0xa49   :  { %19853 = vmatpush3.bf16.msra.mxu1 %v22877_v36 }
 0xa4a   :  { %19913 = vmatpush3.bf16.msra.mxu0 %v22878_v45  ;;  %19882 = vmatprep.subr.bf16.mxu1 %v22879_v55 }
 0xa4b   :  { %19914 = vmatprep.subr.bf16.mxu0 %v22880_v52 }
 0xa4c   :  { %v16286_v19 = vpop.f32.mrf.mxu1  ;;  %16651 = vmatmul.mubr.bf16.vlgmr.msra.gmra.mxu1 %v27671_v23  ;;  %v22887_v23 = vld [vmem:[%s29862_s5 + $0x1470] ss:$28 sps:$4 sm:$0xff]  }
 0xa4d   :  { %v16287_v57 = vadd.f32 %v16286_v19, %v29592_v30  ;;  %19883 = vmatpush3.bf16.msra.mxu1 %v22881_v48  ;;  %16730 = vmatprep.mubr.bf16.mxu1 %v27715_v50  ;;  %v22888_v50 = vld [vmem:[%s29862_s5 + $0x16d8] ss:$28 sps:$4 sm:$0xff]  }
 0xa4e   :  { %19915 = vmatpush3.bf16.msra.mxu0 %v22882_v31  ;;  %v16288_v56 = vpop.f32.mrf.mxu1  ;;  %19884 = vmatprep.subr.bf16.mxu1 %v22883_v28 }
 0xa4f   :  { %v16289_v30 = vadd.f32 %v16288_v56, %v29603_v8  ;;  %19916 = vmatprep.subr.bf16.mxu0 %v22884_v32  ;;  %v22890_v8 = vld [vmem:[%s29862_s5 + $0x1518] ss:$28 sps:$4 sm:$0xff]  }
 0xa50   :  { %v16290_v18 = vpop.f32.mrf.mxu1 }
 0xa51   :  { %v16327_v24 = vpop.f32.mrf.mxu0  ;;  %19885 = vmatpush3.bf16.msra.mxu1 %v22885_v40 }
 0xa52   :  { %v16328_v61 = vadd.f32 %v16327_v24, %v16287_v57  ;;  %19917 = vmatpush3.bf16.msra.mxu0 %v22886_v49  ;;  %v16291_v21 = vpop.f32.mrf.mxu1  ;;  %19886 = vmatprep.subr.bf16.mxu1 %v22887_v23  ;;  %v22919_v49 = vld [vmem:[%s29863_s10] sm:$0x7f] }
 0xa53   :  { %v16329_v62 = vpop.f32.mrf.mxu0  ;;  %19918 = vmatprep.subr.bf16.mxu0 %v22888_v50  ;;  %v11430_v23 = vrot.slane %v22919_v49, %v27305_v29 }
 0xa54   :  { %v16330_v47 = vadd.f32 %v16329_v62, %v16289_v30 }
 0xa55   :  { %v16331_v42 = vpop.f32.mrf.mxu0  ;;  %19887 = vmatpush3.bf16.msra.mxu1 %v22889_v43 }
 0xa56   :  { %19919 = vmatpush3.bf16.msra.mxu0 %v22890_v8  ;;  %19888 = vmatprep.subr.bf16.mxu1 %v22891_v12 }
 0xa57   :  { %v16332_v1 = vpop.f32.mrf.mxu0 }
 0xa59   :  { %16771 = vmatmul.mubr.bf16.vlgmr.msra.gmra.mxu0 %v28106_v59  ;;  %19889 = vmatpush3.bf16.msra.mxu1 %v22892_v26  ;;  %v22897_v59 = vld [vmem:[%s29862_s5 + $0x1390] ss:$28 sps:$4 sm:$0xff]  }
 0xa5a   :  { %19890 = vmatprep.subr.bf16.mxu1 %v22893_v60 }
 0xa5d   :  { %19891 = vmatpush3.bf16.msra.mxu1 %v22894_v41 }
 0xa5e   :  { %19892 = vmatprep.subr.bf16.mxu1 %v22895_v27 }
 0xa61   :  { %19893 = vmatpush3.bf16.msra.mxu1 %v22896_v3 }
 0xa62   :  { %19894 = vmatprep.subr.bf16.mxu1 %v22897_v59 }
 0xa65   :  { %19895 = vmatpush3.bf16.msra.mxu1 %v22898_v11 }
 0xa66   :  { %19896 = vmatprep.subr.bf16.mxu1 %v22899_v4 }
 0xa69   :  { %19897 = vmatpush3.bf16.msra.mxu1 %v22900_v7 }
 0xa6a   :  { %19928 = vmatprep.subr.bf16.mxu1 %v22921_v16 }
 0xa6c   :  { %16731 = vmatmul.mubr.bf16.vlgmr.msra.gmra.mxu1 %v27896_v63 }
 0xa6d   :  { %19929 = vmatpush3.bf16.msra.mxu1 %v15512_v10  ;;  %19930 = vmatprep.mubr.msk.bf16.mxu1 %vm22922_vm4, %v22921_v16 }
 0xa74   :  { %19931 = vmatmul.mubr.msk.bf16.vlgmr.msra.gmra.mxu1 %vm15488_vm3, %v27937_v0 }
 0xa8c   :  { %v16368_v53 = vpop.f32.mrf.mxu1 }
 0xa8d   :  { %v16369_v38 = vadd.f32 %v16368_v53, %v16328_v61 }
 0xa8e   :  { %v16370_v39 = vpop.f32.mrf.mxu1 }
 0xa8f   :  { %v16371_v51 = vadd.f32 %v16370_v39, %v16330_v47 }
 0xa90   :  { %v16372_v2 = vpop.f32.mrf.mxu1 }
 0xa91   :  { %v16409_v22 = vpop.f32.mrf.mxu0 }
 0xa92   :  { %v16373_v5 = vpop.f32.mrf.mxu1  ;;  %v16410_v0 = vadd.f32 %v16409_v22, %v16369_v38 }
 0xa93   :  { %v16411_v58 = vpop.f32.mrf.mxu0 }
 0xa94   :  { %v16412_v54 = vadd.f32 %v16411_v58, %v16371_v51 }
 0xa95   :  { %v16413_v15 = vpop.f32.mrf.mxu0 }
 0xa97   :  { %v16414_v44 = vpop.f32.mrf.mxu0 }
 0xa99   :  { %v16491_v37 = vpop.f32.mrf.mxu0 }
 0xa9b   :  { %v16493_v13 = vpop.f32.mrf.mxu0 }
 0xa9d   :  { %v16495_v20 = vpop.f32.mrf.mxu0 }
 0xa9f   :  { %v16496_v34 = vpop.f32.mrf.mxu0 }
 0xab9   :  { %v19788_v35 = vpop.f32.mrf.mxu0 }
 0xabb   :  { %v19789_v63 = vpop.f32.mrf.mxu0 }
 0xabc   :  { %v19790_v25 = vadd.f32 %v19789_v63, %v19788_v35 }
 0xabd   :  { %v19791_v46 = vpop.f32.mrf.mxu0 }
 0xabe   :  { %v16533_v18 = vadd.f32 %v19790_v25, %v11430_v23 }
 0xabf   :  { %v19792_v14 = vpop.f32.mrf.mxu0 }
 0xacc   :  { %v16450_v17 = vpop.f32.mrf.mxu1 }
 0xacd   :  { %v16451_v6 = vadd.f32 %v16450_v17, %v16410_v0 }
 0xace   :  { %v16452_v33 = vpop.f32.mrf.mxu1 }
 0xacf   :  { %v16492_v36 = vadd.f32 %v16491_v37, %v16451_v6  ;;  %v16453_v45 = vadd.f32 %v16452_v33, %v16412_v54 }
 0xad0   :  { %v16454_v55 = vpop.f32.mrf.mxu1 }
 0xad1   :  { %22910 = vtanh.f32 %v16492_v36  ;;  %v16494_v52 = vadd.f32 %v16493_v13, %v16453_v45 }
 0xad2   :  { %v16455_v48 = vpop.f32.mrf.mxu1 }
 0xad3   :  { %22912 = vtanh.f32 %v16494_v52 }
 0xad9   :  { %v19832_v31 = vpop.f32.mrf.mxu0 }
 0xadb   :  { %v19833_v28 = vpop.f32.mrf.mxu0 }
 0xadc   :  { %v19834_v32 = vadd.f32 %v19833_v28, %v19832_v31 }
 0xadd   :  { %v19835_v19 = vpop.f32.mrf.mxu0 }
 0xade   :  { %v22911_v57 = vpop.eup %22910 }
 0xadf   :  { %16829 = vst [vmem:[%s29864_s11 + $0x20] sm:$0xff] %v22911_v57  ;;  %v19836_v40 = vpop.f32.mrf.mxu0 }
 0xae0   :  { %v22913_v56 = vpop.eup %22912 }
 0xae1   :  { %16830 = vst [vmem:[%s29864_s11 + $0x28] sm:$0xff] %v22913_v56 }
 0xaec   :  { %v19810_v30 = vpop.f32.mrf.mxu1 }
 0xaee   :  { %v19811_v50 = vpop.f32.mrf.mxu1 }
 0xaef   :  { %v19812_v24 = vadd.f32 %v19811_v50, %v19810_v30 }
 0xaf0   :  { %v19813_v43 = vpop.f32.mrf.mxu1 }
 0xaf1   :  { %v16573_v61 = vadd.f32 %v19812_v24, %v16533_v18 }
 0xaf2   :  { %v19814_v21 = vpop.f32.mrf.mxu1 }
 0xaf3   :  { %v16613_v8 = vadd.f32 %v19834_v32, %v16573_v61 }
 0xaf9   :  { %v19876_v12 = vpop.f32.mrf.mxu0 }
 0xafb   :  { %v19877_v62 = vpop.f32.mrf.mxu0 }
 0xafc   :  { %v19878_v9 = vadd.f32 %v19877_v62, %v19876_v12 }
 0xafd   :  { %v19879_v47 = vpop.f32.mrf.mxu0 }
 0xaff   :  { %v19880_v42 = vpop.f32.mrf.mxu0 }
 0xb0c   :  { %v19854_v26 = vpop.f32.mrf.mxu1 }
 0xb0e   :  { %v19855_v60 = vpop.f32.mrf.mxu1 }
 0xb0f   :  { %v19856_v11 = vadd.f32 %v19855_v60, %v19854_v26 }
 0xb10   :  { %v19857_v1 = vpop.f32.mrf.mxu1 }
 0xb11   :  { %v16653_v4 = vadd.f32 %v19856_v11, %v16613_v8 }
 0xb12   :  { %v19858_v41 = vpop.f32.mrf.mxu1 }
 0xb13   :  { %v16693_v10 = vadd.f32 %v19878_v9, %v16653_v4 }
 0xb19   :  { %v19920_v27 = vpop.f32.mrf.mxu0 }
 0xb1b   :  { %v19921_v3 = vpop.f32.mrf.mxu0 }
 0xb1c   :  { %v19922_v2 = vadd.f32 %v19921_v3, %v19920_v27 }
 0xb1d   :  { %v19923_v59 = vpop.f32.mrf.mxu0 }
 0xb1f   :  { %v19924_v29 = vpop.f32.mrf.mxu0 }
 0xb2c   :  { %v19898_v7 = vpop.f32.mrf.mxu1 }
 0xb2e   :  { %v19899_v16 = vpop.f32.mrf.mxu1 }
 0xb2f   :  { %v19900_v53 = vadd.f32 %v19899_v16, %v19898_v7 }
 0xb30   :  { %v19901_v39 = vpop.f32.mrf.mxu1 }
 0xb31   :  { %v16733_v22 = vadd.f32 %v19900_v53, %v16693_v10 }
 0xb32   :  { %v19902_v5 = vpop.f32.mrf.mxu1 }
 0xb33   :  { %v16773_v58 = vadd.f32 %v19922_v2, %v16733_v22 }
 0xb34   :  { %v16812_v15 = vpop.f32.mrf.mxu1 }
 0xb35   :  { %v16813_v44 = vadd.f32 %v16812_v15, %v16773_v58 }
 0xb36   :  { %v19932_v37 = vpop.f32.mrf.mxu1 }
 0xb37   :  { %22914 = vtanh.f32 %v16813_v44 }
 0xb38   :  { %v16815_v13 = vpop.f32.mrf.mxu1 }
 0xb3a   :  { %v19933_v20 = vpop.f32.mrf.mxu1 }
 0xb44   :  { %v22915_v34 = vpop.eup %22914 }
 0xb45   :  { %16831 = vst.msk [vmem:[%s29864_s11 + $0x30] sm:$0xff] %vm1251_vm0, %v22915_v34 }

</bundles_post_ra>
